<compile_context>
chip_gen: v6e
topology: v6e:2x2x1
jax: 0.10.0
libtpu: 0.0.40
codegen_flags: <defaults>
</compile_context>

<pallas_src>
import functools
import numpy as np

import jax
import jax.numpy as jnp
from jax.experimental import pallas as pl
from jax.experimental.pallas import tpu as pltpu


MAX_LANE_TILE = 2048                     # points per tile (lane dim)
VMEM_LIMIT = 40 * 1024 * 1024            # raise above v5e's 16 MiB default
_BF16 = jnp.bfloat16
_F32 = jnp.float32


def _round_up(n, m):
    return ((n + m - 1) // m) * m


# ---------------------------------------------------------------------------
# In-kernel helpers
# ---------------------------------------------------------------------------

def _elu(y):
    # clamp the exp argument so unselected branch never produces inf
    return jnp.where(y > 0, y, jnp.exp(jnp.minimum(y, 0.0)) - 1.0)


def _sigmoid(y):
    y = jnp.clip(y, -30.0, 30.0)
    return pl.reciprocal(1.0 + jnp.exp(-y), approx=True)


def _ln(v, w, b, eps=1e-5):
    mu = jnp.mean(v, axis=-1, keepdims=True)
    var = jnp.mean((v - mu) ** 2, axis=-1, keepdims=True)
    return (v - mu) * jax.lax.rsqrt(var + eps) * w + b


# ---------------------------------------------------------------------------
# Host-side weight packing: one bf16 slab (matrices) + one f32 slab (vectors)
# ---------------------------------------------------------------------------

def _pack_bf16(entries, transpose):
    """Pack weight matrices into one bf16 slab; each entry's rows start at a
    multiple of 16 (bf16 sublane packing).  transpose=True stores W.T so the
    kernel can compute W^T @ X with the point dim on lanes."""
    mats = []
    for name, w in entries:
        m = jnp.asarray(w)
        m = (m.T if transpose else m).astype(_BF16)
        mats.append((name, m))
    lane = max(m.shape[1] for _, m in mats)
    spec, parts, off = {}, [], 0
    for name, m in mats:
        r, c = m.shape
        rp = _round_up(r, 16)
        buf = jnp.zeros((rp, lane), _BF16).at[:r, :c].set(m)
        parts.append(buf)
        spec[name] = (off, r, c)
        off += rp
    return jnp.concatenate(parts, axis=0), spec


def _pack_f32(entries, as_cols):
    """Pack small f32 vectors (biases / norm params / single weight rows) as
    columns (for the transposed kernels) or rows (row-major kernels)."""
    arrs = [jnp.asarray(v).reshape(-1).astype(_F32) for _, v in entries]
    size = max(a.shape[0] for a in arrs)
    spec, padded = {}, []
    for j, ((name, _), a) in enumerate(zip(entries, arrs)):
        padded.append(jnp.pad(a, (0, size - a.shape[0])))
        spec[name] = (j, a.shape[0])
    slab = jnp.stack(padded, axis=1 if as_cols else 0)
    return slab, spec


# ---------------------------------------------------------------------------
# Kernel 1 (channel-first / lane = points): fused per-point chain
#   ray_dir_fc -> weighted mean/var over NV -> base_fc -> vis_fc(+res) ->
#   vis_fc2 -> rgb_fc ; per-view output packed as [x(32); vis2(1); logit(1)]
# ---------------------------------------------------------------------------

def _stage1_kernel(NV, wspec, cspec,
                   samp_ref, rd_ref, mask_ref, w_ref, c_ref, out_ref):
    def W(name):
        off, r, c = wspec[name]
        return w_ref[off:off + r, 0:c]

    def C(name):
        j, n = cspec[name]
        return c_ref[0:n, j:j + 1]

    def mm(name, x, bias=None):
        y = jnp.dot(W(name), x.astype(_BF16), preferred_element_type=_F32)
        if bias is not None:
            y = y + C(bias)
        return y

    # ray_dir_fc + residual add of the sampled features (per view)
    feat = []
    for v in range(NV):
        h = _elu(mm("rd0", rd_ref[v], "rd0"))             # (16, tn)
        d = _elu(mm("rd1", h, "rd1"))                     # (D,  tn)
        feat.append(samp_ref[v] + d)                      # (D,  tn)

    # weight = mask / (sum_views mask + eps)  (one EUP reciprocal, no divides)
    wsum = mask_ref[0]
    for v in range(1, NV):
        wsum = wsum + mask_ref[v]
    inv = pl.reciprocal(wsum + 1e-8, approx=True)         # (1, tn)

    mean = (mask_ref[0] * inv) * feat[0]
    for v in range(1, NV):
        mean = mean + (mask_ref[v] * inv) * feat[v]
    var = (mask_ref[0] * inv) * (feat[0] - mean) ** 2
    for v in range(1, NV):
        var = var + (mask_ref[v] * inv) * (feat[v] - mean) ** 2

    # base_fc on [mean | var | feat_v]; the global term is shared across views
    h_glob = mm("b0m", mean) + mm("b0v", var) + C("b0")   # (64, tn)

    for v in range(NV):
        msk = mask_ref[v]                                 # (1, tn)
        wgt = msk * inv
        h = _elu(h_glob + mm("b0f", feat[v]))             # (64, tn)
        x = _elu(mm("b1", h, "b1"))                       # (32, tn)

        # vis_fc (layer-2 weight split into [res(32) | vis(1)] columns)
        h = _elu(mm("v0", x * wgt, "v0"))                 # (32, tn)
        x_res = _elu(mm("v1r", h, "v1r"))                 # (32, tn)
        vis = _sigmoid(_elu(mm("v1s", h, "v1s"))) * msk   # (1, tn)
        x = x + x_res

        # vis_fc2
        h = _elu(mm("u0", x * vis, "u0"))
        vis2 = _sigmoid(mm("u1", h, "u1")) * msk          # (1, tn)

        # rgb_fc on [x | vis2 | ray_diff] (weight split by input rows)
        h = _elu(mm("r0x", x) + vis2 * C("r0v") + mm("r0d", rd_ref[v])
                 + C("r0"))
        h = _elu(mm("r1", h, "r1"))
        logit = mm("r2", h, "r2")                         # (1, tn)

        # single full-block, lane-dense store per view
        out_ref[v] = jnp.concatenate([x, vis2, logit], axis=0)


def stage1_point_chain(sampled, ray_diff, mask, params):
    """Channel-first inputs: sampled (B,NV,D,P), ray_diff (B,NV,4,P),
    mask (B,NV,1,P)  ->  packed (B,NV,D_out=34,Pp) = [x(32); vis2(1); logit(1)]
    (Pp = P rounded up to the lane tile; padded lanes hold garbage)."""
    B, NV, D, P = sampled.shape
    Pp0 = _round_up(P, 128)
    tn = min(MAX_LANE_TILE, Pp0)
    Pp = _round_up(P, tn)
    if Pp != P:
        pad = ((0, 0), (0, 0), (0, 0), (0, Pp - P))
        sampled = jnp.pad(sampled, pad)
        ray_diff = jnp.pad(ray_diff, pad)
        mask = jnp.pad(mask, pad)

    rd0, rd1 = params["ray_dir_fc"]
    b0, b1 = params["base_fc"]
    v0, v1 = params["vis_fc"]
    u0, u1 = params["vis_fc2"]
    r0, r1, r2 = params["rgb_fc"]
    X = b1["w"].shape[1]                                   # 32

    wslab, wspec = _pack_bf16([
        ("rd0", rd0["w"]), ("rd1", rd1["w"]),
        ("b0m", b0["w"][:D]), ("b0v", b0["w"][D:2 * D]),
        ("b0f", b0["w"][2 * D:3 * D]), ("b1", b1["w"]),
        ("v0", v0["w"]), ("v1r", v1["w"][:, :X]), ("v1s", v1["w"][:, X:X + 1]),
        ("u0", u0["w"]), ("u1", u1["w"]),
        ("r0x", r0["w"][:X]), ("r0d", r0["w"][X + 1:X + 5]),
        ("r1", r1["w"]), ("r2", r2["w"])], transpose=True)
    cslab, cspec = _pack_f32([
        ("rd0", rd0["b"]), ("rd1", rd1["b"]), ("b0", b0["b"]), ("b1", b1["b"]),
        ("v0", v0["b"]), ("v1r", v1["b"][:X]), ("v1s", v1["b"][X:X + 1]),
        ("u0", u0["b"]), ("u1", u1["b"]),
        ("r0v", r0["w"][X]), ("r0", r0["b"]), ("r1", r1["b"]), ("r2", r2["b"])],
        as_cols=True)

    out = pl.pallas_call(
        functools.partial(_stage1_kernel, NV, wspec, cspec),
        out_shape=jax.ShapeDtypeStruct((B, NV, X + 2, Pp), _F32),
        grid=(B, Pp // tn),
        in_specs=[
            pl.BlockSpec((None, NV, D, tn), lambda b, i: (b, 0, 0, i)),
            pl.BlockSpec((None, NV, 4, tn), lambda b, i: (b, 0, 0, i)),
            pl.BlockSpec((None, NV, 1, tn), lambda b, i: (b, 0, 0, i)),
            pl.BlockSpec(wslab.shape, lambda b, i: (0, 0)),
            pl.BlockSpec(cslab.shape, lambda b, i: (0, 0)),
        ],
        out_specs=pl.BlockSpec((None, NV, X + 2, tn), lambda b, i: (b, 0, 0, i)),
        compiler_params=pltpu.CompilerParams(
            dimension_semantics=("parallel", "parallel"),
            vmem_limit_bytes=VMEM_LIMIT),
    )(sampled, ray_diff, mask, wslab, cslab)
    return out                                            # padded (B,NV,34,Pp)


# ---------------------------------------------------------------------------
# Kernel 2 (channel-first): second weighted mean/var over views + geometry_fc
#   output = [geometry(16); posenc(16)]  (single lane-dense store)
# ---------------------------------------------------------------------------

def _stage2_kernel(NV, wspec, cspec,
                   packed_ref, w2_ref, pe_ref, w_ref, c_ref, out_ref):
    X = packed_ref.shape[1] - 2                           # 32

    def W(name):
        off, r, c = wspec[name]
        return w_ref[off:off + r, 0:c]

    def C(name):
        j, n = cspec[name]
        return c_ref[0:n, j:j + 1]

    def mm(name, x):
        return jnp.dot(W(name), x.astype(_BF16), preferred_element_type=_F32)

    mean = w2_ref[0] * packed_ref[0, 0:X, :]
    for v in range(1, NV):
        mean = mean + w2_ref[v] * packed_ref[v, 0:X, :]
    var = w2_ref[0] * (packed_ref[0, 0:X, :] - mean) ** 2
    for v in range(1, NV):
        var = var + w2_ref[v] * (packed_ref[v, 0:X, :] - mean) ** 2
    wsum = w2_ref[0]
    for v in range(1, NV):
        wsum = wsum + w2_ref[v]
    wmean = wsum * (1.0 / NV)                             # (1, tn)

    h = _elu(mm("g0m", mean) + mm("g0v", var) + wmean * C("g0w") + C("g0"))
    g = _elu(mm("g1", h) + C("g1"))                       # (16, tn)
    out_ref[...] = jnp.concatenate([g, pe_ref[...]], axis=0)


def stage2_geometry(packed, weight2, pe_cf, params):
    """packed (B,NV,34,Pp) cf, weight2 (B,NV,1,P) cf, pe_cf (16,P) ->
    (B,32,P) channel-first = [geometry_fc(mean|var|wmean)(16) ; posenc(16)]."""
    B, NV, _, Pp = packed.shape
    P = weight2.shape[-1]
    tn = min(MAX_LANE_TILE, Pp)
    if Pp != P:
        weight2 = jnp.pad(weight2, ((0, 0), (0, 0), (0, 0), (0, Pp - P)))
        pe_cf = jnp.pad(pe_cf, ((0, 0), (0, Pp - P)))

    g0, g1 = params["geometry_fc"]
    G = (g0["w"].shape[0] - 1) // 2                        # 32
    out_rows = g1["w"].shape[1] + pe_cf.shape[0]           # 16 + 16

    wslab, wspec = _pack_bf16([("g0m", g0["w"][:G]), ("g0v", g0["w"][G:2 * G]),
                               ("g1", g1["w"])], transpose=True)
    cslab, cspec = _pack_f32([("g0w", g0["w"][2 * G]), ("g0", g0["b"]),
                              ("g1", g1["b"])], as_cols=True)

    out = pl.pallas_call(
        functools.partial(_stage2_kernel, NV, wspec, cspec),
        out_shape=jax.ShapeDtypeStruct((B, out_rows, Pp), _F32),
        grid=(B, Pp // tn),
        in_specs=[
            pl.BlockSpec((None, NV, G + 2, tn), lambda b, i: (b, 0, 0, i)),
            pl.BlockSpec((None, NV, 1, tn), lambda b, i: (b, 0, 0, i)),
            pl.BlockSpec((pe_cf.shape[0], tn), lambda b, i: (0, i)),
            pl.BlockSpec(wslab.shape, lambda b, i: (0, 0)),
            pl.BlockSpec(cslab.shape, lambda b, i: (0, 0)),
        ],
        out_specs=pl.BlockSpec((None, out_rows, tn), lambda b, i: (b, 0, i)),
        compiler_params=pltpu.CompilerParams(
            dimension_semantics=("parallel", "parallel"),
            vmem_limit_bytes=VMEM_LIMIT),
    )(packed, weight2, pe_cf, wslab, cslab)
    return out[..., :P]


# ---------------------------------------------------------------------------
# Kernel 3: fused density ray transformer + out_geometry_fc
#   qkv proj + per-head linear attention + merge/norm/MLP/norm + residual +
#   out_geometry_fc, one kernel per tile of rays (no HBM round trips).
# TODO(synk): LocalFeatureTransformer source is not provided; this implements
# the standard LoFTR 'linear'-attention self encoder layer.
# ---------------------------------------------------------------------------

def _attn_sigma_kernel(L, nhead, wspec, cspec, x_ref, w_ref, c_ref, out_ref):
    tb, _, d = x_ref.shape
    dim = d // nhead

    def W(name):
        off, r, c = wspec[name]
        return w_ref[off:off + r, 0:c]

    def R(name):
        j, n = cspec[name]
        return c_ref[j:j + 1, 0:n]

    def mm(x, name):
        return jnp.dot(x.astype(_BF16), W(name), preferred_element_type=_F32)

    x2 = x_ref[...].reshape(tb * L, d)
    qkv = mm(x2, "qkv")                                   # (tb*L, 3d)
    q = _elu(qkv[:, 0:d]) + 1.0
    k = _elu(qkv[:, d:2 * d]) + 1.0
    v = qkv[:, 2 * d:3 * d]
    Q3 = q.reshape(tb, L, d)
    K3 = k.reshape(tb, L, d)
    V3 = v.reshape(tb, L, d)

    # linear attention == softmax-free attention: msg = (QK^T V)/rowsum(QK^T)
    msgs = []
    for h in range(nhead):
        sl = slice(h * dim, (h + 1) * dim)
        s = jnp.einsum("bld,bmd->blm", Q3[:, :, sl].astype(_BF16),
                       K3[:, :, sl].astype(_BF16),
                       preferred_element_type=_F32)       # (tb, L, L)
        zinv = pl.reciprocal(jnp.sum(s, axis=-1, keepdims=True) + 1e-6,
                             approx=True)
        m = jnp.einsum("blm,bmv->blv", s.astype(_BF16),
                       V3[:, :, sl].astype(_BF16),
                       preferred_element_type=_F32)       # (tb, L, dim)
        msgs.append(m * zinv)
    msg = jnp.concatenate(msgs, axis=-1).reshape(tb * L, d)

    mrg = _ln(mm(msg, "merge"), R("n1w"), R("n1b"))
    hh = jnp.maximum(mm(x2, "m0x") + mm(mrg, "m0m"), 0.0)
    y = x2 + _ln(mm(hh, "m1"), R("n2w"), R("n2b"))
    hh = _elu(mm(y, "o0") + R("o0b"))                     # out_geometry_fc
    out_ref[...] = jnp.maximum(mm(hh, "o1") + R("o1b"), 0.0)


def attention_sigma(x, p_attn, p_out, nhead=4):
    """x (bs, L, d) -> sigma (bs, L, 1)."""
    bs, L, d = x.shape
    tb = _round_up(max(8, min(128, 2048 // max(L, 1))), 8)
    tb = min(tb, _round_up(bs, 8))
    bs_p = _round_up(bs, tb)
    if bs_p != bs:
        x = jnp.pad(x, ((0, bs_p - bs), (0, 0), (0, 0)))

    o0, o1 = p_out
    w_qkv = jnp.concatenate([p_attn["q"]["w"], p_attn["k"]["w"],
                             p_attn["v"]["w"]], axis=1)
    wslab, wspec = _pack_bf16([
        ("qkv", w_qkv), ("merge", p_attn["merge"]["w"]),
        ("m0x", p_attn["mlp0"]["w"][:d]), ("m0m", p_attn["mlp0"]["w"][d:]),
        ("m1", p_attn["mlp1"]["w"]),
        ("o0", o0["w"]), ("o1", o1["w"])], transpose=False)
    cslab, cspec = _pack_f32([
        ("n1w", p_attn["norm1_w"]), ("n1b", p_attn["norm1_b"]),
        ("n2w", p_attn["norm2_w"]), ("n2b", p_attn["norm2_b"]),
        ("o0b", o0["b"]), ("o1b", o1["b"])], as_cols=False)

    out = pl.pallas_call(
        functools.partial(_attn_sigma_kernel, L, nhead, wspec, cspec),
        out_shape=jax.ShapeDtypeStruct((bs_p * L, 1), _F32),
        grid=(bs_p // tb,),
        in_specs=[
            pl.BlockSpec((tb, L, d), lambda i: (i, 0, 0)),
            pl.BlockSpec(wslab.shape, lambda i: (0, 0)),
            pl.BlockSpec(cslab.shape, lambda i: (0, 0)),
        ],
        out_specs=pl.BlockSpec((tb * L, 1), lambda i: (i, 0)),
        compiler_params=pltpu.CompilerParams(
            dimension_semantics=("parallel",)),
    )(x, wslab, cslab)
    return out[: bs * L].reshape(bs, L, 1)


# ---------------------------------------------------------------------------
# JAX glue (projection, gathers, small element-wise ops)
# ---------------------------------------------------------------------------

def compute_angle(point3D, query_T, train_T):
    v1 = point3D - query_T[:, None, None, :]
    v1 = v1[:, None]                                          # (B,1,RN,SN,3)
    v2 = point3D[:, None] - train_T[:, :, None, None, :]      # (B,NV,RN,SN,3)
    v1 = v1 / jnp.linalg.norm(v1, axis=-1, keepdims=True)
    v2 = v2 / jnp.linalg.norm(v2, axis=-1, keepdims=True)
    dir_rel = v1 - v2
    dot = jnp.sum(v2 * v1, axis=-1, keepdims=True)
    return jnp.concatenate([dir_rel, dot], axis=-1).astype(jnp.float32)


def grid_sample_2d(feat, grid):
    # TODO(synk): grid_sample_2d is not defined in the reference; this follows
    # the usual convention: pixel-coordinate bilinear sampling + in-bounds
    # mask.  The data-dependent gather stays in XLA (take_along_axis).
    N, C, H, W = feat.shape
    x = grid[..., 0]
    y = grid[..., 1]
    mask = ((x >= 0) & (x <= W - 1) & (y >= 0) & (y <= H - 1)).astype(_F32)
    x0 = jnp.floor(x); y0 = jnp.floor(y)
    x1 = x0 + 1.0;     y1 = y0 + 1.0
    wx1 = x - x0; wx0 = 1.0 - wx1
    wy1 = y - y0; wy0 = 1.0 - wy1
    featf = feat.reshape(N, C, H * W)

    def gather(xi, yi):
        xi = jnp.clip(xi, 0, W - 1).astype(jnp.int32)
        yi = jnp.clip(yi, 0, H - 1).astype(jnp.int32)
        idx = (yi * W + xi).reshape(N, 1, -1)
        g = jnp.take_along_axis(featf, idx, axis=2)
        return g.reshape(N, C, *x.shape[1:])

    out = (gather(x0, y0) * (wx0 * wy0)[:, None]
           + gather(x1, y0) * (wx1 * wy0)[:, None]
           + gather(x0, y1) * (wx0 * wy1)[:, None]
           + gather(x1, y1) * (wx1 * wy1)[:, None])
    return out, mask


def order_posenc(d_hid, n_samples):
    pos = np.arange(n_samples, dtype=np.float64)[:, None]
    hid = np.arange(d_hid)[None, :]
    table = pos / np.power(10000.0, 2 * (hid // 2) / d_hid)
    table[:, 0::2] = np.sin(table[:, 0::2])
    table[:, 1::2] = np.cos(table[:, 1::2])
    return jnp.asarray(table, dtype=jnp.float32)


# ---------------------------------------------------------------------------
# Full forward
# ---------------------------------------------------------------------------

def ray_transformer_forward(params, point3D, batch, source_imgs_feat):
    B, NV, _, H, W = batch["source_imgs"].shape
    _, RN, SN, _ = point3D.shape
    FDim = source_imgs_feat.shape[2]
    PE_d_hid = 16
    P = RN * SN

    dir_relative = compute_angle(point3D,
                                 batch["ref_pose_inv"][:, :3, -1],
                                 batch["source_poses_inv"][:, :, :3, -1])
    ray_diff = dir_relative                                    # (B,NV,RN,SN,4)

    p3 = jnp.broadcast_to(point3D[:, None].astype(_F32), (B, NV, RN, SN, 3))
    p3_h = jnp.concatenate([p3, jnp.ones_like(p3[..., :1])], axis=-1)
    pp = jnp.einsum("bnij,bnrsj->bnirs", batch["source_poses"], p3_h)
    pp = pp[:, :, :3]                                          # (B,NV,3,RN,SN)
    mask_valid_depth = (pp[:, :, 2] > 0).astype(_F32)          # (B,NV,RN,SN)
    points_in_pixel = pp[:, :, :2] / pp[:, :, 2:3]             # (B,NV,2,RN,SN)

    grid_pts = jnp.transpose(points_in_pixel, (0, 1, 3, 4, 2)).reshape(
        B * NV, RN, SN, 2)
    feat_flat = source_imgs_feat.reshape(B * NV, FDim, H, W)
    rgb_flat = batch["source_imgs"].reshape(B * NV, 3, H, W)
    img_feat_sampled, mask = grid_sample_2d(feat_flat, grid_pts)
    img_rgb_sampled, _ = grid_sample_2d(rgb_flat, grid_pts)

    mask = mask.reshape(B, NV, RN, SN) * mask_valid_depth      # (B,NV,RN,SN)
    rgb_cf = img_rgb_sampled.reshape(B, NV, 3, RN, SN)

    # channel-first (points on lanes) inputs for the fused kernels; the
    # 35-channel sampled features need no transpose in this layout.
    sampled_cf = jnp.concatenate([img_feat_sampled, img_rgb_sampled], axis=1)
    sampled_cf = sampled_cf.reshape(B, NV, FDim + 3, P)
    rd_cf = jnp.transpose(ray_diff, (0, 1, 4, 2, 3)).reshape(B, NV, 4, P)
    mask_cf = mask.reshape(B, NV, 1, P)

    # ---- stage 1: fused per-point chain ----------------------------------
    packed = stage1_point_chain(sampled_cf, rd_cf, mask_cf, params)
    vis2 = packed[:, :, 32, :P].reshape(B, NV, RN, SN)
    rgb_logit = packed[:, :, 33, :P].reshape(B, NV, RN, SN)

    # second-stage weights (dim=2 normalization, exactly as in the reference)
    weight2 = vis2 / (jnp.sum(vis2, axis=2, keepdims=True) + 1e-8)
    weight2_cf = weight2.reshape(B, NV, 1, P)

    # ---- stage 2: geometry_fc + fused positional encoding ----------------
    pe_cf = jnp.tile(order_posenc(PE_d_hid, SN).T, (1, RN))    # (16, P)
    gfeat = stage2_geometry(packed, weight2_cf, pe_cf, params)  # (B,32,P)

    # ---- fused density ray transformer + out_geometry_fc -----------------
    x_attn = jnp.transpose(gfeat, (0, 2, 1)).reshape(B * RN, SN, 32)
    sigma = attention_sigma(x_attn, params["attn"], params["out_geometry_fc"])
    sigma = sigma.reshape(B, RN, SN, 1)
    num_valid_obs = jnp.sum(mask, axis=1)[..., None]           # (B,RN,SN,1)
    sigma_out = jnp.where(num_valid_obs < 1, 0.0, sigma)

    # ---- rgb blending (softmax over dim=2, as in the reference) ----------
    logit = jnp.where(mask == 0, -1e9, rgb_logit)              # (B,NV,RN,SN)
    blending_weights_valid = jax.nn.softmax(logit, axis=2)
    rgb_out = jnp.sum(rgb_cf * blending_weights_valid[:, :, None], axis=1)
    rgb_out = jnp.transpose(rgb_out, (0, 2, 3, 1))             # (B,RN,SN,3)
    out = jnp.concatenate([rgb_out, sigma_out], axis=-1)       # (B,RN,SN,4)

    points_in_pixel = jnp.transpose(points_in_pixel, (0, 1, 3, 4, 2))
    return out, points_in_pixel


# ---------------------------------------------------------------------------
# Deterministic parameter init + example run
# ---------------------------------------------------------------------------

def init_params(key, img_feat_dim=32):
    keys = iter(jax.random.split(key, 80))

    def lin(k_in, k_out, bias=True):
        w = jax.random.normal(next(keys), (k_in, k_out), _F32) / np.sqrt(k_in)
        b = (jax.random.normal(next(keys), (k_out,), _F32) * 0.01
             if bias else jnp.zeros((k_out,), _F32))
        return {"w": w, "b": b}

    D = img_feat_dim + 3
    return {
        "ray_dir_fc": [lin(4, 16), lin(16, D)],
        "base_fc": [lin(D * 3, 64), lin(64, 32)],
        "vis_fc": [lin(32, 32), lin(32, 33)],
        "vis_fc2": [lin(32, 32), lin(32, 1)],
        "geometry_fc": [lin(32 * 2 + 1, 64), lin(64, 16)],
        "out_geometry_fc": [lin(32, 16), lin(16, 1)],
        "rgb_fc": [lin(32 + 1 + 4, 16), lin(16, 8), lin(8, 1)],
        "attn": {
            "q": lin(32, 32, bias=False), "k": lin(32, 32, bias=False),
            "v": lin(32, 32, bias=False), "merge": lin(32, 32, bias=False),
            "mlp0": lin(64, 64, bias=False), "mlp1": lin(64, 32, bias=False),
            "norm1_w": jnp.ones((32,), _F32),
            "norm1_b": jnp.zeros((32,), _F32),
            "norm2_w": jnp.ones((32,), _F32),
            "norm2_b": jnp.zeros((32,), _F32),
        },
    }


if __name__ == "__main__":
    B, NV, RN, SN, H, W = 2, 3, 4, 8, 16, 16
    img_feat_dim = 32

    params = init_params(jax.random.PRNGKey(42), img_feat_dim)

    key = jax.random.PRNGKey(0)
    k = jax.random.split(key, 8)
    # sample points with positive depth so the projection is well-behaved
    xy = jax.random.uniform(k[0], (B, RN, SN, 2), minval=-1.0, maxval=1.0)
    z = jax.random.uniform(k[1], (B, RN, SN, 1), minval=2.0, maxval=4.0)
    point3D = jnp.concatenate([xy, z], axis=-1).astype(_F32)

    source_imgs = jax.random.uniform(k[2], (B, NV, 3, H, W), dtype=_F32)
    source_imgs_feat = jax.random.normal(k[3], (B, NV, img_feat_dim, H, W),
                                         dtype=_F32)

    eye = jnp.eye(4, dtype=_F32)
    ref_pose_inv = eye[None] + 0.05 * jax.random.normal(k[4], (B, 4, 4))
    source_poses_inv = eye[None, None] + 0.05 * jax.random.normal(
        k[5], (B, NV, 4, 4))
    # pinhole-like projection: x_pix = f*x/z + c; keeps samples in-bounds
    proj = jnp.array([[4.0, 0.0, 8.0, 0.0],
                      [0.0, 4.0, 8.0, 0.0],
                      [0.0, 0.0, 1.0, 0.0],
                      [0.0, 0.0, 0.0, 1.0]], _F32)
    source_poses = proj[None, None] + 0.02 * jax.random.normal(
        k[6], (B, NV, 4, 4))

    batch = {
        "source_imgs": source_imgs,
        "ref_pose_inv": ref_pose_inv.astype(_F32),
        "source_poses_inv": source_poses_inv.astype(_F32),
        "source_poses": source_poses.astype(_F32),
    }

    fwd = jax.jit(ray_transformer_forward)
    out, pip = fwd(params, point3D, batch, source_imgs_feat)
    jax.block_until_ready((out, pip))
    assert out.shape == (B, RN, SN, 4)
    assert pip.shape == (B, NV, RN, SN, 2)
    assert bool(jnp.all(jnp.isfinite(out)))
    print("KERNEL_OK")
</pallas_src>

<mosaic_0001>
module attributes {stable_mosaic.version = 11 : i64} {
  func.func @_stage1_kernel(%arg0: i32, %arg1: i32, %arg2: memref<1x3x35x128xf32, #tpu.memory_space<vmem>>, %arg3: memref<1x3x4x128xf32, #tpu.memory_space<vmem>>, %arg4: memref<1x3x1x128xf32, #tpu.memory_space<vmem>>, %arg5: memref<480x64xbf16, #tpu.memory_space<vmem>>, %arg6: memref<64x13xf32, #tpu.memory_space<vmem>>, %arg7: memref<1x3x34x128xf32, #tpu.memory_space<vmem>>) attributes {dimension_semantics = [#tpu.dimension_semantics<parallel>, #tpu.dimension_semantics<parallel>], iteration_bounds = array<i64: 2, 1>, scalar_prefetch = 0 : i64, scratch_operands = 0 : i64, tpu.core_type = #tpu.core_type<tc>, window_params = [{transform_indices = @transform_0, window_bounds = array<i64: 1, 3, 35, 128>}, {transform_indices = @transform_1, window_bounds = array<i64: 1, 3, 4, 128>}, {transform_indices = @transform_2, window_bounds = array<i64: 1, 3, 1, 128>}, {pipeline_mode = #tpu.pipeline_mode<synchronous>, transform_indices = @transform_3, window_bounds = array<i64: 480, 64>}, {pipeline_mode = #tpu.pipeline_mode<synchronous>, transform_indices = @transform_4, window_bounds = array<i64: 64, 13>}, {transform_indices = @transform_5, window_bounds = array<i64: 1, 3, 34, 128>}]} {
    %c0 = arith.constant 0 : index
    %c0_0 = arith.constant 0 : index
    %c0_1 = arith.constant 0 : index
    %c0_2 = arith.constant 0 : index
    %0 = vector.load %arg3[%c0, %c0_0, %c0_1, %c0_2] : memref<1x3x4x128xf32, #tpu.memory_space<vmem>>, vector<1x1x4x128xf32>
    %1 = vector.shape_cast %0 : vector<1x1x4x128xf32> to vector<4x128xf32>
    %c0_3 = arith.constant 0 : index
    %c0_4 = arith.constant 0 : index
    %2 = vector.load %arg5[%c0_3, %c0_4] : memref<480x64xbf16, #tpu.memory_space<vmem>>, vector<16x4xbf16>
    %3 = arith.truncf %1 : vector<4x128xf32> to vector<4x128xbf16>
    %cst = arith.constant dense<0.000000e+00> : vector<16x128xf32>
    %4 = tpu.matmul %2, %3, %cst {dimension_numbers = #tpu.dot_dimension_numbers<[1], [0], [0], [1], [0, 0, 1, 1], [], []>} : vector<16x4xbf16>, vector<4x128xbf16>, vector<16x128xf32> -> vector<16x128xf32>
    %c0_5 = arith.constant 0 : index
    %c0_6 = arith.constant 0 : index
    %5 = vector.load %arg6[%c0_5, %c0_6] : memref<64x13xf32, #tpu.memory_space<vmem>>, vector<16x1xf32>
    %6 = vector.broadcast %5 : vector<16x1xf32> to vector<16x128xf32>
    %7 = arith.addf %4, %6 : vector<16x128xf32>
    %cst_7 = arith.constant 0.000000e+00 : f32
    %8 = vector.broadcast %cst_7 : f32 to vector<16x128xf32>
    %9 = arith.cmpf ogt, %7, %8 : vector<16x128xf32>
    %cst_8 = arith.constant 0.000000e+00 : f32
    %10 = vector.broadcast %cst_8 : f32 to vector<16x128xf32>
    %11 = arith.minimumf %7, %10 : vector<16x128xf32>
    %12 = math.exp %11 : vector<16x128xf32>
    %cst_9 = arith.constant 1.000000e+00 : f32
    %13 = vector.broadcast %cst_9 : f32 to vector<16x128xf32>
    %14 = arith.subf %12, %13 : vector<16x128xf32>
    %15 = arith.select %9, %7, %14 : vector<16x128xi1>, vector<16x128xf32>
    %c16 = arith.constant 16 : index
    %c0_10 = arith.constant 0 : index
    %16 = vector.load %arg5[%c16, %c0_10] : memref<480x64xbf16, #tpu.memory_space<vmem>>, vector<35x16xbf16>
    %17 = arith.truncf %15 : vector<16x128xf32> to vector<16x128xbf16>
    %cst_11 = arith.constant dense<0.000000e+00> : vector<35x128xf32>
    %18 = tpu.matmul %16, %17, %cst_11 {dimension_numbers = #tpu.dot_dimension_numbers<[1], [0], [0], [1], [0, 0, 1, 1], [], []>} : vector<35x16xbf16>, vector<16x128xbf16>, vector<35x128xf32> -> vector<35x128xf32>
    %c0_12 = arith.constant 0 : index
    %c1 = arith.constant 1 : index
    %19 = vector.load %arg6[%c0_12, %c1] : memref<64x13xf32, #tpu.memory_space<vmem>>, vector<35x1xf32>
    %20 = vector.broadcast %19 : vector<35x1xf32> to vector<35x128xf32>
    %21 = arith.addf %18, %20 : vector<35x128xf32>
    %cst_13 = arith.constant 0.000000e+00 : f32
    %22 = vector.broadcast %cst_13 : f32 to vector<35x128xf32>
    %23 = arith.cmpf ogt, %21, %22 : vector<35x128xf32>
    %cst_14 = arith.constant 0.000000e+00 : f32
    %24 = vector.broadcast %cst_14 : f32 to vector<35x128xf32>
    %25 = arith.minimumf %21, %24 : vector<35x128xf32>
    %26 = math.exp %25 : vector<35x128xf32>
    %cst_15 = arith.constant 1.000000e+00 : f32
    %27 = vector.broadcast %cst_15 : f32 to vector<35x128xf32>
    %28 = arith.subf %26, %27 : vector<35x128xf32>
    %29 = arith.select %23, %21, %28 : vector<35x128xi1>, vector<35x128xf32>
    %c0_16 = arith.constant 0 : index
    %c0_17 = arith.constant 0 : index
    %c0_18 = arith.constant 0 : index
    %c0_19 = arith.constant 0 : index
    %30 = vector.load %arg2[%c0_16, %c0_17, %c0_18, %c0_19] : memref<1x3x35x128xf32, #tpu.memory_space<vmem>>, vector<1x1x35x128xf32>
    %31 = vector.shape_cast %30 : vector<1x1x35x128xf32> to vector<35x128xf32>
    %32 = arith.addf %31, %29 : vector<35x128xf32>
    %c0_20 = arith.constant 0 : index
    %c1_21 = arith.constant 1 : index
    %c0_22 = arith.constant 0 : index
    %c0_23 = arith.constant 0 : index
    %33 = vector.load %arg3[%c0_20, %c1_21, %c0_22, %c0_23] : memref<1x3x4x128xf32, #tpu.memory_space<vmem>>, vector<1x1x4x128xf32>
    %34 = vector.shape_cast %33 : vector<1x1x4x128xf32> to vector<4x128xf32>
    %c0_24 = arith.constant 0 : index
    %c0_25 = arith.constant 0 : index
    %35 = vector.load %arg5[%c0_24, %c0_25] : memref<480x64xbf16, #tpu.memory_space<vmem>>, vector<16x4xbf16>
    %36 = arith.truncf %34 : vector<4x128xf32> to vector<4x128xbf16>
    %cst_26 = arith.constant dense<0.000000e+00> : vector<16x128xf32>
    %37 = tpu.matmul %35, %36, %cst_26 {dimension_numbers = #tpu.dot_dimension_numbers<[1], [0], [0], [1], [0, 0, 1, 1], [], []>} : vector<16x4xbf16>, vector<4x128xbf16>, vector<16x128xf32> -> vector<16x128xf32>
    %c0_27 = arith.constant 0 : index
    %c0_28 = arith.constant 0 : index
    %38 = vector.load %arg6[%c0_27, %c0_28] : memref<64x13xf32, #tpu.memory_space<vmem>>, vector<16x1xf32>
    %39 = vector.broadcast %38 : vector<16x1xf32> to vector<16x128xf32>
    %40 = arith.addf %37, %39 : vector<16x128xf32>
    %cst_29 = arith.constant 0.000000e+00 : f32
    %41 = vector.broadcast %cst_29 : f32 to vector<16x128xf32>
    %42 = arith.cmpf ogt, %40, %41 : vector<16x128xf32>
    %cst_30 = arith.constant 0.000000e+00 : f32
    %43 = vector.broadcast %cst_30 : f32 to vector<16x128xf32>
    %44 = arith.minimumf %40, %43 : vector<16x128xf32>
    %45 = math.exp %44 : vector<16x128xf32>
    %cst_31 = arith.constant 1.000000e+00 : f32
    %46 = vector.broadcast %cst_31 : f32 to vector<16x128xf32>
    %47 = arith.subf %45, %46 : vector<16x128xf32>
    %48 = arith.select %42, %40, %47 : vector<16x128xi1>, vector<16x128xf32>
    %c16_32 = arith.constant 16 : index
    %c0_33 = arith.constant 0 : index
    %49 = vector.load %arg5[%c16_32, %c0_33] : memref<480x64xbf16, #tpu.memory_space<vmem>>, vector<35x16xbf16>
    %50 = arith.truncf %48 : vector<16x128xf32> to vector<16x128xbf16>
    %cst_34 = arith.constant dense<0.000000e+00> : vector<35x128xf32>
    %51 = tpu.matmul %49, %50, %cst_34 {dimension_numbers = #tpu.dot_dimension_numbers<[1], [0], [0], [1], [0, 0, 1, 1], [], []>} : vector<35x16xbf16>, vector<16x128xbf16>, vector<35x128xf32> -> vector<35x128xf32>
    %c0_35 = arith.constant 0 : index
    %c1_36 = arith.constant 1 : index
    %52 = vector.load %arg6[%c0_35, %c1_36] : memref<64x13xf32, #tpu.memory_space<vmem>>, vector<35x1xf32>
    %53 = vector.broadcast %52 : vector<35x1xf32> to vector<35x128xf32>
    %54 = arith.addf %51, %53 : vector<35x128xf32>
    %cst_37 = arith.constant 0.000000e+00 : f32
    %55 = vector.broadcast %cst_37 : f32 to vector<35x128xf32>
    %56 = arith.cmpf ogt, %54, %55 : vector<35x128xf32>
    %cst_38 = arith.constant 0.000000e+00 : f32
    %57 = vector.broadcast %cst_38 : f32 to vector<35x128xf32>
    %58 = arith.minimumf %54, %57 : vector<35x128xf32>
    %59 = math.exp %58 : vector<35x128xf32>
    %cst_39 = arith.constant 1.000000e+00 : f32
    %60 = vector.broadcast %cst_39 : f32 to vector<35x128xf32>
    %61 = arith.subf %59, %60 : vector<35x128xf32>
    %62 = arith.select %56, %54, %61 : vector<35x128xi1>, vector<35x128xf32>
    %c0_40 = arith.constant 0 : index
    %c1_41 = arith.constant 1 : index
    %c0_42 = arith.constant 0 : index
    %c0_43 = arith.constant 0 : index
    %63 = vector.load %arg2[%c0_40, %c1_41, %c0_42, %c0_43] : memref<1x3x35x128xf32, #tpu.memory_space<vmem>>, vector<1x1x35x128xf32>
    %64 = vector.shape_cast %63 : vector<1x1x35x128xf32> to vector<35x128xf32>
    %65 = arith.addf %64, %62 : vector<35x128xf32>
    %c0_44 = arith.constant 0 : index
    %c2 = arith.constant 2 : index
    %c0_45 = arith.constant 0 : index
    %c0_46 = arith.constant 0 : index
    %66 = vector.load %arg3[%c0_44, %c2, %c0_45, %c0_46] : memref<1x3x4x128xf32, #tpu.memory_space<vmem>>, vector<1x1x4x128xf32>
    %67 = vector.shape_cast %66 : vector<1x1x4x128xf32> to vector<4x128xf32>
    %c0_47 = arith.constant 0 : index
    %c0_48 = arith.constant 0 : index
    %68 = vector.load %arg5[%c0_47, %c0_48] : memref<480x64xbf16, #tpu.memory_space<vmem>>, vector<16x4xbf16>
    %69 = arith.truncf %67 : vector<4x128xf32> to vector<4x128xbf16>
    %cst_49 = arith.constant dense<0.000000e+00> : vector<16x128xf32>
    %70 = tpu.matmul %68, %69, %cst_49 {dimension_numbers = #tpu.dot_dimension_numbers<[1], [0], [0], [1], [0, 0, 1, 1], [], []>} : vector<16x4xbf16>, vector<4x128xbf16>, vector<16x128xf32> -> vector<16x128xf32>
    %c0_50 = arith.constant 0 : index
    %c0_51 = arith.constant 0 : index
    %71 = vector.load %arg6[%c0_50, %c0_51] : memref<64x13xf32, #tpu.memory_space<vmem>>, vector<16x1xf32>
    %72 = vector.broadcast %71 : vector<16x1xf32> to vector<16x128xf32>
    %73 = arith.addf %70, %72 : vector<16x128xf32>
    %cst_52 = arith.constant 0.000000e+00 : f32
    %74 = vector.broadcast %cst_52 : f32 to vector<16x128xf32>
    %75 = arith.cmpf ogt, %73, %74 : vector<16x128xf32>
    %cst_53 = arith.constant 0.000000e+00 : f32
    %76 = vector.broadcast %cst_53 : f32 to vector<16x128xf32>
    %77 = arith.minimumf %73, %76 : vector<16x128xf32>
    %78 = math.exp %77 : vector<16x128xf32>
    %cst_54 = arith.constant 1.000000e+00 : f32
    %79 = vector.broadcast %cst_54 : f32 to vector<16x128xf32>
    %80 = arith.subf %78, %79 : vector<16x128xf32>
    %81 = arith.select %75, %73, %80 : vector<16x128xi1>, vector<16x128xf32>
    %c16_55 = arith.constant 16 : index
    %c0_56 = arith.constant 0 : index
    %82 = vector.load %arg5[%c16_55, %c0_56] : memref<480x64xbf16, #tpu.memory_space<vmem>>, vector<35x16xbf16>
    %83 = arith.truncf %81 : vector<16x128xf32> to vector<16x128xbf16>
    %cst_57 = arith.constant dense<0.000000e+00> : vector<35x128xf32>
    %84 = tpu.matmul %82, %83, %cst_57 {dimension_numbers = #tpu.dot_dimension_numbers<[1], [0], [0], [1], [0, 0, 1, 1], [], []>} : vector<35x16xbf16>, vector<16x128xbf16>, vector<35x128xf32> -> vector<35x128xf32>
    %c0_58 = arith.constant 0 : index
    %c1_59 = arith.constant 1 : index
    %85 = vector.load %arg6[%c0_58, %c1_59] : memref<64x13xf32, #tpu.memory_space<vmem>>, vector<35x1xf32>
    %86 = vector.broadcast %85 : vector<35x1xf32> to vector<35x128xf32>
    %87 = arith.addf %84, %86 : vector<35x128xf32>
    %cst_60 = arith.constant 0.000000e+00 : f32
    %88 = vector.broadcast %cst_60 : f32 to vector<35x128xf32>
    %89 = arith.cmpf ogt, %87, %88 : vector<35x128xf32>
    %cst_61 = arith.constant 0.000000e+00 : f32
    %90 = vector.broadcast %cst_61 : f32 to vector<35x128xf32>
    %91 = arith.minimumf %87, %90 : vector<35x128xf32>
    %92 = math.exp %91 : vector<35x128xf32>
    %cst_62 = arith.constant 1.000000e+00 : f32
    %93 = vector.broadcast %cst_62 : f32 to vector<35x128xf32>
    %94 = arith.subf %92, %93 : vector<35x128xf32>
    %95 = arith.select %89, %87, %94 : vector<35x128xi1>, vector<35x128xf32>
    %c0_63 = arith.constant 0 : index
    %c2_64 = arith.constant 2 : index
    %c0_65 = arith.constant 0 : index
    %c0_66 = arith.constant 0 : index
    %96 = vector.load %arg2[%c0_63, %c2_64, %c0_65, %c0_66] : memref<1x3x35x128xf32, #tpu.memory_space<vmem>>, vector<1x1x35x128xf32>
    %97 = vector.shape_cast %96 : vector<1x1x35x128xf32> to vector<35x128xf32>
    %98 = arith.addf %97, %95 : vector<35x128xf32>
    %c0_67 = arith.constant 0 : index
    %c0_68 = arith.constant 0 : index
    %c0_69 = arith.constant 0 : index
    %c0_70 = arith.constant 0 : index
    %99 = vector.load %arg4[%c0_67, %c0_68, %c0_69, %c0_70] : memref<1x3x1x128xf32, #tpu.memory_space<vmem>>, vector<1x1x1x128xf32>
    %100 = vector.shape_cast %99 : vector<1x1x1x128xf32> to vector<1x128xf32>
    %c0_71 = arith.constant 0 : index
    %c1_72 = arith.constant 1 : index
    %c0_73 = arith.constant 0 : index
    %c0_74 = arith.constant 0 : index
    %101 = vector.load %arg4[%c0_71, %c1_72, %c0_73, %c0_74] : memref<1x3x1x128xf32, #tpu.memory_space<vmem>>, vector<1x1x1x128xf32>
    %102 = vector.shape_cast %101 : vector<1x1x1x128xf32> to vector<1x128xf32>
    %103 = arith.addf %100, %102 : vector<1x128xf32>
    %c0_75 = arith.constant 0 : index
    %c2_76 = arith.constant 2 : index
    %c0_77 = arith.constant 0 : index
    %c0_78 = arith.constant 0 : index
    %104 = vector.load %arg4[%c0_75, %c2_76, %c0_77, %c0_78] : memref<1x3x1x128xf32, #tpu.memory_space<vmem>>, vector<1x1x1x128xf32>
    %105 = vector.shape_cast %104 : vector<1x1x1x128xf32> to vector<1x128xf32>
    %106 = arith.addf %103, %105 : vector<1x128xf32>
    %cst_79 = arith.constant 9.99999993E-9 : f32
    %107 = vector.broadcast %cst_79 : f32 to vector<1x128xf32>
    %108 = arith.addf %106, %107 : vector<1x128xf32>
    %109 = tpu.reciprocal %108 {approx = true} : vector<1x128xf32> -> vector<1x128xf32>
    %c0_80 = arith.constant 0 : index
    %c0_81 = arith.constant 0 : index
    %c0_82 = arith.constant 0 : index
    %c0_83 = arith.constant 0 : index
    %110 = vector.load %arg4[%c0_80, %c0_81, %c0_82, %c0_83] : memref<1x3x1x128xf32, #tpu.memory_space<vmem>>, vector<1x1x1x128xf32>
    %111 = vector.shape_cast %110 : vector<1x1x1x128xf32> to vector<1x128xf32>
    %112 = arith.mulf %111, %109 : vector<1x128xf32>
    %113 = vector.broadcast %112 : vector<1x128xf32> to vector<35x128xf32>
    %114 = arith.mulf %113, %32 : vector<35x128xf32>
    %c0_84 = arith.constant 0 : index
    %c1_85 = arith.constant 1 : index
    %c0_86 = arith.constant 0 : index
    %c0_87 = arith.constant 0 : index
    %115 = vector.load %arg4[%c0_84, %c1_85, %c0_86, %c0_87] : memref<1x3x1x128xf32, #tpu.memory_space<vmem>>, vector<1x1x1x128xf32>
    %116 = vector.shape_cast %115 : vector<1x1x1x128xf32> to vector<1x128xf32>
    %117 = arith.mulf %116, %109 : vector<1x128xf32>
    %118 = vector.broadcast %117 : vector<1x128xf32> to vector<35x128xf32>
    %119 = arith.mulf %118, %65 : vector<35x128xf32>
    %120 = arith.addf %114, %119 : vector<35x128xf32>
    %c0_88 = arith.constant 0 : index
    %c2_89 = arith.constant 2 : index
    %c0_90 = arith.constant 0 : index
    %c0_91 = arith.constant 0 : index
    %121 = vector.load %arg4[%c0_88, %c2_89, %c0_90, %c0_91] : memref<1x3x1x128xf32, #tpu.memory_space<vmem>>, vector<1x1x1x128xf32>
    %122 = vector.shape_cast %121 : vector<1x1x1x128xf32> to vector<1x128xf32>
    %123 = arith.mulf %122, %109 : vector<1x128xf32>
    %124 = vector.broadcast %123 : vector<1x128xf32> to vector<35x128xf32>
    %125 = arith.mulf %124, %98 : vector<35x128xf32>
    %126 = arith.addf %120, %125 : vector<35x128xf32>
    %c0_92 = arith.constant 0 : index
    %c0_93 = arith.constant 0 : index
    %c0_94 = arith.constant 0 : index
    %c0_95 = arith.constant 0 : index
    %127 = vector.load %arg4[%c0_92, %c0_93, %c0_94, %c0_95] : memref<1x3x1x128xf32, #tpu.memory_space<vmem>>, vector<1x1x1x128xf32>
    %128 = vector.shape_cast %127 : vector<1x1x1x128xf32> to vector<1x128xf32>
    %129 = arith.mulf %128, %109 : vector<1x128xf32>
    %130 = arith.subf %32, %126 : vector<35x128xf32>
    %131 = arith.mulf %130, %130 : vector<35x128xf32>
    %132 = vector.broadcast %129 : vector<1x128xf32> to vector<35x128xf32>
    %133 = arith.mulf %132, %131 : vector<35x128xf32>
    %c0_96 = arith.constant 0 : index
    %c1_97 = arith.constant 1 : index
    %c0_98 = arith.constant 0 : index
    %c0_99 = arith.constant 0 : index
    %134 = vector.load %arg4[%c0_96, %c1_97, %c0_98, %c0_99] : memref<1x3x1x128xf32, #tpu.memory_space<vmem>>, vector<1x1x1x128xf32>
    %135 = vector.shape_cast %134 : vector<1x1x1x128xf32> to vector<1x128xf32>
    %136 = arith.mulf %135, %109 : vector<1x128xf32>
    %137 = arith.subf %65, %126 : vector<35x128xf32>
    %138 = arith.mulf %137, %137 : vector<35x128xf32>
    %139 = vector.broadcast %136 : vector<1x128xf32> to vector<35x128xf32>
    %140 = arith.mulf %139, %138 : vector<35x128xf32>
    %141 = arith.addf %133, %140 : vector<35x128xf32>
    %c0_100 = arith.constant 0 : index
    %c2_101 = arith.constant 2 : index
    %c0_102 = arith.constant 0 : index
    %c0_103 = arith.constant 0 : index
    %142 = vector.load %arg4[%c0_100, %c2_101, %c0_102, %c0_103] : memref<1x3x1x128xf32, #tpu.memory_space<vmem>>, vector<1x1x1x128xf32>
    %143 = vector.shape_cast %142 : vector<1x1x1x128xf32> to vector<1x128xf32>
    %144 = arith.mulf %143, %109 : vector<1x128xf32>
    %145 = arith.subf %98, %126 : vector<35x128xf32>
    %146 = arith.mulf %145, %145 : vector<35x128xf32>
    %147 = vector.broadcast %144 : vector<1x128xf32> to vector<35x128xf32>
    %148 = arith.mulf %147, %146 : vector<35x128xf32>
    %149 = arith.addf %141, %148 : vector<35x128xf32>
    %c64 = arith.constant 64 : index
    %c0_104 = arith.constant 0 : index
    %150 = vector.load %arg5[%c64, %c0_104] : memref<480x64xbf16, #tpu.memory_space<vmem>>, vector<64x35xbf16>
    %151 = arith.truncf %126 : vector<35x128xf32> to vector<35x128xbf16>
    %cst_105 = arith.constant dense<0.000000e+00> : vector<64x128xf32>
    %152 = tpu.matmul %150, %151, %cst_105 {dimension_numbers = #tpu.dot_dimension_numbers<[1], [0], [0], [1], [0, 0, 1, 1], [], []>} : vector<64x35xbf16>, vector<35x128xbf16>, vector<64x128xf32> -> vector<64x128xf32>
    %c128 = arith.constant 128 : index
    %c0_106 = arith.constant 0 : index
    %153 = vector.load %arg5[%c128, %c0_106] : memref<480x64xbf16, #tpu.memory_space<vmem>>, vector<64x35xbf16>
    %154 = arith.truncf %149 : vector<35x128xf32> to vector<35x128xbf16>
    %cst_107 = arith.constant dense<0.000000e+00> : vector<64x128xf32>
    %155 = tpu.matmul %153, %154, %cst_107 {dimension_numbers = #tpu.dot_dimension_numbers<[1], [0], [0], [1], [0, 0, 1, 1], [], []>} : vector<64x35xbf16>, vector<35x128xbf16>, vector<64x128xf32> -> vector<64x128xf32>
    %156 = arith.addf %152, %155 : vector<64x128xf32>
    %c0_108 = arith.constant 0 : index
    %c2_109 = arith.constant 2 : index
    %157 = vector.load %arg6[%c0_108, %c2_109] : memref<64x13xf32, #tpu.memory_space<vmem>>, vector<64x1xf32>
    %158 = vector.broadcast %157 : vector<64x1xf32> to vector<64x128xf32>
    %159 = arith.addf %156, %158 : vector<64x128xf32>
    %c0_110 = arith.constant 0 : index
    %c0_111 = arith.constant 0 : index
    %c0_112 = arith.constant 0 : index
    %c0_113 = arith.constant 0 : index
    %160 = vector.load %arg4[%c0_110, %c0_111, %c0_112, %c0_113] : memref<1x3x1x128xf32, #tpu.memory_space<vmem>>, vector<1x1x1x128xf32>
    %161 = vector.shape_cast %160 : vector<1x1x1x128xf32> to vector<1x128xf32>
    %162 = arith.mulf %161, %109 : vector<1x128xf32>
    %c192 = arith.constant 192 : index
    %c0_114 = arith.constant 0 : index
    %163 = vector.load %arg5[%c192, %c0_114] : memref<480x64xbf16, #tpu.memory_space<vmem>>, vector<64x35xbf16>
    %164 = arith.truncf %32 : vector<35x128xf32> to vector<35x128xbf16>
    %cst_115 = arith.constant dense<0.000000e+00> : vector<64x128xf32>
    %165 = tpu.matmul %163, %164, %cst_115 {dimension_numbers = #tpu.dot_dimension_numbers<[1], [0], [0], [1], [0, 0, 1, 1], [], []>} : vector<64x35xbf16>, vector<35x128xbf16>, vector<64x128xf32> -> vector<64x128xf32>
    %166 = arith.addf %159, %165 : vector<64x128xf32>
    %cst_116 = arith.constant 0.000000e+00 : f32
    %167 = vector.broadcast %cst_116 : f32 to vector<64x128xf32>
    %168 = arith.cmpf ogt, %166, %167 : vector<64x128xf32>
    %cst_117 = arith.constant 0.000000e+00 : f32
    %169 = vector.broadcast %cst_117 : f32 to vector<64x128xf32>
    %170 = arith.minimumf %166, %169 : vector<64x128xf32>
    %171 = math.exp %170 : vector<64x128xf32>
    %cst_118 = arith.constant 1.000000e+00 : f32
    %172 = vector.broadcast %cst_118 : f32 to vector<64x128xf32>
    %173 = arith.subf %171, %172 : vector<64x128xf32>
    %174 = arith.select %168, %166, %173 : vector<64x128xi1>, vector<64x128xf32>
    %c256 = arith.constant 256 : index
    %c0_119 = arith.constant 0 : index
    %175 = vector.load %arg5[%c256, %c0_119] : memref<480x64xbf16, #tpu.memory_space<vmem>>, vector<32x64xbf16>
    %176 = arith.truncf %174 : vector<64x128xf32> to vector<64x128xbf16>
    %cst_120 = arith.constant dense<0.000000e+00> : vector<32x128xf32>
    %177 = tpu.matmul %175, %176, %cst_120 {dimension_numbers = #tpu.dot_dimension_numbers<[1], [0], [0], [1], [0, 0, 1, 1], [], []>} : vector<32x64xbf16>, vector<64x128xbf16>, vector<32x128xf32> -> vector<32x128xf32>
    %c0_121 = arith.constant 0 : index
    %c3 = arith.constant 3 : index
    %178 = vector.load %arg6[%c0_121, %c3] : memref<64x13xf32, #tpu.memory_space<vmem>>, vector<32x1xf32>
    %179 = vector.broadcast %178 : vector<32x1xf32> to vector<32x128xf32>
    %180 = arith.addf %177, %179 : vector<32x128xf32>
    %cst_122 = arith.constant 0.000000e+00 : f32
    %181 = vector.broadcast %cst_122 : f32 to vector<32x128xf32>
    %182 = arith.cmpf ogt, %180, %181 : vector<32x128xf32>
    %cst_123 = arith.constant 0.000000e+00 : f32
    %183 = vector.broadcast %cst_123 : f32 to vector<32x128xf32>
    %184 = arith.minimumf %180, %183 : vector<32x128xf32>
    %185 = math.exp %184 : vector<32x128xf32>
    %cst_124 = arith.constant 1.000000e+00 : f32
    %186 = vector.broadcast %cst_124 : f32 to vector<32x128xf32>
    %187 = arith.subf %185, %186 : vector<32x128xf32>
    %188 = arith.select %182, %180, %187 : vector<32x128xi1>, vector<32x128xf32>
    %189 = vector.broadcast %162 : vector<1x128xf32> to vector<32x128xf32>
    %190 = arith.mulf %188, %189 : vector<32x128xf32>
    %c288 = arith.constant 288 : index
    %c0_125 = arith.constant 0 : index
    %191 = vector.load %arg5[%c288, %c0_125] : memref<480x64xbf16, #tpu.memory_space<vmem>>, vector<32x32xbf16>
    %192 = arith.truncf %190 : vector<32x128xf32> to vector<32x128xbf16>
    %cst_126 = arith.constant dense<0.000000e+00> : vector<32x128xf32>
    %193 = tpu.matmul %191, %192, %cst_126 {dimension_numbers = #tpu.dot_dimension_numbers<[1], [0], [0], [1], [0, 0, 1, 1], [], []>} : vector<32x32xbf16>, vector<32x128xbf16>, vector<32x128xf32> -> vector<32x128xf32>
    %c0_127 = arith.constant 0 : index
    %c4 = arith.constant 4 : index
    %194 = vector.load %arg6[%c0_127, %c4] : memref<64x13xf32, #tpu.memory_space<vmem>>, vector<32x1xf32>
    %195 = vector.broadcast %194 : vector<32x1xf32> to vector<32x128xf32>
    %196 = arith.addf %193, %195 : vector<32x128xf32>
    %cst_128 = arith.constant 0.000000e+00 : f32
    %197 = vector.broadcast %cst_128 : f32 to vector<32x128xf32>
    %198 = arith.cmpf ogt, %196, %197 : vector<32x128xf32>
    %cst_129 = arith.constant 0.000000e+00 : f32
    %199 = vector.broadcast %cst_129 : f32 to vector<32x128xf32>
    %200 = arith.minimumf %196, %199 : vector<32x128xf32>
    %201 = math.exp %200 : vector<32x128xf32>
    %cst_130 = arith.constant 1.000000e+00 : f32
    %202 = vector.broadcast %cst_130 : f32 to vector<32x128xf32>
    %203 = arith.subf %201, %202 : vector<32x128xf32>
    %204 = arith.select %198, %196, %203 : vector<32x128xi1>, vector<32x128xf32>
    %c320 = arith.constant 320 : index
    %c0_131 = arith.constant 0 : index
    %205 = vector.load %arg5[%c320, %c0_131] : memref<480x64xbf16, #tpu.memory_space<vmem>>, vector<32x32xbf16>
    %206 = arith.truncf %204 : vector<32x128xf32> to vector<32x128xbf16>
    %cst_132 = arith.constant dense<0.000000e+00> : vector<32x128xf32>
    %207 = tpu.matmul %205, %206, %cst_132 {dimension_numbers = #tpu.dot_dimension_numbers<[1], [0], [0], [1], [0, 0, 1, 1], [], []>} : vector<32x32xbf16>, vector<32x128xbf16>, vector<32x128xf32> -> vector<32x128xf32>
    %c0_133 = arith.constant 0 : index
    %c5 = arith.constant 5 : index
    %208 = vector.load %arg6[%c0_133, %c5] : memref<64x13xf32, #tpu.memory_space<vmem>>, vector<32x1xf32>
    %209 = vector.broadcast %208 : vector<32x1xf32> to vector<32x128xf32>
    %210 = arith.addf %207, %209 : vector<32x128xf32>
    %cst_134 = arith.constant 0.000000e+00 : f32
    %211 = vector.broadcast %cst_134 : f32 to vector<32x128xf32>
    %212 = arith.cmpf ogt, %210, %211 : vector<32x128xf32>
    %cst_135 = arith.constant 0.000000e+00 : f32
    %213 = vector.broadcast %cst_135 : f32 to vector<32x128xf32>
    %214 = arith.minimumf %210, %213 : vector<32x128xf32>
    %215 = math.exp %214 : vector<32x128xf32>
    %cst_136 = arith.constant 1.000000e+00 : f32
    %216 = vector.broadcast %cst_136 : f32 to vector<32x128xf32>
    %217 = arith.subf %215, %216 : vector<32x128xf32>
    %218 = arith.select %212, %210, %217 : vector<32x128xi1>, vector<32x128xf32>
    %c352 = arith.constant 352 : index
    %c0_137 = arith.constant 0 : index
    %219 = vector.load %arg5[%c352, %c0_137] : memref<480x64xbf16, #tpu.memory_space<vmem>>, vector<1x32xbf16>
    %220 = arith.truncf %204 : vector<32x128xf32> to vector<32x128xbf16>
    %cst_138 = arith.constant dense<0.000000e+00> : vector<1x128xf32>
    %221 = tpu.matmul %219, %220, %cst_138 {dimension_numbers = #tpu.dot_dimension_numbers<[1], [0], [0], [1], [0, 0, 1, 1], [], []>} : vector<1x32xbf16>, vector<32x128xbf16>, vector<1x128xf32> -> vector<1x128xf32>
    %c0_139 = arith.constant 0 : index
    %c6 = arith.constant 6 : index
    %222 = vector.load %arg6[%c0_139, %c6] : memref<64x13xf32, #tpu.memory_space<vmem>>, vector<1x1xf32>
    %223 = vector.broadcast %222 : vector<1x1xf32> to vector<1x128xf32>
    %224 = arith.addf %221, %223 : vector<1x128xf32>
    %cst_140 = arith.constant 0.000000e+00 : f32
    %225 = vector.broadcast %cst_140 : f32 to vector<1x128xf32>
    %226 = arith.cmpf ogt, %224, %225 : vector<1x128xf32>
    %cst_141 = arith.constant 0.000000e+00 : f32
    %227 = vector.broadcast %cst_141 : f32 to vector<1x128xf32>
    %228 = arith.minimumf %224, %227 : vector<1x128xf32>
    %229 = math.exp %228 : vector<1x128xf32>
    %cst_142 = arith.constant 1.000000e+00 : f32
    %230 = vector.broadcast %cst_142 : f32 to vector<1x128xf32>
    %231 = arith.subf %229, %230 : vector<1x128xf32>
    %232 = arith.select %226, %224, %231 : vector<1x128xi1>, vector<1x128xf32>
    %cst_143 = arith.constant -3.000000e+01 : f32
    %cst_144 = arith.constant 3.000000e+01 : f32
    %233 = vector.broadcast %cst_143 : f32 to vector<1x128xf32>
    %234 = arith.maximumf %233, %232 : vector<1x128xf32>
    %235 = vector.broadcast %cst_144 : f32 to vector<1x128xf32>
    %236 = arith.minimumf %235, %234 : vector<1x128xf32>
    %cst_145 = arith.constant 0.000000e+00 : f32
    %237 = vector.broadcast %cst_145 : f32 to vector<1x128xf32>
    %238 = arith.subf %237, %236 : vector<1x128xf32>
    %239 = math.exp %238 : vector<1x128xf32>
    %cst_146 = arith.constant 1.000000e+00 : f32
    %240 = vector.broadcast %cst_146 : f32 to vector<1x128xf32>
    %241 = arith.addf %240, %239 : vector<1x128xf32>
    %242 = tpu.reciprocal %241 {approx = true} : vector<1x128xf32> -> vector<1x128xf32>
    %243 = arith.mulf %242, %161 : vector<1x128xf32>
    %244 = arith.addf %188, %218 : vector<32x128xf32>
    %245 = vector.broadcast %243 : vector<1x128xf32> to vector<32x128xf32>
    %246 = arith.mulf %244, %245 : vector<32x128xf32>
    %c368 = arith.constant 368 : index
    %c0_147 = arith.constant 0 : index
    %247 = vector.load %arg5[%c368, %c0_147] : memref<480x64xbf16, #tpu.memory_space<vmem>>, vector<32x32xbf16>
    %248 = arith.truncf %246 : vector<32x128xf32> to vector<32x128xbf16>
    %cst_148 = arith.constant dense<0.000000e+00> : vector<32x128xf32>
    %249 = tpu.matmul %247, %248, %cst_148 {dimension_numbers = #tpu.dot_dimension_numbers<[1], [0], [0], [1], [0, 0, 1, 1], [], []>} : vector<32x32xbf16>, vector<32x128xbf16>, vector<32x128xf32> -> vector<32x128xf32>
    %c0_149 = arith.constant 0 : index
    %c7 = arith.constant 7 : index
    %250 = vector.load %arg6[%c0_149, %c7] : memref<64x13xf32, #tpu.memory_space<vmem>>, vector<32x1xf32>
    %251 = vector.broadcast %250 : vector<32x1xf32> to vector<32x128xf32>
    %252 = arith.addf %249, %251 : vector<32x128xf32>
    %cst_150 = arith.constant 0.000000e+00 : f32
    %253 = vector.broadcast %cst_150 : f32 to vector<32x128xf32>
    %254 = arith.cmpf ogt, %252, %253 : vector<32x128xf32>
    %cst_151 = arith.constant 0.000000e+00 : f32
    %255 = vector.broadcast %cst_151 : f32 to vector<32x128xf32>
    %256 = arith.minimumf %252, %255 : vector<32x128xf32>
    %257 = math.exp %256 : vector<32x128xf32>
    %cst_152 = arith.constant 1.000000e+00 : f32
    %258 = vector.broadcast %cst_152 : f32 to vector<32x128xf32>
    %259 = arith.subf %257, %258 : vector<32x128xf32>
    %260 = arith.select %254, %252, %259 : vector<32x128xi1>, vector<32x128xf32>
    %c400 = arith.constant 400 : index
    %c0_153 = arith.constant 0 : index
    %261 = vector.load %arg5[%c400, %c0_153] : memref<480x64xbf16, #tpu.memory_space<vmem>>, vector<1x32xbf16>
    %262 = arith.truncf %260 : vector<32x128xf32> to vector<32x128xbf16>
    %cst_154 = arith.constant dense<0.000000e+00> : vector<1x128xf32>
    %263 = tpu.matmul %261, %262, %cst_154 {dimension_numbers = #tpu.dot_dimension_numbers<[1], [0], [0], [1], [0, 0, 1, 1], [], []>} : vector<1x32xbf16>, vector<32x128xbf16>, vector<1x128xf32> -> vector<1x128xf32>
    %c0_155 = arith.constant 0 : index
    %c8 = arith.constant 8 : index
    %264 = vector.load %arg6[%c0_155, %c8] : memref<64x13xf32, #tpu.memory_space<vmem>>, vector<1x1xf32>
    %265 = vector.broadcast %264 : vector<1x1xf32> to vector<1x128xf32>
    %266 = arith.addf %263, %265 : vector<1x128xf32>
    %cst_156 = arith.constant -3.000000e+01 : f32
    %cst_157 = arith.constant 3.000000e+01 : f32
    %267 = vector.broadcast %cst_156 : f32 to vector<1x128xf32>
    %268 = arith.maximumf %267, %266 : vector<1x128xf32>
    %269 = vector.broadcast %cst_157 : f32 to vector<1x128xf32>
    %270 = arith.minimumf %269, %268 : vector<1x128xf32>
    %cst_158 = arith.constant 0.000000e+00 : f32
    %271 = vector.broadcast %cst_158 : f32 to vector<1x128xf32>
    %272 = arith.subf %271, %270 : vector<1x128xf32>
    %273 = math.exp %272 : vector<1x128xf32>
    %cst_159 = arith.constant 1.000000e+00 : f32
    %274 = vector.broadcast %cst_159 : f32 to vector<1x128xf32>
    %275 = arith.addf %274, %273 : vector<1x128xf32>
    %276 = tpu.reciprocal %275 {approx = true} : vector<1x128xf32> -> vector<1x128xf32>
    %277 = arith.mulf %276, %161 : vector<1x128xf32>
    %c416 = arith.constant 416 : index
    %c0_160 = arith.constant 0 : index
    %278 = vector.load %arg5[%c416, %c0_160] : memref<480x64xbf16, #tpu.memory_space<vmem>>, vector<16x32xbf16>
    %279 = arith.truncf %244 : vector<32x128xf32> to vector<32x128xbf16>
    %cst_161 = arith.constant dense<0.000000e+00> : vector<16x128xf32>
    %280 = tpu.matmul %278, %279, %cst_161 {dimension_numbers = #tpu.dot_dimension_numbers<[1], [0], [0], [1], [0, 0, 1, 1], [], []>} : vector<16x32xbf16>, vector<32x128xbf16>, vector<16x128xf32> -> vector<16x128xf32>
    %c0_162 = arith.constant 0 : index
    %c9 = arith.constant 9 : index
    %281 = vector.load %arg6[%c0_162, %c9] : memref<64x13xf32, #tpu.memory_space<vmem>>, vector<16x1xf32>
    %282 = vector.broadcast %277 : vector<1x128xf32> to vector<16x128xf32>
    %283 = vector.broadcast %281 : vector<16x1xf32> to vector<16x128xf32>
    %284 = arith.mulf %282, %283 : vector<16x128xf32>
    %285 = arith.addf %280, %284 : vector<16x128xf32>
    %c0_163 = arith.constant 0 : index
    %c0_164 = arith.constant 0 : index
    %c0_165 = arith.constant 0 : index
    %c0_166 = arith.constant 0 : index
    %286 = vector.load %arg3[%c0_163, %c0_164, %c0_165, %c0_166] : memref<1x3x4x128xf32, #tpu.memory_space<vmem>>, vector<1x1x4x128xf32>
    %287 = vector.shape_cast %286 : vector<1x1x4x128xf32> to vector<4x128xf32>
    %c432 = arith.constant 432 : index
    %c0_167 = arith.constant 0 : index
    %288 = vector.load %arg5[%c432, %c0_167] : memref<480x64xbf16, #tpu.memory_space<vmem>>, vector<16x4xbf16>
    %289 = arith.truncf %287 : vector<4x128xf32> to vector<4x128xbf16>
    %cst_168 = arith.constant dense<0.000000e+00> : vector<16x128xf32>
    %290 = tpu.matmul %288, %289, %cst_168 {dimension_numbers = #tpu.dot_dimension_numbers<[1], [0], [0], [1], [0, 0, 1, 1], [], []>} : vector<16x4xbf16>, vector<4x128xbf16>, vector<16x128xf32> -> vector<16x128xf32>
    %291 = arith.addf %285, %290 : vector<16x128xf32>
    %c0_169 = arith.constant 0 : index
    %c10 = arith.constant 10 : index
    %292 = vector.load %arg6[%c0_169, %c10] : memref<64x13xf32, #tpu.memory_space<vmem>>, vector<16x1xf32>
    %293 = vector.broadcast %292 : vector<16x1xf32> to vector<16x128xf32>
    %294 = arith.addf %291, %293 : vector<16x128xf32>
    %cst_170 = arith.constant 0.000000e+00 : f32
    %295 = vector.broadcast %cst_170 : f32 to vector<16x128xf32>
    %296 = arith.cmpf ogt, %294, %295 : vector<16x128xf32>
    %cst_171 = arith.constant 0.000000e+00 : f32
    %297 = vector.broadcast %cst_171 : f32 to vector<16x128xf32>
    %298 = arith.minimumf %294, %297 : vector<16x128xf32>
    %299 = math.exp %298 : vector<16x128xf32>
    %cst_172 = arith.constant 1.000000e+00 : f32
    %300 = vector.broadcast %cst_172 : f32 to vector<16x128xf32>
    %301 = arith.subf %299, %300 : vector<16x128xf32>
    %302 = arith.select %296, %294, %301 : vector<16x128xi1>, vector<16x128xf32>
    %c448 = arith.constant 448 : index
    %c0_173 = arith.constant 0 : index
    %303 = vector.load %arg5[%c448, %c0_173] : memref<480x64xbf16, #tpu.memory_space<vmem>>, vector<8x16xbf16>
    %304 = arith.truncf %302 : vector<16x128xf32> to vector<16x128xbf16>
    %cst_174 = arith.constant dense<0.000000e+00> : vector<8x128xf32>
    %305 = tpu.matmul %303, %304, %cst_174 {dimension_numbers = #tpu.dot_dimension_numbers<[1], [0], [0], [1], [0, 0, 1, 1], [], []>} : vector<8x16xbf16>, vector<16x128xbf16>, vector<8x128xf32> -> vector<8x128xf32>
    %c0_175 = arith.constant 0 : index
    %c11 = arith.constant 11 : index
    %306 = vector.load %arg6[%c0_175, %c11] : memref<64x13xf32, #tpu.memory_space<vmem>>, vector<8x1xf32>
    %307 = vector.broadcast %306 : vector<8x1xf32> to vector<8x128xf32>
    %308 = arith.addf %305, %307 : vector<8x128xf32>
    %cst_176 = arith.constant 0.000000e+00 : f32
    %309 = vector.broadcast %cst_176 : f32 to vector<8x128xf32>
    %310 = arith.cmpf ogt, %308, %309 : vector<8x128xf32>
    %cst_177 = arith.constant 0.000000e+00 : f32
    %311 = vector.broadcast %cst_177 : f32 to vector<8x128xf32>
    %312 = arith.minimumf %308, %311 : vector<8x128xf32>
    %313 = math.exp %312 : vector<8x128xf32>
    %cst_178 = arith.constant 1.000000e+00 : f32
    %314 = vector.broadcast %cst_178 : f32 to vector<8x128xf32>
    %315 = arith.subf %313, %314 : vector<8x128xf32>
    %316 = arith.select %310, %308, %315 : vector<8x128xi1>, vector<8x128xf32>
    %c464 = arith.constant 464 : index
    %c0_179 = arith.constant 0 : index
    %317 = vector.load %arg5[%c464, %c0_179] : memref<480x64xbf16, #tpu.memory_space<vmem>>, vector<1x8xbf16>
    %318 = arith.truncf %316 : vector<8x128xf32> to vector<8x128xbf16>
    %cst_180 = arith.constant dense<0.000000e+00> : vector<1x128xf32>
    %319 = tpu.matmul %317, %318, %cst_180 {dimension_numbers = #tpu.dot_dimension_numbers<[1], [0], [0], [1], [0, 0, 1, 1], [], []>} : vector<1x8xbf16>, vector<8x128xbf16>, vector<1x128xf32> -> vector<1x128xf32>
    %c0_181 = arith.constant 0 : index
    %c12 = arith.constant 12 : index
    %320 = vector.load %arg6[%c0_181, %c12] : memref<64x13xf32, #tpu.memory_space<vmem>>, vector<1x1xf32>
    %321 = vector.broadcast %320 : vector<1x1xf32> to vector<1x128xf32>
    %322 = arith.addf %319, %321 : vector<1x128xf32>
    %323 = tpu.concatenate %244, %277, %322 in 0 : vector<32x128xf32>, vector<1x128xf32>, vector<1x128xf32> -> vector<34x128xf32>
    %c0_182 = arith.constant 0 : index
    %c0_183 = arith.constant 0 : index
    %c0_184 = arith.constant 0 : index
    %c0_185 = arith.constant 0 : index
    %324 = vector.load %arg7[%c0_182, %c0_183, %c0_184, %c0_185] : memref<1x3x34x128xf32, #tpu.memory_space<vmem>>, vector<1x1x34x128xf32>
    %325 = vector.shape_cast %324 : vector<1x1x34x128xf32> to vector<34x128xf32>
    %326 = vector.shape_cast %323 : vector<34x128xf32> to vector<1x1x34x128xf32>
    tpu.vector_store %arg7[%c0_182, %c0_183, %c0_184, %c0_185], %326 {strides = array<i32>} : memref<1x3x34x128xf32, #tpu.memory_space<vmem>>, vector<1x1x34x128xf32>,
    %c0_186 = arith.constant 0 : index
    %c1_187 = arith.constant 1 : index
    %c0_188 = arith.constant 0 : index
    %c0_189 = arith.constant 0 : index
    %327 = vector.load %arg4[%c0_186, %c1_187, %c0_188, %c0_189] : memref<1x3x1x128xf32, #tpu.memory_space<vmem>>, vector<1x1x1x128xf32>
    %328 = vector.shape_cast %327 : vector<1x1x1x128xf32> to vector<1x128xf32>
    %329 = arith.mulf %328, %109 : vector<1x128xf32>
    %c192_190 = arith.constant 192 : index
    %c0_191 = arith.constant 0 : index
    %330 = vector.load %arg5[%c192_190, %c0_191] : memref<480x64xbf16, #tpu.memory_space<vmem>>, vector<64x35xbf16>
    %331 = arith.truncf %65 : vector<35x128xf32> to vector<35x128xbf16>
    %cst_192 = arith.constant dense<0.000000e+00> : vector<64x128xf32>
    %332 = tpu.matmul %330, %331, %cst_192 {dimension_numbers = #tpu.dot_dimension_numbers<[1], [0], [0], [1], [0, 0, 1, 1], [], []>} : vector<64x35xbf16>, vector<35x128xbf16>, vector<64x128xf32> -> vector<64x128xf32>
    %333 = arith.addf %159, %332 : vector<64x128xf32>
    %cst_193 = arith.constant 0.000000e+00 : f32
    %334 = vector.broadcast %cst_193 : f32 to vector<64x128xf32>
    %335 = arith.cmpf ogt, %333, %334 : vector<64x128xf32>
    %cst_194 = arith.constant 0.000000e+00 : f32
    %336 = vector.broadcast %cst_194 : f32 to vector<64x128xf32>
    %337 = arith.minimumf %333, %336 : vector<64x128xf32>
    %338 = math.exp %337 : vector<64x128xf32>
    %cst_195 = arith.constant 1.000000e+00 : f32
    %339 = vector.broadcast %cst_195 : f32 to vector<64x128xf32>
    %340 = arith.subf %338, %339 : vector<64x128xf32>
    %341 = arith.select %335, %333, %340 : vector<64x128xi1>, vector<64x128xf32>
    %c256_196 = arith.constant 256 : index
    %c0_197 = arith.constant 0 : index
    %342 = vector.load %arg5[%c256_196, %c0_197] : memref<480x64xbf16, #tpu.memory_space<vmem>>, vector<32x64xbf16>
    %343 = arith.truncf %341 : vector<64x128xf32> to vector<64x128xbf16>
    %cst_198 = arith.constant dense<0.000000e+00> : vector<32x128xf32>
    %344 = tpu.matmul %342, %343, %cst_198 {dimension_numbers = #tpu.dot_dimension_numbers<[1], [0], [0], [1], [0, 0, 1, 1], [], []>} : vector<32x64xbf16>, vector<64x128xbf16>, vector<32x128xf32> -> vector<32x128xf32>
    %c0_199 = arith.constant 0 : index
    %c3_200 = arith.constant 3 : index
    %345 = vector.load %arg6[%c0_199, %c3_200] : memref<64x13xf32, #tpu.memory_space<vmem>>, vector<32x1xf32>
    %346 = vector.broadcast %345 : vector<32x1xf32> to vector<32x128xf32>
    %347 = arith.addf %344, %346 : vector<32x128xf32>
    %cst_201 = arith.constant 0.000000e+00 : f32
    %348 = vector.broadcast %cst_201 : f32 to vector<32x128xf32>
    %349 = arith.cmpf ogt, %347, %348 : vector<32x128xf32>
    %cst_202 = arith.constant 0.000000e+00 : f32
    %350 = vector.broadcast %cst_202 : f32 to vector<32x128xf32>
    %351 = arith.minimumf %347, %350 : vector<32x128xf32>
    %352 = math.exp %351 : vector<32x128xf32>
    %cst_203 = arith.constant 1.000000e+00 : f32
    %353 = vector.broadcast %cst_203 : f32 to vector<32x128xf32>
    %354 = arith.subf %352, %353 : vector<32x128xf32>
    %355 = arith.select %349, %347, %354 : vector<32x128xi1>, vector<32x128xf32>
    %356 = vector.broadcast %329 : vector<1x128xf32> to vector<32x128xf32>
    %357 = arith.mulf %355, %356 : vector<32x128xf32>
    %c288_204 = arith.constant 288 : index
    %c0_205 = arith.constant 0 : index
    %358 = vector.load %arg5[%c288_204, %c0_205] : memref<480x64xbf16, #tpu.memory_space<vmem>>, vector<32x32xbf16>
    %359 = arith.truncf %357 : vector<32x128xf32> to vector<32x128xbf16>
    %cst_206 = arith.constant dense<0.000000e+00> : vector<32x128xf32>
    %360 = tpu.matmul %358, %359, %cst_206 {dimension_numbers = #tpu.dot_dimension_numbers<[1], [0], [0], [1], [0, 0, 1, 1], [], []>} : vector<32x32xbf16>, vector<32x128xbf16>, vector<32x128xf32> -> vector<32x128xf32>
    %c0_207 = arith.constant 0 : index
    %c4_208 = arith.constant 4 : index
    %361 = vector.load %arg6[%c0_207, %c4_208] : memref<64x13xf32, #tpu.memory_space<vmem>>, vector<32x1xf32>
    %362 = vector.broadcast %361 : vector<32x1xf32> to vector<32x128xf32>
    %363 = arith.addf %360, %362 : vector<32x128xf32>
    %cst_209 = arith.constant 0.000000e+00 : f32
    %364 = vector.broadcast %cst_209 : f32 to vector<32x128xf32>
    %365 = arith.cmpf ogt, %363, %364 : vector<32x128xf32>
    %cst_210 = arith.constant 0.000000e+00 : f32
    %366 = vector.broadcast %cst_210 : f32 to vector<32x128xf32>
    %367 = arith.minimumf %363, %366 : vector<32x128xf32>
    %368 = math.exp %367 : vector<32x128xf32>
    %cst_211 = arith.constant 1.000000e+00 : f32
    %369 = vector.broadcast %cst_211 : f32 to vector<32x128xf32>
    %370 = arith.subf %368, %369 : vector<32x128xf32>
    %371 = arith.select %365, %363, %370 : vector<32x128xi1>, vector<32x128xf32>
    %c320_212 = arith.constant 320 : index
    %c0_213 = arith.constant 0 : index
    %372 = vector.load %arg5[%c320_212, %c0_213] : memref<480x64xbf16, #tpu.memory_space<vmem>>, vector<32x32xbf16>
    %373 = arith.truncf %371 : vector<32x128xf32> to vector<32x128xbf16>
    %cst_214 = arith.constant dense<0.000000e+00> : vector<32x128xf32>
    %374 = tpu.matmul %372, %373, %cst_214 {dimension_numbers = #tpu.dot_dimension_numbers<[1], [0], [0], [1], [0, 0, 1, 1], [], []>} : vector<32x32xbf16>, vector<32x128xbf16>, vector<32x128xf32> -> vector<32x128xf32>
    %c0_215 = arith.constant 0 : index
    %c5_216 = arith.constant 5 : index
    %375 = vector.load %arg6[%c0_215, %c5_216] : memref<64x13xf32, #tpu.memory_space<vmem>>, vector<32x1xf32>
    %376 = vector.broadcast %375 : vector<32x1xf32> to vector<32x128xf32>
    %377 = arith.addf %374, %376 : vector<32x128xf32>
    %cst_217 = arith.constant 0.000000e+00 : f32
    %378 = vector.broadcast %cst_217 : f32 to vector<32x128xf32>
    %379 = arith.cmpf ogt, %377, %378 : vector<32x128xf32>
    %cst_218 = arith.constant 0.000000e+00 : f32
    %380 = vector.broadcast %cst_218 : f32 to vector<32x128xf32>
    %381 = arith.minimumf %377, %380 : vector<32x128xf32>
    %382 = math.exp %381 : vector<32x128xf32>
    %cst_219 = arith.constant 1.000000e+00 : f32
    %383 = vector.broadcast %cst_219 : f32 to vector<32x128xf32>
    %384 = arith.subf %382, %383 : vector<32x128xf32>
    %385 = arith.select %379, %377, %384 : vector<32x128xi1>, vector<32x128xf32>
    %c352_220 = arith.constant 352 : index
    %c0_221 = arith.constant 0 : index
    %386 = vector.load %arg5[%c352_220, %c0_221] : memref<480x64xbf16, #tpu.memory_space<vmem>>, vector<1x32xbf16>
    %387 = arith.truncf %371 : vector<32x128xf32> to vector<32x128xbf16>
    %cst_222 = arith.constant dense<0.000000e+00> : vector<1x128xf32>
    %388 = tpu.matmul %386, %387, %cst_222 {dimension_numbers = #tpu.dot_dimension_numbers<[1], [0], [0], [1], [0, 0, 1, 1], [], []>} : vector<1x32xbf16>, vector<32x128xbf16>, vector<1x128xf32> -> vector<1x128xf32>
    %c0_223 = arith.constant 0 : index
    %c6_224 = arith.constant 6 : index
    %389 = vector.load %arg6[%c0_223, %c6_224] : memref<64x13xf32, #tpu.memory_space<vmem>>, vector<1x1xf32>
    %390 = vector.broadcast %389 : vector<1x1xf32> to vector<1x128xf32>
    %391 = arith.addf %388, %390 : vector<1x128xf32>
    %cst_225 = arith.constant 0.000000e+00 : f32
    %392 = vector.broadcast %cst_225 : f32 to vector<1x128xf32>
    %393 = arith.cmpf ogt, %391, %392 : vector<1x128xf32>
    %cst_226 = arith.constant 0.000000e+00 : f32
    %394 = vector.broadcast %cst_226 : f32 to vector<1x128xf32>
    %395 = arith.minimumf %391, %394 : vector<1x128xf32>
    %396 = math.exp %395 : vector<1x128xf32>
    %cst_227 = arith.constant 1.000000e+00 : f32
    %397 = vector.broadcast %cst_227 : f32 to vector<1x128xf32>
    %398 = arith.subf %396, %397 : vector<1x128xf32>
    %399 = arith.select %393, %391, %398 : vector<1x128xi1>, vector<1x128xf32>
    %cst_228 = arith.constant -3.000000e+01 : f32
    %cst_229 = arith.constant 3.000000e+01 : f32
    %400 = vector.broadcast %cst_228 : f32 to vector<1x128xf32>
    %401 = arith.maximumf %400, %399 : vector<1x128xf32>
    %402 = vector.broadcast %cst_229 : f32 to vector<1x128xf32>
    %403 = arith.minimumf %402, %401 : vector<1x128xf32>
    %cst_230 = arith.constant 0.000000e+00 : f32
    %404 = vector.broadcast %cst_230 : f32 to vector<1x128xf32>
    %405 = arith.subf %404, %403 : vector<1x128xf32>
    %406 = math.exp %405 : vector<1x128xf32>
    %cst_231 = arith.constant 1.000000e+00 : f32
    %407 = vector.broadcast %cst_231 : f32 to vector<1x128xf32>
    %408 = arith.addf %407, %406 : vector<1x128xf32>
    %409 = tpu.reciprocal %408 {approx = true} : vector<1x128xf32> -> vector<1x128xf32>
    %410 = arith.mulf %409, %328 : vector<1x128xf32>
    %411 = arith.addf %355, %385 : vector<32x128xf32>
    %412 = vector.broadcast %410 : vector<1x128xf32> to vector<32x128xf32>
    %413 = arith.mulf %411, %412 : vector<32x128xf32>
    %c368_232 = arith.constant 368 : index
    %c0_233 = arith.constant 0 : index
    %414 = vector.load %arg5[%c368_232, %c0_233] : memref<480x64xbf16, #tpu.memory_space<vmem>>, vector<32x32xbf16>
    %415 = arith.truncf %413 : vector<32x128xf32> to vector<32x128xbf16>
    %cst_234 = arith.constant dense<0.000000e+00> : vector<32x128xf32>
    %416 = tpu.matmul %414, %415, %cst_234 {dimension_numbers = #tpu.dot_dimension_numbers<[1], [0], [0], [1], [0, 0, 1, 1], [], []>} : vector<32x32xbf16>, vector<32x128xbf16>, vector<32x128xf32> -> vector<32x128xf32>
    %c0_235 = arith.constant 0 : index
    %c7_236 = arith.constant 7 : index
    %417 = vector.load %arg6[%c0_235, %c7_236] : memref<64x13xf32, #tpu.memory_space<vmem>>, vector<32x1xf32>
    %418 = vector.broadcast %417 : vector<32x1xf32> to vector<32x128xf32>
    %419 = arith.addf %416, %418 : vector<32x128xf32>
    %cst_237 = arith.constant 0.000000e+00 : f32
    %420 = vector.broadcast %cst_237 : f32 to vector<32x128xf32>
    %421 = arith.cmpf ogt, %419, %420 : vector<32x128xf32>
    %cst_238 = arith.constant 0.000000e+00 : f32
    %422 = vector.broadcast %cst_238 : f32 to vector<32x128xf32>
    %423 = arith.minimumf %419, %422 : vector<32x128xf32>
    %424 = math.exp %423 : vector<32x128xf32>
    %cst_239 = arith.constant 1.000000e+00 : f32
    %425 = vector.broadcast %cst_239 : f32 to vector<32x128xf32>
    %426 = arith.subf %424, %425 : vector<32x128xf32>
    %427 = arith.select %421, %419, %426 : vector<32x128xi1>, vector<32x128xf32>
    %c400_240 = arith.constant 400 : index
    %c0_241 = arith.constant 0 : index
    %428 = vector.load %arg5[%c400_240, %c0_241] : memref<480x64xbf16, #tpu.memory_space<vmem>>, vector<1x32xbf16>
    %429 = arith.truncf %427 : vector<32x128xf32> to vector<32x128xbf16>
    %cst_242 = arith.constant dense<0.000000e+00> : vector<1x128xf32>
    %430 = tpu.matmul %428, %429, %cst_242 {dimension_numbers = #tpu.dot_dimension_numbers<[1], [0], [0], [1], [0, 0, 1, 1], [], []>} : vector<1x32xbf16>, vector<32x128xbf16>, vector<1x128xf32> -> vector<1x128xf32>
    %c0_243 = arith.constant 0 : index
    %c8_244 = arith.constant 8 : index
    %431 = vector.load %arg6[%c0_243, %c8_244] : memref<64x13xf32, #tpu.memory_space<vmem>>, vector<1x1xf32>
    %432 = vector.broadcast %431 : vector<1x1xf32> to vector<1x128xf32>
    %433 = arith.addf %430, %432 : vector<1x128xf32>
    %cst_245 = arith.constant -3.000000e+01 : f32
    %cst_246 = arith.constant 3.000000e+01 : f32
    %434 = vector.broadcast %cst_245 : f32 to vector<1x128xf32>
    %435 = arith.maximumf %434, %433 : vector<1x128xf32>
    %436 = vector.broadcast %cst_246 : f32 to vector<1x128xf32>
    %437 = arith.minimumf %436, %435 : vector<1x128xf32>
    %cst_247 = arith.constant 0.000000e+00 : f32
    %438 = vector.broadcast %cst_247 : f32 to vector<1x128xf32>
    %439 = arith.subf %438, %437 : vector<1x128xf32>
    %440 = math.exp %439 : vector<1x128xf32>
    %cst_248 = arith.constant 1.000000e+00 : f32
    %441 = vector.broadcast %cst_248 : f32 to vector<1x128xf32>
    %442 = arith.addf %441, %440 : vector<1x128xf32>
    %443 = tpu.reciprocal %442 {approx = true} : vector<1x128xf32> -> vector<1x128xf32>
    %444 = arith.mulf %443, %328 : vector<1x128xf32>
    %c416_249 = arith.constant 416 : index
    %c0_250 = arith.constant 0 : index
    %445 = vector.load %arg5[%c416_249, %c0_250] : memref<480x64xbf16, #tpu.memory_space<vmem>>, vector<16x32xbf16>
    %446 = arith.truncf %411 : vector<32x128xf32> to vector<32x128xbf16>
    %cst_251 = arith.constant dense<0.000000e+00> : vector<16x128xf32>
    %447 = tpu.matmul %445, %446, %cst_251 {dimension_numbers = #tpu.dot_dimension_numbers<[1], [0], [0], [1], [0, 0, 1, 1], [], []>} : vector<16x32xbf16>, vector<32x128xbf16>, vector<16x128xf32> -> vector<16x128xf32>
    %c0_252 = arith.constant 0 : index
    %c9_253 = arith.constant 9 : index
    %448 = vector.load %arg6[%c0_252, %c9_253] : memref<64x13xf32, #tpu.memory_space<vmem>>, vector<16x1xf32>
    %449 = vector.broadcast %444 : vector<1x128xf32> to vector<16x128xf32>
    %450 = vector.broadcast %448 : vector<16x1xf32> to vector<16x128xf32>
    %451 = arith.mulf %449, %450 : vector<16x128xf32>
    %452 = arith.addf %447, %451 : vector<16x128xf32>
    %c0_254 = arith.constant 0 : index
    %c1_255 = arith.constant 1 : index
    %c0_256 = arith.constant 0 : index
    %c0_257 = arith.constant 0 : index
    %453 = vector.load %arg3[%c0_254, %c1_255, %c0_256, %c0_257] : memref<1x3x4x128xf32, #tpu.memory_space<vmem>>, vector<1x1x4x128xf32>
    %454 = vector.shape_cast %453 : vector<1x1x4x128xf32> to vector<4x128xf32>
    %c432_258 = arith.constant 432 : index
    %c0_259 = arith.constant 0 : index
    %455 = vector.load %arg5[%c432_258, %c0_259] : memref<480x64xbf16, #tpu.memory_space<vmem>>, vector<16x4xbf16>
    %456 = arith.truncf %454 : vector<4x128xf32> to vector<4x128xbf16>
    %cst_260 = arith.constant dense<0.000000e+00> : vector<16x128xf32>
    %457 = tpu.matmul %455, %456, %cst_260 {dimension_numbers = #tpu.dot_dimension_numbers<[1], [0], [0], [1], [0, 0, 1, 1], [], []>} : vector<16x4xbf16>, vector<4x128xbf16>, vector<16x128xf32> -> vector<16x128xf32>
    %458 = arith.addf %452, %457 : vector<16x128xf32>
    %c0_261 = arith.constant 0 : index
    %c10_262 = arith.constant 10 : index
    %459 = vector.load %arg6[%c0_261, %c10_262] : memref<64x13xf32, #tpu.memory_space<vmem>>, vector<16x1xf32>
    %460 = vector.broadcast %459 : vector<16x1xf32> to vector<16x128xf32>
    %461 = arith.addf %458, %460 : vector<16x128xf32>
    %cst_263 = arith.constant 0.000000e+00 : f32
    %462 = vector.broadcast %cst_263 : f32 to vector<16x128xf32>
    %463 = arith.cmpf ogt, %461, %462 : vector<16x128xf32>
    %cst_264 = arith.constant 0.000000e+00 : f32
    %464 = vector.broadcast %cst_264 : f32 to vector<16x128xf32>
    %465 = arith.minimumf %461, %464 : vector<16x128xf32>
    %466 = math.exp %465 : vector<16x128xf32>
    %cst_265 = arith.constant 1.000000e+00 : f32
    %467 = vector.broadcast %cst_265 : f32 to vector<16x128xf32>
    %468 = arith.subf %466, %467 : vector<16x128xf32>
    %469 = arith.select %463, %461, %468 : vector<16x128xi1>, vector<16x128xf32>
    %c448_266 = arith.constant 448 : index
    %c0_267 = arith.constant 0 : index
    %470 = vector.load %arg5[%c448_266, %c0_267] : memref<480x64xbf16, #tpu.memory_space<vmem>>, vector<8x16xbf16>
    %471 = arith.truncf %469 : vector<16x128xf32> to vector<16x128xbf16>
    %cst_268 = arith.constant dense<0.000000e+00> : vector<8x128xf32>
    %472 = tpu.matmul %470, %471, %cst_268 {dimension_numbers = #tpu.dot_dimension_numbers<[1], [0], [0], [1], [0, 0, 1, 1], [], []>} : vector<8x16xbf16>, vector<16x128xbf16>, vector<8x128xf32> -> vector<8x128xf32>
    %c0_269 = arith.constant 0 : index
    %c11_270 = arith.constant 11 : index
    %473 = vector.load %arg6[%c0_269, %c11_270] : memref<64x13xf32, #tpu.memory_space<vmem>>, vector<8x1xf32>
    %474 = vector.broadcast %473 : vector<8x1xf32> to vector<8x128xf32>
    %475 = arith.addf %472, %474 : vector<8x128xf32>
    %cst_271 = arith.constant 0.000000e+00 : f32
    %476 = vector.broadcast %cst_271 : f32 to vector<8x128xf32>
    %477 = arith.cmpf ogt, %475, %476 : vector<8x128xf32>
    %cst_272 = arith.constant 0.000000e+00 : f32
    %478 = vector.broadcast %cst_272 : f32 to vector<8x128xf32>
    %479 = arith.minimumf %475, %478 : vector<8x128xf32>
    %480 = math.exp %479 : vector<8x128xf32>
    %cst_273 = arith.constant 1.000000e+00 : f32
    %481 = vector.broadcast %cst_273 : f32 to vector<8x128xf32>
    %482 = arith.subf %480, %481 : vector<8x128xf32>
    %483 = arith.select %477, %475, %482 : vector<8x128xi1>, vector<8x128xf32>
    %c464_274 = arith.constant 464 : index
    %c0_275 = arith.constant 0 : index
    %484 = vector.load %arg5[%c464_274, %c0_275] : memref<480x64xbf16, #tpu.memory_space<vmem>>, vector<1x8xbf16>
    %485 = arith.truncf %483 : vector<8x128xf32> to vector<8x128xbf16>
    %cst_276 = arith.constant dense<0.000000e+00> : vector<1x128xf32>
    %486 = tpu.matmul %484, %485, %cst_276 {dimension_numbers = #tpu.dot_dimension_numbers<[1], [0], [0], [1], [0, 0, 1, 1], [], []>} : vector<1x8xbf16>, vector<8x128xbf16>, vector<1x128xf32> -> vector<1x128xf32>
    %c0_277 = arith.constant 0 : index
    %c12_278 = arith.constant 12 : index
    %487 = vector.load %arg6[%c0_277, %c12_278] : memref<64x13xf32, #tpu.memory_space<vmem>>, vector<1x1xf32>
    %488 = vector.broadcast %487 : vector<1x1xf32> to vector<1x128xf32>
    %489 = arith.addf %486, %488 : vector<1x128xf32>
    %490 = tpu.concatenate %411, %444, %489 in 0 : vector<32x128xf32>, vector<1x128xf32>, vector<1x128xf32> -> vector<34x128xf32>
    %c0_279 = arith.constant 0 : index
    %c1_280 = arith.constant 1 : index
    %c0_281 = arith.constant 0 : index
    %c0_282 = arith.constant 0 : index
    %491 = vector.load %arg7[%c0_279, %c1_280, %c0_281, %c0_282] : memref<1x3x34x128xf32, #tpu.memory_space<vmem>>, vector<1x1x34x128xf32>
    %492 = vector.shape_cast %491 : vector<1x1x34x128xf32> to vector<34x128xf32>
    %493 = vector.shape_cast %490 : vector<34x128xf32> to vector<1x1x34x128xf32>
    tpu.vector_store %arg7[%c0_279, %c1_280, %c0_281, %c0_282], %493 {strides = array<i32>} : memref<1x3x34x128xf32, #tpu.memory_space<vmem>>, vector<1x1x34x128xf32>,
    %c0_283 = arith.constant 0 : index
    %c2_284 = arith.constant 2 : index
    %c0_285 = arith.constant 0 : index
    %c0_286 = arith.constant 0 : index
    %494 = vector.load %arg4[%c0_283, %c2_284, %c0_285, %c0_286] : memref<1x3x1x128xf32, #tpu.memory_space<vmem>>, vector<1x1x1x128xf32>
    %495 = vector.shape_cast %494 : vector<1x1x1x128xf32> to vector<1x128xf32>
    %496 = arith.mulf %495, %109 : vector<1x128xf32>
    %c192_287 = arith.constant 192 : index
    %c0_288 = arith.constant 0 : index
    %497 = vector.load %arg5[%c192_287, %c0_288] : memref<480x64xbf16, #tpu.memory_space<vmem>>, vector<64x35xbf16>
    %498 = arith.truncf %98 : vector<35x128xf32> to vector<35x128xbf16>
    %cst_289 = arith.constant dense<0.000000e+00> : vector<64x128xf32>
    %499 = tpu.matmul %497, %498, %cst_289 {dimension_numbers = #tpu.dot_dimension_numbers<[1], [0], [0], [1], [0, 0, 1, 1], [], []>} : vector<64x35xbf16>, vector<35x128xbf16>, vector<64x128xf32> -> vector<64x128xf32>
    %500 = arith.addf %159, %499 : vector<64x128xf32>
    %cst_290 = arith.constant 0.000000e+00 : f32
    %501 = vector.broadcast %cst_290 : f32 to vector<64x128xf32>
    %502 = arith.cmpf ogt, %500, %501 : vector<64x128xf32>
    %cst_291 = arith.constant 0.000000e+00 : f32
    %503 = vector.broadcast %cst_291 : f32 to vector<64x128xf32>
    %504 = arith.minimumf %500, %503 : vector<64x128xf32>
    %505 = math.exp %504 : vector<64x128xf32>
    %cst_292 = arith.constant 1.000000e+00 : f32
    %506 = vector.broadcast %cst_292 : f32 to vector<64x128xf32>
    %507 = arith.subf %505, %506 : vector<64x128xf32>
    %508 = arith.select %502, %500, %507 : vector<64x128xi1>, vector<64x128xf32>
    %c256_293 = arith.constant 256 : index
    %c0_294 = arith.constant 0 : index
    %509 = vector.load %arg5[%c256_293, %c0_294] : memref<480x64xbf16, #tpu.memory_space<vmem>>, vector<32x64xbf16>
    %510 = arith.truncf %508 : vector<64x128xf32> to vector<64x128xbf16>
    %cst_295 = arith.constant dense<0.000000e+00> : vector<32x128xf32>
    %511 = tpu.matmul %509, %510, %cst_295 {dimension_numbers = #tpu.dot_dimension_numbers<[1], [0], [0], [1], [0, 0, 1, 1], [], []>} : vector<32x64xbf16>, vector<64x128xbf16>, vector<32x128xf32> -> vector<32x128xf32>
    %c0_296 = arith.constant 0 : index
    %c3_297 = arith.constant 3 : index
    %512 = vector.load %arg6[%c0_296, %c3_297] : memref<64x13xf32, #tpu.memory_space<vmem>>, vector<32x1xf32>
    %513 = vector.broadcast %512 : vector<32x1xf32> to vector<32x128xf32>
    %514 = arith.addf %511, %513 : vector<32x128xf32>
    %cst_298 = arith.constant 0.000000e+00 : f32
    %515 = vector.broadcast %cst_298 : f32 to vector<32x128xf32>
    %516 = arith.cmpf ogt, %514, %515 : vector<32x128xf32>
    %cst_299 = arith.constant 0.000000e+00 : f32
    %517 = vector.broadcast %cst_299 : f32 to vector<32x128xf32>
    %518 = arith.minimumf %514, %517 : vector<32x128xf32>
    %519 = math.exp %518 : vector<32x128xf32>
    %cst_300 = arith.constant 1.000000e+00 : f32
    %520 = vector.broadcast %cst_300 : f32 to vector<32x128xf32>
    %521 = arith.subf %519, %520 : vector<32x128xf32>
    %522 = arith.select %516, %514, %521 : vector<32x128xi1>, vector<32x128xf32>
    %523 = vector.broadcast %496 : vector<1x128xf32> to vector<32x128xf32>
    %524 = arith.mulf %522, %523 : vector<32x128xf32>
    %c288_301 = arith.constant 288 : index
    %c0_302 = arith.constant 0 : index
    %525 = vector.load %arg5[%c288_301, %c0_302] : memref<480x64xbf16, #tpu.memory_space<vmem>>, vector<32x32xbf16>
    %526 = arith.truncf %524 : vector<32x128xf32> to vector<32x128xbf16>
    %cst_303 = arith.constant dense<0.000000e+00> : vector<32x128xf32>
    %527 = tpu.matmul %525, %526, %cst_303 {dimension_numbers = #tpu.dot_dimension_numbers<[1], [0], [0], [1], [0, 0, 1, 1], [], []>} : vector<32x32xbf16>, vector<32x128xbf16>, vector<32x128xf32> -> vector<32x128xf32>
    %c0_304 = arith.constant 0 : index
    %c4_305 = arith.constant 4 : index
    %528 = vector.load %arg6[%c0_304, %c4_305] : memref<64x13xf32, #tpu.memory_space<vmem>>, vector<32x1xf32>
    %529 = vector.broadcast %528 : vector<32x1xf32> to vector<32x128xf32>
    %530 = arith.addf %527, %529 : vector<32x128xf32>
    %cst_306 = arith.constant 0.000000e+00 : f32
    %531 = vector.broadcast %cst_306 : f32 to vector<32x128xf32>
    %532 = arith.cmpf ogt, %530, %531 : vector<32x128xf32>
    %cst_307 = arith.constant 0.000000e+00 : f32
    %533 = vector.broadcast %cst_307 : f32 to vector<32x128xf32>
    %534 = arith.minimumf %530, %533 : vector<32x128xf32>
    %535 = math.exp %534 : vector<32x128xf32>
    %cst_308 = arith.constant 1.000000e+00 : f32
    %536 = vector.broadcast %cst_308 : f32 to vector<32x128xf32>
    %537 = arith.subf %535, %536 : vector<32x128xf32>
    %538 = arith.select %532, %530, %537 : vector<32x128xi1>, vector<32x128xf32>
    %c320_309 = arith.constant 320 : index
    %c0_310 = arith.constant 0 : index
    %539 = vector.load %arg5[%c320_309, %c0_310] : memref<480x64xbf16, #tpu.memory_space<vmem>>, vector<32x32xbf16>
    %540 = arith.truncf %538 : vector<32x128xf32> to vector<32x128xbf16>
    %cst_311 = arith.constant dense<0.000000e+00> : vector<32x128xf32>
    %541 = tpu.matmul %539, %540, %cst_311 {dimension_numbers = #tpu.dot_dimension_numbers<[1], [0], [0], [1], [0, 0, 1, 1], [], []>} : vector<32x32xbf16>, vector<32x128xbf16>, vector<32x128xf32> -> vector<32x128xf32>
    %c0_312 = arith.constant 0 : index
    %c5_313 = arith.constant 5 : index
    %542 = vector.load %arg6[%c0_312, %c5_313] : memref<64x13xf32, #tpu.memory_space<vmem>>, vector<32x1xf32>
    %543 = vector.broadcast %542 : vector<32x1xf32> to vector<32x128xf32>
    %544 = arith.addf %541, %543 : vector<32x128xf32>
    %cst_314 = arith.constant 0.000000e+00 : f32
    %545 = vector.broadcast %cst_314 : f32 to vector<32x128xf32>
    %546 = arith.cmpf ogt, %544, %545 : vector<32x128xf32>
    %cst_315 = arith.constant 0.000000e+00 : f32
    %547 = vector.broadcast %cst_315 : f32 to vector<32x128xf32>
    %548 = arith.minimumf %544, %547 : vector<32x128xf32>
    %549 = math.exp %548 : vector<32x128xf32>
    %cst_316 = arith.constant 1.000000e+00 : f32
    %550 = vector.broadcast %cst_316 : f32 to vector<32x128xf32>
    %551 = arith.subf %549, %550 : vector<32x128xf32>
    %552 = arith.select %546, %544, %551 : vector<32x128xi1>, vector<32x128xf32>
    %c352_317 = arith.constant 352 : index
    %c0_318 = arith.constant 0 : index
    %553 = vector.load %arg5[%c352_317, %c0_318] : memref<480x64xbf16, #tpu.memory_space<vmem>>, vector<1x32xbf16>
    %554 = arith.truncf %538 : vector<32x128xf32> to vector<32x128xbf16>
    %cst_319 = arith.constant dense<0.000000e+00> : vector<1x128xf32>
    %555 = tpu.matmul %553, %554, %cst_319 {dimension_numbers = #tpu.dot_dimension_numbers<[1], [0], [0], [1], [0, 0, 1, 1], [], []>} : vector<1x32xbf16>, vector<32x128xbf16>, vector<1x128xf32> -> vector<1x128xf32>
    %c0_320 = arith.constant 0 : index
    %c6_321 = arith.constant 6 : index
    %556 = vector.load %arg6[%c0_320, %c6_321] : memref<64x13xf32, #tpu.memory_space<vmem>>, vector<1x1xf32>
    %557 = vector.broadcast %556 : vector<1x1xf32> to vector<1x128xf32>
    %558 = arith.addf %555, %557 : vector<1x128xf32>
    %cst_322 = arith.constant 0.000000e+00 : f32
    %559 = vector.broadcast %cst_322 : f32 to vector<1x128xf32>
    %560 = arith.cmpf ogt, %558, %559 : vector<1x128xf32>
    %cst_323 = arith.constant 0.000000e+00 : f32
    %561 = vector.broadcast %cst_323 : f32 to vector<1x128xf32>
    %562 = arith.minimumf %558, %561 : vector<1x128xf32>
    %563 = math.exp %562 : vector<1x128xf32>
    %cst_324 = arith.constant 1.000000e+00 : f32
    %564 = vector.broadcast %cst_324 : f32 to vector<1x128xf32>
    %565 = arith.subf %563, %564 : vector<1x128xf32>
    %566 = arith.select %560, %558, %565 : vector<1x128xi1>, vector<1x128xf32>
    %cst_325 = arith.constant -3.000000e+01 : f32
    %cst_326 = arith.constant 3.000000e+01 : f32
    %567 = vector.broadcast %cst_325 : f32 to vector<1x128xf32>
    %568 = arith.maximumf %567, %566 : vector<1x128xf32>
    %569 = vector.broadcast %cst_326 : f32 to vector<1x128xf32>
    %570 = arith.minimumf %569, %568 : vector<1x128xf32>
    %cst_327 = arith.constant 0.000000e+00 : f32
    %571 = vector.broadcast %cst_327 : f32 to vector<1x128xf32>
    %572 = arith.subf %571, %570 : vector<1x128xf32>
    %573 = math.exp %572 : vector<1x128xf32>
    %cst_328 = arith.constant 1.000000e+00 : f32
    %574 = vector.broadcast %cst_328 : f32 to vector<1x128xf32>
    %575 = arith.addf %574, %573 : vector<1x128xf32>
    %576 = tpu.reciprocal %575 {approx = true} : vector<1x128xf32> -> vector<1x128xf32>
    %577 = arith.mulf %576, %495 : vector<1x128xf32>
    %578 = arith.addf %522, %552 : vector<32x128xf32>
    %579 = vector.broadcast %577 : vector<1x128xf32> to vector<32x128xf32>
    %580 = arith.mulf %578, %579 : vector<32x128xf32>
    %c368_329 = arith.constant 368 : index
    %c0_330 = arith.constant 0 : index
    %581 = vector.load %arg5[%c368_329, %c0_330] : memref<480x64xbf16, #tpu.memory_space<vmem>>, vector<32x32xbf16>
    %582 = arith.truncf %580 : vector<32x128xf32> to vector<32x128xbf16>
    %cst_331 = arith.constant dense<0.000000e+00> : vector<32x128xf32>
    %583 = tpu.matmul %581, %582, %cst_331 {dimension_numbers = #tpu.dot_dimension_numbers<[1], [0], [0], [1], [0, 0, 1, 1], [], []>} : vector<32x32xbf16>, vector<32x128xbf16>, vector<32x128xf32> -> vector<32x128xf32>
    %c0_332 = arith.constant 0 : index
    %c7_333 = arith.constant 7 : index
    %584 = vector.load %arg6[%c0_332, %c7_333] : memref<64x13xf32, #tpu.memory_space<vmem>>, vector<32x1xf32>
    %585 = vector.broadcast %584 : vector<32x1xf32> to vector<32x128xf32>
    %586 = arith.addf %583, %585 : vector<32x128xf32>
    %cst_334 = arith.constant 0.000000e+00 : f32
    %587 = vector.broadcast %cst_334 : f32 to vector<32x128xf32>
    %588 = arith.cmpf ogt, %586, %587 : vector<32x128xf32>
    %cst_335 = arith.constant 0.000000e+00 : f32
    %589 = vector.broadcast %cst_335 : f32 to vector<32x128xf32>
    %590 = arith.minimumf %586, %589 : vector<32x128xf32>
    %591 = math.exp %590 : vector<32x128xf32>
    %cst_336 = arith.constant 1.000000e+00 : f32
    %592 = vector.broadcast %cst_336 : f32 to vector<32x128xf32>
    %593 = arith.subf %591, %592 : vector<32x128xf32>
    %594 = arith.select %588, %586, %593 : vector<32x128xi1>, vector<32x128xf32>
    %c400_337 = arith.constant 400 : index
    %c0_338 = arith.constant 0 : index
    %595 = vector.load %arg5[%c400_337, %c0_338] : memref<480x64xbf16, #tpu.memory_space<vmem>>, vector<1x32xbf16>
    %596 = arith.truncf %594 : vector<32x128xf32> to vector<32x128xbf16>
    %cst_339 = arith.constant dense<0.000000e+00> : vector<1x128xf32>
    %597 = tpu.matmul %595, %596, %cst_339 {dimension_numbers = #tpu.dot_dimension_numbers<[1], [0], [0], [1], [0, 0, 1, 1], [], []>} : vector<1x32xbf16>, vector<32x128xbf16>, vector<1x128xf32> -> vector<1x128xf32>
    %c0_340 = arith.constant 0 : index
    %c8_341 = arith.constant 8 : index
    %598 = vector.load %arg6[%c0_340, %c8_341] : memref<64x13xf32, #tpu.memory_space<vmem>>, vector<1x1xf32>
    %599 = vector.broadcast %598 : vector<1x1xf32> to vector<1x128xf32>
    %600 = arith.addf %597, %599 : vector<1x128xf32>
    %cst_342 = arith.constant -3.000000e+01 : f32
    %cst_343 = arith.constant 3.000000e+01 : f32
    %601 = vector.broadcast %cst_342 : f32 to vector<1x128xf32>
    %602 = arith.maximumf %601, %600 : vector<1x128xf32>
    %603 = vector.broadcast %cst_343 : f32 to vector<1x128xf32>
    %604 = arith.minimumf %603, %602 : vector<1x128xf32>
    %cst_344 = arith.constant 0.000000e+00 : f32
    %605 = vector.broadcast %cst_344 : f32 to vector<1x128xf32>
    %606 = arith.subf %605, %604 : vector<1x128xf32>
    %607 = math.exp %606 : vector<1x128xf32>
    %cst_345 = arith.constant 1.000000e+00 : f32
    %608 = vector.broadcast %cst_345 : f32 to vector<1x128xf32>
    %609 = arith.addf %608, %607 : vector<1x128xf32>
    %610 = tpu.reciprocal %609 {approx = true} : vector<1x128xf32> -> vector<1x128xf32>
    %611 = arith.mulf %610, %495 : vector<1x128xf32>
    %c416_346 = arith.constant 416 : index
    %c0_347 = arith.constant 0 : index
    %612 = vector.load %arg5[%c416_346, %c0_347] : memref<480x64xbf16, #tpu.memory_space<vmem>>, vector<16x32xbf16>
    %613 = arith.truncf %578 : vector<32x128xf32> to vector<32x128xbf16>
    %cst_348 = arith.constant dense<0.000000e+00> : vector<16x128xf32>
    %614 = tpu.matmul %612, %613, %cst_348 {dimension_numbers = #tpu.dot_dimension_numbers<[1], [0], [0], [1], [0, 0, 1, 1], [], []>} : vector<16x32xbf16>, vector<32x128xbf16>, vector<16x128xf32> -> vector<16x128xf32>
    %c0_349 = arith.constant 0 : index
    %c9_350 = arith.constant 9 : index
    %615 = vector.load %arg6[%c0_349, %c9_350] : memref<64x13xf32, #tpu.memory_space<vmem>>, vector<16x1xf32>
    %616 = vector.broadcast %611 : vector<1x128xf32> to vector<16x128xf32>
    %617 = vector.broadcast %615 : vector<16x1xf32> to vector<16x128xf32>
    %618 = arith.mulf %616, %617 : vector<16x128xf32>
    %619 = arith.addf %614, %618 : vector<16x128xf32>
    %c0_351 = arith.constant 0 : index
    %c2_352 = arith.constant 2 : index
    %c0_353 = arith.constant 0 : index
    %c0_354 = arith.constant 0 : index
    %620 = vector.load %arg3[%c0_351, %c2_352, %c0_353, %c0_354] : memref<1x3x4x128xf32, #tpu.memory_space<vmem>>, vector<1x1x4x128xf32>
    %621 = vector.shape_cast %620 : vector<1x1x4x128xf32> to vector<4x128xf32>
    %c432_355 = arith.constant 432 : index
    %c0_356 = arith.constant 0 : index
    %622 = vector.load %arg5[%c432_355, %c0_356] : memref<480x64xbf16, #tpu.memory_space<vmem>>, vector<16x4xbf16>
    %623 = arith.truncf %621 : vector<4x128xf32> to vector<4x128xbf16>
    %cst_357 = arith.constant dense<0.000000e+00> : vector<16x128xf32>
    %624 = tpu.matmul %622, %623, %cst_357 {dimension_numbers = #tpu.dot_dimension_numbers<[1], [0], [0], [1], [0, 0, 1, 1], [], []>} : vector<16x4xbf16>, vector<4x128xbf16>, vector<16x128xf32> -> vector<16x128xf32>
    %625 = arith.addf %619, %624 : vector<16x128xf32>
    %c0_358 = arith.constant 0 : index
    %c10_359 = arith.constant 10 : index
    %626 = vector.load %arg6[%c0_358, %c10_359] : memref<64x13xf32, #tpu.memory_space<vmem>>, vector<16x1xf32>
    %627 = vector.broadcast %626 : vector<16x1xf32> to vector<16x128xf32>
    %628 = arith.addf %625, %627 : vector<16x128xf32>
    %cst_360 = arith.constant 0.000000e+00 : f32
    %629 = vector.broadcast %cst_360 : f32 to vector<16x128xf32>
    %630 = arith.cmpf ogt, %628, %629 : vector<16x128xf32>
    %cst_361 = arith.constant 0.000000e+00 : f32
    %631 = vector.broadcast %cst_361 : f32 to vector<16x128xf32>
    %632 = arith.minimumf %628, %631 : vector<16x128xf32>
    %633 = math.exp %632 : vector<16x128xf32>
    %cst_362 = arith.constant 1.000000e+00 : f32
    %634 = vector.broadcast %cst_362 : f32 to vector<16x128xf32>
    %635 = arith.subf %633, %634 : vector<16x128xf32>
    %636 = arith.select %630, %628, %635 : vector<16x128xi1>, vector<16x128xf32>
    %c448_363 = arith.constant 448 : index
    %c0_364 = arith.constant 0 : index
    %637 = vector.load %arg5[%c448_363, %c0_364] : memref<480x64xbf16, #tpu.memory_space<vmem>>, vector<8x16xbf16>
    %638 = arith.truncf %636 : vector<16x128xf32> to vector<16x128xbf16>
    %cst_365 = arith.constant dense<0.000000e+00> : vector<8x128xf32>
    %639 = tpu.matmul %637, %638, %cst_365 {dimension_numbers = #tpu.dot_dimension_numbers<[1], [0], [0], [1], [0, 0, 1, 1], [], []>} : vector<8x16xbf16>, vector<16x128xbf16>, vector<8x128xf32> -> vector<8x128xf32>
    %c0_366 = arith.constant 0 : index
    %c11_367 = arith.constant 11 : index
    %640 = vector.load %arg6[%c0_366, %c11_367] : memref<64x13xf32, #tpu.memory_space<vmem>>, vector<8x1xf32>
    %641 = vector.broadcast %640 : vector<8x1xf32> to vector<8x128xf32>
    %642 = arith.addf %639, %641 : vector<8x128xf32>
    %cst_368 = arith.constant 0.000000e+00 : f32
    %643 = vector.broadcast %cst_368 : f32 to vector<8x128xf32>
    %644 = arith.cmpf ogt, %642, %643 : vector<8x128xf32>
    %cst_369 = arith.constant 0.000000e+00 : f32
    %645 = vector.broadcast %cst_369 : f32 to vector<8x128xf32>
    %646 = arith.minimumf %642, %645 : vector<8x128xf32>
    %647 = math.exp %646 : vector<8x128xf32>
    %cst_370 = arith.constant 1.000000e+00 : f32
    %648 = vector.broadcast %cst_370 : f32 to vector<8x128xf32>
    %649 = arith.subf %647, %648 : vector<8x128xf32>
    %650 = arith.select %644, %642, %649 : vector<8x128xi1>, vector<8x128xf32>
    %c464_371 = arith.constant 464 : index
    %c0_372 = arith.constant 0 : index
    %651 = vector.load %arg5[%c464_371, %c0_372] : memref<480x64xbf16, #tpu.memory_space<vmem>>, vector<1x8xbf16>
    %652 = arith.truncf %650 : vector<8x128xf32> to vector<8x128xbf16>
    %cst_373 = arith.constant dense<0.000000e+00> : vector<1x128xf32>
    %653 = tpu.matmul %651, %652, %cst_373 {dimension_numbers = #tpu.dot_dimension_numbers<[1], [0], [0], [1], [0, 0, 1, 1], [], []>} : vector<1x8xbf16>, vector<8x128xbf16>, vector<1x128xf32> -> vector<1x128xf32>
    %c0_374 = arith.constant 0 : index
    %c12_375 = arith.constant 12 : index
    %654 = vector.load %arg6[%c0_374, %c12_375] : memref<64x13xf32, #tpu.memory_space<vmem>>, vector<1x1xf32>
    %655 = vector.broadcast %654 : vector<1x1xf32> to vector<1x128xf32>
    %656 = arith.addf %653, %655 : vector<1x128xf32>
    %657 = tpu.concatenate %578, %611, %656 in 0 : vector<32x128xf32>, vector<1x128xf32>, vector<1x128xf32> -> vector<34x128xf32>
    %c0_376 = arith.constant 0 : index
    %c2_377 = arith.constant 2 : index
    %c0_378 = arith.constant 0 : index
    %c0_379 = arith.constant 0 : index
    %658 = vector.load %arg7[%c0_376, %c2_377, %c0_378, %c0_379] : memref<1x3x34x128xf32, #tpu.memory_space<vmem>>, vector<1x1x34x128xf32>
    %659 = vector.shape_cast %658 : vector<1x1x34x128xf32> to vector<34x128xf32>
    %660 = vector.shape_cast %657 : vector<34x128xf32> to vector<1x1x34x128xf32>
    tpu.vector_store %arg7[%c0_376, %c2_377, %c0_378, %c0_379], %660 {strides = array<i32>} : memref<1x3x34x128xf32, #tpu.memory_space<vmem>>, vector<1x1x34x128xf32>,
    return
  }
  func.func @transform_0(%arg0: i32, %arg1: i32) -> (i32, i32, i32, i32) {
    %c0_i32 = arith.constant 0 : i32
    %c0_i32_0 = arith.constant 0 : i32
    %c0_i32_1 = arith.constant 0 : i32
    return %arg0, %c0_i32, %c0_i32_0, %arg1 : i32, i32, i32, i32
  }
  func.func @transform_1(%arg0: i32, %arg1: i32) -> (i32, i32, i32, i32) {
    %c0_i32 = arith.constant 0 : i32
    %c0_i32_0 = arith.constant 0 : i32
    %c0_i32_1 = arith.constant 0 : i32
    return %arg0, %c0_i32, %c0_i32_0, %arg1 : i32, i32, i32, i32
  }
  func.func @transform_2(%arg0: i32, %arg1: i32) -> (i32, i32, i32, i32) {
    %c0_i32 = arith.constant 0 : i32
    %c0_i32_0 = arith.constant 0 : i32
    %c0_i32_1 = arith.constant 0 : i32
    return %arg0, %c0_i32, %c0_i32_0, %arg1 : i32, i32, i32, i32
  }
  func.func @transform_3(%arg0: i32, %arg1: i32) -> (i32, i32) {
    %c0_i32 = arith.constant 0 : i32
    %c0_i32_0 = arith.constant 0 : i32
    %c0_i32_1 = arith.constant 0 : i32
    return %c0_i32, %c0_i32_0 : i32, i32
  }
  func.func @transform_4(%arg0: i32, %arg1: i32) -> (i32, i32) {
    %c0_i32 = arith.constant 0 : i32
    %c0_i32_0 = arith.constant 0 : i32
    %c0_i32_1 = arith.constant 0 : i32
    return %c0_i32, %c0_i32_0 : i32, i32
  }
  func.func @transform_5(%arg0: i32, %arg1: i32) -> (i32, i32, i32, i32) {
    %c0_i32 = arith.constant 0 : i32
    %c0_i32_0 = arith.constant 0 : i32
    %c0_i32_1 = arith.constant 0 : i32
    return %arg0, %c0_i32, %c0_i32_0, %arg1 : i32, i32, i32, i32
  }
}

module attributes {stable_mosaic.version = 11 : i64} {
  func.func @_stage2_kernel(%arg0: i32, %arg1: i32, %arg2: memref<1x3x34x128xf32, #tpu.memory_space<vmem>>, %arg3: memref<1x3x1x128xf32, #tpu.memory_space<vmem>>, %arg4: memref<16x128xf32, #tpu.memory_space<vmem>>, %arg5: memref<144x64xbf16, #tpu.memory_space<vmem>>, %arg6: memref<64x3xf32, #tpu.memory_space<vmem>>, %arg7: memref<1x32x128xf32, #tpu.memory_space<vmem>>) attributes {dimension_semantics = [#tpu.dimension_semantics<parallel>, #tpu.dimension_semantics<parallel>], iteration_bounds = array<i64: 2, 1>, scalar_prefetch = 0 : i64, scratch_operands = 0 : i64, tpu.core_type = #tpu.core_type<tc>, window_params = [{transform_indices = @transform_0, window_bounds = array<i64: 1, 3, 34, 128>}, {transform_indices = @transform_1, window_bounds = array<i64: 1, 3, 1, 128>}, {transform_indices = @transform_2, window_bounds = array<i64: 16, 128>}, {pipeline_mode = #tpu.pipeline_mode<synchronous>, transform_indices = @transform_3, window_bounds = array<i64: 144, 64>}, {pipeline_mode = #tpu.pipeline_mode<synchronous>, transform_indices = @transform_4, window_bounds = array<i64: 64, 3>}, {transform_indices = @transform_5, window_bounds = array<i64: 1, 32, 128>}]} {
    %c0 = arith.constant 0 : index
    %c0_0 = arith.constant 0 : index
    %c0_1 = arith.constant 0 : index
    %c0_2 = arith.constant 0 : index
    %0 = vector.load %arg3[%c0, %c0_0, %c0_1, %c0_2] : memref<1x3x1x128xf32, #tpu.memory_space<vmem>>, vector<1x1x1x128xf32>
    %1 = vector.shape_cast %0 : vector<1x1x1x128xf32> to vector<1x128xf32>
    %c0_3 = arith.constant 0 : index
    %c0_4 = arith.constant 0 : index
    %c0_5 = arith.constant 0 : index
    %c0_6 = arith.constant 0 : index
    %2 = vector.load %arg2[%c0_3, %c0_4, %c0_5, %c0_6] : memref<1x3x34x128xf32, #tpu.memory_space<vmem>>, vector<1x1x32x128xf32>
    %3 = vector.shape_cast %2 : vector<1x1x32x128xf32> to vector<32x128xf32>
    %4 = vector.broadcast %1 : vector<1x128xf32> to vector<32x128xf32>
    %5 = arith.mulf %4, %3 : vector<32x128xf32>
    %c0_7 = arith.constant 0 : index
    %c1 = arith.constant 1 : index
    %c0_8 = arith.constant 0 : index
    %c0_9 = arith.constant 0 : index
    %6 = vector.load %arg3[%c0_7, %c1, %c0_8, %c0_9] : memref<1x3x1x128xf32, #tpu.memory_space<vmem>>, vector<1x1x1x128xf32>
    %7 = vector.shape_cast %6 : vector<1x1x1x128xf32> to vector<1x128xf32>
    %c0_10 = arith.constant 0 : index
    %c1_11 = arith.constant 1 : index
    %c0_12 = arith.constant 0 : index
    %c0_13 = arith.constant 0 : index
    %8 = vector.load %arg2[%c0_10, %c1_11, %c0_12, %c0_13] : memref<1x3x34x128xf32, #tpu.memory_space<vmem>>, vector<1x1x32x128xf32>
    %9 = vector.shape_cast %8 : vector<1x1x32x128xf32> to vector<32x128xf32>
    %10 = vector.broadcast %7 : vector<1x128xf32> to vector<32x128xf32>
    %11 = arith.mulf %10, %9 : vector<32x128xf32>
    %12 = arith.addf %5, %11 : vector<32x128xf32>
    %c0_14 = arith.constant 0 : index
    %c2 = arith.constant 2 : index
    %c0_15 = arith.constant 0 : index
    %c0_16 = arith.constant 0 : index
    %13 = vector.load %arg3[%c0_14, %c2, %c0_15, %c0_16] : memref<1x3x1x128xf32, #tpu.memory_space<vmem>>, vector<1x1x1x128xf32>
    %14 = vector.shape_cast %13 : vector<1x1x1x128xf32> to vector<1x128xf32>
    %c0_17 = arith.constant 0 : index
    %c2_18 = arith.constant 2 : index
    %c0_19 = arith.constant 0 : index
    %c0_20 = arith.constant 0 : index
    %15 = vector.load %arg2[%c0_17, %c2_18, %c0_19, %c0_20] : memref<1x3x34x128xf32, #tpu.memory_space<vmem>>, vector<1x1x32x128xf32>
    %16 = vector.shape_cast %15 : vector<1x1x32x128xf32> to vector<32x128xf32>
    %17 = vector.broadcast %14 : vector<1x128xf32> to vector<32x128xf32>
    %18 = arith.mulf %17, %16 : vector<32x128xf32>
    %19 = arith.addf %12, %18 : vector<32x128xf32>
    %c0_21 = arith.constant 0 : index
    %c0_22 = arith.constant 0 : index
    %c0_23 = arith.constant 0 : index
    %c0_24 = arith.constant 0 : index
    %20 = vector.load %arg3[%c0_21, %c0_22, %c0_23, %c0_24] : memref<1x3x1x128xf32, #tpu.memory_space<vmem>>, vector<1x1x1x128xf32>
    %21 = vector.shape_cast %20 : vector<1x1x1x128xf32> to vector<1x128xf32>
    %c0_25 = arith.constant 0 : index
    %c0_26 = arith.constant 0 : index
    %c0_27 = arith.constant 0 : index
    %c0_28 = arith.constant 0 : index
    %22 = vector.load %arg2[%c0_25, %c0_26, %c0_27, %c0_28] : memref<1x3x34x128xf32, #tpu.memory_space<vmem>>, vector<1x1x32x128xf32>
    %23 = vector.shape_cast %22 : vector<1x1x32x128xf32> to vector<32x128xf32>
    %24 = arith.subf %23, %19 : vector<32x128xf32>
    %25 = arith.mulf %24, %24 : vector<32x128xf32>
    %26 = vector.broadcast %21 : vector<1x128xf32> to vector<32x128xf32>
    %27 = arith.mulf %26, %25 : vector<32x128xf32>
    %c0_29 = arith.constant 0 : index
    %c1_30 = arith.constant 1 : index
    %c0_31 = arith.constant 0 : index
    %c0_32 = arith.constant 0 : index
    %28 = vector.load %arg3[%c0_29, %c1_30, %c0_31, %c0_32] : memref<1x3x1x128xf32, #tpu.memory_space<vmem>>, vector<1x1x1x128xf32>
    %29 = vector.shape_cast %28 : vector<1x1x1x128xf32> to vector<1x128xf32>
    %c0_33 = arith.constant 0 : index
    %c1_34 = arith.constant 1 : index
    %c0_35 = arith.constant 0 : index
    %c0_36 = arith.constant 0 : index
    %30 = vector.load %arg2[%c0_33, %c1_34, %c0_35, %c0_36] : memref<1x3x34x128xf32, #tpu.memory_space<vmem>>, vector<1x1x32x128xf32>
    %31 = vector.shape_cast %30 : vector<1x1x32x128xf32> to vector<32x128xf32>
    %32 = arith.subf %31, %19 : vector<32x128xf32>
    %33 = arith.mulf %32, %32 : vector<32x128xf32>
    %34 = vector.broadcast %29 : vector<1x128xf32> to vector<32x128xf32>
    %35 = arith.mulf %34, %33 : vector<32x128xf32>
    %36 = arith.addf %27, %35 : vector<32x128xf32>
    %c0_37 = arith.constant 0 : index
    %c2_38 = arith.constant 2 : index
    %c0_39 = arith.constant 0 : index
    %c0_40 = arith.constant 0 : index
    %37 = vector.load %arg3[%c0_37, %c2_38, %c0_39, %c0_40] : memref<1x3x1x128xf32, #tpu.memory_space<vmem>>, vector<1x1x1x128xf32>
    %38 = vector.shape_cast %37 : vector<1x1x1x128xf32> to vector<1x128xf32>
    %c0_41 = arith.constant 0 : index
    %c2_42 = arith.constant 2 : index
    %c0_43 = arith.constant 0 : index
    %c0_44 = arith.constant 0 : index
    %39 = vector.load %arg2[%c0_41, %c2_42, %c0_43, %c0_44] : memref<1x3x34x128xf32, #tpu.memory_space<vmem>>, vector<1x1x32x128xf32>
    %40 = vector.shape_cast %39 : vector<1x1x32x128xf32> to vector<32x128xf32>
    %41 = arith.subf %40, %19 : vector<32x128xf32>
    %42 = arith.mulf %41, %41 : vector<32x128xf32>
    %43 = vector.broadcast %38 : vector<1x128xf32> to vector<32x128xf32>
    %44 = arith.mulf %43, %42 : vector<32x128xf32>
    %45 = arith.addf %36, %44 : vector<32x128xf32>
    %c0_45 = arith.constant 0 : index
    %c0_46 = arith.constant 0 : index
    %c0_47 = arith.constant 0 : index
    %c0_48 = arith.constant 0 : index
    %46 = vector.load %arg3[%c0_45, %c0_46, %c0_47, %c0_48] : memref<1x3x1x128xf32, #tpu.memory_space<vmem>>, vector<1x1x1x128xf32>
    %47 = vector.shape_cast %46 : vector<1x1x1x128xf32> to vector<1x128xf32>
    %c0_49 = arith.constant 0 : index
    %c1_50 = arith.constant 1 : index
    %c0_51 = arith.constant 0 : index
    %c0_52 = arith.constant 0 : index
    %48 = vector.load %arg3[%c0_49, %c1_50, %c0_51, %c0_52] : memref<1x3x1x128xf32, #tpu.memory_space<vmem>>, vector<1x1x1x128xf32>
    %49 = vector.shape_cast %48 : vector<1x1x1x128xf32> to vector<1x128xf32>
    %50 = arith.addf %47, %49 : vector<1x128xf32>
    %c0_53 = arith.constant 0 : index
    %c2_54 = arith.constant 2 : index
    %c0_55 = arith.constant 0 : index
    %c0_56 = arith.constant 0 : index
    %51 = vector.load %arg3[%c0_53, %c2_54, %c0_55, %c0_56] : memref<1x3x1x128xf32, #tpu.memory_space<vmem>>, vector<1x1x1x128xf32>
    %52 = vector.shape_cast %51 : vector<1x1x1x128xf32> to vector<1x128xf32>
    %53 = arith.addf %50, %52 : vector<1x128xf32>
    %cst = arith.constant 0.333333343 : f32
    %54 = vector.broadcast %cst : f32 to vector<1x128xf32>
    %55 = arith.mulf %53, %54 : vector<1x128xf32>
    %c0_57 = arith.constant 0 : index
    %c0_58 = arith.constant 0 : index
    %56 = vector.load %arg5[%c0_57, %c0_58] : memref<144x64xbf16, #tpu.memory_space<vmem>>, vector<64x32xbf16>
    %57 = arith.truncf %19 : vector<32x128xf32> to vector<32x128xbf16>
    %cst_59 = arith.constant dense<0.000000e+00> : vector<64x128xf32>
    %58 = tpu.matmul %56, %57, %cst_59 {dimension_numbers = #tpu.dot_dimension_numbers<[1], [0], [0], [1], [0, 0, 1, 1], [], []>} : vector<64x32xbf16>, vector<32x128xbf16>, vector<64x128xf32> -> vector<64x128xf32>
    %c64 = arith.constant 64 : index
    %c0_60 = arith.constant 0 : index
    %59 = vector.load %arg5[%c64, %c0_60] : memref<144x64xbf16, #tpu.memory_space<vmem>>, vector<64x32xbf16>
    %60 = arith.truncf %45 : vector<32x128xf32> to vector<32x128xbf16>
    %cst_61 = arith.constant dense<0.000000e+00> : vector<64x128xf32>
    %61 = tpu.matmul %59, %60, %cst_61 {dimension_numbers = #tpu.dot_dimension_numbers<[1], [0], [0], [1], [0, 0, 1, 1], [], []>} : vector<64x32xbf16>, vector<32x128xbf16>, vector<64x128xf32> -> vector<64x128xf32>
    %62 = arith.addf %58, %61 : vector<64x128xf32>
    %c0_62 = arith.constant 0 : index
    %c0_63 = arith.constant 0 : index
    %63 = vector.load %arg6[%c0_62, %c0_63] : memref<64x3xf32, #tpu.memory_space<vmem>>, vector<64x1xf32>
    %64 = vector.broadcast %55 : vector<1x128xf32> to vector<64x128xf32>
    %65 = vector.broadcast %63 : vector<64x1xf32> to vector<64x128xf32>
    %66 = arith.mulf %64, %65 : vector<64x128xf32>
    %67 = arith.addf %62, %66 : vector<64x128xf32>
    %c0_64 = arith.constant 0 : index
    %c1_65 = arith.constant 1 : index
    %68 = vector.load %arg6[%c0_64, %c1_65] : memref<64x3xf32, #tpu.memory_space<vmem>>, vector<64x1xf32>
    %69 = vector.broadcast %68 : vector<64x1xf32> to vector<64x128xf32>
    %70 = arith.addf %67, %69 : vector<64x128xf32>
    %cst_66 = arith.constant 0.000000e+00 : f32
    %71 = vector.broadcast %cst_66 : f32 to vector<64x128xf32>
    %72 = arith.cmpf ogt, %70, %71 : vector<64x128xf32>
    %cst_67 = arith.constant 0.000000e+00 : f32
    %73 = vector.broadcast %cst_67 : f32 to vector<64x128xf32>
    %74 = arith.minimumf %70, %73 : vector<64x128xf32>
    %75 = math.exp %74 : vector<64x128xf32>
    %cst_68 = arith.constant 1.000000e+00 : f32
    %76 = vector.broadcast %cst_68 : f32 to vector<64x128xf32>
    %77 = arith.subf %75, %76 : vector<64x128xf32>
    %78 = arith.select %72, %70, %77 : vector<64x128xi1>, vector<64x128xf32>
    %c128 = arith.constant 128 : index
    %c0_69 = arith.constant 0 : index
    %79 = vector.load %arg5[%c128, %c0_69] : memref<144x64xbf16, #tpu.memory_space<vmem>>, vector<16x64xbf16>
    %80 = arith.truncf %78 : vector<64x128xf32> to vector<64x128xbf16>
    %cst_70 = arith.constant dense<0.000000e+00> : vector<16x128xf32>
    %81 = tpu.matmul %79, %80, %cst_70 {dimension_numbers = #tpu.dot_dimension_numbers<[1], [0], [0], [1], [0, 0, 1, 1], [], []>} : vector<16x64xbf16>, vector<64x128xbf16>, vector<16x128xf32> -> vector<16x128xf32>
    %c0_71 = arith.constant 0 : index
    %c2_72 = arith.constant 2 : index
    %82 = vector.load %arg6[%c0_71, %c2_72] : memref<64x3xf32, #tpu.memory_space<vmem>>, vector<16x1xf32>
    %83 = vector.broadcast %82 : vector<16x1xf32> to vector<16x128xf32>
    %84 = arith.addf %81, %83 : vector<16x128xf32>
    %cst_73 = arith.constant 0.000000e+00 : f32
    %85 = vector.broadcast %cst_73 : f32 to vector<16x128xf32>
    %86 = arith.cmpf ogt, %84, %85 : vector<16x128xf32>
    %cst_74 = arith.constant 0.000000e+00 : f32
    %87 = vector.broadcast %cst_74 : f32 to vector<16x128xf32>
    %88 = arith.minimumf %84, %87 : vector<16x128xf32>
    %89 = math.exp %88 : vector<16x128xf32>
    %cst_75 = arith.constant 1.000000e+00 : f32
    %90 = vector.broadcast %cst_75 : f32 to vector<16x128xf32>
    %91 = arith.subf %89, %90 : vector<16x128xf32>
    %92 = arith.select %86, %84, %91 : vector<16x128xi1>, vector<16x128xf32>
    %c0_76 = arith.constant 0 : index
    %c0_77 = arith.constant 0 : index
    %93 = vector.load %arg4[%c0_76, %c0_77] : memref<16x128xf32, #tpu.memory_space<vmem>>, vector<16x128xf32>
    %94 = tpu.concatenate %92, %93 in 0 : vector<16x128xf32>, vector<16x128xf32> -> vector<32x128xf32>
    %c0_78 = arith.constant 0 : index
    %c0_79 = arith.constant 0 : index
    %c0_80 = arith.constant 0 : index
    %95 = vector.load %arg7[%c0_78, %c0_79, %c0_80] : memref<1x32x128xf32, #tpu.memory_space<vmem>>, vector<1x32x128xf32>
    %96 = vector.shape_cast %95 : vector<1x32x128xf32> to vector<32x128xf32>
    %97 = vector.shape_cast %94 : vector<32x128xf32> to vector<1x32x128xf32>
    tpu.vector_store %arg7[%c0_78, %c0_79, %c0_80], %97 {strides = array<i32>} : memref<1x32x128xf32, #tpu.memory_space<vmem>>, vector<1x32x128xf32>,
    return
  }
  func.func @transform_0(%arg0: i32, %arg1: i32) -> (i32, i32, i32, i32) {
    %c0_i32 = arith.constant 0 : i32
    %c0_i32_0 = arith.constant 0 : i32
    %c0_i32_1 = arith.constant 0 : i32
    return %arg0, %c0_i32, %c0_i32_0, %arg1 : i32, i32, i32, i32
  }
  func.func @transform_1(%arg0: i32, %arg1: i32) -> (i32, i32, i32, i32) {
    %c0_i32 = arith.constant 0 : i32
    %c0_i32_0 = arith.constant 0 : i32
    %c0_i32_1 = arith.constant 0 : i32
    return %arg0, %c0_i32, %c0_i32_0, %arg1 : i32, i32, i32, i32
  }
  func.func @transform_2(%arg0: i32, %arg1: i32) -> (i32, i32) {
    %c0_i32 = arith.constant 0 : i32
    %c0_i32_0 = arith.constant 0 : i32
    return %c0_i32, %arg1 : i32, i32
  }
  func.func @transform_3(%arg0: i32, %arg1: i32) -> (i32, i32) {
    %c0_i32 = arith.constant 0 : i32
    %c0_i32_0 = arith.constant 0 : i32
    %c0_i32_1 = arith.constant 0 : i32
    return %c0_i32, %c0_i32_0 : i32, i32
  }
  func.func @transform_4(%arg0: i32, %arg1: i32) -> (i32, i32) {
    %c0_i32 = arith.constant 0 : i32
    %c0_i32_0 = arith.constant 0 : i32
    %c0_i32_1 = arith.constant 0 : i32
    return %c0_i32, %c0_i32_0 : i32, i32
  }
  func.func @transform_5(%arg0: i32, %arg1: i32) -> (i32, i32, i32) {
    %c0_i32 = arith.constant 0 : i32
    %c0_i32_0 = arith.constant 0 : i32
    return %arg0, %c0_i32, %arg1 : i32, i32, i32
  }
}

module attributes {stable_mosaic.version = 11 : i64} {
  func.func @_attn_sigma_kernel(%arg0: i32, %arg1: memref<8x8x32xf32, #tpu.memory_space<vmem>>, %arg2: memref<240x96xbf16, #tpu.memory_space<vmem>>, %arg3: memref<6x32xf32, #tpu.memory_space<vmem>>, %arg4: memref<64x1xf32, #tpu.memory_space<vmem>>) attributes {dimension_semantics = [#tpu.dimension_semantics<parallel>], iteration_bounds = array<i64: 1>, scalar_prefetch = 0 : i64, scratch_operands = 0 : i64, tpu.core_type = #tpu.core_type<tc>, window_params = [{transform_indices = @transform_0, window_bounds = array<i64: 8, 8, 32>}, {pipeline_mode = #tpu.pipeline_mode<synchronous>, transform_indices = @transform_1, window_bounds = array<i64: 240, 96>}, {pipeline_mode = #tpu.pipeline_mode<synchronous>, transform_indices = @transform_2, window_bounds = array<i64: 6, 32>}, {transform_indices = @transform_3, window_bounds = array<i64: 64, 1>}]} {
    %c0 = arith.constant 0 : index
    %c0_0 = arith.constant 0 : index
    %c0_1 = arith.constant 0 : index
    %0 = vector.load %arg1[%c0, %c0_0, %c0_1] : memref<8x8x32xf32, #tpu.memory_space<vmem>>, vector<8x8x32xf32>
    %1 = vector.shape_cast %0 : vector<8x8x32xf32> to vector<64x32xf32>
    %2 = arith.truncf %1 : vector<64x32xf32> to vector<64x32xbf16>
    %c0_2 = arith.constant 0 : index
    %c0_3 = arith.constant 0 : index
    %3 = vector.load %arg2[%c0_2, %c0_3] : memref<240x96xbf16, #tpu.memory_space<vmem>>, vector<32x96xbf16>
    %cst = arith.constant dense<0.000000e+00> : vector<64x96xf32>
    %4 = tpu.matmul %2, %3, %cst {dimension_numbers = #tpu.dot_dimension_numbers<[1], [0], [0], [1], [0, 0, 1, 1], [], []>} : vector<64x32xbf16>, vector<32x96xbf16>, vector<64x96xf32> -> vector<64x96xf32>
    %5 = vector.extract_strided_slice %4 {offsets = [0, 0], sizes = [64, 32], strides = [1, 1]} : vector<64x96xf32> to vector<64x32xf32>
    %cst_4 = arith.constant 0.000000e+00 : f32
    %6 = vector.broadcast %cst_4 : f32 to vector<64x32xf32>
    %7 = arith.cmpf ogt, %5, %6 : vector<64x32xf32>
    %cst_5 = arith.constant 0.000000e+00 : f32
    %8 = vector.broadcast %cst_5 : f32 to vector<64x32xf32>
    %9 = arith.minimumf %5, %8 : vector<64x32xf32>
    %10 = math.exp %9 : vector<64x32xf32>
    %cst_6 = arith.constant 1.000000e+00 : f32
    %11 = vector.broadcast %cst_6 : f32 to vector<64x32xf32>
    %12 = arith.subf %10, %11 : vector<64x32xf32>
    %13 = arith.select %7, %5, %12 : vector<64x32xi1>, vector<64x32xf32>
    %cst_7 = arith.constant 1.000000e+00 : f32
    %14 = vector.broadcast %cst_7 : f32 to vector<64x32xf32>
    %15 = arith.addf %13, %14 : vector<64x32xf32>
    %16 = vector.extract_strided_slice %4 {offsets = [0, 32], sizes = [64, 32], strides = [1, 1]} : vector<64x96xf32> to vector<64x32xf32>
    %cst_8 = arith.constant 0.000000e+00 : f32
    %17 = vector.broadcast %cst_8 : f32 to vector<64x32xf32>
    %18 = arith.cmpf ogt, %16, %17 : vector<64x32xf32>
    %cst_9 = arith.constant 0.000000e+00 : f32
    %19 = vector.broadcast %cst_9 : f32 to vector<64x32xf32>
    %20 = arith.minimumf %16, %19 : vector<64x32xf32>
    %21 = math.exp %20 : vector<64x32xf32>
    %cst_10 = arith.constant 1.000000e+00 : f32
    %22 = vector.broadcast %cst_10 : f32 to vector<64x32xf32>
    %23 = arith.subf %21, %22 : vector<64x32xf32>
    %24 = arith.select %18, %16, %23 : vector<64x32xi1>, vector<64x32xf32>
    %cst_11 = arith.constant 1.000000e+00 : f32
    %25 = vector.broadcast %cst_11 : f32 to vector<64x32xf32>
    %26 = arith.addf %24, %25 : vector<64x32xf32>
    %27 = vector.extract_strided_slice %4 {offsets = [0, 64], sizes = [64, 32], strides = [1, 1]} : vector<64x96xf32> to vector<64x32xf32>
    %28 = vector.shape_cast %15 : vector<64x32xf32> to vector<8x8x32xf32>
    %29 = vector.shape_cast %26 : vector<64x32xf32> to vector<8x8x32xf32>
    %30 = vector.shape_cast %27 : vector<64x32xf32> to vector<8x8x32xf32>
    %31 = vector.extract_strided_slice %28 {offsets = [0, 0, 0], sizes = [8, 8, 8], strides = [1, 1, 1]} : vector<8x8x32xf32> to vector<8x8x8xf32>
    %32 = arith.truncf %31 : vector<8x8x8xf32> to vector<8x8x8xbf16>
    %33 = vector.extract_strided_slice %29 {offsets = [0, 0, 0], sizes = [8, 8, 8], strides = [1, 1, 1]} : vector<8x8x32xf32> to vector<8x8x8xf32>
    %34 = arith.truncf %33 : vector<8x8x8xf32> to vector<8x8x8xbf16>
    "tpu.trace_start"() <{level = 10 : i32, message = "bld,bmd->blm"}> : () -> ()
    %cst_12 = arith.constant dense<0.000000e+00> : vector<8x8x8xf32>
    %35 = tpu.matmul %32, %34, %cst_12 {dimension_numbers = #tpu.dot_dimension_numbers<[2], [2], [1], [1], [0, 0, 0, 1, 1, 1], [0], [0]>} : vector<8x8x8xbf16>, vector<8x8x8xbf16>, vector<8x8x8xf32> -> vector<8x8x8xf32>
    "tpu.trace_stop"() : () -> ()
    %cst_13 = arith.constant dense<0.000000e+00> : vector<8x8xf32>
    %36 = vector.multi_reduction <add>, %35, %cst_13 [2] : vector<8x8x8xf32> to vector<8x8xf32>
    %37 = vector.shape_cast %36 : vector<8x8xf32> to vector<8x8x1xf32>
    %cst_14 = arith.constant 9.99999997E-7 : f32
    %38 = vector.broadcast %cst_14 : f32 to vector<8x8x1xf32>
    %39 = arith.addf %37, %38 : vector<8x8x1xf32>
    %40 = tpu.reciprocal %39 {approx = true} : vector<8x8x1xf32> -> vector<8x8x1xf32>
    %41 = arith.truncf %35 : vector<8x8x8xf32> to vector<8x8x8xbf16>
    %42 = vector.extract_strided_slice %30 {offsets = [0, 0, 0], sizes = [8, 8, 8], strides = [1, 1, 1]} : vector<8x8x32xf32> to vector<8x8x8xf32>
    %43 = arith.truncf %42 : vector<8x8x8xf32> to vector<8x8x8xbf16>
    "tpu.trace_start"() <{level = 10 : i32, message = "blm,bmv->blv"}> : () -> ()
    %cst_15 = arith.constant dense<0.000000e+00> : vector<8x8x8xf32>
    %44 = tpu.matmul %41, %43, %cst_15 {dimension_numbers = #tpu.dot_dimension_numbers<[2], [1], [1], [2], [0, 0, 0, 1, 1, 2], [0], [0]>} : vector<8x8x8xbf16>, vector<8x8x8xbf16>, vector<8x8x8xf32> -> vector<8x8x8xf32>
    "tpu.trace_stop"() : () -> ()
    %45 = vector.broadcast %40 : vector<8x8x1xf32> to vector<8x8x8xf32>
    %46 = arith.mulf %44, %45 : vector<8x8x8xf32>
    %47 = vector.extract_strided_slice %28 {offsets = [0, 0, 8], sizes = [8, 8, 8], strides = [1, 1, 1]} : vector<8x8x32xf32> to vector<8x8x8xf32>
    %48 = arith.truncf %47 : vector<8x8x8xf32> to vector<8x8x8xbf16>
    %49 = vector.extract_strided_slice %29 {offsets = [0, 0, 8], sizes = [8, 8, 8], strides = [1, 1, 1]} : vector<8x8x32xf32> to vector<8x8x8xf32>
    %50 = arith.truncf %49 : vector<8x8x8xf32> to vector<8x8x8xbf16>
    "tpu.trace_start"() <{level = 10 : i32, message = "bld,bmd->blm"}> : () -> ()
    %cst_16 = arith.constant dense<0.000000e+00> : vector<8x8x8xf32>
    %51 = tpu.matmul %48, %50, %cst_16 {dimension_numbers = #tpu.dot_dimension_numbers<[2], [2], [1], [1], [0, 0, 0, 1, 1, 1], [0], [0]>} : vector<8x8x8xbf16>, vector<8x8x8xbf16>, vector<8x8x8xf32> -> vector<8x8x8xf32>
    "tpu.trace_stop"() : () -> ()
    %cst_17 = arith.constant dense<0.000000e+00> : vector<8x8xf32>
    %52 = vector.multi_reduction <add>, %51, %cst_17 [2] : vector<8x8x8xf32> to vector<8x8xf32>
    %53 = vector.shape_cast %52 : vector<8x8xf32> to vector<8x8x1xf32>
    %cst_18 = arith.constant 9.99999997E-7 : f32
    %54 = vector.broadcast %cst_18 : f32 to vector<8x8x1xf32>
    %55 = arith.addf %53, %54 : vector<8x8x1xf32>
    %56 = tpu.reciprocal %55 {approx = true} : vector<8x8x1xf32> -> vector<8x8x1xf32>
    %57 = arith.truncf %51 : vector<8x8x8xf32> to vector<8x8x8xbf16>
    %58 = vector.extract_strided_slice %30 {offsets = [0, 0, 8], sizes = [8, 8, 8], strides = [1, 1, 1]} : vector<8x8x32xf32> to vector<8x8x8xf32>
    %59 = arith.truncf %58 : vector<8x8x8xf32> to vector<8x8x8xbf16>
    "tpu.trace_start"() <{level = 10 : i32, message = "blm,bmv->blv"}> : () -> ()
    %cst_19 = arith.constant dense<0.000000e+00> : vector<8x8x8xf32>
    %60 = tpu.matmul %57, %59, %cst_19 {dimension_numbers = #tpu.dot_dimension_numbers<[2], [1], [1], [2], [0, 0, 0, 1, 1, 2], [0], [0]>} : vector<8x8x8xbf16>, vector<8x8x8xbf16>, vector<8x8x8xf32> -> vector<8x8x8xf32>
    "tpu.trace_stop"() : () -> ()
    %61 = vector.broadcast %56 : vector<8x8x1xf32> to vector<8x8x8xf32>
    %62 = arith.mulf %60, %61 : vector<8x8x8xf32>
    %63 = vector.extract_strided_slice %28 {offsets = [0, 0, 16], sizes = [8, 8, 8], strides = [1, 1, 1]} : vector<8x8x32xf32> to vector<8x8x8xf32>
    %64 = arith.truncf %63 : vector<8x8x8xf32> to vector<8x8x8xbf16>
    %65 = vector.extract_strided_slice %29 {offsets = [0, 0, 16], sizes = [8, 8, 8], strides = [1, 1, 1]} : vector<8x8x32xf32> to vector<8x8x8xf32>
    %66 = arith.truncf %65 : vector<8x8x8xf32> to vector<8x8x8xbf16>
    "tpu.trace_start"() <{level = 10 : i32, message = "bld,bmd->blm"}> : () -> ()
    %cst_20 = arith.constant dense<0.000000e+00> : vector<8x8x8xf32>
    %67 = tpu.matmul %64, %66, %cst_20 {dimension_numbers = #tpu.dot_dimension_numbers<[2], [2], [1], [1], [0, 0, 0, 1, 1, 1], [0], [0]>} : vector<8x8x8xbf16>, vector<8x8x8xbf16>, vector<8x8x8xf32> -> vector<8x8x8xf32>
    "tpu.trace_stop"() : () -> ()
    %cst_21 = arith.constant dense<0.000000e+00> : vector<8x8xf32>
    %68 = vector.multi_reduction <add>, %67, %cst_21 [2] : vector<8x8x8xf32> to vector<8x8xf32>
    %69 = vector.shape_cast %68 : vector<8x8xf32> to vector<8x8x1xf32>
    %cst_22 = arith.constant 9.99999997E-7 : f32
    %70 = vector.broadcast %cst_22 : f32 to vector<8x8x1xf32>
    %71 = arith.addf %69, %70 : vector<8x8x1xf32>
    %72 = tpu.reciprocal %71 {approx = true} : vector<8x8x1xf32> -> vector<8x8x1xf32>
    %73 = arith.truncf %67 : vector<8x8x8xf32> to vector<8x8x8xbf16>
    %74 = vector.extract_strided_slice %30 {offsets = [0, 0, 16], sizes = [8, 8, 8], strides = [1, 1, 1]} : vector<8x8x32xf32> to vector<8x8x8xf32>
    %75 = arith.truncf %74 : vector<8x8x8xf32> to vector<8x8x8xbf16>
    "tpu.trace_start"() <{level = 10 : i32, message = "blm,bmv->blv"}> : () -> ()
    %cst_23 = arith.constant dense<0.000000e+00> : vector<8x8x8xf32>
    %76 = tpu.matmul %73, %75, %cst_23 {dimension_numbers = #tpu.dot_dimension_numbers<[2], [1], [1], [2], [0, 0, 0, 1, 1, 2], [0], [0]>} : vector<8x8x8xbf16>, vector<8x8x8xbf16>, vector<8x8x8xf32> -> vector<8x8x8xf32>
    "tpu.trace_stop"() : () -> ()
    %77 = vector.broadcast %72 : vector<8x8x1xf32> to vector<8x8x8xf32>
    %78 = arith.mulf %76, %77 : vector<8x8x8xf32>
    %79 = vector.extract_strided_slice %28 {offsets = [0, 0, 24], sizes = [8, 8, 8], strides = [1, 1, 1]} : vector<8x8x32xf32> to vector<8x8x8xf32>
    %80 = arith.truncf %79 : vector<8x8x8xf32> to vector<8x8x8xbf16>
    %81 = vector.extract_strided_slice %29 {offsets = [0, 0, 24], sizes = [8, 8, 8], strides = [1, 1, 1]} : vector<8x8x32xf32> to vector<8x8x8xf32>
    %82 = arith.truncf %81 : vector<8x8x8xf32> to vector<8x8x8xbf16>
    "tpu.trace_start"() <{level = 10 : i32, message = "bld,bmd->blm"}> : () -> ()
    %cst_24 = arith.constant dense<0.000000e+00> : vector<8x8x8xf32>
    %83 = tpu.matmul %80, %82, %cst_24 {dimension_numbers = #tpu.dot_dimension_numbers<[2], [2], [1], [1], [0, 0, 0, 1, 1, 1], [0], [0]>} : vector<8x8x8xbf16>, vector<8x8x8xbf16>, vector<8x8x8xf32> -> vector<8x8x8xf32>
    "tpu.trace_stop"() : () -> ()
    %cst_25 = arith.constant dense<0.000000e+00> : vector<8x8xf32>
    %84 = vector.multi_reduction <add>, %83, %cst_25 [2] : vector<8x8x8xf32> to vector<8x8xf32>
    %85 = vector.shape_cast %84 : vector<8x8xf32> to vector<8x8x1xf32>
    %cst_26 = arith.constant 9.99999997E-7 : f32
    %86 = vector.broadcast %cst_26 : f32 to vector<8x8x1xf32>
    %87 = arith.addf %85, %86 : vector<8x8x1xf32>
    %88 = tpu.reciprocal %87 {approx = true} : vector<8x8x1xf32> -> vector<8x8x1xf32>
    %89 = arith.truncf %83 : vector<8x8x8xf32> to vector<8x8x8xbf16>
    %90 = vector.extract_strided_slice %30 {offsets = [0, 0, 24], sizes = [8, 8, 8], strides = [1, 1, 1]} : vector<8x8x32xf32> to vector<8x8x8xf32>
    %91 = arith.truncf %90 : vector<8x8x8xf32> to vector<8x8x8xbf16>
    "tpu.trace_start"() <{level = 10 : i32, message = "blm,bmv->blv"}> : () -> ()
    %cst_27 = arith.constant dense<0.000000e+00> : vector<8x8x8xf32>
    %92 = tpu.matmul %89, %91, %cst_27 {dimension_numbers = #tpu.dot_dimension_numbers<[2], [1], [1], [2], [0, 0, 0, 1, 1, 2], [0], [0]>} : vector<8x8x8xbf16>, vector<8x8x8xbf16>, vector<8x8x8xf32> -> vector<8x8x8xf32>
    "tpu.trace_stop"() : () -> ()
    %93 = vector.broadcast %88 : vector<8x8x1xf32> to vector<8x8x8xf32>
    %94 = arith.mulf %92, %93 : vector<8x8x8xf32>
    %95 = tpu.concatenate %46, %62, %78, %94 in 2 : vector<8x8x8xf32>, vector<8x8x8xf32>, vector<8x8x8xf32>, vector<8x8x8xf32> -> vector<8x8x32xf32>
    %96 = vector.shape_cast %95 : vector<8x8x32xf32> to vector<64x32xf32>
    %97 = arith.truncf %96 : vector<64x32xf32> to vector<64x32xbf16>
    %c32 = arith.constant 32 : index
    %c0_28 = arith.constant 0 : index
    %98 = vector.load %arg2[%c32, %c0_28] : memref<240x96xbf16, #tpu.memory_space<vmem>>, vector<32x32xbf16>
    %cst_29 = arith.constant dense<0.000000e+00> : vector<64x32xf32>
    %99 = tpu.matmul %97, %98, %cst_29 {dimension_numbers = #tpu.dot_dimension_numbers<[1], [0], [0], [1], [0, 0, 1, 1], [], []>} : vector<64x32xbf16>, vector<32x32xbf16>, vector<64x32xf32> -> vector<64x32xf32>
    %c0_30 = arith.constant 0 : index
    %c0_31 = arith.constant 0 : index
    %100 = vector.load %arg3[%c0_30, %c0_31] : memref<6x32xf32, #tpu.memory_space<vmem>>, vector<1x32xf32>
    %c1 = arith.constant 1 : index
    %c0_32 = arith.constant 0 : index
    %101 = vector.load %arg3[%c1, %c0_32] : memref<6x32xf32, #tpu.memory_space<vmem>>, vector<1x32xf32>
    %cst_33 = arith.constant dense<0.000000e+00> : vector<64xf32>
    %102 = vector.multi_reduction <add>, %99, %cst_33 [1] : vector<64x32xf32> to vector<64xf32>
    %103 = vector.shape_cast %102 : vector<64xf32> to vector<64x1xf32>
    %cst_34 = arith.constant 3.200000e+01 : f32
    %104 = vector.broadcast %cst_34 : f32 to vector<64x1xf32>
    %105 = arith.divf %103, %104 : vector<64x1xf32>
    %106 = vector.broadcast %105 : vector<64x1xf32> to vector<64x32xf32>
    %107 = arith.subf %99, %106 : vector<64x32xf32>
    %108 = arith.mulf %107, %107 : vector<64x32xf32>
    %cst_35 = arith.constant dense<0.000000e+00> : vector<64xf32>
    %109 = vector.multi_reduction <add>, %108, %cst_35 [1] : vector<64x32xf32> to vector<64xf32>
    %110 = vector.shape_cast %109 : vector<64xf32> to vector<64x1xf32>
    %cst_36 = arith.constant 3.200000e+01 : f32
    %111 = vector.broadcast %cst_36 : f32 to vector<64x1xf32>
    %112 = arith.divf %110, %111 : vector<64x1xf32>
    %113 = vector.broadcast %105 : vector<64x1xf32> to vector<64x32xf32>
    %114 = arith.subf %99, %113 : vector<64x32xf32>
    %cst_37 = arith.constant 9.99999974E-6 : f32
    %115 = vector.broadcast %cst_37 : f32 to vector<64x1xf32>
    %116 = arith.addf %112, %115 : vector<64x1xf32>
    %117 = math.rsqrt %116 : vector<64x1xf32>
    %118 = vector.broadcast %117 : vector<64x1xf32> to vector<64x32xf32>
    %119 = arith.mulf %114, %118 : vector<64x32xf32>
    %120 = vector.broadcast %100 : vector<1x32xf32> to vector<64x32xf32>
    %121 = arith.mulf %119, %120 : vector<64x32xf32>
    %122 = vector.broadcast %101 : vector<1x32xf32> to vector<64x32xf32>
    %123 = arith.addf %121, %122 : vector<64x32xf32>
    %124 = arith.truncf %1 : vector<64x32xf32> to vector<64x32xbf16>
    %c64 = arith.constant 64 : index
    %c0_38 = arith.constant 0 : index
    %125 = vector.load %arg2[%c64, %c0_38] : memref<240x96xbf16, #tpu.memory_space<vmem>>, vector<32x64xbf16>
    %cst_39 = arith.constant dense<0.000000e+00> : vector<64x64xf32>
    %126 = tpu.matmul %124, %125, %cst_39 {dimension_numbers = #tpu.dot_dimension_numbers<[1], [0], [0], [1], [0, 0, 1, 1], [], []>} : vector<64x32xbf16>, vector<32x64xbf16>, vector<64x64xf32> -> vector<64x64xf32>
    %127 = arith.truncf %123 : vector<64x32xf32> to vector<64x32xbf16>
    %c96 = arith.constant 96 : index
    %c0_40 = arith.constant 0 : index
    %128 = vector.load %arg2[%c96, %c0_40] : memref<240x96xbf16, #tpu.memory_space<vmem>>, vector<32x64xbf16>
    %cst_41 = arith.constant dense<0.000000e+00> : vector<64x64xf32>
    %129 = tpu.matmul %127, %128, %cst_41 {dimension_numbers = #tpu.dot_dimension_numbers<[1], [0], [0], [1], [0, 0, 1, 1], [], []>} : vector<64x32xbf16>, vector<32x64xbf16>, vector<64x64xf32> -> vector<64x64xf32>
    %130 = arith.addf %126, %129 : vector<64x64xf32>
    %cst_42 = arith.constant 0.000000e+00 : f32
    %131 = vector.broadcast %cst_42 : f32 to vector<64x64xf32>
    %132 = arith.maximumf %130, %131 : vector<64x64xf32>
    %133 = arith.truncf %132 : vector<64x64xf32> to vector<64x64xbf16>
    %c128 = arith.constant 128 : index
    %c0_43 = arith.constant 0 : index
    %134 = vector.load %arg2[%c128, %c0_43] : memref<240x96xbf16, #tpu.memory_space<vmem>>, vector<64x32xbf16>
    %cst_44 = arith.constant dense<0.000000e+00> : vector<64x32xf32>
    %135 = tpu.matmul %133, %134, %cst_44 {dimension_numbers = #tpu.dot_dimension_numbers<[1], [0], [0], [1], [0, 0, 1, 1], [], []>} : vector<64x64xbf16>, vector<64x32xbf16>, vector<64x32xf32> -> vector<64x32xf32>
    %c2 = arith.constant 2 : index
    %c0_45 = arith.constant 0 : index
    %136 = vector.load %arg3[%c2, %c0_45] : memref<6x32xf32, #tpu.memory_space<vmem>>, vector<1x32xf32>
    %c3 = arith.constant 3 : index
    %c0_46 = arith.constant 0 : index
    %137 = vector.load %arg3[%c3, %c0_46] : memref<6x32xf32, #tpu.memory_space<vmem>>, vector<1x32xf32>
    %cst_47 = arith.constant dense<0.000000e+00> : vector<64xf32>
    %138 = vector.multi_reduction <add>, %135, %cst_47 [1] : vector<64x32xf32> to vector<64xf32>
    %139 = vector.shape_cast %138 : vector<64xf32> to vector<64x1xf32>
    %cst_48 = arith.constant 3.200000e+01 : f32
    %140 = vector.broadcast %cst_48 : f32 to vector<64x1xf32>
    %141 = arith.divf %139, %140 : vector<64x1xf32>
    %142 = vector.broadcast %141 : vector<64x1xf32> to vector<64x32xf32>
    %143 = arith.subf %135, %142 : vector<64x32xf32>
    %144 = arith.mulf %143, %143 : vector<64x32xf32>
    %cst_49 = arith.constant dense<0.000000e+00> : vector<64xf32>
    %145 = vector.multi_reduction <add>, %144, %cst_49 [1] : vector<64x32xf32> to vector<64xf32>
    %146 = vector.shape_cast %145 : vector<64xf32> to vector<64x1xf32>
    %cst_50 = arith.constant 3.200000e+01 : f32
    %147 = vector.broadcast %cst_50 : f32 to vector<64x1xf32>
    %148 = arith.divf %146, %147 : vector<64x1xf32>
    %149 = vector.broadcast %141 : vector<64x1xf32> to vector<64x32xf32>
    %150 = arith.subf %135, %149 : vector<64x32xf32>
    %cst_51 = arith.constant 9.99999974E-6 : f32
    %151 = vector.broadcast %cst_51 : f32 to vector<64x1xf32>
    %152 = arith.addf %148, %151 : vector<64x1xf32>
    %153 = math.rsqrt %152 : vector<64x1xf32>
    %154 = vector.broadcast %153 : vector<64x1xf32> to vector<64x32xf32>
    %155 = arith.mulf %150, %154 : vector<64x32xf32>
    %156 = vector.broadcast %136 : vector<1x32xf32> to vector<64x32xf32>
    %157 = arith.mulf %155, %156 : vector<64x32xf32>
    %158 = vector.broadcast %137 : vector<1x32xf32> to vector<64x32xf32>
    %159 = arith.addf %157, %158 : vector<64x32xf32>
    %160 = arith.addf %1, %159 : vector<64x32xf32>
    %161 = arith.truncf %160 : vector<64x32xf32> to vector<64x32xbf16>
    %c192 = arith.constant 192 : index
    %c0_52 = arith.constant 0 : index
    %162 = vector.load %arg2[%c192, %c0_52] : memref<240x96xbf16, #tpu.memory_space<vmem>>, vector<32x16xbf16>
    %cst_53 = arith.constant dense<0.000000e+00> : vector<64x16xf32>
    %163 = tpu.matmul %161, %162, %cst_53 {dimension_numbers = #tpu.dot_dimension_numbers<[1], [0], [0], [1], [0, 0, 1, 1], [], []>} : vector<64x32xbf16>, vector<32x16xbf16>, vector<64x16xf32> -> vector<64x16xf32>
    %c4 = arith.constant 4 : index
    %c0_54 = arith.constant 0 : index
    %164 = vector.load %arg3[%c4, %c0_54] : memref<6x32xf32, #tpu.memory_space<vmem>>, vector<1x16xf32>
    %165 = vector.broadcast %164 : vector<1x16xf32> to vector<64x16xf32>
    %166 = arith.addf %163, %165 : vector<64x16xf32>
    %cst_55 = arith.constant 0.000000e+00 : f32
    %167 = vector.broadcast %cst_55 : f32 to vector<64x16xf32>
    %168 = arith.cmpf ogt, %166, %167 : vector<64x16xf32>
    %cst_56 = arith.constant 0.000000e+00 : f32
    %169 = vector.broadcast %cst_56 : f32 to vector<64x16xf32>
    %170 = arith.minimumf %166, %169 : vector<64x16xf32>
    %171 = math.exp %170 : vector<64x16xf32>
    %cst_57 = arith.constant 1.000000e+00 : f32
    %172 = vector.broadcast %cst_57 : f32 to vector<64x16xf32>
    %173 = arith.subf %171, %172 : vector<64x16xf32>
    %174 = arith.select %168, %166, %173 : vector<64x16xi1>, vector<64x16xf32>
    %175 = arith.truncf %174 : vector<64x16xf32> to vector<64x16xbf16>
    %c224 = arith.constant 224 : index
    %c0_58 = arith.constant 0 : index
    %176 = vector.load %arg2[%c224, %c0_58] : memref<240x96xbf16, #tpu.memory_space<vmem>>, vector<16x1xbf16>
    %cst_59 = arith.constant dense<0.000000e+00> : vector<64x1xf32>
    %177 = tpu.matmul %175, %176, %cst_59 {dimension_numbers = #tpu.dot_dimension_numbers<[1], [0], [0], [1], [0, 0, 1, 1], [], []>} : vector<64x16xbf16>, vector<16x1xbf16>, vector<64x1xf32> -> vector<64x1xf32>
    %c5 = arith.constant 5 : index
    %c0_60 = arith.constant 0 : index
    %178 = vector.load %arg3[%c5, %c0_60] : memref<6x32xf32, #tpu.memory_space<vmem>>, vector<1x1xf32>
    %179 = vector.broadcast %178 : vector<1x1xf32> to vector<64x1xf32>
    %180 = arith.addf %177, %179 : vector<64x1xf32>
    %cst_61 = arith.constant 0.000000e+00 : f32
    %181 = vector.broadcast %cst_61 : f32 to vector<64x1xf32>
    %182 = arith.maximumf %180, %181 : vector<64x1xf32>
    %c0_62 = arith.constant 0 : index
    %c0_63 = arith.constant 0 : index
    %183 = vector.load %arg4[%c0_62, %c0_63] : memref<64x1xf32, #tpu.memory_space<vmem>>, vector<64x1xf32>
    tpu.vector_store %arg4[%c0_62, %c0_63], %182 {strides = array<i32>} : memref<64x1xf32, #tpu.memory_space<vmem>>, vector<64x1xf32>,
    return
  }
  func.func @transform_0(%arg0: i32) -> (i32, i32, i32) {
    %c0_i32 = arith.constant 0 : i32
    %c0_i32_0 = arith.constant 0 : i32
    %c0_i32_1 = arith.constant 0 : i32
    return %arg0, %c0_i32, %c0_i32_0 : i32, i32, i32
  }
  func.func @transform_1(%arg0: i32) -> (i32, i32) {
    %c0_i32 = arith.constant 0 : i32
    %c0_i32_0 = arith.constant 0 : i32
    %c0_i32_1 = arith.constant 0 : i32
    return %c0_i32, %c0_i32_0 : i32, i32
  }
  func.func @transform_2(%arg0: i32) -> (i32, i32) {
    %c0_i32 = arith.constant 0 : i32
    %c0_i32_0 = arith.constant 0 : i32
    %c0_i32_1 = arith.constant 0 : i32
    return %c0_i32, %c0_i32_0 : i32, i32
  }
  func.func @transform_3(%arg0: i32) -> (i32, i32) {
    %c0_i32 = arith.constant 0 : i32
    %c0_i32_0 = arith.constant 0 : i32
    return %arg0, %c0_i32 : i32, i32
  }
}

</mosaic_0001>

<bundles_post_ra>
// kernel: squeeze.19
= control target key start
LH: loop header
LB: loop body
LE: loop exit
PB: predicated region body
PF: predicated region fallthrough
CT: control target
= control target key end

     0   :  { %vm12_vm0 = vcmask 64512   ;;  %s99_s10 = smov 104   ;;  %s100_s11 = smov 112   ;;  %s143_s0 = inlined_call_operand.vmem [shape: f32[2,3,32], index: 0, kind: input, shape index: {}]   ;;  %s144_s1 = inlined_call_operand.vmem [shape: f32[2,3,4,8], index: 1, kind: output, shape index: {}]  }
   0x1   :  { %v89_v0 = vld [vmem:[%s143_s0 + $0x4] sm:$0xf]  ;;  %v9_v1 = vld [vmem:[%s143_s0] sm:$0xf]  ;;  %s98_s0 = smov 120  }
   0x2   :  { %8 = vst [vmem:[#allocation1 + $0x8] sm:$0xf] %v89_v0  ;;  %10 = vst [vmem:[#allocation1] sm:$0xf] %v9_v1 }
   0x9   :  { %v11_v2 = vld [vmem:[#allocation1] sm:$0x7]   ;;  %v15_v4 = vld [vmem:[#allocation1 + $0x8] sm:$0x7]  }
   0xa   :  { %v19_v3 = vld.sshfl [vmem:[#allocation1] sm:$0xff pattern:$0xaaa98210]   ;;  %13 = vst.msk [vmem:[#allocation0] ss:$8 sm:$0x7] %vm12_vm0, %v11_v2  }
   0xb   :  { %20 = vrot.lane.b32.xlu0 %v19_v3, %s98_s0  ;;  %36 = vrot.lane.b32.xlu1 %v19_v3, %s99_s10  ;;  %18 = vst.msk [vmem:[#allocation0 + $0x18] ss:$8 sm:$0x7] %vm12_vm0, %v15_v4  }
   0xf   :  { %28 = vrot.lane.b32.xlu0 %v19_v3, %s100_s11 }
  0x7d   :  { %v21_v5 = vpop.permute.xlu0 %20   ;;  %v37_v6 = vpop.permute.xlu1 %36  }
  0x7e   :  { %24 = vst.msk [vmem:[#allocation0 + $0x1] ss:$8 sm:$0xf] %vm12_vm0, %v21_v5   ;;  %26 = vst.msk [vmem:[#allocation0 + $0x1] ss:$8 sm:$0x30] %vm12_vm0, %v21_v5  }
  0x7f   :  { %40 = vst.msk [vmem:[#allocation0 + $0x3] ss:$8 sm:$0xf] %vm12_vm0, %v37_v6   ;;  %42 = vst.msk [vmem:[#allocation0 + $0x3] ss:$8 sm:$0x30] %vm12_vm0, %v37_v6  }
  0x81   :  { %v29_v7 = vpop.permute.xlu0 %28  }
  0x82   :  { %32 = vst.msk [vmem:[#allocation0 + $0x2] ss:$8 sm:$0xf] %vm12_vm0, %v29_v7   ;;  %34 = vst.msk [vmem:[#allocation0 + $0x2] ss:$8 sm:$0x30] %vm12_vm0, %v29_v7  }
  0x89   :  { %v47_v8 = vld [vmem:[#allocation0] sm:$0xf]  ;;  %v52_v9 = vld [vmem:[#allocation0 + $0x8] sm:$0xf]  ;;  %v58_v10 = vld [vmem:[#allocation0 + $0x10] sm:$0xf] }
  0x8a   :  { %50 = vst [vmem:[%s144_s1] sm:$0xf] %v47_v8  ;;  %90 = vst [vmem:[%s144_s1 + $0x4] sm:$0xf] %v52_v9  ;;  %v65_v11 = vld [vmem:[#allocation0 + $0x18] sm:$0xf] }
  0x8b   :  { %91 = vst [vmem:[%s144_s1 + $0x8] sm:$0xf] %v58_v10  ;;  %v72_v12 = vld [vmem:[#allocation0 + $0x20] sm:$0xf]  ;;  %v79_v13 = vld [vmem:[#allocation0 + $0x28] sm:$0xf] }
  0x8c   :  { %92 = vst [vmem:[%s144_s1 + $0xc] sm:$0xf] %v65_v11  ;;  %93 = vst [vmem:[%s144_s1 + $0x10] sm:$0xf] %v72_v12 }
  0x8d   :  { %94 = vst [vmem:[%s144_s1 + $0x14] sm:$0xf] %v79_v13 }

// kernel: ray_transformer_forward.4
= control target key start
LH: loop header
LB: loop body
LE: loop exit
PB: predicated region body
PF: predicated region fallthrough
CT: control target
= control target key end

     0   :  { %s1212_s18 = smov 0   ;;  %s1214_s19 = smov 0   ;;  %s1417_s0 = inlined_call_operand.vmem [shape: f32[2,3,34,128], index: 0, kind: input, shape index: {}]   ;;  %s1418_s1 = inlined_call_operand.vmem [shape: f32[2,3,1,128], index: 1, kind: input, shape index: {}]   ;;  %s1419_s2 = inlined_call_operand.vmem [shape: f32[16,128], index: 2, kind: input, shape index: {}]   ;;  %s1420_s3 = inlined_call_operand.vmem [shape: bf16[144,64], index: 3, kind: input, shape index: {}]   ;;  %s1421_s4 = inlined_call_operand.vmem [shape: f32[64,3], index: 4, kind: input, shape index: {}]   ;;  %s1422_s5 = inlined_call_operand.vmem [shape: f32[2,32,128], index: 5, kind: output, shape index: {}]  }
   0x1   :  { %s1216_s20 = smov 0  }
   0x2 LB: > { %s27_s21 = sadd.s32 1, %s1171_s19  ;;  %p984_p0 = scmp.ge.s32.totalorder %s1175_s20, 1  ;;  %s1175_s20 = sphi %s1216_s20, %s15_s20   ;;  %s1171_s19 = sphi %s1214_s19, %s1424_s19   ;;  %s1167_s18 = sphi %s1212_s18, %s1423_s18  }
   0x3   : > { %p29_p1 = scmp.ge.s32.totalorder %s27_s21, 2  ;;  %p229_p2 = scmp.lt.s32.totalorder %s1175_s20, 3 }
   0x5   : > { %s1426_s21 = smov (%p29_p1, %s27_s21), 0  ;;  %p230_p3 = pnand %p984_p0, %p229_p2 }
   0x6   : > { %p274_p4 = scmp.lt.s32.totalorder (!%p230_p3), %s1167_s18, 1 }
   0x7   : > { %233 = sbr.rel (%p230_p3) target bundleno = 519 (0x207), region = 40 }
   0xc   : > { %v308_v0 = vlaneseq  ;;  %vm446_vm0 = vcmask 261120   ;;  %v1124_v1 = vld [vmem:[%s1420_s3] sm:$0xff]   ;;  %s1428_s18 = smov (!%p274_p4, %s1167_s18), 1  ;;  %v1177_v4 = vmov 0   ;;  %v1178_v12 = vmov 1   ;;  %v627_v41 = vld [vmem:[%s1421_s4 + $0x30] sm:$0xff] }
   0xd   : > { %v1126_v3 = vld [vmem:[%s1420_s3 + $0x20] sm:$0xff]   ;;  %1113 = vset.pattern.permute.xlu1 %v1177_v4  ;;  %1062 = vmatprep.mubr.msk.bf16.mxu1 %vm446_vm0, %v1124_v1  ;;  %s1082_s26 = smul.u32 120, %s1428_s18  ;;  %v1297_v47 = vld [vmem:[%s1421_s4 + $0x28] sm:$0xff]  ;;  %v628_v1 = vld [vmem:[%s1421_s4 + $0x38] sm:$0xff]  ;;  %vm1180_vm1 = vmmov 0   ;;  %vm802_vm10 = vcmask 523264  }
   0xe   : > { %v309_v2 = vshrl.u32 %v308_v0, 7  ;;  %1050 = vmatprep.mubr.msk.bf16.mxu0 %vm446_vm0, %v1126_v3  ;;  %s1083_s27 = smul.u32 3, %s1428_s18  ;;  %1114 = vset.pattern.permute.xlu0 %v1178_v12  ;;  %v1284_v38 = vld [vmem:[%s1421_s4 + $0x20] sm:$0xff]  ;;  %s1028_s22 = sshll.u32 %s1428_s18, 5 }
   0xf   : > { %s281_s30 = scalar_lea.vmem %s1417_s0, %s1082_s26  ;;  %657 = vperm.xlu1 %1113, %v1284_v38   ;;  %716 = vperm.xlu0 %1114, %v627_v41   ;;  %s300_s25 = scalar_lea.vmem %s1422_s5, %s1028_s22 }
  0x10   : > { %v1243_v5 = vsub.s32 0, %v309_v2  ;;  %s288_s8 = scalar_lea.vmem %s1418_s1, %s1083_s27  ;;  %v305_v6 = vld [vmem:[%s281_s30 + $0x10] sm:$0xff]  ;;  %v306_v7 = vld [vmem:[%s281_s30 + $0x18] sm:$0xff]  ;;  %v992_v11 = vld [vmem:[%s281_s30 + $0x40] sm:$0xff] }
  0x11   : > { %v991_v8 = vld [vmem:[%s281_s30 + $0x38] sm:$0xff]  ;;  %v302_v9 = vld [vmem:[%s288_s8] sm:$0x1]  ;;  %v988_v10 = vld [vmem:[%s288_s8 + $0x1] sm:$0x1] }
  0x12   : > { %v1253_v13 = vrot.slane %v302_v9, %v1243_v5  ;;  %v1256_v14 = vrot.slane %v988_v10, %v1243_v5  ;;  %v993_v15 = vld [vmem:[%s288_s8 + $0x2] sm:$0x1]  ;;  %v997_v17 = vld [vmem:[%s281_s30 + $0x68] sm:$0xff]  ;;  %v403_v18 = vadd.f32 %v988_v10, %v302_v9  ;;  %v1267_v27 = vld [vmem:[%s281_s30 + $0x30] sm:$0xff] }
  0x13   : > { %v996_v16 = vld [vmem:[%s281_s30 + $0x60] sm:$0xff]  ;;  %v1259_v19 = vrot.slane %v993_v15, %v1243_v5  ;;  %v304_v21 = vld [vmem:[%s281_s30 + $0x8] sm:$0xff]  ;;  %v1269_v28 = vld [vmem:[%s281_s30 + $0x50] sm:$0xff]  ;;  %662 = vperm.xlu1 %1113, %v1297_v47   ;;  %1115 = vset.pattern.permute.xlu0 %v1177_v4 }
  0x14   : > { %v303_v20 = vld [vmem:[%s281_s30] sm:$0xff]  ;;  %v1261_v22 = vld [vmem:[%s281_s30 + $0x28] sm:$0xff]  ;;  %v315_v23 = vmul.f32 %v1253_v13, %v305_v6  ;;  %v316_v24 = vmul.f32 %v1253_v13, %v306_v7  ;;  %v332_v25 = vmul.f32 %v991_v8, %v1256_v14  ;;  %v333_v26 = vmul.f32 %v992_v11, %v1256_v14  ;;  %v1271_v29 = vld [vmem:[%s281_s30 + $0x58] sm:$0xff]  ;;  %667 = vperm.xlu0 %1115, %v627_v41  }
  0x15   : > { %v353_v30 = vmul.f32 %v996_v16, %v1259_v19  ;;  %v354_v31 = vmul.f32 %v997_v17, %v1259_v19  ;;  %v313_v32 = vmul.f32 %v1253_v13, %v303_v20  ;;  %v314_v33 = vmul.f32 %v1253_v13, %v304_v21 }
  0x16   : > { %v336_v34 = vadd.f32 %v332_v25, %v315_v23  ;;  %v337_v35 = vadd.f32 %v333_v26, %v316_v24  ;;  %v330_v36 = vmul.f32 %v1261_v22, %v1256_v14  ;;  %v331_v37 = vmul.f32 %v1267_v27, %v1256_v14  ;;  %v1128_v26 = vld [vmem:[%s1420_s3 + $0x10] sm:$0xff]  }
  0x17   : > { %v351_v39 = vmul.f32 %v1269_v28, %v1259_v19  ;;  %v352_v40 = vmul.f32 %v1271_v29, %v1259_v19  ;;  %v404_v42 = vadd.f32 %v993_v15, %v403_v18  ;;  %1116 = vset.pattern.permute.xlu1 %v1178_v12 }
  0x18   : > { %v357_v43 = vadd.f32 %v353_v30, %v336_v34  ;;  %v358_v44 = vadd.f32 %v354_v31, %v337_v35  ;;  %v334_v45 = vadd.f32 %v330_v36, %v313_v32  ;;  %v335_v46 = vadd.f32 %v331_v37, %v314_v33  ;;  %720 = vperm.xlu1 %1116, %v628_v1  }
  0x19   : > { %v405_v48 = vmul.f32 0.33333334, %v404_v42  ;;  %672 = vperm.xlu0 %1115, %v628_v1  }
  0x1a   : > { %v415_v49 = vpack.c.bf16 %v358_v44, %v357_v43  ;;  %v355_v50 = vadd.f32 %v351_v39, %v334_v45  ;;  %v356_v51 = vadd.f32 %v352_v40, %v335_v46  ;;  %v361_v52 = vsub.f32 %v305_v6, %v357_v43  ;;  %v1127_v46 = vld [vmem:[%s1420_s3 + $0x28] sm:$0xff]  }
  0x1b   : > { %v362_v53 = vsub.f32 %v306_v7, %v358_v44  ;;  %v373_v54 = vsub.f32 %v991_v8, %v357_v43  ;;  %v374_v55 = vsub.f32 %v992_v11, %v358_v44  ;;  %v389_v56 = vsub.f32 %v996_v16, %v357_v43  ;;  %v1125_v16 = vld [vmem:[%s1420_s3 + $0x8] sm:$0xff]   ;;  %v1129_v43 = vld [vmem:[%s1420_s3 + $0x18] sm:$0xff]  }
  0x1c   : > { %1058 = vmatprep.subr.bf16.mxu1 %v415_v49  ;;  %v414_v57 = vpack.c.bf16 %v356_v51, %v355_v50  ;;  %v365_v58 = vmul.f32 %v361_v52, %v361_v52  ;;  %v390_v59 = vsub.f32 %v997_v17, %v358_v44  ;;  %v359_v60 = vsub.f32 %v303_v20, %v355_v50 }
  0x1d   : > { %1059 = vmatpush3.bf16.msra.mxu1 %v415_v49  ;;  %v366_v61 = vmul.f32 %v362_v53, %v362_v53  ;;  %v377_v62 = vmul.f32 %v373_v54, %v373_v54  ;;  %v378_v63 = vmul.f32 %v374_v55, %v374_v55  ;;  %v393_v0 = vmul.f32 %v389_v56, %v389_v56  ;;  %v1131_v49 = vld [vmem:[%s1420_s3 + $0x38] sm:$0xff]  }
  0x1e   : > { %1060 = vmatprep.subr.bf16.mxu1 %v414_v57  ;;  %v369_v2 = vmul.f32 %v365_v58, %v1253_v13  ;;  %v394_v3 = vmul.f32 %v390_v59, %v390_v59  ;;  %v360_v6 = vsub.f32 %v304_v21, %v356_v51  ;;  %v363_v7 = vmul.f32 %v359_v60, %v359_v60 }
  0x1f   : > { %v370_v8 = vmul.f32 %v366_v61, %v1253_v13  ;;  %v381_v9 = vmul.f32 %v377_v62, %v1256_v14  ;;  %v382_v10 = vmul.f32 %v378_v63, %v1256_v14  ;;  %v397_v11 = vmul.f32 %v393_v0, %v1259_v19  ;;  %1117 = vset.pattern.permute.xlu1 %v1177_v4 }
  0x20   : > { %v398_v15 = vmul.f32 %v394_v3, %v1259_v19  ;;  %v364_v17 = vmul.f32 %v360_v6, %v360_v6  ;;  %v367_v18 = vmul.f32 %v363_v7, %v1253_v13  ;;  %v371_v20 = vsub.f32 %v1261_v22, %v355_v50  ;;  %v623_v22 = vld [vmem:[%s1421_s4 + $0x10] sm:$0xff] }
  0x21   : > { %1061 = vmatpush3.bf16.msra.mxu1 %v414_v57  ;;  %v385_v21 = vadd.f32 %v381_v9, %v369_v2  ;;  %v386_v23 = vadd.f32 %v382_v10, %v370_v8  ;;  %v372_v24 = vsub.f32 %v1267_v27, %v356_v51  ;;  %v387_v25 = vsub.f32 %v1269_v28, %v355_v50 }
  0x22   : > { %v368_v30 = vmul.f32 %v364_v17, %v1253_v13  ;;  %v375_v31 = vmul.f32 %v371_v20, %v371_v20  ;;  %v388_v32 = vsub.f32 %v1271_v29, %v356_v51  ;;  %v1327_v33 = vrot.slane %v405_v48, %v1243_v5  ;;  %647 = vperm.xlu1 %1117, %v623_v22   ;;  %v1130_v48 = vld [vmem:[%s1420_s3 + $0x30] sm:$0xff]  }
  0x23   : > { %v401_v27 = vadd.f32 %v397_v11, %v385_v21  ;;  %v402_v28 = vadd.f32 %v398_v15, %v386_v23  ;;  %v376_v34 = vmul.f32 %v372_v24, %v372_v24  ;;  %v391_v35 = vmul.f32 %v387_v25, %v387_v25 }
  0x24   : > { %1063 = vmatmul.mubr.msk.bf16.vlgmr.msra.gmra.mxu1 %vm446_vm0, %v1125_v16  ;;  %v379_v13 = vmul.f32 %v375_v31, %v1256_v14  ;;  %v392_v36 = vmul.f32 %v388_v32, %v388_v32 }
  0x25   : > { %v425_v29 = vpack.c.bf16 %v402_v28, %v401_v27  ;;  %v380_v37 = vmul.f32 %v376_v34, %v1256_v14  ;;  %v395_v39 = vmul.f32 %v391_v35, %v1259_v19  ;;  %1066 = vmatprep.mubr.msk.bf16.mxu1 %vm446_vm0, %v1128_v26  ;;  %v624_v14 = vld [vmem:[%s1421_s4 + $0x18] sm:$0xff] }
  0x26   : > { %v383_v5 = vadd.f32 %v379_v13, %v367_v18  ;;  %v396_v40 = vmul.f32 %v392_v36, %v1259_v19  ;;  %1118 = vset.pattern.permute.xlu1 %v1178_v12  ;;  %652 = vperm.xlu0 %1115, %v624_v14   ;;  %v621_v19 = vld [vmem:[%s1421_s4] sm:$0xff] }
  0x27   : > { %1046 = vmatprep.subr.bf16.mxu0 %v425_v29  ;;  %v384_v41 = vadd.f32 %v380_v37, %v368_v30  ;;  %708 = vperm.xlu1 %1118, %v1284_v38   ;;  %v622_v38 = vld [vmem:[%s1421_s4 + $0x8] sm:$0xff] }
  0x28   : > { %1047 = vmatpush3.bf16.msra.mxu0 %v425_v29  ;;  %v399_v42 = vadd.f32 %v395_v39, %v383_v5 }
  0x29   : > { %v400_v44 = vadd.f32 %v396_v40, %v384_v41 }
  0x2a   : > { %637 = vperm.xlu0 %1115, %v621_v19  }
  0x2b   : > { %v424_v45 = vpack.c.bf16 %v400_v44, %v399_v42  ;;  %712 = vperm.xlu1 %1118, %v1297_v47   ;;  %v1179_v47 = vmov 0.0  }
  0x2c   : > { %1067 = vmatmul.mubr.msk.bf16.gmra.mxu1 %vm446_vm0, %v1129_v43 }
  0x2d   : > { %1048 = vmatprep.subr.bf16.mxu0 %v424_v45 }
  0x2e   : > { %1049 = vmatpush3.bf16.msra.mxu0 %v424_v45  ;;  %1120 = vset.pattern.permute.xlu0 %v1178_v12 }
  0x2f   : > { %1119 = vset.pattern.permute.xlu1 %v1177_v4  ;;  %700 = vperm.xlu0 %1120, %v623_v22   ;;  %v1181_v4 = vmov 2  }
  0x30   : > { %642 = vperm.xlu1 %1119, %v622_v38   ;;  %1070 = vmatprep.subr.bf16.mxu0 %v1179_v47 }
  0x31   : > { %1051 = vmatmul.mubr.msk.bf16.vlgmr.msra.gmra.mxu0 %vm446_vm0, %v1127_v46 }
  0x32   : > { %1054 = vmatprep.mubr.msk.bf16.mxu0 %vm446_vm0, %v1130_v48 }
  0x33   : > { %696 = vperm.xlu0 %1120, %v622_v38  }
  0x34   : > { %1121 = vset.pattern.permute.xlu1 %v1178_v12 }
  0x35   : > { %704 = vperm.xlu1 %1121, %v624_v14  }
  0x37   : > { %1123 = vset.pattern.permute.xlu0 %v1181_v4 }
  0x38   : > { %794 = vperm.xlu0 %1123, %v622_v38  }
  0x39   : > { %1055 = vmatmul.mubr.msk.bf16.gmra.mxu0 %vm446_vm0, %v1131_v49  ;;  %692 = vperm.xlu1 %1121, %v621_v19  }
  0x3a   : > { %1078 = vmatprep.mubr.msk.bf16.mxu0 %vm1180_vm1, %v1179_v47 }
  0x3d   : > { %1122 = vset.pattern.permute.xlu1 %v1181_v4 }
  0x3e   : > { %789 = vperm.xlu1 %1122, %v621_v19  }
  0x8a   : > { %v658_v50 = vpop.permute.xlu1 %657  ;;  %v717_v12 = vpop.permute.xlu0 %716 }
  0x8b   : > { %v679_v27 = vmul.f32 %v658_v50, %v1327_v33 }
  0x8e   : > { %v663_v51 = vpop.permute.xlu1 %662 }
  0x8f   : > { %v668_v54 = vpop.permute.xlu0 %667  ;;  %v680_v5 = vmul.f32 %v663_v51, %v1327_v33 }
  0x90   : > { %v681_v16 = vmul.f32 %v668_v54, %v1327_v33 }
  0x93   : > { %v721_v52 = vpop.permute.xlu1 %720 }
  0x94   : > { %v673_v58 = vpop.permute.xlu0 %672 }
  0x95   : > { %v682_v36 = vmul.f32 %v673_v58, %v1327_v33 }
  0x9d   : > { %v648_v53 = vpop.permute.xlu1 %647 }
  0x9e   : > { %v677_v11 = vmul.f32 %v648_v53, %v1327_v33 }
  0xa1   : > { %v653_v61 = vpop.permute.xlu0 %652 }
  0xa2   : > { %v709_v57 = vpop.permute.xlu1 %708  ;;  %v678_v6 = vmul.f32 %v653_v61, %v1327_v33 }
  0xa5   : > { %v638_v3 = vpop.permute.xlu0 %637 }
  0xa6   : > { %v713_v60 = vpop.permute.xlu1 %712  ;;  %v675_v31 = vmul.f32 %v638_v3, %v1327_v33 }
  0xaa   : > { %v701_v23 = vpop.permute.xlu0 %700 }
  0xab   : > { %v643_v2 = vpop.permute.xlu1 %642 }
  0xac   : > { %v676_v20 = vmul.f32 %v643_v2, %v1327_v33 }
  0xae   : > { %v697_v29 = vpop.permute.xlu0 %696 }
  0xb0   : > { %v705_v21 = vpop.permute.xlu1 %704 }
  0xb4   : > { %v693_v48 = vpop.permute.xlu1 %692 }
  0xe4   : > { %v1064_v55 = vpop.f32.mrf.mxu1 }
  0xe6   : > { %v590_v56 = vpop.f32.mrf.mxu1 }
  0xe8   : > { %v1065_v59 = vpop.f32.mrf.mxu1 }
  0xea   : > { %v593_v62 = vpop.f32.mrf.mxu1 }
  0xec   : > { %v1068_v1 = vpop.f32.mrf.mxu1 }
  0xee   : > { %v606_v9 = vpop.f32.mrf.mxu1 }
  0xf0   : > { %v1069_v25 = vpop.f32.mrf.mxu1 }
  0xf1   : > { %v1052_v63 = vpop.f32.mrf.mxu0 }
  0xf2   : > { %v599_v15 = vadd.f32 %v1064_v55, %v1052_v63  ;;  %v609_v41 = vpop.f32.mrf.mxu1 }
  0xf3   : > { %v493_v0 = vpop.f32.mrf.mxu0 }
  0xf4   : > { %v591_v32 = vadd.f32 %v590_v56, %v493_v0  ;;  %v685_v22 = vadd.f32 %v677_v11, %v599_v15 }
  0xf5   : > { %v1053_v7 = vpop.f32.mrf.mxu0 }
  0xf6   : > { %v602_v8 = vadd.f32 %v1065_v59, %v1053_v7  ;;  %v1379_v14 = vadd.f32 %v701_v23, %v685_v22  ;;  %v683_v44 = vadd.f32 %v675_v31, %v591_v32 }
  0xf7   : > { %v496_v10 = vpop.f32.mrf.mxu0 }
  0xf8   : > { %v686_v17 = vadd.f32 %v678_v6, %v602_v8  ;;  %v594_v24 = vadd.f32 %v593_v62, %v496_v10  ;;  %v741_v51 = vmin.f32 %v1379_v14, 0.0  ;;  %vm733_vm7 = vcmp.gt.f32.partialorder %v1379_v14, 0.0 }
  0xf9   : > { %v1056_v18 = vpop.f32.mrf.mxu0 }
  0xfa   : > { %v615_v26 = vadd.f32 %v1068_v1, %v1056_v18  ;;  %v1375_v28 = vadd.f32 %v705_v21, %v686_v17  ;;  %v684_v37 = vadd.f32 %v676_v20, %v594_v24 }
  0xfb   : > { %v509_v30 = vpop.f32.mrf.mxu0 }
  0xfc   : > { %v689_v34 = vadd.f32 %v681_v16, %v615_v26  ;;  %v607_v35 = vadd.f32 %v606_v9, %v509_v30  ;;  %v742_v46 = vmin.f32 %v1375_v28, 0.0  ;;  %v1382_v4 = vadd.f32 %v697_v29, %v684_v37  ;;  %v1132_v29 = vld [vmem:[%s1420_s3 + $0x40] sm:$0xff]  }
  0xfd   : > { %v1057_v13 = vpop.f32.mrf.mxu0  ;;  %vm734_vm6 = vcmp.gt.f32.partialorder %v1375_v28, 0.0  ;;  %v859_v37 = vld [vmem:[%s1419_s2] sm:$0xff] }
  0xfe   : > { %v618_v39 = vadd.f32 %v1069_v25, %v1057_v13  ;;  %v729_v40 = vadd.f32 %v717_v12, %v689_v34  ;;  %v687_v42 = vadd.f32 %v679_v27, %v607_v35  ;;  %v723_v12 = vadd.f32 %v693_v48, %v683_v44  ;;  %863 = vst [vmem:[%s300_s25 + $0x10] sm:$0xff] %v859_v37 }
  0xff   : > { %v512_v43 = vpop.f32.mrf.mxu0  ;;  %v753_v58 = vmul.f32 1.442695, %v742_v46  ;;  %v740_v61 = vmin.f32 %v1382_v4, 0.0  ;;  %vm732_vm8 = vcmp.gt.f32.partialorder %v1382_v4, 0.0 }
 0x100   : > { %v690_v45 = vadd.f32 %v682_v36, %v618_v39  ;;  %v610_v19 = vadd.f32 %v609_v41, %v512_v43  ;;  %v745_v38 = vmin.f32 %v729_v40, 0.0  ;;  %v727_v49 = vadd.f32 %v709_v57, %v687_v42  ;;  %v790_v39 = vpop.permute.xlu1 %789  ;;  %v795_v42 = vpop.permute.xlu0 %794 }
 0x101   : > { %v751_v57 = vmul.f32 1.442695, %v741_v51  ;;  %v739_v0 = vmin.f32 %v723_v12, 0.0  ;;  %v749_v1 = vmul.f32 1.442695, %v740_v61  ;;  %vm737_vm2 = vcmp.gt.f32.partialorder %v729_v40, 0.0 }
 0x102   : > { %v730_v50 = vadd.f32 %v721_v52, %v690_v45  ;;  %v688_v53 = vadd.f32 %v680_v5, %v610_v19  ;;  %v759_v54 = vmul.f32 1.442695, %v745_v38  ;;  %v743_v33 = vmin.f32 %v727_v49, 0.0 }
 0x103   : > { %v747_v2 = vmul.f32 1.442695, %v739_v0  ;;  %vm735_vm5 = vcmp.gt.f32.partialorder %v727_v49, 0.0  ;;  %vm731_vm9 = vcmp.gt.f32.partialorder %v723_v12, 0.0 }
 0x104   : > { %v746_v55 = vmin.f32 %v730_v50, 0.0  ;;  %v728_v56 = vadd.f32 %v713_v60, %v688_v53  ;;  %1133 = vpow2.f32 %v759_v54  ;;  %v755_v59 = vmul.f32 1.442695, %v743_v33 }
 0x105   : > { %vm738_vm3 = vcmp.gt.f32.partialorder %v730_v50, 0.0 }
 0x106   : > { %v761_v62 = vmul.f32 1.442695, %v746_v55  ;;  %v744_v63 = vmin.f32 %v728_v56, 0.0  ;;  %1135 = vpow2.f32 %v755_v59  ;;  %vm736_vm4 = vcmp.gt.f32.partialorder %v728_v56, 0.0 }
 0x108   : > { %1137 = vpow2.f32 %v761_v62  ;;  %v757_v52 = vmul.f32 1.442695, %v744_v63 }
 0x109   : > { %1139 = vpow2.f32 %v753_v58 }
 0x10a   : > { %1141 = vpow2.f32 %v757_v52 }
 0x10b   : > { %1143 = vpow2.f32 %v751_v57 }
 0x10c   : > { %1145 = vpow2.f32 %v749_v1 }
 0x10d   : > { %1147 = vpow2.f32 %v747_v2 }
 0x111   : > { %v1134_v60 = vpop.eup %1133 }
 0x112   : > { %v1020_v6 = vadd.f32 -1.0, %v1134_v60 }
 0x113   : > { %v1136_v3 = vpop.eup %1135 }
 0x114   : > { %v777_v11 = vsel %vm737_vm2, %v729_v40, %v1020_v6  ;;  %v1018_v16 = vadd.f32 -1.0, %v1136_v3 }
 0x115   : > { %v1138_v7 = vpop.eup %1137 }
 0x116   : > { %v1140_v8 = vpop.eup %1139  ;;  %v1021_v9 = vadd.f32 -1.0, %v1138_v7  ;;  %v775_v26 = vsel %vm735_vm5, %v727_v49, %v1018_v16 }
 0x117   : > { %v1142_v10 = vpop.eup %1141  ;;  %v1017_v23 = vadd.f32 -1.0, %v1140_v8 }
 0x118   : > { %v778_v15 = vsel %vm738_vm3, %v730_v50, %v1021_v9  ;;  %v1019_v17 = vadd.f32 -1.0, %v1142_v10  ;;  %v1144_v18 = vpop.eup %1143 }
 0x119   : > { %v784_v20 = vpack.c.bf16 %v778_v15, %v777_v11  ;;  %v1146_v24 = vpop.eup %1145  ;;  %v1016_v25 = vadd.f32 -1.0, %v1144_v18  ;;  %v774_v22 = vsel %vm734_vm6, %v1375_v28, %v1017_v23 }
 0x11a   : > { %v776_v21 = vsel %vm736_vm4, %v728_v56, %v1019_v17  ;;  %v1148_v30 = vpop.eup %1147  ;;  %v1015_v32 = vadd.f32 -1.0, %v1146_v24 }
 0x11b   : > { %1071 = vmatpush3.bf16.msra.mxu0 %v784_v20  ;;  %v783_v31 = vpack.c.bf16 %v776_v21, %v775_v26  ;;  %v773_v27 = vsel %vm733_vm7, %v1379_v14, %v1016_v25  ;;  %v1014_v34 = vadd.f32 -1.0, %v1148_v30 }
 0x11c   : > { %1072 = vmatprep.subr.bf16.mxu0 %v1179_v47  ;;  %v782_v35 = vpack.c.bf16 %v774_v22, %v773_v27  ;;  %v772_v13 = vsel %vm732_vm8, %v1382_v4, %v1015_v32 }
 0x11d   : > { %v771_v36 = vsel %vm731_vm9, %v723_v12, %v1014_v34 }
 0x11e   : > { %v781_v28 = vpack.c.bf16 %v772_v13, %v771_v36 }
 0x11f   : > { %1073 = vmatpush3.bf16.msra.mxu0 %v783_v31 }
 0x120   : > { %1074 = vmatprep.subr.bf16.mxu0 %v1179_v47 }
 0x123   : > { %1075 = vmatpush3.bf16.msra.mxu0 %v782_v35 }
 0x124   : > { %1076 = vmatprep.subr.bf16.mxu0 %v1179_v47  ;;  %v860_v47 = vld [vmem:[%s1419_s2 + $0x8] sm:$0xff] }
 0x125   : > { %864 = vst [vmem:[%s300_s25 + $0x18] sm:$0xff] %v860_v47 }
 0x127   : > { %1077 = vmatpush3.bf16.msra.mxu0 %v781_v28 }
 0x12a   : > { %1079 = vmatmul.mubr.msk.bf16.vlgmr.msra.gmra.mxu0 %vm802_vm10, %v1132_v29 }
 0x1ea   : > { %v840_v5 = vpop.f32.mrf.mxu0 }
 0x1eb   : > { %v841_v40 = vadd.f32 %v840_v5, %v790_v39 }
 0x1ec   : > { %v1080_v41 = vpop.f32.mrf.mxu0 }
 0x1ed   : > { %v849_v43 = vmin.f32 %v841_v40, 0.0  ;;  %vm847_vm11 = vcmp.gt.f32.partialorder %v841_v40, 0.0 }
 0x1ee   : > { %v843_v14 = vpop.f32.mrf.mxu0 }
 0x1ef   : > { %v851_v44 = vmul.f32 1.442695, %v849_v43  ;;  %v844_v45 = vadd.f32 %v843_v14, %v795_v42 }
 0x1f0   : > { %v1081_v19 = vpop.f32.mrf.mxu0 }
 0x1f1   : > { %1149 = vpow2.f32 %v851_v44  ;;  %v850_v46 = vmin.f32 %v844_v45, 0.0  ;;  %vm848_vm12 = vcmp.gt.f32.partialorder %v844_v45, 0.0 }
 0x1f3   : > { %v853_v48 = vmul.f32 1.442695, %v850_v46 }
 0x1f5   : > { %1151 = vpow2.f32 %v853_v48 }
 0x1fe   : > { %v1150_v38 = vpop.eup %1149 }
 0x1ff   : > { %v1024_v49 = vadd.f32 -1.0, %v1150_v38 }
 0x201   : > { %v857_v4 = vsel %vm847_vm11, %v841_v40, %v1024_v49 }
 0x202   : > { %v1152_v50 = vpop.eup %1151  ;;  %861 = vst [vmem:[%s300_s25] sm:$0xff] %v857_v4 }
 0x203   : > { %v1025_v53 = vadd.f32 -1.0, %v1152_v50 }
 0x205   : > { %v858_v54 = vsel %vm848_vm12, %v844_v45, %v1025_v53 }
 0x206   : > { %862 = vst [vmem:[%s300_s25 + $0x8] sm:$0xff] %v858_v54 }
 0x207 PF: > { %s15_s20 = sadd.s32 1, %s1175_s20   ;;  %s1423_s18 = smov %s1171_s19 }
 0x208   : > { %p12_p5 = scmp.ge.s32.totalorder %s15_s20, 4   ;;  %s1424_s19 = smov %s1426_s21 }
 0x20a   :  { %14 = sbr.rel (!%p12_p5) target bundleno = 2 (0x2), region = 80 }

// kernel: ray_transformer_forward.3
= control target key start
LH: loop header
LB: loop body
LE: loop exit
PB: predicated region body
PF: predicated region fallthrough
CT: control target
= control target key end

     0   :  { %s5725_s18 = smov 0   ;;  %s5727_s19 = smov 0   ;;  %s6992_s0 = inlined_call_operand.vmem [shape: f32[2,3,35,128], index: 0, kind: input, shape index: {}]   ;;  %s6993_s1 = inlined_call_operand.vmem [shape: f32[2,3,4,128], index: 1, kind: input, shape index: {}]   ;;  %s6994_s2 = inlined_call_operand.vmem [shape: f32[2,3,1,128], index: 2, kind: input, shape index: {}]   ;;  %s6995_s3 = inlined_call_operand.vmem [shape: bf16[480,64], index: 3, kind: input, shape index: {}]   ;;  %s6996_s4 = inlined_call_operand.vmem [shape: f32[64,13], index: 4, kind: input, shape index: {}]   ;;  %s6997_s5 = inlined_call_operand.vmem [shape: f32[2,3,34,128], index: 5, kind: output, shape index: {}]  }
   0x1   :  { %s5729_s20 = smov 0  }
   0x2 LB: > { %s27_s21 = sadd.s32 1, %s5673_s19  ;;  %p4476_p0 = scmp.ge.s32.totalorder %s5677_s20, 1  ;;  %s5677_s20 = sphi %s5729_s20, %s15_s20   ;;  %s5673_s19 = sphi %s5727_s19, %s7007_s19   ;;  %s5669_s18 = sphi %s5725_s18, %s7006_s18  }
   0x3   : > { %p29_p1 = scmp.ge.s32.totalorder %s27_s21, 2  ;;  %p235_p2 = scmp.lt.s32.totalorder %s5677_s20, 3 }
   0x5   : > { %s7009_s21 = smov (%p29_p1, %s27_s21), 0  ;;  %p236_p3 = pnand %p4476_p0, %p235_p2 }
   0x6   : > { %p284_p4 = scmp.lt.s32.totalorder (!%p236_p3), %s5669_s18, 1 }
   0x7   : > { %239 = sbr.rel (%p236_p3) target bundleno = 5648 (0x1610), region = 40 }
   0xc   : > { %v5679_v0 = vmov 0.0   ;;  %vm5680_vm0 = vmmov 0   ;;  %v5749_v1 = vld [vmem:[%s6996_s4] sm:$0xff]  ;;  %s7011_s18 = smov (!%p284_p4, %s5669_s18), 1  ;;  %v5681_v2 = vmov 0   ;;  %v5760_v3 = vld [vmem:[%s6996_s4 + $0x8] sm:$0xff] }
   0xd   : > { %4901 = vmatprep.subr.bf16.mxu0 %v5679_v0  ;;  %4903 = vmatprep.mubr.msk.bf16.mxu0 %vm5680_vm0, %v5679_v0  ;;  %s5266_s26 = smul.u32 12, %s7011_s18  ;;  %vm341_vm1 = vcmask 1041408   ;;  %vm337_vm2 = vcmask 31744   ;;  %v5774_v7 = vld [vmem:[%s6995_s3] sm:$0xff]   ;;  %v5797_v12 = vld [vmem:[%s6996_s4 + $0x18] sm:$0xff]  ;;  %v5682_v13 = vmov 1  }
   0xe   : > { %5308 = vset.pattern.permute.xlu0 %v5681_v2  ;;  %4907 = vmatprep.subr.bf16.mxu1 %v5679_v0  ;;  %v408_v11 = vld [vmem:[%s6996_s4 + $0x20] sm:$0x7]  ;;  %v5803_v14 = vld [vmem:[%s6996_s4 + $0x10] sm:$0xff]  ;;  %v5820_v47 = vld [vmem:[%s6995_s3 + $0x8] sm:$0xff]   ;;  %vm447_vm5 = vcmask 130048   ;;  %s5265_s23 = smul.u32 120, %s7011_s18 }
   0xf   : > { %324 = vperm.xlu0 %5308, %v5749_v1   ;;  %4909 = vmatprep.mubr.msk.bf16.mxu1 %vm5680_vm0, %v5679_v0  ;;  %s5766_s29 = scalar_lea.vmem %s6993_s1, %s5266_s26  ;;  %v5832_v55 = vld [vmem:[%s6995_s3 + $0x10] sm:$0xff]   ;;  %v5845_v56 = vld [vmem:[%s6995_s3 + $0x18] ss:$0 sps:$4 sm:$0x33]   ;;  %vm1032_vm9 = vcmask 1040384   ;;  %s5267_s27 = smul.u32 3, %s7011_s18 }
  0x10   : > { %v316_v4 = vld [vmem:[%s5766_s29] sm:$0xf]  ;;  %v4495_v5 = vld [vmem:[%s5766_s29 + $0x4] sm:$0xf]  ;;  %5309 = vset.pattern.permute.xlu1 %v5682_v13  ;;  %v4512_v40 = vld [vmem:[%s5766_s29 + $0x8] sm:$0xf]  ;;  %s5906_s26 = scalar_lea.vmem %s6992_s0, %s5265_s23  ;;  %s6387_s12 = scalar_lea.vmem %s6997_s5, %s5265_s23 }
  0x11   : > { %v319_v6 = vpack.c.bf16 %v316_v4, %v316_v4  ;;  %v555_v8 = vpack.c.bf16 %v4495_v5, %v4495_v5  ;;  %431 = vperm.xlu1 %5309, %v408_v11   ;;  %v712_v44 = vpack.c.bf16 %v4512_v40, %v4512_v40  ;;  %s5992_s6 = scalar_lea.vmem %s6994_s2, %s5267_s27 }
  0x13   : > { %329 = vperm.xlu0 %5308, %v5760_v3   ;;  %v5777_v9 = vsel %vm341_vm1, %v319_v6, 0  ;;  %v557_v10 = vsel %vm341_vm1, %v555_v8, 0  ;;  %v714_v49 = vsel %vm341_vm1, %v712_v44, 0 }
  0x14   : > { %4902 = vmatpush3.bf16.msra.mxu0 %v5777_v9 }
  0x15   : > { %4921 = vmatprep.subr.bf16.mxu0 %v5679_v0  ;;  %421 = vperm.xlu1 %5309, %v5803_v14  }
  0x17   : > { %4904 = vmatmul.mubr.msk.bf16.vlgmr.msra.gmra.mxu0 %vm337_vm2, %v5774_v7  ;;  %5310 = vset.pattern.permute.xlu0 %v5682_v13 }
  0x18   : > { %4922 = vmatpush3.bf16.msra.mxu0 %v557_v10  ;;  %4923 = vmatprep.mubr.msk.bf16.mxu0 %vm5680_vm0, %v5679_v0 }
  0x19   : > { %4927 = vmatprep.subr.bf16.mxu0 %v5679_v0  ;;  %426 = vperm.xlu0 %5310, %v5797_v12  }
  0x1a   : > { %411 = vperm.xlu1 %5309, %v5749_v1  }
  0x1e   : > { %416 = vperm.xlu1 %5309, %v5760_v3  }
  0x1f   : > { %4924 = vmatmul.mubr.msk.bf16.vlgmr.msra.gmra.mxu0 %vm337_vm2, %v5774_v7 }
  0x20   : > { %4929 = vmatprep.mubr.msk.bf16.mxu0 %vm5680_vm0, %v5679_v0 }
  0x8a   : > { %v5808_v15 = vpop.permute.xlu0 %324 }
  0x8c   : > { %v5861_v58 = vpop.permute.xlu1 %431 }
  0x8e   : > { %v5811_v20 = vpop.permute.xlu0 %329 }
  0x90   : > { %v5863_v62 = vpop.permute.xlu1 %421 }
  0x94   : > { %v5871_v13 = vpop.permute.xlu0 %426 }
  0xd7   : > { %v379_v16 = vpop.f32.mrf.mxu0 }
  0xd8   : > { %v380_v17 = vadd.f32 %v379_v16, %v5808_v15 }
  0xd9   : > { %v4905_v18 = vpop.f32.mrf.mxu0 }
  0xda   : > { %v388_v19 = vmin.f32 %v380_v17, 0.0  ;;  %vm386_vm3 = vcmp.gt.f32.partialorder %v380_v17, 0.0 }
  0xdb   : > { %v382_v21 = vpop.f32.mrf.mxu0 }
  0xdc   : > { %v390_v22 = vmul.f32 1.442695, %v388_v19  ;;  %v383_v23 = vadd.f32 %v382_v21, %v5811_v20 }
  0xdd   : > { %v4906_v24 = vpop.f32.mrf.mxu0 }
  0xde   : > { %5411 = vpow2.f32 %v390_v22  ;;  %v389_v25 = vmin.f32 %v383_v23, 0.0  ;;  %vm387_vm4 = vcmp.gt.f32.partialorder %v383_v23, 0.0 }
  0xdf   : > { %v593_v26 = vpop.f32.mrf.mxu0 }
  0xe0   : > { %v392_v27 = vmul.f32 1.442695, %v389_v25  ;;  %v594_v28 = vadd.f32 %v593_v26, %v5808_v15 }
  0xe1   : > { %v4925_v29 = vpop.f32.mrf.mxu0 }
  0xe2   : > { %5413 = vpow2.f32 %v392_v27  ;;  %v602_v30 = vmin.f32 %v594_v28, 0.0  ;;  %vm600_vm6 = vcmp.gt.f32.partialorder %v594_v28, 0.0 }
  0xe3   : > { %v596_v31 = vpop.f32.mrf.mxu0 }
  0xe4   : > { %v604_v32 = vmul.f32 1.442695, %v602_v30  ;;  %v597_v33 = vadd.f32 %v596_v31, %v5811_v20 }
  0xe5   : > { %v4926_v34 = vpop.f32.mrf.mxu0 }
  0xe6   : > { %5415 = vpow2.f32 %v604_v32  ;;  %v603_v35 = vmin.f32 %v597_v33, 0.0  ;;  %vm601_vm7 = vcmp.gt.f32.partialorder %v597_v33, 0.0 }
  0xe8   : > { %v606_v36 = vmul.f32 1.442695, %v603_v35 }
  0xea   : > { %5417 = vpow2.f32 %v606_v36 }
  0xeb   : > { %v5412_v37 = vpop.eup %5411 }
  0xec   : > { %v4482_v38 = vadd.f32 -1.0, %v5412_v37 }
  0xee   : > { %v396_v42 = vsel %vm386_vm3, %v380_v17, %v4482_v38  ;;  %vm1019_vm3 = vcmask 285696  }
  0xef   : > { %v5414_v39 = vpop.eup %5413 }
  0xf0   : > { %v4483_v41 = vadd.f32 -1.0, %v5414_v39 }
  0xf2   : > { %v397_v43 = vsel %vm387_vm4, %v383_v23, %v4483_v41 }
  0xf3   : > { %v5416_v45 = vpop.eup %5415  ;;  %v403_v46 = vpack.c.bf16 %v397_v43, %v396_v42 }
  0xf4   : > { %v4497_v48 = vadd.f32 -1.0, %v5416_v45 }
  0xf5   : > { %4908 = vmatpush3.bf16.msra.mxu1 %v403_v46 }
  0xf6   : > { %4941 = vmatprep.subr.bf16.mxu1 %v5679_v0  ;;  %v610_v52 = vsel %vm600_vm6, %v594_v28, %v4497_v48 }
  0xf7   : > { %v5418_v50 = vpop.eup %5417 }
  0xf8   : > { %v4498_v51 = vadd.f32 -1.0, %v5418_v50  ;;  %4910 = vmatmul.mubr.msk.bf16.vlgmr.msra.gmra.mxu1 %vm447_vm5, %v5820_v47 }
  0xf9   : > { %4913 = vmatprep.mubr.msk.bf16.mxu1 %vm5680_vm0, %v5679_v0  ;;  %4942 = vmatpush3.bf16.msra.mxu1 %v714_v49 }
  0xfa   : > { %v611_v53 = vsel %vm601_vm7, %v597_v33, %v4498_v51  ;;  %4947 = vmatprep.subr.bf16.mxu1 %v5679_v0 }
  0xfb   : > { %v612_v54 = vpack.c.bf16 %v611_v53, %v610_v52 }
  0xfd   : > { %4928 = vmatpush3.bf16.msra.mxu0 %v612_v54 }
 0x100   : > { %4914 = vmatmul.mubr.msk.bf16.gmra.mxu1 %vm447_vm5, %v5832_v55  ;;  %4930 = vmatmul.mubr.msk.bf16.vlgmr.msra.gmra.mxu0 %vm447_vm5, %v5820_v47 }
 0x101   : > { %4917 = vmatprep.mubr.msk.bf16.mxu1 %vm5680_vm0, %v5679_v0  ;;  %4933 = vmatprep.mubr.msk.bf16.mxu0 %vm5680_vm0, %v5679_v0 }
 0x108   : > { %4918 = vmatmul.mubr.msk.bf16.gmra.mxu1 %vm447_vm5, %v5845_v56  ;;  %4934 = vmatmul.mubr.msk.bf16.gmra.mxu0 %vm447_vm5, %v5832_v55 }
 0x109   : > { %4937 = vmatprep.mubr.msk.bf16.mxu0 %vm5680_vm0, %v5679_v0  ;;  %4943 = vmatprep.mubr.msk.bf16.mxu1 %vm5680_vm0, %v5679_v0 }
 0x110   : > { %4938 = vmatmul.mubr.msk.bf16.gmra.mxu0 %vm447_vm5, %v5845_v56  ;;  %4944 = vmatmul.mubr.msk.bf16.vlgmr.msra.gmra.mxu1 %vm337_vm2, %v5774_v7  ;;  %v5869_v7 = vpop.permute.xlu1 %411 }
 0x111   : > { %4949 = vmatprep.mubr.msk.bf16.mxu1 %vm5680_vm0, %v5679_v0 }
 0x114   : > { %v5879_v23 = vpop.permute.xlu1 %416 }
 0x1b8   : > { %v491_v57 = vpop.f32.mrf.mxu1 }
 0x1b9   : > { %v5892_v34 = vadd.f32 %v491_v57, %v5869_v7 }
 0x1ba   : > { %v4911_v59 = vpop.f32.mrf.mxu1 }
 0x1bb   : > { %v518_v43 = vmin.f32 %v5892_v34, 0.0  ;;  %vm513_vm15 = vcmp.gt.f32.partialorder %v5892_v34, 0.0 }
 0x1bc   : > { %v494_v60 = vpop.f32.mrf.mxu1 }
 0x1bd   : > { %v5887_v29 = vadd.f32 %v494_v60, %v5879_v23  ;;  %v523_v53 = vmul.f32 1.442695, %v518_v43  ;;  %v547_v60 = vld [vmem:[%s5906_s26 + $0x20] sm:$0x7] }
 0x1be   : > { %v4912_v61 = vpop.f32.mrf.mxu1 }
 0x1bf   : > { %v519_v38 = vmin.f32 %v5887_v29, 0.0  ;;  %vm514_vm14 = vcmp.gt.f32.partialorder %v5887_v29, 0.0 }
 0x1c0   : > { %v499_v63 = vpop.f32.mrf.mxu1  ;;  %v5865_v2 = vpop.f32.mrf.mxu0 }
 0x1c1   : > { %v5882_v24 = vadd.f32 %v499_v63, %v5863_v62  ;;  %v525_v49 = vmul.f32 1.442695, %v519_v38 }
 0x1c2   : > { %v4915_v4 = vpop.f32.mrf.mxu1  ;;  %v4931_v5 = vpop.f32.mrf.mxu0 }
 0x1c3   : > { %v520_v33 = vmin.f32 %v5882_v24, 0.0  ;;  %vm515_vm13 = vcmp.gt.f32.partialorder %v5882_v24, 0.0 }
 0x1c4   : > { %v502_v6 = vpop.f32.mrf.mxu1  ;;  %v5867_v8 = vpop.f32.mrf.mxu0 }
 0x1c5   : > { %v5877_v19 = vadd.f32 %v502_v6, %v5871_v13  ;;  %v527_v42 = vmul.f32 1.442695, %v520_v33  ;;  %v546_v33 = vld [vmem:[%s5906_s26 + $0x18] sm:$0xff] }
 0x1c6   : > { %v4916_v10 = vpop.f32.mrf.mxu1  ;;  %v4932_v11 = vpop.f32.mrf.mxu0 }
 0x1c7   : > { %v521_v30 = vmin.f32 %v5877_v19, 0.0  ;;  %v5683_v10 = vmov 65535   ;;  %vm516_vm10 = vcmp.gt.f32.partialorder %v5877_v19, 0.0 }
 0x1c8   : > { %v507_v16 = vpop.f32.mrf.mxu1  ;;  %v5873_v17 = vpop.f32.mrf.mxu0  ;;  %v1033_v11 = vsel %vm1032_vm9, 4294967295, %v5683_v10 }
 0x1c9   : > { %v508_v18 = vadd.f32 %v507_v16, %v5861_v58  ;;  %v529_v39 = vmul.f32 1.442695, %v521_v30 }
 0x1ca   : > { %v4919_v21 = vpop.f32.mrf.mxu1  ;;  %v4935_v22 = vpop.f32.mrf.mxu0 }
 0x1cb   : > { %v522_v25 = vmin.f32 %v508_v18, 0.0  ;;  %vm517_vm8 = vcmp.gt.f32.partialorder %v508_v18, 0.0 }
 0x1cc   : > { %v510_v26 = vpop.f32.mrf.mxu1  ;;  %v5884_v27 = vpop.f32.mrf.mxu0 }
 0x1cd   : > { %v531_v28 = vmul.f32 1.442695, %v522_v25 }
 0x1ce   : > { %v4920_v31 = vpop.f32.mrf.mxu1  ;;  %v4936_v32 = vpop.f32.mrf.mxu0 }
 0x1cf   : > { %5419 = vpow2.f32 %v531_v28  ;;  %v5914_v28 = vsel %vm341_vm1, %v1033_v11, 0 }
 0x1d0   : > { %v5894_v35 = vpop.f32.mrf.mxu0  ;;  %v750_v36 = vpop.f32.mrf.mxu1  ;;  %5421 = vpow2.f32 %v529_v39 }
 0x1d1   : > { %v751_v37 = vadd.f32 %v750_v36, %v5808_v15  ;;  %5423 = vpow2.f32 %v527_v42 }
 0x1d2   : > { %v4945_v40 = vpop.f32.mrf.mxu1  ;;  %v4939_v41 = vpop.f32.mrf.mxu0 }
 0x1d3   : > { %v759_v44 = vmin.f32 %v751_v37, 0.0  ;;  %vm757_vm11 = vcmp.gt.f32.partialorder %v751_v37, 0.0  ;;  %v545_v41 = vld [vmem:[%s5906_s26 + $0x10] sm:$0xff] }
 0x1d4   : > { %v753_v45 = vpop.f32.mrf.mxu1  ;;  %v666_v46 = vpop.f32.mrf.mxu0 }
 0x1d5   : > { %v754_v48 = vadd.f32 %v753_v45, %v5811_v20  ;;  %v761_v50 = vmul.f32 1.442695, %v759_v44  ;;  %v544_v45 = vld [vmem:[%s5906_s26 + $0x8] sm:$0xff] }
 0x1d6   : > { %v4946_v51 = vpop.f32.mrf.mxu1  ;;  %v4940_v15 = vpop.f32.mrf.mxu0 }
 0x1d7   : > { %v760_v52 = vmin.f32 %v754_v48, 0.0  ;;  %5425 = vpow2.f32 %v761_v50  ;;  %vm758_vm12 = vcmp.gt.f32.partialorder %v754_v48, 0.0  ;;  %v5372_v51 = vld [vmem:[%s6995_s3 + $0x78] sm:$0xff]  }
 0x1d8   : > { %5427 = vpow2.f32 %v525_v49  ;;  %v1210_v15 = vld [vmem:[%s6996_s4 + $0x38] sm:$0xff] }
 0x1d9   : > { %v763_v54 = vmul.f32 1.442695, %v760_v52  ;;  %v1209_v52 = vld [vmem:[%s6996_s4 + $0x30] sm:$0xff] }
 0x1db   : > { %5429 = vpow2.f32 %v763_v54  ;;  %v1207_v54 = vld [vmem:[%s6996_s4 + $0x20] sm:$0xff] }
 0x1dc   : > { %v5420_v57 = vpop.eup %5419  ;;  %5431 = vpow2.f32 %v523_v53  ;;  %v5684_v53 = vmov 2  }
 0x1dd   : > { %v4494_v59 = vadd.f32 -1.0, %v5420_v57  ;;  %v5422_v61 = vpop.eup %5421  ;;  %5312 = vset.pattern.permute.xlu1 %v5684_v53  ;;  %5311 = vset.pattern.permute.xlu0 %v5684_v53  ;;  %v1208_v57 = vld [vmem:[%s6996_s4 + $0x28] sm:$0xff] }
 0x1de   : > { %v5424_v63 = vpop.eup %5423  ;;  %v4493_v6 = vadd.f32 -1.0, %v5422_v61  ;;  %1248 = vperm.xlu1 %5312, %v1210_v15   ;;  %1243 = vperm.xlu0 %5311, %v1209_v52   ;;  %v6021_v61 = vld [vmem:[%s5992_s6 + $0x2] sm:$0x1] }
 0x1df   : > { %v542_v20 = vsel %vm517_vm8, %v508_v18, %v4494_v59  ;;  %v4492_v25 = vadd.f32 -1.0, %v5424_v63  ;;  %v5996_v59 = vadd.f32 %v5865_v2, %v5869_v7 }
 0x1e0   : > { %v5909_v5 = vadd.f32 %v547_v60, %v542_v20  ;;  %v541_v32 = vsel %vm516_vm10, %v5877_v19, %v4493_v6  ;;  %v6014_v20 = vadd.f32 %v5884_v27, %v5871_v13 }
 0x1e1   : > { %v540_v40 = vsel %vm515_vm13, %v5882_v24, %v4492_v25  ;;  %v5924_v43 = vadd.f32 %v546_v33, %v541_v32  ;;  %v543_v24 = vld [vmem:[%s5906_s26] sm:$0xff]  ;;  %v674_v60 = vmin.f32 %v5996_v59, 0.0  ;;  %vm669_vm6 = vcmp.gt.f32.partialorder %v5996_v59, 0.0 }
 0x1e2   : > { %v1269_v30 = vpack.c.bf16 %v5909_v5, %v5909_v5  ;;  %1233 = vperm.xlu1 %5312, %v1207_v54   ;;  %1238 = vperm.xlu0 %5311, %v1208_v57   ;;  %vm672_vm8 = vcmp.gt.f32.partialorder %v6014_v20, 0.0 }
 0x1e3   : > { %v679_v6 = vmul.f32 1.442695, %v674_v60 }
 0x1e4   : > { %v5426_v4 = vpop.eup %5425  ;;  %v1303_v44 = vand.u32 %v1269_v30, %v5914_v28 }
 0x1e5   : > { %v5428_v16 = vpop.eup %5427  ;;  %v4514_v21 = vadd.f32 -1.0, %v5426_v4  ;;  %v677_v4 = vmin.f32 %v6014_v20, 0.0  ;;  %5433 = vpow2.f32 %v679_v6 }
 0x1e6   : > { %v4491_v31 = vadd.f32 -1.0, %v5428_v16  ;;  %1223 = vperm.xlu1 %5312, %v5803_v14   ;;  %1228 = vperm.xlu0 %5311, %v5797_v12   ;;  %v6000_v12 = vadd.f32 %v5873_v17, %v5863_v62  ;;  %v6010_v14 = vadd.f32 %v5867_v8, %v5879_v23  ;;  %v6027_v8 = vadd.f32 %v5894_v35, %v5861_v58 }
 0x1e7   : > { %v767_v36 = vsel %vm757_vm11, %v751_v37, %v4514_v21  ;;  %v5930_v37 = vadd.f32 %v545_v41, %v540_v40 }
 0x1e8   : > { %v5430_v22 = vpop.eup %5429  ;;  %v539_v19 = vsel %vm514_vm14, %v5887_v29, %v4491_v31  ;;  %v676_v17 = vmin.f32 %v6000_v12, 0.0  ;;  %v675_v63 = vmin.f32 %v6010_v14, 0.0  ;;  %v678_v25 = vmin.f32 %v6027_v8, 0.0 }
 0x1e9   : > { %v5432_v26 = vpop.eup %5431  ;;  %v4515_v18 = vadd.f32 -1.0, %v5430_v22  ;;  %v1268_v49 = vpack.c.bf16 %v5924_v43, %v5930_v37  ;;  %v685_v22 = vmul.f32 1.442695, %v677_v4  ;;  %vm671_vm4 = vcmp.gt.f32.partialorder %v6000_v12, 0.0 }
 0x1ea   : > { %v4490_v39 = vadd.f32 -1.0, %v5432_v26  ;;  %1213 = vperm.xlu1 %5312, %v5749_v1   ;;  %1218 = vperm.xlu0 %5311, %v5760_v3   ;;  %v6003_v1 = vld [vmem:[%s5992_s6] sm:$0x1]  ;;  %v6006_v3 = vld [vmem:[%s5992_s6 + $0x1] sm:$0x1]  ;;  %vm670_vm7 = vcmp.gt.f32.partialorder %v6010_v14, 0.0 }
 0x1eb   : > { %v768_v38 = vsel %vm758_vm12, %v754_v48, %v4515_v18  ;;  %v5934_v48 = vadd.f32 %v544_v45, %v539_v19  ;;  %v870_v2 = vadd.f32 %v6006_v3, %v6003_v1  ;;  %v683_v10 = vmul.f32 1.442695, %v676_v17 }
 0x1ec   : > { %v769_v42 = vpack.c.bf16 %v768_v38, %v767_v36  ;;  %v538_v46 = vsel %vm513_vm15, %v5892_v34, %v4490_v39  ;;  %v5367_v34 = vld [vmem:[%s6995_s3 + $0x60] sm:$0xff]   ;;  %v681_v16 = vmul.f32 1.442695, %v675_v63  ;;  %v687_v33 = vmul.f32 1.442695, %v678_v25 }
 0x1ed   : > { %v5942_v29 = vadd.f32 %v543_v24, %v538_v46  ;;  %v873_v27 = vadd.f32 %v6021_v61, %v870_v2  ;;  %5435 = vpow2.f32 %v683_v10  ;;  %vm673_vm12 = vcmp.gt.f32.partialorder %v6027_v8, 0.0 }
 0x1ee   : > { %4948 = vmatpush3.bf16.msra.mxu1 %v769_v42  ;;  %5437 = vpow2.f32 %v681_v16  ;;  %v4509_v16 = vld [vmem:[%s5906_s26 + $0x38] sm:$0xff] }
 0x1ef   : > { %4989 = vmatprep.subr.bf16.mxu1 %v1303_v44  ;;  %v1267_v50 = vpack.c.bf16 %v5934_v48, %v5942_v29  ;;  %v874_v30 = vadd.f32 1e-08, %v873_v27  ;;  %5439 = vpow2.f32 %v685_v22 }
 0x1f1   : > { %4950 = vmatmul.mubr.msk.bf16.vlgmr.msra.gmra.mxu1 %vm447_vm5, %v5820_v47  ;;  %v5361_v47 = vld [vmem:[%s6995_s3 + $0x40] sm:$0xff]  }
 0x1f2   : > { %4990 = vmatpush3.bf16.msra.mxu1 %v1303_v44  ;;  %4953 = vmatprep.mubr.msk.bf16.mxu1 %vm5680_vm0, %v5679_v0  ;;  %v5434_v24 = vpop.eup %5433 }
 0x1f3   : > { %4991 = vmatprep.subr.bf16.mxu1 %v1268_v49  ;;  %4967 = vmatprep.mubr.msk.bf16.mxu0 %vm1019_vm3, %v5361_v47  ;;  %v878_v47 = vlaneseq  ;;  %v4502_v2 = vadd.f32 -1.0, %v5434_v24 }
 0x1f5   : > { %v879_v57 = vshrl.u32 %v878_v47, 7 }
 0x1f6   : > { %4992 = vmatpush3.bf16.msra.mxu1 %v1268_v49 }
 0x1f7   : > { %4993 = vmatprep.subr.bf16.mxu1 %v1267_v50  ;;  %v6061_v22 = vsub.s32 0, %v879_v57 }
 0x1f9   : > { %4954 = vmatmul.mubr.msk.bf16.gmra.mxu1 %vm447_vm5, %v5832_v55  ;;  %v5368_v55 = vld [vmem:[%s6995_s3 + $0x68] sm:$0xff]  }
 0x1fa   : > { %4994 = vmatpush3.bf16.msra.mxu1 %v1267_v50  ;;  %4957 = vmatprep.mubr.msk.bf16.mxu1 %vm5680_vm0, %v5679_v0  ;;  %v5436_v50 = vpop.eup %5435 }
 0x1fb   : > { %v4504_v52 = vadd.f32 -1.0, %v5436_v50 }
 0x201   : > { %4958 = vmatmul.mubr.msk.bf16.gmra.mxu1 %vm447_vm5, %v5845_v56  ;;  %v5371_v56 = vld [vmem:[%s6995_s3 + $0x70] sm:$0xff]  }
 0x202   : > { %4995 = vmatprep.mubr.msk.bf16.mxu1 %vm1019_vm3, %v5367_v34 }
 0x209   : > { %4996 = vmatmul.mubr.msk.bf16.vlgmr.msra.gmra.mxu1 %vm1019_vm3, %v5368_v55  ;;  %v5438_v55 = vpop.eup %5437 }
 0x20a   : > { %4999 = vmatprep.mubr.msk.bf16.mxu1 %vm1019_vm3, %v5371_v56  ;;  %v4503_v17 = vadd.f32 -1.0, %v5438_v55 }
 0x211   : > { %5000 = vmatmul.mubr.msk.bf16.gmra.mxu1 %vm1019_vm3, %v5372_v51  ;;  %v5440_v51 = vpop.eup %5439 }
 0x212   : > { %v4505_v6 = vadd.f32 -1.0, %v5440_v51 }
 0x2b1   : > { %v804_v11 = vpop.f32.mrf.mxu1 }
 0x2b2   : > { %v6031_v21 = vadd.f32 %v804_v11, %v5869_v7  ;;  %v696_v11 = vsel %vm671_vm4, %v6000_v12, %v4504_v52  ;;  %vm1468_vm4 = vcmask 523264  }
 0x2b3   : > { %v4951_v26 = vpop.f32.mrf.mxu1 }
 0x2b4   : > { %v831_v18 = vmin.f32 %v6031_v21, 0.0  ;;  %vm826_vm10 = vcmp.gt.f32.partialorder %v6031_v21, 0.0 }
 0x2b5   : > { %v807_v35 = vpop.f32.mrf.mxu1 }
 0x2b6   : > { %v836_v31 = vmul.f32 1.442695, %v831_v18  ;;  %v6036_v32 = vadd.f32 %v807_v35, %v5879_v23  ;;  %v4525_v18 = vld [vmem:[%s5906_s26 + $0x58] sm:$0xff]  ;;  %v695_v35 = vsel %vm670_vm7, %v6010_v14, %v4503_v17 }
 0x2b7   : > { %v4952_v36 = vpop.f32.mrf.mxu1 }
 0x2b8   : > { %5441 = vpow2.f32 %v836_v31  ;;  %v832_v7 = vmin.f32 %v6036_v32, 0.0  ;;  %v4524_v31 = vld [vmem:[%s5906_s26 + $0x50] sm:$0xff]  ;;  %vm827_vm11 = vcmp.gt.f32.partialorder %v6036_v32, 0.0  ;;  %v6074_v36 = vadd.f32 %v4509_v16, %v696_v11 }
 0x2b9   : > { %5443 = vrcp.f32 %v874_v30  ;;  %v812_v38 = vpop.f32.mrf.mxu1  ;;  %v694_v30 = vsel %vm669_vm6, %v5996_v59, %v4502_v2 }
 0x2ba   : > { %v838_v39 = vmul.f32 1.442695, %v832_v7  ;;  %v6040_v40 = vadd.f32 %v812_v38, %v5863_v62  ;;  %5445 = vpow2.f32 %v687_v33  ;;  %v4507_v33 = vld [vmem:[%s5906_s26 + $0x28] sm:$0xff]  ;;  %v4510_v7 = vld [vmem:[%s5906_s26 + $0x40] sm:$0xff] }
 0x2bb   : > { %v4955_v41 = vpop.f32.mrf.mxu1 }
 0x2bc   : > { %5447 = vpow2.f32 %v838_v39  ;;  %v833_v42 = vmin.f32 %v6040_v40, 0.0  ;;  %vm828_vm13 = vcmp.gt.f32.partialorder %v6040_v40, 0.0 }
 0x2bd   : > { %v815_v44 = vpop.f32.mrf.mxu1 }
 0x2be   : > { %v840_v23 = vmul.f32 1.442695, %v833_v42  ;;  %v6044_v19 = vadd.f32 %v815_v44, %v5871_v13 }
 0x2bf   : > { %v4956_v45 = vpop.f32.mrf.mxu1 }
 0x2c0   : > { %5449 = vpow2.f32 %v840_v23  ;;  %v834_v46 = vmin.f32 %v6044_v19, 0.0  ;;  %v4526_v23 = vld [vmem:[%s5906_s26 + $0x60] sm:$0xff]  ;;  %v6095_v45 = vadd.f32 %v4507_v33, %v694_v30  ;;  %vm829_vm14 = vcmp.gt.f32.partialorder %v6044_v19, 0.0 }
 0x2c1   : > { %v820_v49 = vpop.f32.mrf.mxu1 }
 0x2c2   : > { %v842_v62 = vmul.f32 1.442695, %v834_v46  ;;  %v6048_v34 = vadd.f32 %v820_v49, %v5861_v58  ;;  %v4511_v49 = vld [vmem:[%s5906_s26 + $0x48] sm:$0x7] }
 0x2c3   : > { %v4959_v56 = vpop.f32.mrf.mxu1 }
 0x2c4   : > { %5451 = vpow2.f32 %v842_v62  ;;  %v835_v15 = vmin.f32 %v6048_v34, 0.0  ;;  %vm830_vm15 = vcmp.gt.f32.partialorder %v6048_v34, 0.0 }
 0x2c5   : > { %v5442_v13 = vpop.eup %5441  ;;  %v823_v53 = vpop.f32.mrf.mxu1 }
 0x2c6   : > { %v6051_v54 = vpop.eup %5443  ;;  %v844_v60 = vmul.f32 1.442695, %v835_v15  ;;  %v4519_v58 = vadd.f32 -1.0, %v5442_v13 }
 0x2c7   : > { %v4960_v63 = vpop.f32.mrf.mxu1  ;;  %v5446_v4 = vpop.eup %5445  ;;  %v876_v10 = vmul.f32 %v6051_v54, %v6003_v1  ;;  %v888_v25 = vmul.f32 %v6051_v54, %v6006_v3  ;;  %v4508_v1 = vld [vmem:[%s5906_s26 + $0x30] sm:$0xff]  ;;  %v697_v3 = vsel %vm672_vm8, %v6014_v20, %v4505_v6  ;;  %v905_v14 = vmul.f32 %v6051_v54, %v6021_v61 }
 0x2c8   : > { %5453 = vpow2.f32 %v844_v60  ;;  %v851_v12 = vsel %vm826_vm10, %v6031_v21, %v4519_v58  ;;  %v4506_v38 = vadd.f32 -1.0, %v5446_v4  ;;  %v6087_v42 = vadd.f32 %v4508_v1, %v695_v35 }
 0x2c9   : > { %v5448_v27 = vpop.eup %5447  ;;  %v6085_v41 = vrot.slane %v888_v25, %v6061_v22  ;;  %v6089_v44 = vadd.f32 %v4524_v31, %v851_v12  ;;  %v6097_v46 = vadd.f32 %v4510_v7, %v697_v3  ;;  %v6110_v55 = vrot.slane %v905_v14, %v6061_v22 }
 0x2ca   : > { %v4520_v26 = vadd.f32 -1.0, %v5448_v27  ;;  %v698_v24 = vsel %vm673_vm12, %v6027_v8, %v4506_v38 }
 0x2cb   : > { %v897_v61 = vmul.f32 %v6085_v41, %v6074_v36  ;;  %v896_v8 = vmul.f32 %v6085_v41, %v6087_v42  ;;  %v898_v52 = vmul.f32 %v6085_v41, %v6097_v46  ;;  %v6121_v53 = vadd.f32 %v4511_v49, %v698_v24 }
 0x2cc   : > { %v852_v39 = vsel %vm827_vm11, %v6036_v32, %v4520_v26  ;;  %v6093_v32 = vrot.slane %v876_v10, %v6061_v22  ;;  %v895_v60 = vmul.f32 %v6085_v41, %v6095_v45  ;;  %v912_v11 = vmul.f32 %v6110_v55, %v6089_v44  ;;  %v4528_v26 = vld [vmem:[%s5906_s26 + $0x70] sm:$0x7] }
 0x2cd   : > { %v5450_v59 = vpop.eup %5449  ;;  %v6082_v21 = vadd.f32 %v4525_v18, %v852_v39 }
 0x2ce   : > { %v4521_v20 = vadd.f32 -1.0, %v5450_v59  ;;  %v884_v51 = vmul.f32 %v6093_v32, %v5934_v48  ;;  %v885_v15 = vmul.f32 %v6093_v32, %v5930_v37  ;;  %v883_v4 = vmul.f32 %v6093_v32, %v5942_v29 }
 0x2cf   : > { %v6107_v47 = vpack.c.bf16 %v6082_v21, %v6089_v44  ;;  %v913_v17 = vmul.f32 %v6110_v55, %v6082_v21  ;;  %v886_v6 = vmul.f32 %v6093_v32, %v5924_v43  ;;  %v887_v31 = vmul.f32 %v6093_v32, %v5909_v5 }
 0x2d0   : > { %v853_v50 = vsel %vm828_vm13, %v6040_v40, %v4521_v20  ;;  %v4527_v40 = vld [vmem:[%s5906_s26 + $0x68] sm:$0xff]  ;;  %v902_v2 = vadd.f32 %v897_v61, %v885_v15  ;;  %v901_v10 = vadd.f32 %v896_v8, %v884_v51  ;;  %v900_v35 = vadd.f32 %v895_v60, %v883_v4 }
 0x2d1   : > { %v5452_v62 = vpop.eup %5451  ;;  %v864_v56 = vadd.f32 %v4526_v23, %v853_v50  ;;  %v903_v18 = vadd.f32 %v898_v52, %v886_v6 }
 0x2d2   : > { %v4522_v13 = vadd.f32 -1.0, %v5452_v62  ;;  %v6143_v1 = vadd.f32 %v913_v17, %v901_v10  ;;  %v6152_v7 = vadd.f32 %v912_v11, %v900_v35 }
 0x2d3   : > { %v914_v57 = vmul.f32 %v6110_v55, %v864_v56 }
 0x2d4   : > { %v854_v58 = vsel %vm829_vm14, %v6044_v19, %v4522_v13  ;;  %v899_v19 = vmul.f32 %v6085_v41, %v6121_v53  ;;  %v923_v61 = vsub.f32 %v5934_v48, %v6143_v1  ;;  %v922_v15 = vsub.f32 %v5942_v29, %v6152_v7 }
 0x2d5   : > { %v5454_v63 = vpop.eup %5453  ;;  %v865_v27 = vadd.f32 %v4527_v40, %v854_v58  ;;  %v6136_v16 = vadd.f32 %v914_v57, %v902_v2 }
 0x2d6   : > { %v4523_v25 = vadd.f32 -1.0, %v5454_v63  ;;  %v904_v14 = vadd.f32 %v899_v19, %v887_v31  ;;  %v928_v60 = vmul.f32 %v923_v61, %v923_v61  ;;  %v927_v6 = vmul.f32 %v922_v15, %v922_v15 }
 0x2d7   : > { %v915_v30 = vmul.f32 %v6110_v55, %v865_v27  ;;  %v924_v38 = vsub.f32 %v5930_v37, %v6136_v16  ;;  %v939_v39 = vsub.f32 %v6074_v36, %v6136_v16  ;;  %v6158_v59 = vpack.c.bf16 %v865_v27, %v864_v56 }
 0x2d8   : > { %v855_v12 = vsel %vm830_vm15, %v6048_v34, %v4523_v25  ;;  %v938_v37 = vsub.f32 %v6087_v42, %v6143_v1  ;;  %v959_v57 = vsub.f32 %v864_v56, %v6136_v16  ;;  %v957_v19 = vsub.f32 %v6089_v44, %v6152_v7 }
 0x2d9   : > { %v6148_v33 = vadd.f32 %v915_v30, %v903_v18  ;;  %v6150_v3 = vadd.f32 %v4528_v26, %v855_v12  ;;  %v929_v62 = vmul.f32 %v924_v38, %v924_v38  ;;  %v944_v51 = vmul.f32 %v939_v39, %v939_v39 }
 0x2da   : > { %v943_v2 = vmul.f32 %v938_v37, %v938_v37  ;;  %v933_v26 = vmul.f32 %v928_v60, %v6093_v32  ;;  %v964_v31 = vmul.f32 %v959_v57, %v959_v57  ;;  %v5362_v57 = vld [vmem:[%s6995_s3 + $0x48] sm:$0xff]   ;;  %v5363_v60 = vld [vmem:[%s6995_s3 + $0x50] sm:$0xff]   ;;  %vm1584_vm15 = vcmask 261120  }
 0x2db   : > { %v916_v34 = vmul.f32 %v6110_v55, %v6150_v3  ;;  %v925_v20 = vsub.f32 %v5924_v43, %v6148_v33  ;;  %v940_v23 = vsub.f32 %v6097_v46, %v6148_v33  ;;  %v937_v43 = vsub.f32 %v6095_v45, %v6152_v7 }
 0x2dc   : > { %v960_v40 = vsub.f32 %v865_v27, %v6148_v33  ;;  %v934_v4 = vmul.f32 %v929_v62, %v6093_v32  ;;  %v949_v56 = vmul.f32 %v944_v51, %v6085_v41  ;;  %v948_v18 = vmul.f32 %v943_v2, %v6085_v41  ;;  %v5364_v2 = vld [vmem:[%s6995_s3 + $0x58] sm:$0xff]  }
 0x2dd   : > { %v921_v24 = vadd.f32 %v916_v34, %v904_v14  ;;  %v930_v49 = vmul.f32 %v925_v20, %v925_v20  ;;  %v945_v50 = vmul.f32 %v940_v23, %v940_v23  ;;  %v942_v10 = vmul.f32 %v937_v43, %v937_v43 }
 0x2de   : > { %v965_v25 = vmul.f32 %v960_v40, %v960_v40  ;;  %v954_v14 = vadd.f32 %v949_v56, %v934_v4  ;;  %v962_v23 = vmul.f32 %v957_v19, %v957_v19  ;;  %v969_v37 = vmul.f32 %v964_v31, %v6110_v55  ;;  %v6253_v4 = vld [vmem:[%s6996_s4] sm:$0xff] }
 0x2df   : > { %v961_v8 = vsub.f32 %v6150_v3, %v921_v24  ;;  %v926_v13 = vsub.f32 %v5909_v5, %v921_v24  ;;  %v941_v48 = vsub.f32 %v6121_v53, %v921_v24  ;;  %v935_v52 = vmul.f32 %v930_v49, %v6093_v32 }
 0x2e0   : > { %v950_v63 = vmul.f32 %v945_v50, %v6085_v41  ;;  %v958_v5 = vsub.f32 %v6082_v21, %v6143_v1  ;;  %v932_v21 = vmul.f32 %v927_v6, %v6093_v32  ;;  %v947_v38 = vmul.f32 %v942_v10, %v6085_v41  ;;  %v6259_v6 = vld [vmem:[%s6996_s4 + $0x8] sm:$0xff] }
 0x2e1   : > { %v931_v17 = vmul.f32 %v926_v13, %v926_v13  ;;  %v946_v58 = vmul.f32 %v941_v48, %v941_v48  ;;  %v966_v29 = vmul.f32 %v961_v8, %v961_v8  ;;  %v970_v34 = vmul.f32 %v965_v25, %v6110_v55  ;;  %v4997_v25 = vpop.f32.mrf.mxu1 }
 0x2e2   : > { %v955_v12 = vadd.f32 %v950_v63, %v935_v52  ;;  %v963_v20 = vmul.f32 %v958_v5, %v958_v5  ;;  %v953_v44 = vadd.f32 %v948_v18, %v933_v26  ;;  %v974_v62 = vadd.f32 %v969_v37, %v954_v14  ;;  %v6246_v63 = vld [vmem:[%s6996_s4 + $0x18] sm:$0xff]  ;;  %v1249_v26 = vpop.permute.xlu1 %1248 }
 0x2e3   : > { %v936_v27 = vmul.f32 %v931_v17, %v6093_v32  ;;  %v951_v11 = vmul.f32 %v946_v58, %v6085_v41  ;;  %v971_v35 = vmul.f32 %v966_v29, %v6110_v55  ;;  %v952_v51 = vadd.f32 %v947_v38, %v932_v21  ;;  %v5365_v17 = vld [vmem:[%s6995_s3 + $0x20] sm:$0xff]   ;;  %v6239_v58 = vld [vmem:[%s6996_s4 + $0x10] sm:$0xff] }
 0x2e4   : > { %v975_v49 = vadd.f32 %v970_v34, %v955_v12  ;;  %v968_v15 = vmul.f32 %v963_v20, %v6110_v55  ;;  %v967_v41 = vmul.f32 %v962_v23, %v6110_v55  ;;  %v987_v40 = vpack.c.bf16 %v921_v24, %v921_v24 }
 0x2e5   : > { %v956_v30 = vadd.f32 %v951_v11, %v936_v27  ;;  %v986_v55 = vpack.c.bf16 %v6148_v33, %v6136_v16  ;;  %v985_v24 = vpack.c.bf16 %v6143_v1, %v6152_v7  ;;  %v5366_v16 = vld [vmem:[%s6995_s3 + $0x28] sm:$0xff]   ;;  %v5369_v1 = vld [vmem:[%s6995_s3 + $0x30] sm:$0xff]   ;;  %v5370_v33 = vld [vmem:[%s6995_s3 + $0x38] sm:$0xff]   ;;  %v5685_v29 = vmov 3   ;;  %v1244_v11 = vpop.permute.xlu0 %1243 }
 0x2e6   : > { %v997_v43 = vpack.c.bf16 %v975_v49, %v974_v62  ;;  %v973_v8 = vadd.f32 %v968_v15, %v953_v44  ;;  %v972_v13 = vadd.f32 %v967_v41, %v952_v51  ;;  %v1136_v52 = vand.u32 %v5914_v28, %v987_v40  ;;  %v5373_v7 = vld [vmem:[%s6995_s3 + $0x80] sm:$0xff]   ;;  %5313 = vset.pattern.permute.xlu1 %v5685_v29  ;;  %v1234_v31 = vpop.permute.xlu1 %1233 }
 0x2e7   : > { %v976_v39 = vadd.f32 %v971_v35, %v956_v30  ;;  %5314 = vset.pattern.permute.xlu0 %v5685_v29  ;;  %1450 = vperm.xlu1 %5313, %v6239_v58   ;;  %v1339_v30 = vpop.f32.mrf.mxu1 }
 0x2e8   : > { %v996_v48 = vpack.c.bf16 %v973_v8, %v972_v13  ;;  %1455 = vperm.xlu0 %5314, %v6246_v63  }
 0x2e9   : > { %v998_v61 = vpack.c.bf16 %v976_v39, %v976_v39  ;;  %v1239_v35 = vpop.permute.xlu0 %1238  ;;  %v4998_v38 = vpop.f32.mrf.mxu1 }
 0x2ea   : > { %v1224_v23 = vpop.permute.xlu1 %1223 }
 0x2eb   : > { %v1036_v50 = vand.u32 %v5914_v28, %v998_v61  ;;  %1440 = vperm.xlu1 %5313, %v6253_v4   ;;  %v1342_v20 = vpop.f32.mrf.mxu1 }
 0x2ed   : > { %4961 = vmatprep.subr.bf16.mxu0 %v1036_v50  ;;  %v1229_v14 = vpop.permute.xlu0 %1228 }
 0x2ee   : > { %4962 = vmatpush3.bf16.msra.mxu0 %v1036_v50  ;;  %v5001_v50 = vpop.f32.mrf.mxu1  ;;  %v1214_v13 = vpop.permute.xlu1 %1213 }
 0x2ef   : > { %4963 = vmatprep.subr.bf16.mxu0 %v997_v43  ;;  %1445 = vperm.xlu1 %5313, %v6259_v6  }
 0x2f2   : > { %4964 = vmatpush3.bf16.msra.mxu0 %v997_v43  ;;  %v1219_v43 = vpop.permute.xlu0 %1218 }
 0x2f3   : > { %4965 = vmatprep.subr.bf16.mxu0 %v996_v48 }
 0x2f6   : > { %4966 = vmatpush3.bf16.msra.mxu0 %v996_v48 }
 0x2f7   : > { %4975 = vmatprep.subr.bf16.mxu0 %v1136_v52 }
 0x2f9   : > { %4968 = vmatmul.mubr.msk.bf16.vlgmr.msra.gmra.mxu0 %vm1019_vm3, %v5362_v57  ;;  %v1355_v57 = vpop.f32.mrf.mxu1 }
 0x2fa   : > { %4976 = vmatpush3.bf16.msra.mxu0 %v1136_v52  ;;  %4971 = vmatprep.mubr.msk.bf16.mxu0 %vm1019_vm3, %v5363_v60 }
 0x2fb   : > { %4977 = vmatprep.subr.bf16.mxu0 %v986_v55 }
 0x2fe   : > { %4978 = vmatpush3.bf16.msra.mxu0 %v986_v55 }
 0x2ff   : > { %4979 = vmatprep.subr.bf16.mxu0 %v985_v24 }
 0x301   : > { %4972 = vmatmul.mubr.msk.bf16.gmra.mxu0 %vm1019_vm3, %v5364_v2 }
 0x302   : > { %4980 = vmatpush3.bf16.msra.mxu0 %v985_v24  ;;  %4981 = vmatprep.mubr.msk.bf16.mxu0 %vm1019_vm3, %v5365_v17 }
 0x309   : > { %4982 = vmatmul.mubr.msk.bf16.vlgmr.msra.gmra.mxu0 %vm1019_vm3, %v5366_v16 }
 0x30a   : > { %4985 = vmatprep.mubr.msk.bf16.mxu0 %vm1019_vm3, %v5369_v1 }
 0x311   : > { %4986 = vmatmul.mubr.msk.bf16.gmra.mxu0 %vm1019_vm3, %v5370_v33 }
 0x312   : > { %5011 = vmatprep.mubr.msk.bf16.mxu0 %vm1468_vm4, %v5373_v7 }
 0x3b9   : > { %v4969_v10 = vpop.f32.mrf.mxu0 }
 0x3bb   : > { %v1072_v5 = vpop.f32.mrf.mxu0 }
 0x3bd   : > { %v4970_v27 = vpop.f32.mrf.mxu0 }
 0x3bf   : > { %v1075_v56 = vpop.f32.mrf.mxu0 }
 0x3c1   : > { %v4973_v18 = vpop.f32.mrf.mxu0 }
 0x3c3   : > { %v1088_v19 = vpop.f32.mrf.mxu0 }
 0x3c5   : > { %v4974_v12 = vpop.f32.mrf.mxu0 }
 0x3c7   : > { %v1091_v21 = vpop.f32.mrf.mxu0 }
 0x3c9   : > { %v4983_v39 = vpop.f32.mrf.mxu0 }
 0x3ca   : > { %v1181_v61 = vadd.f32 %v4983_v39, %v4969_v10 }
 0x3cb   : > { %v1172_v34 = vpop.f32.mrf.mxu0 }
 0x3cc   : > { %v6264_v51 = vadd.f32 %v1224_v23, %v1181_v61  ;;  %v1173_v8 = vadd.f32 %v1172_v34, %v1072_v5 }
 0x3cd   : > { %v4984_v37 = vpop.f32.mrf.mxu0 }
 0x3ce   : > { %v1184_v49 = vadd.f32 %v4984_v37, %v4970_v27  ;;  %v6272_v55 = vadd.f32 %v4997_v25, %v6264_v51  ;;  %v6276_v16 = vadd.f32 %v1214_v13, %v1173_v8  ;;  %v5002_v27 = vpop.f32.mrf.mxu1 }
 0x3cf   : > { %v1175_v44 = vpop.f32.mrf.mxu0 }
 0x3d0   : > { %v6262_v62 = vadd.f32 %v1229_v14, %v1184_v49  ;;  %v1176_v15 = vadd.f32 %v1175_v44, %v1075_v56  ;;  %v6290_v39 = vadd.f32 %v1339_v30, %v6276_v16  ;;  %vm1380_vm12 = vcmp.gt.f32.partialorder %v6272_v55, 0.0 }
 0x3d1   : > { %v4987_v41 = vpop.f32.mrf.mxu0 }
 0x3d2   : > { %v6267_v48 = vadd.f32 %v4998_v38, %v6262_v62  ;;  %v1197_v40 = vadd.f32 %v4987_v41, %v4973_v18  ;;  %v6269_v60 = vadd.f32 %v1219_v43, %v1176_v15  ;;  %v1388_v18 = vmin.f32 %v6272_v55, 0.0 }
 0x3d3   : > { %v1188_v52 = vpop.f32.mrf.mxu0  ;;  %v1386_v44 = vmin.f32 %v6290_v39, 0.0  ;;  %vm1378_vm14 = vcmp.gt.f32.partialorder %v6290_v39, 0.0 }
 0x3d4   : > { %v6274_v24 = vadd.f32 %v1244_v11, %v1197_v40  ;;  %v1189_v2 = vadd.f32 %v1188_v52, %v1088_v19  ;;  %v1389_v1 = vmin.f32 %v6267_v48, 0.0  ;;  %v6283_v56 = vadd.f32 %v1342_v20, %v6269_v60  ;;  %v1358_v20 = vpop.f32.mrf.mxu1 }
 0x3d5   : > { %v4988_v17 = vpop.f32.mrf.mxu0  ;;  %v1398_v37 = vmul.f32 1.442695, %v1388_v18  ;;  %v1394_v43 = vmul.f32 1.442695, %v1386_v44  ;;  %vm1381_vm11 = vcmp.gt.f32.partialorder %v6267_v48, 0.0 }
 0x3d6   : > { %v1200_v33 = vadd.f32 %v4988_v17, %v4974_v12  ;;  %v6279_v7 = vadd.f32 %v1234_v31, %v1189_v2  ;;  %v1376_v10 = vadd.f32 %v5001_v50, %v6274_v24  ;;  %v1400_v12 = vmul.f32 1.442695, %v1389_v1 }
 0x3d7   : > { %v1191_v5 = vpop.f32.mrf.mxu0  ;;  %vm1379_vm13 = vcmp.gt.f32.partialorder %v6283_v56, 0.0 }
 0x3d8   : > { %v6285_v25 = vadd.f32 %v1249_v26, %v1200_v33  ;;  %v1192_v11 = vadd.f32 %v1191_v5, %v1091_v21  ;;  %v1392_v19 = vmin.f32 %v1376_v10, 0.0  ;;  %v1374_v38 = vadd.f32 %v1355_v57, %v6279_v7 }
 0x3d9   : > { %v1387_v26 = vmin.f32 %v6283_v56, 0.0  ;;  %vm1384_vm6 = vcmp.gt.f32.partialorder %v1376_v10, 0.0 }
 0x3da   : > { %v6292_v31 = vadd.f32 %v1239_v35, %v1192_v11  ;;  %v1377_v14 = vadd.f32 %v5002_v27, %v6285_v25  ;;  %v1406_v34 = vmul.f32 1.442695, %v1392_v19  ;;  %v1390_v23 = vmin.f32 %v1374_v38, 0.0 }
 0x3db   : > { %v1396_v35 = vmul.f32 1.442695, %v1387_v26  ;;  %vm1382_vm8 = vcmp.gt.f32.partialorder %v1374_v38, 0.0 }
 0x3dc   : > { %v1393_v61 = vmin.f32 %v1377_v14, 0.0  ;;  %v1375_v21 = vadd.f32 %v1358_v20, %v6292_v31  ;;  %5455 = vpow2.f32 %v1406_v34  ;;  %v1402_v49 = vmul.f32 1.442695, %v1390_v23 }
 0x3dd   : > { %5457 = vpow2.f32 %v1400_v12  ;;  %vm1385_vm7 = vcmp.gt.f32.partialorder %v1377_v14, 0.0 }
 0x3de   : > { %v1408_v30 = vmul.f32 1.442695, %v1393_v61  ;;  %v1391_v50 = vmin.f32 %v1375_v21, 0.0  ;;  %5459 = vpow2.f32 %v1402_v49  ;;  %vm1383_vm10 = vcmp.gt.f32.partialorder %v1375_v21, 0.0 }
 0x3e0   : > { %5461 = vpow2.f32 %v1408_v30  ;;  %v1404_v15 = vmul.f32 1.442695, %v1391_v50 }
 0x3e1   : > { %5463 = vpow2.f32 %v1398_v37 }
 0x3e2   : > { %5465 = vpow2.f32 %v1404_v15 }
 0x3e3   : > { %5467 = vpow2.f32 %v1396_v35 }
 0x3e4   : > { %5469 = vpow2.f32 %v1394_v43  ;;  %v1456_v43 = vpop.permute.xlu0 %1455 }
 0x3e9   : > { %v5456_v41 = vpop.eup %5455 }
 0x3ea   : > { %v5458_v8 = vpop.eup %5457  ;;  %v4561_v40 = vadd.f32 -1.0, %v5456_v41 }
 0x3eb   : > { %v5460_v13 = vpop.eup %5459  ;;  %v4558_v11 = vadd.f32 -1.0, %v5458_v8 }
 0x3ec   : > { %v4559_v17 = vadd.f32 -1.0, %v5460_v13  ;;  %v1424_v33 = vsel %vm1384_vm6, %v1376_v10, %v4561_v40 }
 0x3ed   : > { %v5462_v52 = vpop.eup %5461  ;;  %v1421_v61 = vsel %vm1381_vm11, %v6267_v48, %v4558_v11  ;;  %v5374_v48 = vld [vmem:[%s6995_s3 + $0x88] sm:$0xff]  }
 0x3ee   : > { %v5464_v57 = vpop.eup %5463  ;;  %v4562_v2 = vadd.f32 -1.0, %v5462_v52  ;;  %v1422_v12 = vsel %vm1382_vm8, %v1374_v38, %v4559_v17 }
 0x3ef   : > { %v5466_v1 = vpop.eup %5465  ;;  %v4557_v23 = vadd.f32 -1.0, %v5464_v57 }
 0x3f0   : > { %v1425_v5 = vsel %vm1385_vm7, %v1377_v14, %v4562_v2  ;;  %v4560_v27 = vadd.f32 -1.0, %v5466_v1  ;;  %v5468_v18 = vpop.eup %5467 }
 0x3f1   : > { %v1433_v19 = vpack.c.bf16 %v1425_v5, %v1424_v33  ;;  %v5470_v20 = vpop.eup %5469  ;;  %v4556_v37 = vadd.f32 -1.0, %v5468_v18  ;;  %v1420_v10 = vsel %vm1380_vm12, %v6272_v55, %v4557_v23  ;;  %v5375_v55 = vld [vmem:[%s6995_s3 + $0x90] sm:$0xff]  }
 0x3f2   : > { %v1423_v34 = vsel %vm1383_vm10, %v1375_v21, %v4560_v27  ;;  %v4555_v14 = vadd.f32 -1.0, %v5470_v20  ;;  %v1431_v38 = vpack.c.bf16 %v1421_v61, %v1420_v10  ;;  %5019 = vmatprep.mubr.msk.bf16.mxu1 %vm1584_vm15, %v5375_v55 }
 0x3f3   : > { %5003 = vmatprep.subr.bf16.mxu0 %v1433_v19  ;;  %v1432_v26 = vpack.c.bf16 %v1423_v34, %v1422_v12  ;;  %v1419_v21 = vsel %vm1379_vm13, %v6283_v56, %v4556_v37  ;;  %v5686_v56 = vmov 4  }
 0x3f4   : > { %5004 = vmatpush3.bf16.msra.mxu0 %v1433_v19  ;;  %v1418_v49 = vsel %vm1378_vm14, %v6290_v39, %v4555_v14  ;;  %5316 = vset.pattern.permute.xlu1 %v5686_v56  ;;  %v1451_v39 = vpop.permute.xlu1 %1450 }
 0x3f5   : > { %5005 = vmatprep.subr.bf16.mxu0 %v1432_v26  ;;  %v1430_v44 = vpack.c.bf16 %v1419_v21, %v1418_v49  ;;  %5315 = vset.pattern.permute.xlu0 %v5686_v56 }
 0x3f6   : > { %1571 = vperm.xlu1 %5316, %v6246_v63   ;;  %1567 = vperm.xlu0 %5315, %v6239_v58  }
 0x3f8   : > { %5006 = vmatpush3.bf16.msra.mxu0 %v1432_v26  ;;  %v1441_v50 = vpop.permute.xlu1 %1440 }
 0x3f9   : > { %5007 = vmatprep.subr.bf16.mxu0 %v1431_v38 }
 0x3fa   : > { %1559 = vperm.xlu1 %5316, %v6253_v4   ;;  %1563 = vperm.xlu0 %5315, %v6259_v6  }
 0x3fc   : > { %5008 = vmatpush3.bf16.msra.mxu0 %v1431_v38  ;;  %v1446_v1 = vpop.permute.xlu1 %1445 }
 0x3fd   : > { %5009 = vmatprep.subr.bf16.mxu0 %v1430_v44 }
 0x400   : > { %5010 = vmatpush3.bf16.msra.mxu0 %v1430_v44 }
 0x403   : > { %5012 = vmatmul.mubr.msk.bf16.vlgmr.msra.gmra.mxu0 %vm1468_vm4, %v5374_v48 }
 0x4c3   : > { %v5013_v30 = vpop.f32.mrf.mxu0 }
 0x4c4   : > { %v1518_v35 = vadd.f32 %v5013_v30, %v1451_v39 }
 0x4c5   : > { %v1509_v15 = vpop.f32.mrf.mxu0 }
 0x4c6   : > { %v1530_v41 = vmin.f32 %v1518_v35, 0.0  ;;  %v1510_v8 = vadd.f32 %v1509_v15, %v1441_v50  ;;  %vm1526_vm6 = vcmp.gt.f32.partialorder %v1518_v35, 0.0  ;;  %v5376_v50 = vld [vmem:[%s6995_s3 + $0x98] sm:$0xff]   ;;  %v5687_v15 = vmov 6  }
 0x4c7   : > { %v5014_v13 = vpop.f32.mrf.mxu0  ;;  %5317 = vset.pattern.permute.xlu1 %v5687_v15 }
 0x4c8   : > { %v1536_v40 = vmul.f32 1.442695, %v1530_v41  ;;  %v1528_v52 = vmin.f32 %v1510_v8, 0.0  ;;  %v1521_v57 = vadd.f32 %v5014_v13, %v1456_v43  ;;  %vm1524_vm8 = vcmp.gt.f32.partialorder %v1510_v8, 0.0  ;;  %v1572_v41 = vpop.permute.xlu1 %1571 }
 0x4c9   : > { %v1512_v2 = vpop.f32.mrf.mxu0  ;;  %v7001_v43 = vmov 5  }
 0x4ca   : > { %5471 = vpow2.f32 %v1536_v40  ;;  %v1532_v17 = vmul.f32 1.442695, %v1528_v52  ;;  %v1531_v33 = vmin.f32 %v1521_v57, 0.0  ;;  %v1513_v5 = vadd.f32 %v1512_v2, %v1446_v1  ;;  %5318 = vset.pattern.permute.xlu0 %v7001_v43 }
 0x4cb   : > { %vm1527_vm7 = vcmp.gt.f32.partialorder %v1521_v57, 0.0  ;;  %1679 = vperm.xlu0 %5318, %v6239_v58  }
 0x4cc   : > { %5473 = vpow2.f32 %v1532_v17  ;;  %v1538_v27 = vmul.f32 1.442695, %v1531_v33  ;;  %v1529_v11 = vmin.f32 %v1513_v5, 0.0  ;;  %vm1525_vm10 = vcmp.gt.f32.partialorder %v1513_v5, 0.0  ;;  %v1560_v40 = vpop.permute.xlu1 %1559 }
 0x4ce   : > { %5475 = vpow2.f32 %v1538_v27  ;;  %v1534_v18 = vmul.f32 1.442695, %v1529_v11 }
 0x4cf   : > { %1675 = vperm.xlu0 %5318, %v6259_v6  }
 0x4d0   : > { %5477 = vpow2.f32 %v1534_v18 }
 0x4d7   : > { %v5472_v19 = vpop.eup %5471 }
 0x4d8   : > { %v4569_v12 = vadd.f32 -1.0, %v5472_v19 }
 0x4d9   : > { %v5474_v34 = vpop.eup %5473 }
 0x4da   : > { %v4567_v20 = vadd.f32 -1.0, %v5474_v34  ;;  %v6320_v26 = vsel %vm1526_vm6, %v1518_v35, %v4569_v12  ;;  %v6350_v35 = vld [vmem:[%s6996_s4] sm:$0x1] }
 0x4db   : > { %v5476_v23 = vpop.eup %5475  ;;  %v1550_v21 = vmul.f32 %v6320_v26, %v6093_v32  ;;  %1779 = vperm.xlu1 %5317, %v6350_v35  }
 0x4dc   : > { %v4570_v61 = vadd.f32 -1.0, %v5476_v23  ;;  %v6324_v14 = vsel %vm1524_vm8, %v1510_v8, %v4567_v20  ;;  %v1568_v8 = vpop.permute.xlu0 %1567 }
 0x4dd   : > { %v5478_v37 = vpop.eup %5477  ;;  %v1548_v55 = vmul.f32 %v6324_v14, %v6093_v32 }
 0x4de   : > { %v6322_v10 = vsel %vm1527_vm7, %v1521_v57, %v4570_v61  ;;  %v4568_v38 = vadd.f32 -1.0, %v5478_v37 }
 0x4df   : > { %v1551_v49 = vmul.f32 %v6322_v10, %v6093_v32  ;;  %5319 = vset.pattern.permute.xlu1 %v7001_v43 }
 0x4e0   : > { %v6330_v44 = vsel %vm1525_vm10, %v1513_v5, %v4568_v38  ;;  %1683 = vperm.xlu1 %5319, %v6246_v63   ;;  %v1564_v12 = vpop.permute.xlu0 %1563 }
 0x4e1   : > { %v1557_v48 = vpack.c.bf16 %v1551_v49, %v1550_v21  ;;  %v1549_v39 = vmul.f32 %v6330_v44, %v6093_v32  ;;  %v5377_v32 = vld [vmem:[%s6995_s3 + $0xa0] sm:$0xff]  }
 0x4e2   : > { %5027 = vmatprep.mubr.msk.bf16.mxu0 %vm1584_vm15, %v5377_v32 }
 0x4e3   : > { %5015 = vmatprep.subr.bf16.mxu1 %v1557_v48  ;;  %v1556_v30 = vpack.c.bf16 %v1549_v39, %v1548_v55 }
 0x4e4   : > { %5016 = vmatpush3.bf16.msra.mxu1 %v1557_v48  ;;  %1671 = vperm.xlu1 %5319, %v6253_v4  }
 0x4e5   : > { %5017 = vmatprep.subr.bf16.mxu1 %v1556_v30 }
 0x4e8   : > { %5018 = vmatpush3.bf16.msra.mxu1 %v1556_v30 }
 0x4e9   : > { %5031 = vmatprep.subr.bf16.mxu1 %v5679_v0 }
 0x4eb   : > { %5020 = vmatmul.mubr.msk.bf16.vlgmr.msra.gmra.mxu1 %vm1584_vm15, %v5376_v50 }
 0x4ec   : > { %5035 = vmatprep.mubr.msk.bf16.mxu1 %vm5680_vm0, %v5679_v0 }
 0x5ab   : > { %v5021_v13 = vpop.f32.mrf.mxu1 }
 0x5ac   : > { %v1634_v52 = vadd.f32 %v5021_v13, %v1568_v8 }
 0x5ad   : > { %v1625_v57 = vpop.f32.mrf.mxu1 }
 0x5ae   : > { %v1646_v2 = vmin.f32 %v1634_v52, 0.0  ;;  %v1626_v17 = vadd.f32 %v1625_v57, %v1560_v40  ;;  %vm1642_vm11 = vcmp.gt.f32.partialorder %v1634_v52, 0.0  ;;  %v1775_v57 = vld [vmem:[%s6995_s3 + $0xb0] sm:$0x1] }
 0x5af   : > { %v5022_v1 = vpop.f32.mrf.mxu1 }
 0x5b0   : > { %v1652_v33 = vmul.f32 1.442695, %v1646_v2  ;;  %v1644_v5 = vmin.f32 %v1626_v17, 0.0  ;;  %v1637_v27 = vadd.f32 %v5022_v1, %v1572_v41  ;;  %vm1640_vm13 = vcmp.gt.f32.partialorder %v1626_v17, 0.0  ;;  %v5379_v2 = vld [vmem:[%s6995_s3 + $0xb8] sm:$0xff]   ;;  %v1780_v1 = vpop.permute.xlu1 %1779 }
 0x5b1   : > { %v1628_v11 = vpop.f32.mrf.mxu1 }
 0x5b2   : > { %5479 = vpow2.f32 %v1652_v33  ;;  %v1648_v18 = vmul.f32 1.442695, %v1644_v5  ;;  %v1647_v19 = vmin.f32 %v1637_v27, 0.0  ;;  %v1629_v34 = vadd.f32 %v1628_v11, %v1564_v12  ;;  %v1680_v5 = vpop.permute.xlu0 %1679 }
 0x5b3   : > { %vm1643_vm12 = vcmp.gt.f32.partialorder %v1637_v27, 0.0 }
 0x5b4   : > { %v1654_v23 = vmul.f32 1.442695, %v1647_v19  ;;  %5481 = vpow2.f32 %v1648_v18  ;;  %v1645_v20 = vmin.f32 %v1629_v34, 0.0  ;;  %vm1641_vm14 = vcmp.gt.f32.partialorder %v1629_v34, 0.0  ;;  %v1684_v33 = vpop.permute.xlu1 %1683 }
 0x5b6   : > { %5483 = vpow2.f32 %v1654_v23  ;;  %v1650_v61 = vmul.f32 1.442695, %v1645_v20 }
 0x5b8   : > { %5485 = vpow2.f32 %v1650_v61  ;;  %v1672_v19 = vpop.permute.xlu1 %1671 }
 0x5bf   : > { %v5480_v37 = vpop.eup %5479 }
 0x5c0   : > { %v4577_v21 = vadd.f32 -1.0, %v5480_v37 }
 0x5c1   : > { %v5482_v38 = vpop.eup %5481 }
 0x5c2   : > { %v4575_v55 = vadd.f32 -1.0, %v5482_v38  ;;  %v1662_v30 = vsel %vm1642_vm11, %v1634_v52, %v4577_v21  ;;  %v5378_v52 = vld [vmem:[%s6995_s3 + $0xa8] sm:$0xff]  }
 0x5c3   : > { %v5484_v49 = vpop.eup %5483 }
 0x5c4   : > { %v4578_v48 = vadd.f32 -1.0, %v5484_v49  ;;  %v1660_v8 = vsel %vm1640_vm13, %v1626_v17, %v4575_v55  ;;  %v7000_v17 = vmov 7  }
 0x5c5   : > { %v5486_v39 = vpop.eup %5485  ;;  %5320 = vset.pattern.permute.xlu1 %v7000_v17  ;;  %5321 = vset.pattern.permute.xlu0 %v7000_v17 }
 0x5c6   : > { %v1663_v50 = vsel %vm1643_vm12, %v1637_v27, %v4578_v48  ;;  %v4576_v41 = vadd.f32 -1.0, %v5486_v39  ;;  %1866 = vperm.xlu1 %5320, %v6239_v58   ;;  %1870 = vperm.xlu0 %5321, %v6246_v63  }
 0x5c7   : > { %v1669_v32 = vpack.c.bf16 %v1663_v50, %v1662_v30  ;;  %v1676_v50 = vpop.permute.xlu0 %1675 }
 0x5c8   : > { %v1661_v13 = vsel %vm1641_vm14, %v1629_v34, %v4576_v41 }
 0x5c9   : > { %5023 = vmatprep.subr.bf16.mxu0 %v1669_v32  ;;  %5032 = vmatpush3.bf16.msra.mxu1 %v1669_v32  ;;  %v1668_v40 = vpack.c.bf16 %v1661_v13, %v1660_v8 }
 0x5ca   : > { %5024 = vmatpush3.bf16.msra.mxu0 %v1669_v32  ;;  %5033 = vmatprep.subr.bf16.mxu1 %v5679_v0 }
 0x5cb   : > { %5025 = vmatprep.subr.bf16.mxu0 %v1668_v40  ;;  %1858 = vperm.xlu1 %5320, %v6253_v4  }
 0x5cd   : > { %5034 = vmatpush3.bf16.msra.mxu1 %v1668_v40 }
 0x5ce   : > { %5026 = vmatpush3.bf16.msra.mxu0 %v1668_v40  ;;  %5047 = vmatprep.subr.bf16.mxu1 %v5679_v0 }
 0x5cf   : > { %1862 = vperm.xlu1 %5320, %v6259_v6  }
 0x5d0   : > { %5036 = vmatmul.mubr.msk.bf16.vlgmr.msra.gmra.mxu1 %vm1584_vm15, %v1775_v57 }
 0x5d1   : > { %5028 = vmatmul.mubr.msk.bf16.vlgmr.msra.gmra.mxu0 %vm1584_vm15, %v5378_v52  ;;  %5051 = vmatprep.mubr.msk.bf16.mxu1 %vm5680_vm0, %v5679_v0 }
 0x5d2   : > { %5043 = vmatprep.mubr.msk.bf16.mxu0 %vm1584_vm15, %v5379_v2 }
 0x690   : > { %v1819_v27 = vpop.f32.mrf.mxu1 }
 0x691   : > { %v1820_v11 = vadd.f32 %v1819_v27, %v1780_v1  ;;  %v5029_v18 = vpop.f32.mrf.mxu0 }
 0x692   : > { %v1745_v12 = vadd.f32 %v5029_v18, %v1680_v5  ;;  %v5037_v34 = vpop.f32.mrf.mxu1 }
 0x693   : > { %v1826_v23 = vmin.f32 %v1820_v11, 0.0  ;;  %v1736_v20 = vpop.f32.mrf.mxu0  ;;  %vm1825_vm7 = vcmp.gt.f32.partialorder %v1820_v11, 0.0 }
 0x694   : > { %v1757_v61 = vmin.f32 %v1745_v12, 0.0  ;;  %v1737_v37 = vadd.f32 %v1736_v20, %v1672_v19  ;;  %v1822_v38 = vpop.f32.mrf.mxu1  ;;  %vm1753_vm6 = vcmp.gt.f32.partialorder %v1745_v12, 0.0 }
 0x695   : > { %v1827_v21 = vmul.f32 1.442695, %v1826_v23  ;;  %v5030_v49 = vpop.f32.mrf.mxu0 }
 0x696   : > { %v1763_v48 = vmul.f32 1.442695, %v1757_v61  ;;  %v1755_v55 = vmin.f32 %v1737_v37, 0.0  ;;  %v1748_v39 = vadd.f32 %v5030_v49, %v1684_v33  ;;  %v5038_v30 = vpop.f32.mrf.mxu1  ;;  %vm1751_vm8 = vcmp.gt.f32.partialorder %v1737_v37, 0.0 }
 0x697   : > { %5487 = vpow2.f32 %v1827_v21  ;;  %v1739_v32 = vpop.f32.mrf.mxu0 }
 0x698   : > { %5489 = vpow2.f32 %v1763_v48  ;;  %v1759_v41 = vmul.f32 1.442695, %v1755_v55  ;;  %v1758_v8 = vmin.f32 %v1748_v39, 0.0  ;;  %v1740_v13 = vadd.f32 %v1739_v32, %v1676_v50 }
 0x699   : > { %vm1754_vm10 = vcmp.gt.f32.partialorder %v1748_v39, 0.0 }
 0x69a   : > { %5491 = vpow2.f32 %v1759_v41  ;;  %v1765_v40 = vmul.f32 1.442695, %v1758_v8  ;;  %v1756_v57 = vmin.f32 %v1740_v13, 0.0  ;;  %vm1752_vm11 = vcmp.gt.f32.partialorder %v1740_v13, 0.0 }
 0x69c   : > { %5493 = vpow2.f32 %v1765_v40  ;;  %v1761_v52 = vmul.f32 1.442695, %v1756_v57 }
 0x69e   : > { %5495 = vpow2.f32 %v1761_v52 }
 0x6a4   : > { %v5488_v2 = vpop.eup %5487 }
 0x6a5   : > { %v5490_v1 = vpop.eup %5489  ;;  %v4588_v5 = vadd.f32 -1.0, %v5488_v2 }
 0x6a6   : > { %v4585_v33 = vadd.f32 -1.0, %v5490_v1 }
 0x6a7   : > { %v5492_v27 = vpop.eup %5491  ;;  %v1830_v18 = vsel %vm1825_vm7, %v1820_v11, %v4588_v5 }
 0x6a8   : > { %v4589_v19 = vclamps-f32 %v1830_v18, 30.0  ;;  %v1773_v34 = vsel %vm1753_vm6, %v1745_v12, %v4585_v33  ;;  %v4583_v23 = vadd.f32 -1.0, %v5492_v27  ;;  %v5381_v27 = vld [vmem:[%s6995_s3 + $0xd0] sm:$0xff]   ;;  %v5690_v18 = vmov 8  }
 0x6a9   : > { %v5494_v20 = vpop.eup %5493  ;;  %v1841_v61 = vadd.f32 %v1773_v34, %v6320_v26  ;;  %5322 = vset.pattern.permute.xlu0 %v5690_v18  ;;  %v5648_v34 = vld [vmem:[%s6996_s4] sm:$0xff] }
 0x6aa   : > { %v1833_v38 = vsub.f32 0.0, %v4589_v19  ;;  %v1771_v11 = vsel %vm1751_vm8, %v1737_v37, %v4583_v23  ;;  %v4586_v21 = vadd.f32 -1.0, %v5494_v20  ;;  %v6999_v19 = vmov 9   ;;  %1966 = vperm.xlu0 %5322, %v6350_v35   ;;  %v5649_v23 = vld [vmem:[%s6996_s4 + $0x8] sm:$0xff] }
 0x6ab   : > { %2279 = vst [vmem:[%s6387_s12 + $0x10] sm:$0xff] %v1841_v61  ;;  %v1839_v49 = vadd.f32 %v1771_v11, %v6324_v14  ;;  %v5496_v48 = vpop.eup %5495  ;;  %v6398_v14 = vld [vmem:[%s5992_s6] sm:$0x1]  ;;  %5323 = vset.pattern.permute.xlu1 %v6999_v19  ;;  %v5692_v20 = vmov 10  }
 0x6ac   : > { %v1834_v55 = vmul.f32 1.442695, %v1833_v38  ;;  %v1774_v30 = vsel %vm1754_vm10, %v1748_v39, %v4586_v21  ;;  %v4584_v50 = vadd.f32 -1.0, %v5496_v48  ;;  %2029 = vperm.xlu1 %5323, %v5648_v34   ;;  %v1871_v48 = vpop.permute.xlu0 %1870 }
 0x6ad   : > { %2277 = vst [vmem:[%s6387_s12] sm:$0xff] %v1839_v49  ;;  %v1842_v12 = vadd.f32 %v1774_v30, %v6322_v10 }
 0x6ae   : > { %5497 = vpow2.f32 %v1834_v55  ;;  %v1772_v26 = vsel %vm1752_vm11, %v1740_v13, %v4584_v50  ;;  %5324 = vset.pattern.permute.xlu0 %v5692_v20  ;;  %vm2229_vm11 = vcmask 1043456  }
 0x6af   : > { %2280 = vst [vmem:[%s6387_s12 + $0x18] sm:$0xff] %v1842_v12  ;;  %v1840_v32 = vadd.f32 %v1772_v26, %v6330_v44  ;;  %v5380_v44 = vld [vmem:[%s6995_s3 + $0xc0] sm:$0xff]   ;;  %v2023_v5 = vpack.c.bf16 %v1842_v12, %v1841_v61  ;;  %2141 = vperm.xlu0 %5324, %v5648_v34  }
 0x6b0   : > { %2033 = vperm.xlu1 %5323, %v5649_v23  }
 0x6b1   : > { %2278 = vst [vmem:[%s6387_s12 + $0x8] sm:$0xff] %v1840_v32  ;;  %v2022_v33 = vpack.c.bf16 %v1840_v32, %v1839_v49 }
 0x6b3   : > { %5327 = vset.pattern.permute.xlu0 %v5685_v29 }
 0x6b4   : > { %5325 = vset.pattern.permute.xlu1 %v5692_v20  ;;  %2475 = vperm.xlu0 %5327, %v6239_v58  }
 0x6b5   : > { %2145 = vperm.xlu1 %5325, %v5649_v23  }
 0x6b8   : > { %2470 = vperm.xlu0 %5327, %v6259_v6  }
 0x6bb   : > { %v5498_v37 = vpop.eup %5497 }
 0x6bc   : > { %v1836_v41 = vadd.f32 1.0, %v5498_v37  ;;  %5330 = vset.pattern.permute.xlu0 %v5686_v56 }
 0x6bd   : > { %2601 = vperm.xlu0 %5330, %v6246_v63  }
 0x6be   : > { %5499 = vrcp.f32 %v1836_v41 }
 0x6c1   : > { %5331 = vset.pattern.permute.xlu0 %v5687_v15 }
 0x6cb   : > { %v5500_v8 = vpop.eup %5499 }
 0x6cc   : > { %v1838_v40 = vmul.f32 %v6398_v14, %v5500_v8 }
 0x6ce   : > { %v1846_v39 = vrot.slane %v1838_v40, %v6061_v22 }
 0x6d0   : > { %v1849_v57 = vmul.f32 %v1846_v39, %v1841_v61  ;;  %v1850_v52 = vmul.f32 %v1846_v39, %v1842_v12  ;;  %v1847_v10 = vmul.f32 %v1846_v39, %v1839_v49  ;;  %v1848_v2 = vmul.f32 %v1846_v39, %v1840_v32  ;;  %v1867_v61 = vpop.permute.xlu1 %1866 }
 0x6d2   : > { %v1856_v1 = vpack.c.bf16 %v1850_v52, %v1849_v57  ;;  %v1855_v13 = vpack.c.bf16 %v1848_v2, %v1847_v10 }
 0x6d4   : > { %5039 = vmatprep.subr.bf16.mxu0 %v1856_v1  ;;  %v1859_v11 = vpop.permute.xlu1 %1858 }
 0x6d5   : > { %5040 = vmatpush3.bf16.msra.mxu0 %v1856_v1 }
 0x6d6   : > { %5041 = vmatprep.subr.bf16.mxu0 %v1855_v13 }
 0x6d8   : > { %v1863_v8 = vpop.permute.xlu1 %1862 }
 0x6d9   : > { %5042 = vmatpush3.bf16.msra.mxu0 %v1855_v13 }
 0x6da   : > { %5055 = vmatprep.subr.bf16.mxu0 %v5679_v0 }
 0x6dc   : > { %5044 = vmatmul.mubr.msk.bf16.vlgmr.msra.gmra.mxu0 %vm1584_vm15, %v5380_v44 }
 0x6dd   : > { %5056 = vmatpush3.bf16.msra.mxu0 %v2023_v5  ;;  %5059 = vmatprep.mubr.msk.bf16.mxu0 %vm5680_vm0, %v5679_v0 }
 0x6de   : > { %5057 = vmatprep.subr.bf16.mxu0 %v5679_v0 }
 0x6e1   : > { %5058 = vmatpush3.bf16.msra.mxu0 %v2022_v33 }
 0x6e2   : > { %5069 = vmatprep.subr.bf16.mxu0 %v5679_v0 }
 0x6e4   : > { %5060 = vmatmul.mubr.msk.bf16.vlgmr.msra.gmra.mxu0 %vm1584_vm15, %v5381_v27 }
 0x6e5   : > { %5071 = vmatprep.mubr.msk.bf16.mxu0 %vm5680_vm0, %v5679_v0 }
 0x79c   : > { %v5045_v38 = vpop.f32.mrf.mxu0 }
 0x79d   : > { %v1932_v21 = vadd.f32 %v5045_v38, %v1867_v61 }
 0x79e   : > { %v1923_v49 = vpop.f32.mrf.mxu0 }
 0x79f   : > { %v1944_v55 = vmin.f32 %v1932_v21, 0.0  ;;  %v1924_v30 = vadd.f32 %v1923_v49, %v1859_v11  ;;  %vm1940_vm12 = vcmp.gt.f32.partialorder %v1932_v21, 0.0 }
 0x7a0   : > { %v5046_v12 = vpop.f32.mrf.mxu0 }
 0x7a1   : > { %v1950_v50 = vmul.f32 1.442695, %v1944_v55  ;;  %v1942_v26 = vmin.f32 %v1924_v30, 0.0  ;;  %v1935_v32 = vadd.f32 %v5046_v12, %v1871_v48  ;;  %vm1938_vm6 = vcmp.gt.f32.partialorder %v1924_v30, 0.0  ;;  %v1962_v55 = vld [vmem:[%s6995_s3 + $0xc8] sm:$0x1] }
 0x7a2   : > { %v1926_v37 = vpop.f32.mrf.mxu0 }
 0x7a3   : > { %5501 = vpow2.f32 %v1950_v50  ;;  %v1946_v41 = vmul.f32 1.442695, %v1942_v26  ;;  %v1945_v40 = vmin.f32 %v1935_v32, 0.0  ;;  %v1927_v39 = vadd.f32 %v1926_v37, %v1863_v8 }
 0x7a4   : > { %vm1941_vm13 = vcmp.gt.f32.partialorder %v1935_v32, 0.0 }
 0x7a5   : > { %v1952_v57 = vmul.f32 1.442695, %v1945_v40  ;;  %5503 = vpow2.f32 %v1946_v41  ;;  %v1943_v52 = vmin.f32 %v1927_v39, 0.0  ;;  %vm1939_vm14 = vcmp.gt.f32.partialorder %v1927_v39, 0.0 }
 0x7a7   : > { %5505 = vpow2.f32 %v1952_v57  ;;  %v1948_v10 = vmul.f32 1.442695, %v1943_v52 }
 0x7a9   : > { %5507 = vpow2.f32 %v1948_v10 }
 0x7b0   : > { %v5502_v2 = vpop.eup %5501 }
 0x7b1   : > { %v4596_v13 = vadd.f32 -1.0, %v5502_v2 }
 0x7b2   : > { %v5504_v1 = vpop.eup %5503 }
 0x7b3   : > { %v1960_v27 = vsel %vm1940_vm12, %v1932_v21, %v4596_v13  ;;  %v4594_v34 = vadd.f32 -1.0, %v5504_v1  ;;  %v5382_v21 = vld [vmem:[%s6995_s3 + $0xd8] sm:$0xff]   ;;  %vm2225_vm12 = vcmask 64512  }
 0x7b4   : > { %v5506_v44 = vpop.eup %5505 }
 0x7b5   : > { %v4597_v5 = vadd.f32 -1.0, %v5506_v44  ;;  %v1958_v49 = vsel %vm1938_vm6, %v1924_v30, %v4594_v34  ;;  %v2080_v30 = vpop.f32.mrf.mxu0 }
 0x7b6   : > { %v5508_v33 = vpop.eup %5507 }
 0x7b7   : > { %v1961_v23 = vsel %vm1941_vm13, %v1935_v32, %v4597_v5  ;;  %v4595_v38 = vadd.f32 -1.0, %v5508_v33  ;;  %v5061_v12 = vpop.f32.mrf.mxu0  ;;  %v5693_v32 = vmov 11   ;;  %v2030_v33 = vpop.permute.xlu1 %2029 }
 0x7b8   : > { %v1964_v61 = vpack.c.bf16 %v1961_v23, %v1960_v27  ;;  %5326 = vset.pattern.permute.xlu1 %v5693_v32 }
 0x7b9   : > { %v1959_v11 = vsel %vm1939_vm14, %v1927_v39, %v4595_v38  ;;  %v2083_v50 = vpop.f32.mrf.mxu0  ;;  %2167 = vperm.xlu1 %5326, %v6253_v4  }
 0x7ba   : > { %5048 = vmatpush3.bf16.msra.mxu1 %v1964_v61  ;;  %v1963_v48 = vpack.c.bf16 %v1959_v11, %v1958_v49 }
 0x7bb   : > { %5049 = vmatprep.subr.bf16.mxu1 %v5679_v0  ;;  %v5062_v26 = vpop.f32.mrf.mxu0  ;;  %v2034_v23 = vpop.permute.xlu1 %2033 }
 0x7bd   : > { %5328 = vset.pattern.permute.xlu1 %v5685_v29 }
 0x7be   : > { %5050 = vmatpush3.bf16.msra.mxu1 %v1963_v48  ;;  %2480 = vperm.xlu1 %5328, %v6246_v63  }
 0x7bf   : > { %5063 = vmatprep.subr.bf16.mxu1 %v5679_v0  ;;  %v2146_v49 = vpop.permute.xlu1 %2145 }
 0x7c1   : > { %5052 = vmatmul.mubr.msk.bf16.vlgmr.msra.gmra.mxu1 %vm1584_vm15, %v1962_v55 }
 0x7c2   : > { %5064 = vmatpush3.bf16.msra.mxu1 %v5777_v9  ;;  %5065 = vmatprep.mubr.msk.bf16.mxu1 %vm5680_vm0, %v5679_v0  ;;  %v1967_v9 = vpop.permute.xlu0 %1966 }
 0x7c3   : > { %5075 = vmatprep.subr.bf16.mxu1 %v5679_v0  ;;  %2465 = vperm.xlu1 %5328, %v6253_v4  }
 0x7c6   : > { %v2142_v48 = vpop.permute.xlu0 %2141 }
 0x7c7   : > { %5329 = vset.pattern.permute.xlu1 %v5686_v56 }
 0x7c8   : > { %2597 = vperm.xlu1 %5329, %v6239_v58  }
 0x7c9   : > { %5066 = vmatmul.mubr.msk.bf16.vlgmr.msra.gmra.mxu1 %vm337_vm2, %v5382_v21 }
 0x7ca   : > { %5077 = vmatprep.mubr.msk.bf16.mxu1 %vm5680_vm0, %v5679_v0 }
 0x7cc   : > { %2589 = vperm.xlu1 %5329, %v6253_v4  }
 0x7d0   : > { %2593 = vperm.xlu1 %5329, %v6259_v6  }
 0x7d4   : > { %5332 = vset.pattern.permute.xlu1 %v7001_v43 }
 0x7d5   : > { %2708 = vperm.xlu1 %5332, %v6239_v58  }
 0x7d9   : > { %2712 = vperm.xlu1 %5332, %v6246_v63  }
 0x7dd   : > { %2704 = vperm.xlu1 %5332, %v6259_v6  }
 0x7e1   : > { %5334 = vset.pattern.permute.xlu1 %v7000_v17 }
 0x7e2   : > { %2895 = vperm.xlu1 %5334, %v6239_v58  }
 0x7e6   : > { %2887 = vperm.xlu1 %5334, %v6253_v4  }
 0x7ea   : > { %2891 = vperm.xlu1 %5334, %v6259_v6  }
 0x7ee   : > { %5337 = vset.pattern.permute.xlu1 %v6999_v19 }
 0x7ef   : > { %3061 = vperm.xlu1 %5337, %v6253_v4  }
 0x881   : > { %v2006_v37 = vpop.f32.mrf.mxu1 }
 0x882   : > { %v2007_v41 = vadd.f32 %v2006_v37, %v1967_v9 }
 0x883   : > { %v5053_v8 = vpop.f32.mrf.mxu1 }
 0x884   : > { %v4599_v40 = vclamps-f32 %v2007_v41, 30.0 }
 0x885   : > { %v2009_v39 = vpop.f32.mrf.mxu1 }
 0x886   : > { %v2014_v57 = vsub.f32 0.0, %v4599_v40 }
 0x887   : > { %v5054_v52 = vpop.f32.mrf.mxu1 }
 0x888   : > { %v2015_v10 = vmul.f32 1.442695, %v2014_v57 }
 0x889   : > { %v2131_v2 = vpop.f32.mrf.mxu1 }
 0x88a   : > { %5509 = vpow2.f32 %v2015_v10 }
 0x88b   : > { %v5067_v1 = vpop.f32.mrf.mxu1 }
 0x88c   : > { %v5383_v1 = vld [vmem:[%s6995_s3 + $0x60] sm:$0xff]  }
 0x88d   : > { %v2134_v13 = vpop.f32.mrf.mxu1 }
 0x88f   : > { %v5068_v44 = vpop.f32.mrf.mxu1 }
 0x890   : > { %v5384_v44 = vld [vmem:[%s6995_s3 + $0x68] sm:$0xff]  }
 0x897   : > { %v5510_v63 = vpop.eup %5509 }
 0x898   : > { %v2017_v5 = vadd.f32 1.0, %v5510_v63  ;;  %v5385_v63 = vld [vmem:[%s6995_s3 + $0x70] sm:$0xff]  }
 0x89a   : > { %5511 = vrcp.f32 %v2017_v5  ;;  %v6521_v5 = vld [vmem:[%s6996_s4 + $0x10] sm:$0xff] }
 0x8a7   : > { %v5512_v27 = vpop.eup %5511 }
 0x8a8   : > { %v6470_v34 = vmul.f32 %v6398_v14, %v5512_v27  ;;  %v6535_v27 = vld [vmem:[%s6996_s4] sm:$0x1] }
 0x8aa   : > { %v2027_v58 = vrot.slane %v6470_v34, %v6061_v22 }
 0x8ac   : > { %v2036_v61 = vmul.f32 %v2030_v33, %v2027_v58  ;;  %v2037_v38 = vmul.f32 %v2034_v23, %v2027_v58  ;;  %v6527_v33 = vld [vmem:[%s6996_s4 + $0x8] sm:$0xff]  ;;  %v6542_v58 = vld [vmem:[%s6996_s4] sm:$0xff]  ;;  %v2168_v23 = vpop.permute.xlu1 %2167 }
 0x8ae   : > { %v2081_v11 = vadd.f32 %v2080_v30, %v2036_v61  ;;  %v2084_v6 = vadd.f32 %v2083_v50, %v2037_v38  ;;  %v2294_v30 = vpack.c.bf16 %v6121_v53, %v6121_v53  ;;  %v2293_v53 = vpack.c.bf16 %v6097_v46, %v6074_v36  ;;  %v5386_v36 = vld [vmem:[%s6995_s3 + $0x78] sm:$0xff]  }
 0x8af   : > { %v6512_v46 = vld [vmem:[%s6996_s4 + $0x18] sm:$0xff] }
 0x8b0   : > { %v2138_v55 = vadd.f32 %v2131_v2, %v2081_v11  ;;  %v2139_v21 = vadd.f32 %v2134_v13, %v2084_v6  ;;  %v2328_v10 = vand.u32 %v2294_v30, %v5914_v28  ;;  %v2162_v2 = vld [vmem:[%s6995_s3 + $0xe0] sm:$0xf]  ;;  %v2292_v13 = vpack.c.bf16 %v6087_v42, %v6095_v45 }
 0x8b1   : > { %v2805_v42 = vld [vmem:[%s6996_s4] sm:$0x1] }
 0x8b2   : > { %v2149_v12 = vadd.f32 %v2146_v49, %v2139_v21  ;;  %v2148_v26 = vadd.f32 %v2142_v48, %v2138_v55  ;;  %2808 = vperm.xlu0 %5331, %v2805_v42   ;;  %v5650_v45 = vld [vmem:[%s6996_s4] sm:$0xff] }
 0x8b4   : > { %v2153_v4 = vmin.f32 %v2149_v12, 0.0  ;;  %v2152_v9 = vmin.f32 %v2148_v26, 0.0  ;;  %vm2151_vm7 = vcmp.gt.f32.partialorder %v2149_v12, 0.0  ;;  %vm2150_vm8 = vcmp.gt.f32.partialorder %v2148_v26, 0.0 }
 0x8b6   : > { %v2156_v37 = vmul.f32 1.442695, %v2153_v4  ;;  %v2154_v41 = vmul.f32 1.442695, %v2152_v9  ;;  %5333 = vset.pattern.permute.xlu0 %v7001_v43 }
 0x8b7   : > { %2700 = vperm.xlu0 %5333, %v5650_v45  }
 0x8b8   : > { %5513 = vpow2.f32 %v2156_v37 }
 0x8b9   : > { %5515 = vpow2.f32 %v2154_v41 }
 0x8bb   : > { %5335 = vset.pattern.permute.xlu0 %v7000_v17 }
 0x8bc   : > { %2899 = vperm.xlu0 %5335, %v6512_v46  }
 0x8c0   : > { %5336 = vset.pattern.permute.xlu0 %v5690_v18 }
 0x8c1   : > { %2995 = vperm.xlu0 %5336, %v2805_v42  }
 0x8c5   : > { %v5514_v14 = vpop.eup %5513  ;;  %5338 = vset.pattern.permute.xlu0 %v5692_v20 }
 0x8c6   : > { %v5516_v8 = vpop.eup %5515  ;;  %v4605_v40 = vadd.f32 -1.0, %v5514_v14  ;;  %3179 = vperm.xlu0 %5338, %v5650_v45  }
 0x8c7   : > { %v4604_v39 = vadd.f32 -1.0, %v5516_v8 }
 0x8c8   : > { %v2161_v50 = vsel %vm2151_vm7, %v2149_v12, %v4605_v40 }
 0x8c9   : > { %v2160_v57 = vsel %vm2150_vm8, %v2148_v26, %v4604_v39 }
 0x8ca   : > { %v2163_v52 = vpack.c.bf16 %v2161_v50, %v2160_v57  ;;  %5341 = vset.pattern.permute.xlu0 %v5685_v29 }
 0x8cb   : > { %3512 = vperm.xlu0 %5341, %v6521_v5  }
 0x8cc   : > { %5070 = vmatpush3.bf16.msra.mxu0 %v2163_v52 }
 0x8cd   : > { %5081 = vmatprep.subr.bf16.mxu0 %v2328_v10 }
 0x8cf   : > { %5072 = vmatmul.mubr.msk.bf16.vlgmr.msra.gmra.mxu0 %vm447_vm5, %v2162_v2  ;;  %3507 = vperm.xlu0 %5341, %v6527_v33  }
 0x8d0   : > { %5082 = vmatpush3.bf16.msra.mxu0 %v2328_v10  ;;  %5087 = vmatprep.mubr.msk.bf16.mxu0 %vm1019_vm3, %v5383_v1 }
 0x8d1   : > { %5083 = vmatprep.subr.bf16.mxu0 %v2293_v53 }
 0x8d3   : > { %5344 = vset.pattern.permute.xlu0 %v5686_v56 }
 0x8d4   : > { %5084 = vmatpush3.bf16.msra.mxu0 %v2293_v53  ;;  %3638 = vperm.xlu0 %5344, %v6512_v46  }
 0x8d5   : > { %5085 = vmatprep.subr.bf16.mxu0 %v2292_v13 }
 0x8d8   : > { %5086 = vmatpush3.bf16.msra.mxu0 %v2292_v13  ;;  %5345 = vset.pattern.permute.xlu0 %v5687_v15  ;;  %v6998_v15 = vmov 12  }
 0x8d9   : > { %3845 = vperm.xlu0 %5345, %v6535_v27  }
 0x8db   : > { %5088 = vmatmul.mubr.msk.bf16.vlgmr.msra.gmra.mxu0 %vm1019_vm3, %v5384_v44 }
 0x8dc   : > { %5091 = vmatprep.mubr.msk.bf16.mxu0 %vm1019_vm3, %v5385_v63 }
 0x8dd   : > { %5347 = vset.pattern.permute.xlu0 %v7001_v43 }
 0x8de   : > { %3737 = vperm.xlu0 %5347, %v6542_v58  }
 0x8e2   : > { %5349 = vset.pattern.permute.xlu0 %v7000_v17 }
 0x8e3   : > { %5092 = vmatmul.mubr.msk.bf16.gmra.mxu0 %vm1019_vm3, %v5386_v36  ;;  %3936 = vperm.xlu0 %5349, %v6512_v46  }
 0x8e7   : > { %5350 = vset.pattern.permute.xlu0 %v5690_v18 }
 0x8e8   : > { %4032 = vperm.xlu0 %5350, %v6535_v27  }
 0x8ec   : > { %5352 = vset.pattern.permute.xlu0 %v5692_v20 }
 0x8ed   : > { %4216 = vperm.xlu0 %5352, %v6542_v58  }
 0x8f1   : > { %5355 = vset.pattern.permute.xlu0 %v6998_v15 }
 0x8f2   : > { %2222 = vperm.xlu0 %5355, %v6350_v35  }
 0x98f   : > { %v2207_v61 = vpop.f32.mrf.mxu0 }
 0x990   : > { %v2208_v38 = vadd.f32 %v2207_v61, %v2168_v23 }
 0x991   : > { %v5073_v11 = vpop.f32.mrf.mxu0 }
 0x992   : > { %v2214_v6 = vmin.f32 %v2208_v38, 0.0  ;;  %vm2213_vm10 = vcmp.gt.f32.partialorder %v2208_v38, 0.0  ;;  %v5387_v11 = vld [vmem:[%s6995_s3 + $0x80] sm:$0xff]  }
 0x993   : > { %v2210_v49 = vpop.f32.mrf.mxu0 }
 0x994   : > { %v2215_v48 = vmul.f32 1.442695, %v2214_v6 }
 0x995   : > { %v5074_v55 = vpop.f32.mrf.mxu0 }
 0x996   : > { %5517 = vpow2.f32 %v2215_v48 }
 0x99b   : > { %v5089_v18 = vpop.f32.mrf.mxu0 }
 0x99c   : > { %v6558_v37 = vadd.f32 %v5089_v18, %v6264_v51 }
 0x99d   : > { %v2364_v21 = vpop.f32.mrf.mxu0 }
 0x99e   : > { %v2413_v52 = vmin.f32 %v6558_v37, 0.0  ;;  %v6568_v1 = vadd.f32 %v2364_v21, %v6276_v16 }
 0x99f   : > { %v5090_v12 = vpop.f32.mrf.mxu0 }
 0x9a0   : > { %v6555_v26 = vadd.f32 %v5090_v12, %v6262_v62  ;;  %v2423_v6 = vmul.f32 1.442695, %v2413_v52  ;;  %v2411_v48 = vmin.f32 %v6568_v1, 0.0 }
 0x9a1   : > { %v2367_v4 = vpop.f32.mrf.mxu0 }
 0x9a2   : > { %v2414_v14 = vmin.f32 %v6555_v26, 0.0  ;;  %v6563_v30 = vadd.f32 %v2367_v4, %v6269_v60  ;;  %v2419_v4 = vmul.f32 1.442695, %v2411_v48  ;;  %vm2406_vm8 = vcmp.gt.f32.partialorder %v6555_v26, 0.0 }
 0x9a3   : > { %v5518_v9 = vpop.eup %5517  ;;  %v5093_v35 = vpop.f32.mrf.mxu0 }
 0x9a4   : > { %v4607_v41 = vadd.f32 -1.0, %v5518_v9  ;;  %v2401_v8 = vadd.f32 %v5093_v35, %v6274_v24  ;;  %v2425_v53 = vmul.f32 1.442695, %v2414_v14  ;;  %v2412_v45 = vmin.f32 %v6563_v30, 0.0 }
 0x9a5   : > { %v2380_v40 = vpop.f32.mrf.mxu0 }
 0x9a6   : > { %v2218_v39 = vsel %vm2213_vm10, %v2208_v38, %v4607_v41  ;;  %v2417_v50 = vmin.f32 %v2401_v8, 0.0  ;;  %v2399_v10 = vadd.f32 %v2380_v40, %v6279_v7  ;;  %v2219_v38 = vld [vmem:[%s6995_s3 + $0xe8] sm:$0x1]  ;;  %v2421_v21 = vmul.f32 1.442695, %v2412_v45 }
 0x9a7   : > { %v2220_v57 = vpack.c.bf16 %v2218_v39, %v2218_v39  ;;  %v5094_v2 = vpop.f32.mrf.mxu0  ;;  %vm2409_vm13 = vcmp.gt.f32.partialorder %v2401_v8, 0.0  ;;  %vm2405_vm10 = vcmp.gt.f32.partialorder %v6558_v37, 0.0 }
 0x9a8   : > { %v2431_v13 = vmul.f32 1.442695, %v2417_v50  ;;  %v2402_v44 = vadd.f32 %v5094_v2, %v6285_v25  ;;  %v2415_v63 = vmin.f32 %v2399_v10, 0.0  ;;  %vm2407_vm6 = vcmp.gt.f32.partialorder %v2399_v10, 0.0 }
 0x9a9   : > { %v2383_v36 = vpop.f32.mrf.mxu0  ;;  %v2231_v42 = vsel %vm2229_vm11, %v2220_v57, 0 }
 0x9aa   : > { %5519 = vpow2.f32 %v2431_v13  ;;  %v2418_v23 = vmin.f32 %v2402_v44, 0.0  ;;  %v2400_v61 = vadd.f32 %v2383_v36, %v6292_v31  ;;  %5076 = vmatpush3.bf16.msra.mxu1 %v2231_v42  ;;  %v2427_v49 = vmul.f32 1.442695, %v2415_v63 }
 0x9ab   : > { %5521 = vpow2.f32 %v2425_v53  ;;  %vm2410_vm14 = vcmp.gt.f32.partialorder %v2402_v44, 0.0 }
 0x9ac   : > { %v2433_v55 = vmul.f32 1.442695, %v2418_v23  ;;  %v2416_v18 = vmin.f32 %v2400_v61, 0.0  ;;  %5523 = vpow2.f32 %v2427_v49  ;;  %vm2408_vm7 = vcmp.gt.f32.partialorder %v2400_v61, 0.0 }
 0x9ad   : > { %5078 = vmatmul.mubr.msk.bf16.vlgmr.msra.gmra.mxu1 %vm2225_vm12, %v2219_v38 }
 0x9ae   : > { %5525 = vpow2.f32 %v2433_v55  ;;  %v2429_v12 = vmul.f32 1.442695, %v2416_v18  ;;  %5103 = vmatprep.mubr.msk.bf16.mxu1 %vm1468_vm4, %v5387_v11 }
 0x9af   : > { %5527 = vpow2.f32 %v2423_v6 }
 0x9b0   : > { %5529 = vpow2.f32 %v2429_v12 }
 0x9b1   : > { %5531 = vpow2.f32 %v2421_v21 }
 0x9b2   : > { %5533 = vpow2.f32 %v2419_v4 }
 0x9b7   : > { %v5520_v9 = vpop.eup %5519 }
 0x9b8   : > { %v5522_v35 = vpop.eup %5521  ;;  %v4624_v14 = vadd.f32 -1.0, %v5520_v9 }
 0x9b9   : > { %v5524_v41 = vpop.eup %5523  ;;  %v4621_v63 = vadd.f32 -1.0, %v5522_v35 }
 0x9ba   : > { %v4622_v57 = vadd.f32 -1.0, %v5524_v41  ;;  %v2449_v2 = vsel %vm2409_vm13, %v2401_v8, %v4624_v14  ;;  %vm2404_vm13 = vcmp.gt.f32.partialorder %v6563_v30, 0.0  ;;  %v5389_v41 = vld [vmem:[%s6995_s3 + $0x90] sm:$0xff]  }
 0x9bb   : > { %v5526_v40 = vpop.eup %5525  ;;  %v2446_v49 = vsel %vm2406_vm8, %v6555_v26, %v4621_v63  ;;  %v5388_v26 = vld [vmem:[%s6995_s3 + $0x88] sm:$0xff]  }
 0x9bc   : > { %v5528_v39 = vpop.eup %5527  ;;  %v4625_v50 = vadd.f32 -1.0, %v5526_v40  ;;  %v2447_v45 = vsel %vm2407_vm6, %v2399_v10, %v4622_v57 }
 0x9bd   : > { %v5530_v52 = vpop.eup %5529  ;;  %v4620_v38 = vadd.f32 -1.0, %v5528_v39 }
 0x9be   : > { %v2450_v53 = vsel %vm2410_vm14, %v2402_v44, %v4625_v50  ;;  %v4623_v13 = vadd.f32 -1.0, %v5530_v52  ;;  %v5532_v36 = vpop.eup %5531  ;;  %vm2403_vm14 = vcmp.gt.f32.partialorder %v6568_v1, 0.0 }
 0x9bf   : > { %v2458_v42 = vpack.c.bf16 %v2450_v53, %v2449_v2  ;;  %v5534_v11 = vpop.eup %5533  ;;  %v4619_v48 = vadd.f32 -1.0, %v5532_v36  ;;  %v2445_v8 = vsel %vm2405_vm10, %v6558_v37, %v4620_v38  ;;  %v2476_v37 = vpop.permute.xlu0 %2475 }
 0x9c0   : > { %v2448_v23 = vsel %vm2408_vm7, %v2400_v61, %v4623_v13  ;;  %v4618_v44 = vadd.f32 -1.0, %v5534_v11  ;;  %v2456_v10 = vpack.c.bf16 %v2446_v49, %v2445_v8 }
 0x9c1   : > { %5095 = vmatprep.subr.bf16.mxu1 %v2458_v42  ;;  %v2457_v6 = vpack.c.bf16 %v2448_v23, %v2447_v45  ;;  %v2444_v61 = vsel %vm2404_vm13, %v6563_v30, %v4619_v48 }
 0x9c2   : > { %5096 = vmatpush3.bf16.msra.mxu1 %v2458_v42  ;;  %v2443_v55 = vsel %vm2403_vm14, %v6568_v1, %v4618_v44 }
 0x9c3   : > { %5097 = vmatprep.subr.bf16.mxu1 %v2457_v6  ;;  %v2455_v18 = vpack.c.bf16 %v2444_v61, %v2443_v55  ;;  %v2471_v21 = vpop.permute.xlu0 %2470 }
 0x9c6   : > { %5098 = vmatpush3.bf16.msra.mxu1 %v2457_v6  ;;  %v2481_v6 = vpop.permute.xlu1 %2480 }
 0x9c7   : > { %5099 = vmatprep.subr.bf16.mxu1 %v2456_v10  ;;  %v6595_v12 = vpop.permute.xlu0 %2601 }
 0x9ca   : > { %5100 = vmatpush3.bf16.msra.mxu1 %v2456_v10  ;;  %v2466_v48 = vpop.permute.xlu1 %2465 }
 0x9cb   : > { %5101 = vmatprep.subr.bf16.mxu1 %v2455_v18  ;;  %v6597_v30 = vpop.permute.xlu0 %2808 }
 0x9ce   : > { %5102 = vmatpush3.bf16.msra.mxu1 %v2455_v18 }
 0x9cf   : > { %v6599_v4 = vpop.permute.xlu0 %2700 }
 0x9d1   : > { %5104 = vmatmul.mubr.msk.bf16.vlgmr.msra.gmra.mxu1 %vm1468_vm4, %v5388_v26 }
 0x9d2   : > { %5111 = vmatprep.mubr.msk.bf16.mxu1 %vm1584_vm15, %v5389_v41 }
 0x9d3   : > { %v6601_v9 = vpop.permute.xlu0 %2899 }
 0x9d7   : > { %v6603_v1 = vpop.permute.xlu0 %2995 }
 0x9db   : > { %v6605_v35 = vpop.permute.xlu0 %3179 }
 0x9df   : > { %v6611_v14 = vpop.permute.xlu0 %3512 }
 0x9e3   : > { %v6613_v40 = vpop.permute.xlu0 %3507 }
 0x9e7   : > { %v6615_v39 = vpop.permute.xlu0 %3638 }
 0x9eb   : > { %v6617_v50 = vpop.permute.xlu0 %3845 }
 0x9ef   : > { %v6619_v57 = vpop.permute.xlu0 %3737 }
 0x9f3   : > { %v6621_v52 = vpop.permute.xlu0 %3936 }
 0x9f7   : > { %v6623_v2 = vpop.permute.xlu0 %4032 }
 0x9fb   : > { %v6625_v53 = vpop.permute.xlu0 %4216 }
 0x9ff   : > { %v2223_v13 = vpop.permute.xlu0 %2222 }
 0xa6d   : > { %v2267_v63 = vpop.f32.mrf.mxu1 }
 0xa6e   : > { %v2268_v36 = vadd.f32 %v2267_v63, %v2223_v13 }
 0xa6f   : > { %v5079_v42 = vpop.f32.mrf.mxu1 }
 0xa70   : > { %v2274_v45 = vrot.slane %v2268_v36, 7 }
 0xa71   : > { %v2270_v23 = vpop.f32.mrf.mxu1 }
 0xa72   : > { %v2276_v38 = vsel %vm1032_vm9, %v6470_v34, %v2274_v45 }
 0xa73   : > { %2281 = vst [vmem:[%s6387_s12 + $0x20] sm:$0x3] %v2276_v38  ;;  %v5080_v11 = vpop.f32.mrf.mxu1 }
 0xa91   : > { %v5105_v49 = vpop.f32.mrf.mxu1 }
 0xa92   : > { %v2542_v8 = vadd.f32 %v5105_v49, %v2476_v37  ;;  %v6631_v37 = vld [vmem:[%s5992_s6 + $0x1] sm:$0x1] }
 0xa93   : > { %v2533_v44 = vpop.f32.mrf.mxu1  ;;  %v2283_v11 = vmul.f32 %v6051_v54, %v6631_v37 }
 0xa94   : > { %v2554_v10 = vmin.f32 %v2542_v8, 0.0  ;;  %v2534_v61 = vadd.f32 %v2533_v44, %v2466_v48  ;;  %vm2550_vm6 = vcmp.gt.f32.partialorder %v2542_v8, 0.0 }
 0xa95   : > { %v5106_v55 = vpop.f32.mrf.mxu1 }
 0xa96   : > { %v2560_v18 = vmul.f32 1.442695, %v2554_v10  ;;  %v2552_v26 = vmin.f32 %v2534_v61, 0.0  ;;  %v2545_v41 = vadd.f32 %v5106_v55, %v2481_v6  ;;  %v2576_v10 = vrot.slane %v2283_v11, %v6061_v22 }
 0xa97   : > { %v2536_v13 = vpop.f32.mrf.mxu1  ;;  %vm2548_vm8 = vcmp.gt.f32.partialorder %v2534_v61, 0.0 }
 0xa98   : > { %5535 = vpow2.f32 %v2560_v18  ;;  %v2556_v63 = vmul.f32 1.442695, %v2552_v26  ;;  %v2555_v36 = vmin.f32 %v2545_v41, 0.0  ;;  %v2537_v42 = vadd.f32 %v2536_v13, %v2471_v21 }
 0xa99   : > { %vm2551_vm7 = vcmp.gt.f32.partialorder %v2545_v41, 0.0 }
 0xa9a   : > { %5537 = vpow2.f32 %v2556_v63  ;;  %v2562_v34 = vmul.f32 1.442695, %v2555_v36  ;;  %v2553_v45 = vmin.f32 %v2537_v42, 0.0  ;;  %vm2549_vm10 = vcmp.gt.f32.partialorder %v2537_v42, 0.0 }
 0xa9c   : > { %5539 = vpow2.f32 %v2562_v34  ;;  %v2558_v23 = vmul.f32 1.442695, %v2553_v45 }
 0xa9e   : > { %5541 = vpow2.f32 %v2558_v23 }
 0xaa5   : > { %v5536_v38 = vpop.eup %5535 }
 0xaa6   : > { %v4632_v49 = vadd.f32 -1.0, %v5536_v38 }
 0xaa7   : > { %v5538_v48 = vpop.eup %5537 }
 0xaa8   : > { %v4630_v44 = vadd.f32 -1.0, %v5538_v48  ;;  %v6636_v21 = vsel %vm2550_vm6, %v2542_v8, %v4632_v49 }
 0xaa9   : > { %v5540_v6 = vpop.eup %5539  ;;  %v2580_v36 = vmul.f32 %v2576_v10, %v6636_v21 }
 0xaaa   : > { %v4633_v55 = vadd.f32 -1.0, %v5540_v6  ;;  %v6640_v13 = vsel %vm2548_vm8, %v2534_v61, %v4630_v44  ;;  %v5390_v61 = vld [vmem:[%s6995_s3 + $0x98] sm:$0xff]  }
 0xaab   : > { %v5542_v18 = vpop.eup %5541  ;;  %v2578_v8 = vmul.f32 %v2576_v10, %v6640_v13 }
 0xaac   : > { %v6638_v26 = vsel %vm2551_vm7, %v2545_v41, %v4633_v55  ;;  %v4631_v63 = vadd.f32 -1.0, %v5542_v18  ;;  %v5391_v41 = vld [vmem:[%s6995_s3 + $0xa0] sm:$0xff]  }
 0xaad   : > { %v2581_v34 = vmul.f32 %v2576_v10, %v6638_v26  ;;  %5119 = vmatprep.mubr.msk.bf16.mxu0 %vm1584_vm15, %v5391_v41 }
 0xaae   : > { %v6644_v45 = vsel %vm2549_vm10, %v2537_v42, %v4631_v63  ;;  %v2598_v42 = vpop.permute.xlu1 %2597 }
 0xaaf   : > { %v2587_v23 = vpack.c.bf16 %v2581_v34, %v2580_v36  ;;  %v2579_v38 = vmul.f32 %v2576_v10, %v6644_v45 }
 0xab1   : > { %5107 = vmatprep.subr.bf16.mxu1 %v2587_v23  ;;  %v2586_v11 = vpack.c.bf16 %v2579_v38, %v2578_v8 }
 0xab2   : > { %5108 = vmatpush3.bf16.msra.mxu1 %v2587_v23  ;;  %v2590_v48 = vpop.permute.xlu1 %2589 }
 0xab3   : > { %5109 = vmatprep.subr.bf16.mxu1 %v2586_v11 }
 0xab6   : > { %5110 = vmatpush3.bf16.msra.mxu1 %v2586_v11  ;;  %v2594_v38 = vpop.permute.xlu1 %2593 }
 0xab7   : > { %5123 = vmatprep.subr.bf16.mxu1 %v5679_v0 }
 0xab9   : > { %5112 = vmatmul.mubr.msk.bf16.vlgmr.msra.gmra.mxu1 %vm1584_vm15, %v5390_v61 }
 0xaba   : > { %5127 = vmatprep.mubr.msk.bf16.mxu1 %vm5680_vm0, %v5679_v0 }
 0xb79   : > { %v5113_v49 = vpop.f32.mrf.mxu1 }
 0xb7a   : > { %v2663_v6 = vadd.f32 %v5113_v49, %v2598_v42 }
 0xb7b   : > { %v2654_v44 = vpop.f32.mrf.mxu1 }
 0xb7c   : > { %v2675_v10 = vmin.f32 %v2663_v6, 0.0  ;;  %v2655_v55 = vadd.f32 %v2654_v44, %v2590_v48  ;;  %vm2671_vm13 = vcmp.gt.f32.partialorder %v2663_v6, 0.0 }
 0xb7d   : > { %v5114_v18 = vpop.f32.mrf.mxu1 }
 0xb7e   : > { %v2681_v63 = vmul.f32 1.442695, %v2675_v10  ;;  %v2673_v36 = vmin.f32 %v2655_v55, 0.0  ;;  %v2666_v34 = vadd.f32 %v5114_v18, %v6595_v12  ;;  %vm2669_vm6 = vcmp.gt.f32.partialorder %v2655_v55, 0.0 }
 0xb7f   : > { %v2657_v23 = vpop.f32.mrf.mxu1 }
 0xb80   : > { %5543 = vpow2.f32 %v2681_v63  ;;  %v2677_v8 = vmul.f32 1.442695, %v2673_v36  ;;  %v2676_v11 = vmin.f32 %v2666_v34, 0.0  ;;  %v2658_v61 = vadd.f32 %v2657_v23, %v2594_v38 }
 0xb81   : > { %vm2672_vm14 = vcmp.gt.f32.partialorder %v2666_v34, 0.0 }
 0xb82   : > { %v2683_v15 = vmul.f32 1.442695, %v2676_v11  ;;  %5545 = vpow2.f32 %v2677_v8  ;;  %v2674_v41 = vmin.f32 %v2658_v61, 0.0  ;;  %vm2670_vm7 = vcmp.gt.f32.partialorder %v2658_v61, 0.0  ;;  %v2804_v8 = vld [vmem:[%s6995_s3 + $0xb0] sm:$0x1] }
 0xb84   : > { %5547 = vpow2.f32 %v2683_v15  ;;  %v2679_v19 = vmul.f32 1.442695, %v2674_v41 }
 0xb86   : > { %5549 = vpow2.f32 %v2679_v19 }
 0xb8d   : > { %v5544_v42 = vpop.eup %5543 }
 0xb8e   : > { %v4640_v48 = vadd.f32 -1.0, %v5544_v42 }
 0xb8f   : > { %v5546_v49 = vpop.eup %5545 }
 0xb90   : > { %v4638_v12 = vadd.f32 -1.0, %v5546_v49  ;;  %v2691_v63 = vsel %vm2671_vm13, %v2663_v6, %v4640_v48  ;;  %v5392_v6 = vld [vmem:[%s6995_s3 + $0xa8] sm:$0xff]  }
 0xb91   : > { %v5548_v44 = vpop.eup %5547 }
 0xb92   : > { %v4641_v10 = vadd.f32 -1.0, %v5548_v44  ;;  %v2689_v15 = vsel %vm2669_vm6, %v2655_v55, %v4638_v12 }
 0xb93   : > { %v5550_v18 = vpop.eup %5549 }
 0xb94   : > { %v2692_v36 = vsel %vm2672_vm14, %v2666_v34, %v4641_v10  ;;  %v4639_v43 = vadd.f32 -1.0, %v5550_v18 }
 0xb95   : > { %v2698_v17 = vpack.c.bf16 %v2692_v36, %v2691_v63 }
 0xb96   : > { %v2690_v23 = vsel %vm2670_vm7, %v2658_v61, %v4639_v43  ;;  %v5393_v43 = vld [vmem:[%s6995_s3 + $0xb8] sm:$0xff]  }
 0xb97   : > { %5115 = vmatprep.subr.bf16.mxu0 %v2698_v17  ;;  %5124 = vmatpush3.bf16.msra.mxu1 %v2698_v17  ;;  %v2697_v19 = vpack.c.bf16 %v2690_v23, %v2689_v15 }
 0xb98   : > { %5116 = vmatpush3.bf16.msra.mxu0 %v2698_v17  ;;  %5125 = vmatprep.subr.bf16.mxu1 %v5679_v0  ;;  %v2709_v17 = vpop.permute.xlu1 %2708 }
 0xb99   : > { %5117 = vmatprep.subr.bf16.mxu0 %v2697_v19 }
 0xb9b   : > { %5126 = vmatpush3.bf16.msra.mxu1 %v2697_v19 }
 0xb9c   : > { %5118 = vmatpush3.bf16.msra.mxu0 %v2697_v19  ;;  %5139 = vmatprep.subr.bf16.mxu1 %v5679_v0  ;;  %v2713_v34 = vpop.permute.xlu1 %2712 }
 0xb9e   : > { %5128 = vmatmul.mubr.msk.bf16.vlgmr.msra.gmra.mxu1 %vm1584_vm15, %v2804_v8 }
 0xb9f   : > { %5120 = vmatmul.mubr.msk.bf16.vlgmr.msra.gmra.mxu0 %vm1584_vm15, %v5392_v6  ;;  %5143 = vmatprep.mubr.msk.bf16.mxu1 %vm5680_vm0, %v5679_v0 }
 0xba0   : > { %5135 = vmatprep.mubr.msk.bf16.mxu0 %vm1584_vm15, %v5393_v43  ;;  %v2705_v19 = vpop.permute.xlu1 %2704 }
 0xc5e   : > { %v2848_v55 = vpop.f32.mrf.mxu1 }
 0xc5f   : > { %v2849_v38 = vadd.f32 %v2848_v55, %v6597_v30  ;;  %v5121_v11 = vpop.f32.mrf.mxu0 }
 0xc60   : > { %v2774_v61 = vadd.f32 %v5121_v11, %v2709_v17  ;;  %v5129_v41 = vpop.f32.mrf.mxu1 }
 0xc61   : > { %v2855_v42 = vmin.f32 %v2849_v38, 0.0  ;;  %v2765_v49 = vpop.f32.mrf.mxu0  ;;  %vm2854_vm10 = vcmp.gt.f32.partialorder %v2849_v38, 0.0 }
 0xc62   : > { %v2786_v48 = vmin.f32 %v2774_v61, 0.0  ;;  %v2766_v44 = vadd.f32 %v2765_v49, %v6599_v4  ;;  %v2851_v10 = vpop.f32.mrf.mxu1  ;;  %vm2782_vm8 = vcmp.gt.f32.partialorder %v2774_v61, 0.0 }
 0xc63   : > { %v2856_v12 = vmul.f32 1.442695, %v2855_v42  ;;  %v5122_v18 = vpop.f32.mrf.mxu0 }
 0xc64   : > { %v2792_v63 = vmul.f32 1.442695, %v2786_v48  ;;  %v2784_v36 = vmin.f32 %v2766_v44, 0.0  ;;  %v2777_v15 = vadd.f32 %v5122_v18, %v2713_v34  ;;  %v5130_v23 = vpop.f32.mrf.mxu1  ;;  %vm2780_vm13 = vcmp.gt.f32.partialorder %v2766_v44, 0.0 }
 0xc65   : > { %5551 = vpow2.f32 %v2856_v12  ;;  %v2768_v8 = vpop.f32.mrf.mxu0 }
 0xc66   : > { %5553 = vpow2.f32 %v2792_v63  ;;  %v2788_v30 = vmul.f32 1.442695, %v2784_v36  ;;  %v2787_v6 = vmin.f32 %v2777_v15, 0.0  ;;  %v2769_v43 = vadd.f32 %v2768_v8, %v2705_v19 }
 0xc67   : > { %vm2783_vm14 = vcmp.gt.f32.partialorder %v2777_v15, 0.0 }
 0xc68   : > { %5555 = vpow2.f32 %v2788_v30  ;;  %v2794_v17 = vmul.f32 1.442695, %v2787_v6  ;;  %v2785_v55 = vmin.f32 %v2769_v43, 0.0  ;;  %vm2781_vm6 = vcmp.gt.f32.partialorder %v2769_v43, 0.0 }
 0xc6a   : > { %5557 = vpow2.f32 %v2794_v17  ;;  %v2790_v11 = vmul.f32 1.442695, %v2785_v55 }
 0xc6c   : > { %5559 = vpow2.f32 %v2790_v11 }
 0xc72   : > { %v5552_v4 = vpop.eup %5551 }
 0xc73   : > { %v5554_v41 = vpop.eup %5553  ;;  %v4651_v42 = vadd.f32 -1.0, %v5552_v4 }
 0xc74   : > { %v4648_v34 = vadd.f32 -1.0, %v5554_v41 }
 0xc75   : > { %v5556_v49 = vpop.eup %5555  ;;  %v2859_v48 = vsel %vm2854_vm10, %v2849_v38, %v4651_v42 }
 0xc76   : > { %v4652_v10 = vclamps-f32 %v2859_v48, 30.0  ;;  %v2802_v12 = vsel %vm2782_vm8, %v2774_v61, %v4648_v34  ;;  %v4646_v18 = vadd.f32 -1.0, %v5556_v49 }
 0xc77   : > { %v5558_v63 = vpop.eup %5557  ;;  %v2870_v36 = vadd.f32 %v2802_v12, %v6636_v21 }
 0xc78   : > { %v2862_v23 = vsub.f32 0.0, %v4652_v10  ;;  %v2800_v19 = vsel %vm2780_vm13, %v2766_v44, %v4646_v18  ;;  %v4649_v8 = vadd.f32 -1.0, %v5558_v63  ;;  %v5395_v18 = vld [vmem:[%s6995_s3 + $0xd0] sm:$0xff]   ;;  %v3054_v63 = vld [vmem:[%s6996_s4 + $0x8] sm:$0xff] }
 0xc79   : > { %4675 = vst [vmem:[%s6387_s12 + $0x38] sm:$0xff] %v2870_v36  ;;  %v2868_v30 = vadd.f32 %v2800_v19, %v6640_v13  ;;  %v5560_v6 = vpop.eup %5559  ;;  %3066 = vperm.xlu1 %5337, %v3054_v63  }
 0xc7a   : > { %v2863_v17 = vmul.f32 1.442695, %v2862_v23  ;;  %v2803_v38 = vsel %vm2783_vm14, %v2777_v15, %v4649_v8  ;;  %v4647_v55 = vadd.f32 -1.0, %v5560_v6 }
 0xc7b   : > { %4673 = vst [vmem:[%s6387_s12 + $0x28] sm:$0xff] %v2868_v30  ;;  %v2871_v61 = vadd.f32 %v2803_v38, %v6638_v26 }
 0xc7c   : > { %5561 = vpow2.f32 %v2863_v17  ;;  %v2801_v11 = vsel %vm2781_vm6, %v2769_v43, %v4647_v55 }
 0xc7d   : > { %4676 = vst [vmem:[%s6387_s12 + $0x40] sm:$0xff] %v2871_v61  ;;  %v2869_v21 = vadd.f32 %v2801_v11, %v6644_v45  ;;  %v5394_v45 = vld [vmem:[%s6995_s3 + $0xc0] sm:$0xff]   ;;  %v3052_v43 = vpack.c.bf16 %v2871_v61, %v2870_v36  ;;  %5339 = vset.pattern.permute.xlu1 %v5692_v20 }
 0xc7e   : > { %3183 = vperm.xlu1 %5339, %v3054_v63  }
 0xc7f   : > { %4674 = vst [vmem:[%s6387_s12 + $0x30] sm:$0xff] %v2869_v21  ;;  %v3051_v12 = vpack.c.bf16 %v2869_v21, %v2868_v30 }
 0xc82   : > { %5340 = vset.pattern.permute.xlu1 %v5693_v32 }
 0xc83   : > { %3205 = vperm.xlu1 %5340, %v6542_v58  }
 0xc87   : > { %5342 = vset.pattern.permute.xlu1 %v5685_v29  ;;  %v7003_v29 = vmov 7  }
 0xc88   : > { %3517 = vperm.xlu1 %5342, %v6512_v46  }
 0xc89   : > { %v5562_v4 = vpop.eup %5561 }
 0xc8a   : > { %v2865_v44 = vadd.f32 1.0, %v5562_v4 }
 0xc8c   : > { %5563 = vrcp.f32 %v2865_v44  ;;  %3502 = vperm.xlu1 %5342, %v6542_v58  }
 0xc90   : > { %5343 = vset.pattern.permute.xlu1 %v5686_v56  ;;  %v7004_v56 = vmov 9  }
 0xc91   : > { %3634 = vperm.xlu1 %5343, %v6521_v5  }
 0xc95   : > { %3626 = vperm.xlu1 %5343, %v6542_v58  }
 0xc99   : > { %v5564_v41 = vpop.eup %5563  ;;  %3630 = vperm.xlu1 %5343, %v6527_v33  }
 0xc9a   : > { %v2867_v13 = vmul.f32 %v5564_v41, %v6631_v37 }
 0xc9c   : > { %v2875_v42 = vrot.slane %v2867_v13, %v6061_v22 }
 0xc9e   : > { %v2878_v15 = vmul.f32 %v2875_v42, %v2870_v36  ;;  %v2879_v34 = vmul.f32 %v2875_v42, %v2871_v61  ;;  %v2876_v49 = vmul.f32 %v2875_v42, %v2868_v30  ;;  %v2877_v48 = vmul.f32 %v2875_v42, %v2869_v21 }
 0xc9f   : > { %v7002_v36 = vmov 5  }
 0xca0   : > { %v2885_v26 = vpack.c.bf16 %v2879_v34, %v2878_v15  ;;  %v2884_v10 = vpack.c.bf16 %v2877_v48, %v2876_v49  ;;  %5346 = vset.pattern.permute.xlu1 %v7002_v36 }
 0xca1   : > { %3745 = vperm.xlu1 %5346, %v6521_v5  }
 0xca2   : > { %5131 = vmatprep.subr.bf16.mxu0 %v2885_v26 }
 0xca3   : > { %5132 = vmatpush3.bf16.msra.mxu0 %v2885_v26 }
 0xca4   : > { %5133 = vmatprep.subr.bf16.mxu0 %v2884_v10 }
 0xca5   : > { %3749 = vperm.xlu1 %5346, %v6512_v46   ;;  %v2896_v46 = vpop.permute.xlu1 %2895 }
 0xca7   : > { %5134 = vmatpush3.bf16.msra.mxu0 %v2884_v10 }
 0xca8   : > { %5147 = vmatprep.subr.bf16.mxu0 %v5679_v0 }
 0xca9   : > { %3741 = vperm.xlu1 %5346, %v6527_v33   ;;  %v2888_v19 = vpop.permute.xlu1 %2887 }
 0xcaa   : > { %5136 = vmatmul.mubr.msk.bf16.vlgmr.msra.gmra.mxu0 %vm1584_vm15, %v5394_v45 }
 0xcab   : > { %5148 = vmatpush3.bf16.msra.mxu0 %v3052_v43  ;;  %5151 = vmatprep.mubr.msk.bf16.mxu0 %vm5680_vm0, %v5679_v0  ;;  %v4665_v43 = vld [vmem:[%s5766_s29 + $0x4] sm:$0xf] }
 0xcac   : > { %5149 = vmatprep.subr.bf16.mxu0 %v5679_v0 }
 0xcad   : > { %5348 = vset.pattern.permute.xlu1 %v7003_v29  ;;  %v2892_v11 = vpop.permute.xlu1 %2891  ;;  %v2991_v29 = vld [vmem:[%s6995_s3 + $0xc8] sm:$0x1] }
 0xcae   : > { %3932 = vperm.xlu1 %5348, %v6521_v5  }
 0xcaf   : > { %5150 = vmatpush3.bf16.msra.mxu0 %v3051_v12 }
 0xcb0   : > { %5161 = vmatprep.subr.bf16.mxu0 %v5679_v0 }
 0xcb2   : > { %5152 = vmatmul.mubr.msk.bf16.vlgmr.msra.gmra.mxu0 %vm1584_vm15, %v5395_v18  ;;  %3924 = vperm.xlu1 %5348, %v6542_v58  }
 0xcb3   : > { %5163 = vmatprep.mubr.msk.bf16.mxu0 %vm5680_vm0, %v5679_v0 }
 0xcb6   : > { %3928 = vperm.xlu1 %5348, %v6527_v33  }
 0xcba   : > { %5351 = vset.pattern.permute.xlu1 %v7004_v56 }
 0xcbb   : > { %4098 = vperm.xlu1 %5351, %v6542_v58  }
 0xcbf   : > { %4103 = vperm.xlu1 %5351, %v3054_v63  }
 0xcc3   : > { %5353 = vset.pattern.permute.xlu1 %v5692_v20 }
 0xcc4   : > { %4220 = vperm.xlu1 %5353, %v3054_v63   ;;  %v3123_v63 = vpack.c.bf16 %v4665_v43, %v4665_v43 }
 0xcc6   : > { %v3133_v56 = vsel %vm341_vm1, %v3123_v63, 0 }
 0xcc8   : > { %5354 = vset.pattern.permute.xlu1 %v5693_v32 }
 0xd6a   : > { %v5137_v23 = vpop.f32.mrf.mxu0 }
 0xd6b   : > { %v2961_v8 = vadd.f32 %v5137_v23, %v2896_v46  ;;  %v5396_v46 = vld [vmem:[%s6995_s3 + $0xd8] sm:$0xff]  }
 0xd6c   : > { %v2952_v30 = vpop.f32.mrf.mxu0 }
 0xd6d   : > { %v2973_v5 = vmin.f32 %v2961_v8, 0.0  ;;  %v2953_v6 = vadd.f32 %v2952_v30, %v2888_v19  ;;  %vm2969_vm7 = vcmp.gt.f32.partialorder %v2961_v8, 0.0 }
 0xd6e   : > { %v5138_v17 = vpop.f32.mrf.mxu0 }
 0xd6f   : > { %v2979_v38 = vmul.f32 1.442695, %v2973_v5  ;;  %v2971_v33 = vmin.f32 %v2953_v6, 0.0  ;;  %v2964_v61 = vadd.f32 %v5138_v17, %v6601_v9  ;;  %vm2967_vm13 = vcmp.gt.f32.partialorder %v2953_v6, 0.0 }
 0xd70   : > { %v2955_v55 = vpop.f32.mrf.mxu0 }
 0xd71   : > { %5565 = vpow2.f32 %v2979_v38  ;;  %v2975_v58 = vmul.f32 1.442695, %v2971_v33  ;;  %v2974_v20 = vmin.f32 %v2964_v61, 0.0  ;;  %v2956_v21 = vadd.f32 %v2955_v55, %v2892_v11 }
 0xd72   : > { %vm2970_vm8 = vcmp.gt.f32.partialorder %v2964_v61, 0.0  ;;  %v3113_v23 = vpop.f32.mrf.mxu0 }
 0xd73   : > { %v2981_v4 = vmul.f32 1.442695, %v2974_v20  ;;  %5567 = vpow2.f32 %v2975_v58  ;;  %v2972_v32 = vmin.f32 %v2956_v21, 0.0  ;;  %vm2968_vm10 = vcmp.gt.f32.partialorder %v2956_v21, 0.0 }
 0xd74   : > { %v5153_v19 = vpop.f32.mrf.mxu0 }
 0xd75   : > { %5569 = vpow2.f32 %v2981_v4  ;;  %v2977_v44 = vmul.f32 1.442695, %v2972_v32 }
 0xd77   : > { %5571 = vpow2.f32 %v2977_v44 }
 0xd7e   : > { %v5566_v41 = vpop.eup %5565 }
 0xd7f   : > { %v4659_v42 = vadd.f32 -1.0, %v5566_v41  ;;  %v3062_v41 = vpop.permute.xlu1 %3061 }
 0xd80   : > { %v5568_v13 = vpop.eup %5567 }
 0xd81   : > { %v2989_v49 = vsel %vm2969_vm7, %v2961_v8, %v4659_v42  ;;  %v4657_v48 = vadd.f32 -1.0, %v5568_v13  ;;  %v3116_v8 = vpop.f32.mrf.mxu0 }
 0xd82   : > { %v5570_v15 = vpop.eup %5569 }
 0xd83   : > { %v4660_v34 = vadd.f32 -1.0, %v5570_v15  ;;  %v2987_v18 = vsel %vm2967_vm13, %v2953_v6, %v4657_v48  ;;  %v5154_v30 = vpop.f32.mrf.mxu0  ;;  %v3067_v15 = vpop.permute.xlu1 %3066 }
 0xd84   : > { %v5572_v9 = vpop.eup %5571 }
 0xd85   : > { %v2990_v26 = vsel %vm2970_vm8, %v2964_v61, %v4660_v34  ;;  %v4658_v45 = vadd.f32 -1.0, %v5572_v9 }
 0xd86   : > { %v2993_v10 = vpack.c.bf16 %v2990_v26, %v2989_v49 }
 0xd87   : > { %v2988_v12 = vsel %vm2968_vm10, %v2956_v21, %v4658_v45  ;;  %v3184_v26 = vpop.permute.xlu1 %3183 }
 0xd88   : > { %5140 = vmatpush3.bf16.msra.mxu1 %v2993_v10  ;;  %v2992_v36 = vpack.c.bf16 %v2988_v12, %v2987_v18 }
 0xd89   : > { %5141 = vmatprep.subr.bf16.mxu1 %v5679_v0 }
 0xd8c   : > { %5142 = vmatpush3.bf16.msra.mxu1 %v2992_v36 }
 0xd8d   : > { %5155 = vmatprep.subr.bf16.mxu1 %v5679_v0 }
 0xd8f   : > { %5144 = vmatmul.mubr.msk.bf16.vlgmr.msra.gmra.mxu1 %vm1584_vm15, %v2991_v29 }
 0xd90   : > { %5156 = vmatpush3.bf16.msra.mxu1 %v3133_v56  ;;  %5157 = vmatprep.mubr.msk.bf16.mxu1 %vm5680_vm0, %v5679_v0 }
 0xd91   : > { %5167 = vmatprep.subr.bf16.mxu1 %v5679_v0 }
 0xd97   : > { %5158 = vmatmul.mubr.msk.bf16.vlgmr.msra.gmra.mxu1 %vm337_vm2, %v5396_v46 }
 0xd98   : > { %5169 = vmatprep.mubr.msk.bf16.mxu1 %vm5680_vm0, %v5679_v0 }
 0xe4f   : > { %v3035_v5 = vpop.f32.mrf.mxu1 }
 0xe50   : > { %v3036_v6 = vadd.f32 %v3035_v5, %v6603_v1 }
 0xe51   : > { %v5145_v17 = vpop.f32.mrf.mxu1 }
 0xe52   : > { %v4662_v38 = vclamps-f32 %v3036_v6, 30.0  ;;  %v3200_v6 = vld [vmem:[%s6995_s3 + $0xe0] sm:$0xf] }
 0xe53   : > { %v3038_v33 = vpop.f32.mrf.mxu1  ;;  %v5397_v17 = vld [vmem:[%s6995_s3 + $0x60] sm:$0xff]  }
 0xe54   : > { %v3043_v61 = vsub.f32 0.0, %v4662_v38  ;;  %v4239_v38 = vld [vmem:[%s6996_s4] sm:$0xff] }
 0xe55   : > { %v5146_v55 = vpop.f32.mrf.mxu1  ;;  %4242 = vperm.xlu1 %5354, %v4239_v38   ;;  %v5654_v33 = vld [vmem:[%s6996_s4] sm:$0x1] }
 0xe56   : > { %v3044_v58 = vmul.f32 1.442695, %v3043_v61  ;;  %v3206_v61 = vpop.permute.xlu1 %3205 }
 0xe57   : > { %v3169_v11 = vpop.f32.mrf.mxu1 }
 0xe58   : > { %5573 = vpow2.f32 %v3044_v58 }
 0xe59   : > { %v5159_v20 = vpop.f32.mrf.mxu1 }
 0xe5b   : > { %v3172_v21 = vpop.f32.mrf.mxu1 }
 0xe5d   : > { %v5160_v4 = vpop.f32.mrf.mxu1 }
 0xe65   : > { %v5574_v32 = vpop.eup %5573 }
 0xe66   : > { %v3046_v44 = vadd.f32 1.0, %v5574_v32 }
 0xe68   : > { %5575 = vrcp.f32 %v3046_v44 }
 0xe75   : > { %v5576_v13 = vpop.eup %5575 }
 0xe76   : > { %v6748_v42 = vmul.f32 %v5576_v13, %v6631_v37 }
 0xe78   : > { %v3058_v1 = vrot.slane %v6748_v42, %v6061_v22 }
 0xe7a   : > { %v3069_v34 = vmul.f32 %v3062_v41, %v3058_v1  ;;  %v3070_v9 = vmul.f32 %v3067_v15, %v3058_v1 }
 0xe7c   : > { %v3114_v49 = vadd.f32 %v3113_v23, %v3069_v34  ;;  %v3117_v48 = vadd.f32 %v3116_v8, %v3070_v9  ;;  %v3331_v23 = vpack.c.bf16 %v6150_v3, %v6150_v3  ;;  %v5399_v3 = vld [vmem:[%s6995_s3 + $0x70] sm:$0xff]  }
 0xe7e   : > { %v3176_v10 = vadd.f32 %v3169_v11, %v3114_v49  ;;  %v3177_v45 = vadd.f32 %v3172_v21, %v3117_v48 }
 0xe80   : > { %v3186_v43 = vadd.f32 %v6605_v35, %v3176_v10  ;;  %v3187_v12 = vadd.f32 %v3184_v26, %v3177_v45  ;;  %v3365_v35 = vand.u32 %v3331_v23, %v5914_v28  ;;  %v5398_v28 = vld [vmem:[%s6995_s3 + $0x68] sm:$0xff]  }
 0xe82   : > { %v3190_v18 = vmin.f32 %v3186_v43, 0.0  ;;  %v3191_v63 = vmin.f32 %v3187_v12, 0.0  ;;  %vm3188_vm14 = vcmp.gt.f32.partialorder %v3186_v43, 0.0  ;;  %vm3189_vm6 = vcmp.gt.f32.partialorder %v3187_v12, 0.0 }
 0xe84   : > { %v3192_v36 = vmul.f32 1.442695, %v3190_v18  ;;  %v3194_v29 = vmul.f32 1.442695, %v3191_v63 }
 0xe86   : > { %5577 = vpow2.f32 %v3192_v36 }
 0xe87   : > { %5579 = vpow2.f32 %v3194_v29 }
 0xe93   : > { %v5578_v37 = vpop.eup %5577 }
 0xe94   : > { %v5580_v56 = vpop.eup %5579  ;;  %v4668_v46 = vadd.f32 -1.0, %v5578_v37 }
 0xe95   : > { %v4669_v19 = vadd.f32 -1.0, %v5580_v56 }
 0xe96   : > { %v3198_v8 = vsel %vm3188_vm14, %v3186_v43, %v4668_v46 }
 0xe97   : > { %v3199_v30 = vsel %vm3189_vm6, %v3187_v12, %v4669_v19 }
 0xe98   : > { %v3201_v5 = vpack.c.bf16 %v3199_v30, %v3198_v8 }
 0xe9a   : > { %5162 = vmatpush3.bf16.msra.mxu0 %v3201_v5 }
 0xe9b   : > { %5173 = vmatprep.subr.bf16.mxu0 %v3365_v35 }
 0xe9d   : > { %5164 = vmatmul.mubr.msk.bf16.vlgmr.msra.gmra.mxu0 %vm447_vm5, %v3200_v6 }
 0xe9e   : > { %5174 = vmatpush3.bf16.msra.mxu0 %v3365_v35  ;;  %5179 = vmatprep.mubr.msk.bf16.mxu0 %vm1019_vm3, %v5397_v17 }
 0xe9f   : > { %5175 = vmatprep.subr.bf16.mxu0 %v6158_v59 }
 0xea2   : > { %5176 = vmatpush3.bf16.msra.mxu0 %v6158_v59  ;;  %v5400_v59 = vld [vmem:[%s6995_s3 + $0x78] sm:$0xff]  }
 0xea3   : > { %5177 = vmatprep.subr.bf16.mxu0 %v6107_v47 }
 0xea6   : > { %5178 = vmatpush3.bf16.msra.mxu0 %v6107_v47  ;;  %v7005_v47 = vmov 12  }
 0xea7   : > { %5356 = vset.pattern.permute.xlu1 %v7005_v47 }
 0xea8   : > { %3260 = vperm.xlu1 %5356, %v5654_v33  }
 0xea9   : > { %5180 = vmatmul.mubr.msk.bf16.vlgmr.msra.gmra.mxu0 %vm1019_vm3, %v5398_v28 }
 0xeaa   : > { %5183 = vmatprep.mubr.msk.bf16.mxu0 %vm1019_vm3, %v5399_v3 }
 0xeac   : > { %4297 = vperm.xlu1 %5356, %v6535_v27  }
 0xeb1   : > { %5184 = vmatmul.mubr.msk.bf16.gmra.mxu0 %vm1019_vm3, %v5400_v59 }
 0xf5d   : > { %v3245_v55 = vpop.f32.mrf.mxu0 }
 0xf5e   : > { %v3246_v58 = vadd.f32 %v3245_v55, %v3206_v61 }
 0xf5f   : > { %v5165_v11 = vpop.f32.mrf.mxu0 }
 0xf60   : > { %v3252_v20 = vmin.f32 %v3246_v58, 0.0  ;;  %vm3251_vm3 = vcmp.gt.f32.partialorder %v3246_v58, 0.0 }
 0xf61   : > { %v3248_v21 = vpop.f32.mrf.mxu0 }
 0xf62   : > { %v3253_v4 = vmul.f32 1.442695, %v3252_v20 }
 0xf63   : > { %v5166_v32 = vpop.f32.mrf.mxu0 }
 0xf64   : > { %5581 = vpow2.f32 %v3253_v4 }
 0xf69   : > { %v5181_v44 = vpop.f32.mrf.mxu0 }
 0xf6a   : > { %v6792_v9 = vadd.f32 %v5181_v44, %v6264_v51 }
 0xf6b   : > { %v3401_v41 = vpop.f32.mrf.mxu0 }
 0xf6c   : > { %v3450_v18 = vmin.f32 %v6792_v9, 0.0  ;;  %v6802_v36 = vadd.f32 %v3401_v41, %v6276_v16  ;;  %v3257_v16 = vld [vmem:[%s6995_s3 + $0xe8] sm:$0x1]  ;;  %vm3442_vm6 = vcmp.gt.f32.partialorder %v6792_v9, 0.0 }
 0xf6d   : > { %v5182_v13 = vpop.f32.mrf.mxu0 }
 0xf6e   : > { %v6789_v1 = vadd.f32 %v5182_v13, %v6262_v62  ;;  %v3448_v5 = vmin.f32 %v6802_v36, 0.0 }
 0xf6f   : > { %v3404_v15 = vpop.f32.mrf.mxu0 }
 0xf70   : > { %v3451_v48 = vmin.f32 %v6789_v1, 0.0  ;;  %v6797_v43 = vadd.f32 %v3404_v15, %v6269_v60  ;;  %v3456_v28 = vmul.f32 1.442695, %v3448_v5  ;;  %vm3443_vm14 = vcmp.gt.f32.partialorder %v6789_v1, 0.0 }
 0xf71   : > { %v5582_v34 = vpop.eup %5581  ;;  %v5185_v27 = vpop.f32.mrf.mxu0 }
 0xf72   : > { %v4671_v49 = vadd.f32 -1.0, %v5582_v34  ;;  %v3438_v26 = vadd.f32 %v5185_v27, %v6274_v24  ;;  %v3462_v29 = vmul.f32 1.442695, %v3451_v48  ;;  %v3449_v60 = vmin.f32 %v6797_v43, 0.0 }
 0xf73   : > { %v3417_v10 = vpop.f32.mrf.mxu0 }
 0xf74   : > { %v3256_v45 = vsel %vm3251_vm3, %v3246_v58, %v4671_v49  ;;  %v3454_v12 = vmin.f32 %v3438_v26, 0.0  ;;  %v3436_v63 = vadd.f32 %v3417_v10, %v6279_v7  ;;  %v5401_v7 = vld [vmem:[%s6995_s3 + $0x80] sm:$0xff]   ;;  %vm3446_vm7 = vcmp.gt.f32.partialorder %v3438_v26, 0.0 }
 0xf75   : > { %v3258_v62 = vpack.c.bf16 %v3256_v45, %v3256_v45  ;;  %v5186_v51 = vpop.f32.mrf.mxu0  ;;  %vm3441_vm3 = vcmp.gt.f32.partialorder %v6797_v43, 0.0 }
 0xf76   : > { %v3468_v37 = vmul.f32 1.442695, %v3454_v12  ;;  %v3439_v24 = vadd.f32 %v5186_v51, %v6285_v25  ;;  %v3452_v56 = vmin.f32 %v3436_v63, 0.0  ;;  %v3460_v25 = vmul.f32 1.442695, %v3450_v18 }
 0xf77   : > { %v3420_v46 = vpop.f32.mrf.mxu0  ;;  %v3267_v19 = vsel %vm2229_vm11, %v3258_v62, 0  ;;  %vm3444_vm10 = vcmp.gt.f32.partialorder %v3436_v63, 0.0 }
 0xf78   : > { %5583 = vpow2.f32 %v3468_v37  ;;  %v3455_v23 = vmin.f32 %v3439_v24, 0.0  ;;  %v3437_v8 = vadd.f32 %v3420_v46, %v6292_v31  ;;  %5168 = vmatpush3.bf16.msra.mxu1 %v3267_v19  ;;  %v3464_v30 = vmul.f32 1.442695, %v3452_v56  ;;  %v5403_v56 = vld [vmem:[%s6995_s3 + $0x90] sm:$0xff]  }
 0xf79   : > { %5585 = vpow2.f32 %v3462_v29  ;;  %v3458_v31 = vmul.f32 1.442695, %v3449_v60  ;;  %vm3447_vm8 = vcmp.gt.f32.partialorder %v3439_v24, 0.0  ;;  %5203 = vmatprep.mubr.msk.bf16.mxu0 %vm1584_vm15, %v5403_v56 }
 0xf7a   : > { %v3470_v35 = vmul.f32 1.442695, %v3455_v23  ;;  %v3453_v6 = vmin.f32 %v3437_v8, 0.0  ;;  %5587 = vpow2.f32 %v3464_v30  ;;  %vm3445_vm13 = vcmp.gt.f32.partialorder %v3437_v8, 0.0 }
 0xf7b   : > { %5170 = vmatmul.mubr.msk.bf16.vlgmr.msra.gmra.mxu1 %vm2225_vm12, %v3257_v16 }
 0xf7c   : > { %5589 = vpow2.f32 %v3470_v35  ;;  %v3466_v17 = vmul.f32 1.442695, %v3453_v6  ;;  %5195 = vmatprep.mubr.msk.bf16.mxu1 %vm1468_vm4, %v5401_v7 }
 0xf7d   : > { %5591 = vpow2.f32 %v3460_v25 }
 0xf7e   : > { %5593 = vpow2.f32 %v3466_v17 }
 0xf7f   : > { %5595 = vpow2.f32 %v3458_v31 }
 0xf80   : > { %5597 = vpow2.f32 %v3456_v28 }
 0xf85   : > { %v5584_v3 = vpop.eup %5583 }
 0xf86   : > { %v5586_v59 = vpop.eup %5585  ;;  %v4693_v47 = vadd.f32 -1.0, %v5584_v3 }
 0xf87   : > { %v5588_v38 = vpop.eup %5587  ;;  %v4690_v32 = vadd.f32 -1.0, %v5586_v59 }
 0xf88   : > { %v4691_v58 = vadd.f32 -1.0, %v5588_v38  ;;  %v3486_v20 = vsel %vm3446_vm7, %v3438_v26, %v4693_v47  ;;  %vm3440_vm7 = vcmp.gt.f32.partialorder %v6802_v36, 0.0 }
 0xf89   : > { %v5590_v33 = vpop.eup %5589  ;;  %v3483_v48 = vsel %vm3443_vm14, %v6789_v1, %v4690_v32  ;;  %v5402_v1 = vld [vmem:[%s6995_s3 + $0x88] sm:$0xff]  }
 0xf8a   : > { %v5592_v61 = vpop.eup %5591  ;;  %v4694_v55 = vadd.f32 -1.0, %v5590_v33  ;;  %v3484_v13 = vsel %vm3444_vm10, %v3436_v63, %v4691_v58 }
 0xf8b   : > { %v5594_v11 = vpop.eup %5593  ;;  %v4689_v34 = vadd.f32 -1.0, %v5592_v61 }
 0xf8c   : > { %v3487_v21 = vsel %vm3447_vm8, %v3439_v24, %v4694_v55  ;;  %v4692_v4 = vadd.f32 -1.0, %v5594_v11  ;;  %v5596_v44 = vpop.eup %5595 }
 0xf8d   : > { %v3495_v41 = vpack.c.bf16 %v3487_v21, %v3486_v20  ;;  %v5598_v27 = vpop.eup %5597  ;;  %v4688_v10 = vadd.f32 -1.0, %v5596_v44  ;;  %v3482_v26 = vsel %vm3442_vm6, %v6792_v9, %v4689_v34  ;;  %v3518_v9 = vpop.permute.xlu1 %3517 }
 0xf8e   : > { %v3485_v15 = vsel %vm3445_vm13, %v3437_v8, %v4692_v4  ;;  %v4687_v45 = vadd.f32 -1.0, %v5598_v27  ;;  %v3493_v12 = vpack.c.bf16 %v3483_v48, %v3482_v26 }
 0xf8f   : > { %5187 = vmatprep.subr.bf16.mxu1 %v3495_v41  ;;  %v3494_v49 = vpack.c.bf16 %v3485_v15, %v3484_v13  ;;  %v3481_v62 = vsel %vm3441_vm3, %v6797_v43, %v4688_v10 }
 0xf90   : > { %5188 = vmatpush3.bf16.msra.mxu1 %v3495_v41  ;;  %v3480_v18 = vsel %vm3440_vm7, %v6802_v36, %v4687_v45 }
 0xf91   : > { %5189 = vmatprep.subr.bf16.mxu1 %v3494_v49  ;;  %v3492_v63 = vpack.c.bf16 %v3481_v62, %v3480_v18  ;;  %v3503_v51 = vpop.permute.xlu1 %3502 }
 0xf94   : > { %5190 = vmatpush3.bf16.msra.mxu1 %v3494_v49 }
 0xf95   : > { %5191 = vmatprep.subr.bf16.mxu1 %v3493_v12  ;;  %v6829_v29 = vpop.permute.xlu1 %3634 }
 0xf98   : > { %5192 = vmatpush3.bf16.msra.mxu1 %v3493_v12 }
 0xf99   : > { %5193 = vmatprep.subr.bf16.mxu1 %v3492_v63  ;;  %v6831_v43 = vpop.permute.xlu1 %3626 }
 0xf9c   : > { %5194 = vmatpush3.bf16.msra.mxu1 %v3492_v63 }
 0xf9d   : > { %v6833_v37 = vpop.permute.xlu1 %3630 }
 0xf9f   : > { %5196 = vmatmul.mubr.msk.bf16.vlgmr.msra.gmra.mxu1 %vm1468_vm4, %v5402_v1 }
 0xfa1   : > { %v6835_v24 = vpop.permute.xlu1 %3745 }
 0xfa5   : > { %v6837_v36 = vpop.permute.xlu1 %3749 }
 0xfa9   : > { %v6843_v46 = vpop.permute.xlu1 %3741 }
 0xfad   : > { %v6845_v19 = vpop.permute.xlu1 %3932 }
 0xfb1   : > { %v6847_v60 = vpop.permute.xlu1 %3924 }
 0xfb5   : > { %v6849_v23 = vpop.permute.xlu1 %3928 }
 0xfb9   : > { %v6851_v8 = vpop.permute.xlu1 %4098 }
 0xfbd   : > { %v6853_v16 = vpop.permute.xlu1 %4103 }
 0xfc1   : > { %v6855_v7 = vpop.permute.xlu1 %4220 }
 0xfc5   : > { %v6857_v25 = vpop.permute.xlu1 %4242 }
 0xfc9   : > { %v3261_v30 = vpop.permute.xlu1 %3260 }
0x103b   : > { %v3303_v5 = vpop.f32.mrf.mxu1 }
0x103c   : > { %v3304_v35 = vadd.f32 %v3303_v5, %v3261_v30 }
0x103d   : > { %v5171_v6 = vpop.f32.mrf.mxu1 }
0x103e   : > { %v3310_v31 = vrot.slane %v3304_v35, 7  ;;  %v5404_v35 = vld [vmem:[%s6995_s3 + $0x98] sm:$0xff]   ;;  %v5405_v6 = vld [vmem:[%s6995_s3 + $0xa0] sm:$0xff]  }
0x103f   : > { %v3306_v17 = vpop.f32.mrf.mxu1  ;;  %5211 = vmatprep.mubr.msk.bf16.mxu1 %vm1584_vm15, %v5405_v6 }
0x1040   : > { %v3312_v28 = vsel %vm1032_vm9, %v6748_v42, %v3310_v31 }
0x1041   : > { %4677 = vst [vmem:[%s6387_s12 + $0x48] sm:$0x3] %v3312_v28  ;;  %v5172_v3 = vpop.f32.mrf.mxu1 }
0x105f   : > { %v5197_v59 = vpop.f32.mrf.mxu1 }
0x1060   : > { %v3579_v38 = vadd.f32 %v5197_v59, %v6611_v14  ;;  %v6865_v14 = vld [vmem:[%s5992_s6 + $0x2] sm:$0x1] }
0x1061   : > { %v3570_v47 = vpop.f32.mrf.mxu1  ;;  %v3320_v34 = vmul.f32 %v6051_v54, %v6865_v14 }
0x1062   : > { %v3591_v33 = vmin.f32 %v3579_v38, 0.0  ;;  %v3571_v61 = vadd.f32 %v3570_v47, %v3503_v51  ;;  %vm3587_vm4 = vcmp.gt.f32.partialorder %v3579_v38, 0.0 }
0x1063   : > { %v5198_v55 = vpop.f32.mrf.mxu1  ;;  %v3613_v26 = vrot.slane %v3320_v34, %v6061_v22 }
0x1064   : > { %v3597_v58 = vmul.f32 1.442695, %v3591_v33  ;;  %v3589_v11 = vmin.f32 %v3571_v61, 0.0  ;;  %v3582_v20 = vadd.f32 %v5198_v55, %v3518_v9  ;;  %vm3585_vm10 = vcmp.gt.f32.partialorder %v3571_v61, 0.0 }
0x1065   : > { %v3573_v21 = vpop.f32.mrf.mxu1 }
0x1066   : > { %5599 = vpow2.f32 %v3597_v58  ;;  %v3593_v4 = vmul.f32 1.442695, %v3589_v11  ;;  %v3592_v32 = vmin.f32 %v3582_v20, 0.0  ;;  %v3574_v44 = vadd.f32 %v3573_v21, %v6613_v40 }
0x1067   : > { %vm3588_vm8 = vcmp.gt.f32.partialorder %v3582_v20, 0.0 }
0x1068   : > { %5601 = vpow2.f32 %v3593_v4  ;;  %v3599_v42 = vmul.f32 1.442695, %v3592_v32  ;;  %v3590_v41 = vmin.f32 %v3574_v44, 0.0  ;;  %vm3586_vm13 = vcmp.gt.f32.partialorder %v3574_v44, 0.0 }
0x106a   : > { %5603 = vpow2.f32 %v3599_v42  ;;  %v3595_v13 = vmul.f32 1.442695, %v3590_v41 }
0x106c   : > { %5605 = vpow2.f32 %v3595_v13 }
0x1073   : > { %v5600_v15 = vpop.eup %5599 }
0x1074   : > { %v4701_v27 = vadd.f32 -1.0, %v5600_v15 }
0x1075   : > { %v5602_v49 = vpop.eup %5601 }
0x1076   : > { %v4699_v10 = vadd.f32 -1.0, %v5602_v49  ;;  %v6870_v40 = vsel %vm3587_vm4, %v3579_v38, %v4701_v27 }
0x1077   : > { %v5604_v48 = vpop.eup %5603  ;;  %v3617_v54 = vmul.f32 %v3613_v26, %v6870_v40 }
0x1078   : > { %v4702_v45 = vadd.f32 -1.0, %v5604_v48  ;;  %v6874_v18 = vsel %vm3585_vm10, %v3571_v61, %v4699_v10 }
0x1079   : > { %v5606_v12 = vpop.eup %5605  ;;  %v3615_v56 = vmul.f32 %v3613_v26, %v6874_v18 }
0x107a   : > { %v6872_v62 = vsel %vm3588_vm8, %v3582_v20, %v4702_v45  ;;  %v4700_v63 = vadd.f32 -1.0, %v5606_v12  ;;  %v5406_v45 = vld [vmem:[%s6995_s3 + $0xa8] sm:$0xff]   ;;  %v5407_v12 = vld [vmem:[%s6995_s3 + $0xb8] sm:$0xff]  }
0x107b   : > { %v3618_v1 = vmul.f32 %v3613_v26, %v6872_v62 }
0x107c   : > { %v6878_v9 = vsel %vm3586_vm13, %v3574_v44, %v4700_v63 }
0x107d   : > { %v3624_v51 = vpack.c.bf16 %v3618_v1, %v3617_v54  ;;  %v3616_v30 = vmul.f32 %v3613_v26, %v6878_v9  ;;  %v3841_v26 = vld [vmem:[%s6995_s3 + $0xb0] sm:$0x1] }
0x107f   : > { %5199 = vmatprep.subr.bf16.mxu0 %v3624_v51  ;;  %v3623_v5 = vpack.c.bf16 %v3616_v30, %v3615_v56 }
0x1080   : > { %5200 = vmatpush3.bf16.msra.mxu0 %v3624_v51 }
0x1081   : > { %5201 = vmatprep.subr.bf16.mxu0 %v3623_v5 }
0x1084   : > { %5202 = vmatpush3.bf16.msra.mxu0 %v3623_v5 }
0x1085   : > { %5215 = vmatprep.subr.bf16.mxu0 %v5679_v0 }
0x1087   : > { %5204 = vmatmul.mubr.msk.bf16.vlgmr.msra.gmra.mxu0 %vm1584_vm15, %v5404_v35 }
0x1088   : > { %5219 = vmatprep.mubr.msk.bf16.mxu0 %vm5680_vm0, %v5679_v0 }
0x1147   : > { %v5205_v31 = vpop.f32.mrf.mxu0 }
0x1148   : > { %v3700_v17 = vadd.f32 %v5205_v31, %v6829_v29 }
0x1149   : > { %v3691_v28 = vpop.f32.mrf.mxu0 }
0x114a   : > { %v3712_v3 = vmin.f32 %v3700_v17, 0.0  ;;  %v3692_v59 = vadd.f32 %v3691_v28, %v6831_v43  ;;  %vm3708_vm14 = vcmp.gt.f32.partialorder %v3700_v17, 0.0 }
0x114b   : > { %v5206_v38 = vpop.f32.mrf.mxu0 }
0x114c   : > { %v3718_v47 = vmul.f32 1.442695, %v3712_v3  ;;  %v3710_v33 = vmin.f32 %v3692_v59, 0.0  ;;  %v3703_v61 = vadd.f32 %v5206_v38, %v6615_v39  ;;  %vm3706_vm3 = vcmp.gt.f32.partialorder %v3692_v59, 0.0 }
0x114d   : > { %v3694_v55 = vpop.f32.mrf.mxu0 }
0x114e   : > { %5607 = vpow2.f32 %v3718_v47  ;;  %v3714_v58 = vmul.f32 1.442695, %v3710_v33  ;;  %v3713_v11 = vmin.f32 %v3703_v61, 0.0  ;;  %v3695_v20 = vadd.f32 %v3694_v55, %v6833_v37 }
0x114f   : > { %vm3709_vm6 = vcmp.gt.f32.partialorder %v3703_v61, 0.0 }
0x1150   : > { %v3720_v21 = vmul.f32 1.442695, %v3713_v11  ;;  %5609 = vpow2.f32 %v3714_v58  ;;  %v3711_v4 = vmin.f32 %v3695_v20, 0.0  ;;  %vm3707_vm7 = vcmp.gt.f32.partialorder %v3695_v20, 0.0 }
0x1152   : > { %5611 = vpow2.f32 %v3720_v21  ;;  %v3716_v29 = vmul.f32 1.442695, %v3711_v4 }
0x1154   : > { %5613 = vpow2.f32 %v3716_v29 }
0x115b   : > { %v5608_v32 = vpop.eup %5607 }
0x115c   : > { %v4709_v43 = vadd.f32 -1.0, %v5608_v32 }
0x115d   : > { %v5610_v44 = vpop.eup %5609 }
0x115e   : > { %v4707_v39 = vadd.f32 -1.0, %v5610_v44  ;;  %v3728_v15 = vsel %vm3708_vm14, %v3700_v17, %v4709_v43 }
0x115f   : > { %v5612_v42 = vpop.eup %5611 }
0x1160   : > { %v4710_v41 = vadd.f32 -1.0, %v5612_v42  ;;  %v3726_v37 = vsel %vm3706_vm3, %v3692_v59, %v4707_v39 }
0x1161   : > { %v5614_v13 = vpop.eup %5613 }
0x1162   : > { %v3729_v34 = vsel %vm3709_vm6, %v3703_v61, %v4710_v41  ;;  %v4708_v49 = vadd.f32 -1.0, %v5614_v13 }
0x1163   : > { %v3735_v27 = vpack.c.bf16 %v3729_v34, %v3728_v15 }
0x1164   : > { %v3727_v48 = vsel %vm3707_vm7, %v3695_v20, %v4708_v49 }
0x1165   : > { %5207 = vmatprep.subr.bf16.mxu1 %v3735_v27  ;;  %5216 = vmatpush3.bf16.msra.mxu0 %v3735_v27  ;;  %v3734_v10 = vpack.c.bf16 %v3727_v48, %v3726_v37 }
0x1166   : > { %5208 = vmatpush3.bf16.msra.mxu1 %v3735_v27  ;;  %5217 = vmatprep.subr.bf16.mxu0 %v5679_v0 }
0x1167   : > { %5209 = vmatprep.subr.bf16.mxu1 %v3734_v10 }
0x1169   : > { %5218 = vmatpush3.bf16.msra.mxu0 %v3734_v10 }
0x116a   : > { %5210 = vmatpush3.bf16.msra.mxu1 %v3734_v10  ;;  %5231 = vmatprep.subr.bf16.mxu0 %v5679_v0 }
0x116c   : > { %5220 = vmatmul.mubr.msk.bf16.vlgmr.msra.gmra.mxu0 %vm1584_vm15, %v3841_v26 }
0x116d   : > { %5212 = vmatmul.mubr.msk.bf16.vlgmr.msra.gmra.mxu1 %vm1584_vm15, %v5406_v45  ;;  %5235 = vmatprep.mubr.msk.bf16.mxu0 %vm5680_vm0, %v5679_v0 }
0x116e   : > { %5227 = vmatprep.mubr.msk.bf16.mxu1 %vm1584_vm15, %v5407_v12 }
0x122c   : > { %v3885_v63 = vpop.f32.mrf.mxu0 }
0x122d   : > { %v3886_v54 = vadd.f32 %v3885_v63, %v6617_v50  ;;  %v5213_v1 = vpop.f32.mrf.mxu1 }
0x122e   : > { %v3811_v51 = vadd.f32 %v5213_v1, %v6835_v24  ;;  %v5221_v56 = vpop.f32.mrf.mxu0 }
0x122f   : > { %v3892_v30 = vmin.f32 %v3886_v54, 0.0  ;;  %v3802_v5 = vpop.f32.mrf.mxu1  ;;  %vm3891_vm8 = vcmp.gt.f32.partialorder %v3886_v54, 0.0 }
0x1230   : > { %v3823_v35 = vmin.f32 %v3811_v51, 0.0  ;;  %v3803_v6 = vadd.f32 %v3802_v5, %v6619_v57  ;;  %v3888_v31 = vpop.f32.mrf.mxu0  ;;  %vm3819_vm4 = vcmp.gt.f32.partialorder %v3811_v51, 0.0 }
0x1231   : > { %v3893_v17 = vmul.f32 1.442695, %v3892_v30  ;;  %v5214_v28 = vpop.f32.mrf.mxu1 }
0x1232   : > { %v3829_v3 = vmul.f32 1.442695, %v3823_v35  ;;  %v3821_v59 = vmin.f32 %v3803_v6, 0.0  ;;  %v3814_v38 = vadd.f32 %v5214_v28, %v6837_v36  ;;  %v5222_v47 = vpop.f32.mrf.mxu0  ;;  %vm3817_vm10 = vcmp.gt.f32.partialorder %v3803_v6, 0.0 }
0x1233   : > { %5615 = vpow2.f32 %v3893_v17  ;;  %v3805_v33 = vpop.f32.mrf.mxu1 }
0x1234   : > { %5617 = vpow2.f32 %v3829_v3  ;;  %v3825_v50 = vmul.f32 1.442695, %v3821_v59  ;;  %v3824_v61 = vmin.f32 %v3814_v38, 0.0  ;;  %v3806_v24 = vadd.f32 %v3805_v33, %v6843_v46 }
0x1235   : > { %vm3820_vm13 = vcmp.gt.f32.partialorder %v3814_v38, 0.0 }
0x1236   : > { %5619 = vpow2.f32 %v3825_v50  ;;  %v3831_v55 = vmul.f32 1.442695, %v3824_v61  ;;  %v3822_v58 = vmin.f32 %v3806_v24, 0.0  ;;  %vm3818_vm14 = vcmp.gt.f32.partialorder %v3806_v24, 0.0 }
0x1238   : > { %5621 = vpow2.f32 %v3831_v55  ;;  %v3827_v57 = vmul.f32 1.442695, %v3822_v58 }
0x123a   : > { %5623 = vpow2.f32 %v3827_v57 }
0x1240   : > { %v5616_v11 = vpop.eup %5615 }
0x1241   : > { %v5618_v20 = vpop.eup %5617  ;;  %v4720_v21 = vadd.f32 -1.0, %v5616_v11 }
0x1242   : > { %v4717_v36 = vadd.f32 -1.0, %v5618_v20 }
0x1243   : > { %v5620_v4 = vpop.eup %5619  ;;  %v3896_v29 = vsel %vm3891_vm8, %v3886_v54, %v4720_v21 }
0x1244   : > { %v4721_v32 = vclamps-f32 %v3896_v29, 30.0  ;;  %v3839_v44 = vsel %vm3819_vm4, %v3811_v51, %v4717_v36  ;;  %v4715_v46 = vadd.f32 -1.0, %v5620_v4 }
0x1245   : > { %v5622_v43 = vpop.eup %5621  ;;  %v3907_v42 = vadd.f32 %v3839_v44, %v6870_v40 }
0x1246   : > { %v3899_v41 = vsub.f32 0.0, %v4721_v32  ;;  %v3837_v39 = vsel %vm3817_vm10, %v3803_v6, %v4715_v46  ;;  %v4718_v13 = vadd.f32 -1.0, %v5622_v43  ;;  %v5409_v6 = vld [vmem:[%s6995_s3 + $0xd0] sm:$0xff]   ;;  %v4734_v43 = vld [vmem:[%s5766_s29 + $0x8] sm:$0xf] }
0x1247   : > { %4744 = vst [vmem:[%s6387_s12 + $0x60] sm:$0xff] %v3907_v42  ;;  %v3905_v15 = vadd.f32 %v3837_v39, %v6874_v18  ;;  %v5624_v34 = vpop.eup %5623  ;;  %v4160_v39 = vpack.c.bf16 %v4734_v43, %v4734_v43 }
0x1248   : > { %v3900_v27 = vmul.f32 1.442695, %v3899_v41  ;;  %v3840_v49 = vsel %vm3820_vm13, %v3814_v38, %v4718_v13  ;;  %v4716_v48 = vadd.f32 -1.0, %v5624_v34 }
0x1249   : > { %4742 = vst [vmem:[%s6387_s12 + $0x50] sm:$0xff] %v3905_v15  ;;  %v3908_v37 = vadd.f32 %v3840_v49, %v6872_v62  ;;  %v4170_v34 = vsel %vm341_vm1, %v4160_v39, 0 }
0x124a   : > { %5625 = vpow2.f32 %v3900_v27  ;;  %v3838_v10 = vsel %vm3818_vm14, %v3806_v24, %v4716_v48  ;;  %v5410_v27 = vld [vmem:[%s6995_s3 + $0xd8] sm:$0xff]  }
0x124b   : > { %4745 = vst [vmem:[%s6387_s12 + $0x68] sm:$0xff] %v3908_v37  ;;  %v3906_v40 = vadd.f32 %v3838_v10, %v6878_v9  ;;  %v5408_v9 = vld [vmem:[%s6995_s3 + $0xc0] sm:$0xff]   ;;  %v4089_v5 = vpack.c.bf16 %v3908_v37, %v3907_v42 }
0x124d   : > { %4743 = vst [vmem:[%s6387_s12 + $0x58] sm:$0xff] %v3906_v40  ;;  %v4088_v35 = vpack.c.bf16 %v3906_v40, %v3905_v15 }
0x1257   : > { %v5626_v26 = vpop.eup %5625 }
0x1258   : > { %v3902_v45 = vadd.f32 1.0, %v5626_v26 }
0x125a   : > { %5627 = vrcp.f32 %v3902_v45 }
0x1267   : > { %v5628_v12 = vpop.eup %5627 }
0x1268   : > { %v3904_v18 = vmul.f32 %v5628_v12, %v6865_v14 }
0x126a   : > { %v3912_v63 = vrot.slane %v3904_v18, %v6061_v22 }
0x126c   : > { %v3915_v54 = vmul.f32 %v3912_v63, %v3907_v42  ;;  %v3916_v1 = vmul.f32 %v3912_v63, %v3908_v37  ;;  %v3913_v51 = vmul.f32 %v3912_v63, %v3905_v15  ;;  %v3914_v56 = vmul.f32 %v3912_v63, %v3906_v40  ;;  %v4028_v15 = vld [vmem:[%s6995_s3 + $0xc8] sm:$0x1] }
0x126e   : > { %v3922_v62 = vpack.c.bf16 %v3916_v1, %v3915_v54  ;;  %v3921_v30 = vpack.c.bf16 %v3914_v56, %v3913_v51 }
0x1270   : > { %5223 = vmatprep.subr.bf16.mxu1 %v3922_v62 }
0x1271   : > { %5224 = vmatpush3.bf16.msra.mxu1 %v3922_v62 }
0x1272   : > { %5225 = vmatprep.subr.bf16.mxu1 %v3921_v30 }
0x1275   : > { %5226 = vmatpush3.bf16.msra.mxu1 %v3921_v30 }
0x1276   : > { %5239 = vmatprep.subr.bf16.mxu1 %v5679_v0 }
0x1278   : > { %5228 = vmatmul.mubr.msk.bf16.vlgmr.msra.gmra.mxu1 %vm1584_vm15, %v5408_v9 }
0x1279   : > { %5240 = vmatpush3.bf16.msra.mxu1 %v4089_v5  ;;  %5243 = vmatprep.mubr.msk.bf16.mxu1 %vm5680_vm0, %v5679_v0 }
0x127a   : > { %5241 = vmatprep.subr.bf16.mxu1 %v5679_v0 }
0x127d   : > { %5242 = vmatpush3.bf16.msra.mxu1 %v4088_v35 }
0x127e   : > { %5253 = vmatprep.subr.bf16.mxu1 %v5679_v0 }
0x1280   : > { %5244 = vmatmul.mubr.msk.bf16.vlgmr.msra.gmra.mxu1 %vm1584_vm15, %v5409_v6 }
0x1281   : > { %5255 = vmatprep.mubr.msk.bf16.mxu1 %vm5680_vm0, %v5679_v0 }
0x1338   : > { %v5229_v31 = vpop.f32.mrf.mxu1 }
0x1339   : > { %v3998_v17 = vadd.f32 %v5229_v31, %v6845_v19 }
0x133a   : > { %v3989_v28 = vpop.f32.mrf.mxu1 }
0x133b   : > { %v4010_v3 = vmin.f32 %v3998_v17, 0.0  ;;  %v3990_v59 = vadd.f32 %v3989_v28, %v6847_v60  ;;  %vm4006_vm6 = vcmp.gt.f32.partialorder %v3998_v17, 0.0 }
0x133c   : > { %v5230_v38 = vpop.f32.mrf.mxu1 }
0x133d   : > { %v4016_v47 = vmul.f32 1.442695, %v4010_v3  ;;  %v4008_v33 = vmin.f32 %v3990_v59, 0.0  ;;  %v4001_v50 = vadd.f32 %v5230_v38, %v6621_v52  ;;  %vm4004_vm4 = vcmp.gt.f32.partialorder %v3990_v59, 0.0 }
0x133e   : > { %v3992_v61 = vpop.f32.mrf.mxu1 }
0x133f   : > { %5629 = vpow2.f32 %v4016_v47  ;;  %v4012_v24 = vmul.f32 1.442695, %v4008_v33  ;;  %v4011_v55 = vmin.f32 %v4001_v50, 0.0  ;;  %v3993_v58 = vadd.f32 %v3992_v61, %v6849_v23 }
0x1340   : > { %vm4007_vm3 = vcmp.gt.f32.partialorder %v4001_v50, 0.0  ;;  %v4150_v49 = vpop.f32.mrf.mxu1 }
0x1341   : > { %v4018_v57 = vmul.f32 1.442695, %v4011_v55  ;;  %5631 = vpow2.f32 %v4012_v24  ;;  %v4009_v11 = vmin.f32 %v3993_v58, 0.0  ;;  %vm4005_vm7 = vcmp.gt.f32.partialorder %v3993_v58, 0.0 }
0x1342   : > { %v5245_v37 = vpop.f32.mrf.mxu1 }
0x1343   : > { %5633 = vpow2.f32 %v4018_v57  ;;  %v4014_v19 = vmul.f32 1.442695, %v4009_v11 }
0x1344   : > { %v4153_v48 = vpop.f32.mrf.mxu1 }
0x1345   : > { %5635 = vpow2.f32 %v4014_v19 }
0x1346   : > { %v5246_v10 = vpop.f32.mrf.mxu1 }
0x134c   : > { %v5630_v20 = vpop.eup %5629 }
0x134d   : > { %v4728_v21 = vadd.f32 -1.0, %v5630_v20 }
0x134e   : > { %v5632_v60 = vpop.eup %5631 }
0x134f   : > { %v4026_v29 = vsel %vm4006_vm6, %v3998_v17, %v4728_v21  ;;  %v4726_v32 = vadd.f32 -1.0, %v5632_v60 }
0x1350   : > { %v5634_v36 = vpop.eup %5633 }
0x1351   : > { %v4729_v4 = vadd.f32 -1.0, %v5634_v36  ;;  %v4024_v41 = vsel %vm4004_vm4, %v3990_v59, %v4726_v32 }
0x1352   : > { %v5636_v52 = vpop.eup %5635 }
0x1353   : > { %v4027_v44 = vsel %vm4007_vm3, %v4001_v50, %v4729_v4  ;;  %v4727_v23 = vadd.f32 -1.0, %v5636_v52 }
0x1354   : > { %v4030_v46 = vpack.c.bf16 %v4027_v44, %v4026_v29 }
0x1355   : > { %v4025_v42 = vsel %vm4005_vm7, %v3993_v58, %v4727_v23 }
0x1356   : > { %5232 = vmatpush3.bf16.msra.mxu0 %v4030_v46  ;;  %v4029_v13 = vpack.c.bf16 %v4025_v42, %v4024_v41  ;;  %v4294_v46 = vld [vmem:[%s6995_s3 + $0xe8] sm:$0x1] }
0x1357   : > { %5233 = vmatprep.subr.bf16.mxu0 %v5679_v0 }
0x135a   : > { %5234 = vmatpush3.bf16.msra.mxu0 %v4029_v13 }
0x135b   : > { %5247 = vmatprep.subr.bf16.mxu0 %v5679_v0 }
0x135d   : > { %5236 = vmatmul.mubr.msk.bf16.vlgmr.msra.gmra.mxu0 %vm1584_vm15, %v4028_v15 }
0x135e   : > { %5248 = vmatpush3.bf16.msra.mxu0 %v4170_v34  ;;  %5249 = vmatprep.mubr.msk.bf16.mxu0 %vm5680_vm0, %v5679_v0 }
0x135f   : > { %5259 = vmatprep.subr.bf16.mxu0 %v5679_v0 }
0x1365   : > { %5250 = vmatmul.mubr.msk.bf16.vlgmr.msra.gmra.mxu0 %vm337_vm2, %v5410_v27 }
0x1366   : > { %5261 = vmatprep.mubr.msk.bf16.mxu0 %vm5680_vm0, %v5679_v0 }
0x141d   : > { %v4072_v40 = vpop.f32.mrf.mxu0 }
0x141e   : > { %v4073_v26 = vadd.f32 %v4072_v40, %v6623_v2 }
0x141f   : > { %v5237_v45 = vpop.f32.mrf.mxu0 }
0x1420   : > { %v4731_v12 = vclamps-f32 %v4073_v26, 30.0 }
0x1421   : > { %v4075_v18 = vpop.f32.mrf.mxu0 }
0x1422   : > { %v4080_v63 = vsub.f32 0.0, %v4731_v12 }
0x1423   : > { %v5238_v54 = vpop.f32.mrf.mxu0 }
0x1424   : > { %v4081_v1 = vmul.f32 1.442695, %v4080_v63 }
0x1425   : > { %v4206_v51 = vpop.f32.mrf.mxu0 }
0x1426   : > { %5637 = vpow2.f32 %v4081_v1 }
0x1427   : > { %v5251_v56 = vpop.f32.mrf.mxu0 }
0x1429   : > { %v4209_v62 = vpop.f32.mrf.mxu0 }
0x142b   : > { %v5252_v30 = vpop.f32.mrf.mxu0 }
0x1433   : > { %v5638_v9 = vpop.eup %5637 }
0x1434   : > { %v4083_v0 = vadd.f32 1.0, %v5638_v9 }
0x1436   : > { %5639 = vrcp.f32 %v4083_v0 }
0x1443   : > { %v5640_v5 = vpop.eup %5639 }
0x1444   : > { %v4085_v35 = vmul.f32 %v5640_v5, %v6865_v14 }
0x1446   : > { %v4095_v6 = vrot.slane %v4085_v35, %v6061_v22 }
0x1448   : > { %v4106_v2 = vmul.f32 %v6851_v8, %v4095_v6  ;;  %v4107_v31 = vmul.f32 %v6853_v16, %v4095_v6 }
0x144a   : > { %v4151_v17 = vadd.f32 %v4150_v49, %v4106_v2  ;;  %v4154_v28 = vadd.f32 %v4153_v48, %v4107_v31 }
0x144c   : > { %v4213_v3 = vadd.f32 %v4206_v51, %v4151_v17  ;;  %v4214_v59 = vadd.f32 %v4209_v62, %v4154_v28 }
0x144e   : > { %v4223_v38 = vadd.f32 %v6625_v53, %v4213_v3  ;;  %v4224_v47 = vadd.f32 %v6855_v7, %v4214_v59  ;;  %v4237_v53 = vld [vmem:[%s6995_s3 + $0xe0] sm:$0xf] }
0x1450   : > { %v4227_v33 = vmin.f32 %v4223_v38, 0.0  ;;  %v4228_v50 = vmin.f32 %v4224_v47, 0.0  ;;  %vm4225_vm0 = vcmp.gt.f32.partialorder %v4223_v38, 0.0  ;;  %vm4226_vm1 = vcmp.gt.f32.partialorder %v4224_v47, 0.0 }
0x1452   : > { %v4229_v61 = vmul.f32 1.442695, %v4227_v33  ;;  %v4231_v24 = vmul.f32 1.442695, %v4228_v50 }
0x1454   : > { %5641 = vpow2.f32 %v4229_v61 }
0x1455   : > { %5643 = vpow2.f32 %v4231_v24 }
0x1461   : > { %v5642_v14 = vpop.eup %5641 }
0x1462   : > { %v5644_v22 = vpop.eup %5643  ;;  %v4737_v55 = vadd.f32 -1.0, %v5642_v14 }
0x1463   : > { %v4738_v8 = vadd.f32 -1.0, %v5644_v22 }
0x1464   : > { %v4235_v16 = vsel %vm4225_vm0, %v4223_v38, %v4737_v55 }
0x1465   : > { %v4236_v58 = vsel %vm4226_vm1, %v4224_v47, %v4738_v8 }
0x1466   : > { %v4238_v57 = vpack.c.bf16 %v4236_v58, %v4235_v16 }
0x1468   : > { %5254 = vmatpush3.bf16.msra.mxu1 %v4238_v57 }
0x146b   : > { %5256 = vmatmul.mubr.msk.bf16.vlgmr.msra.gmra.mxu1 %vm447_vm5, %v4237_v53 }
0x152b   : > { %v4282_v7 = vpop.f32.mrf.mxu1 }
0x152c   : > { %v4283_v11 = vadd.f32 %v4282_v7, %v6857_v25  ;;  %v4298_v25 = vpop.permute.xlu1 %4297 }
0x152d   : > { %v5257_v19 = vpop.f32.mrf.mxu1 }
0x152e   : > { %v4289_v20 = vmin.f32 %v4283_v11, 0.0  ;;  %vm4288_vm2 = vcmp.gt.f32.partialorder %v4283_v11, 0.0 }
0x152f   : > { %v4285_v60 = vpop.f32.mrf.mxu1 }
0x1530   : > { %v4290_v21 = vmul.f32 1.442695, %v4289_v20 }
0x1531   : > { %v5258_v36 = vpop.f32.mrf.mxu1 }
0x1532   : > { %5645 = vpow2.f32 %v4290_v21 }
0x153f   : > { %v5646_v4 = vpop.eup %5645 }
0x1540   : > { %v4740_v52 = vadd.f32 -1.0, %v5646_v4 }
0x1542   : > { %v4293_v29 = vsel %vm4288_vm2, %v4283_v11, %v4740_v52 }
0x1543   : > { %v4295_v32 = vpack.c.bf16 %v4293_v29, %v4293_v29 }
0x1545   : > { %v4304_v44 = vsel %vm2229_vm11, %v4295_v32, 0 }
0x1546   : > { %5260 = vmatpush3.bf16.msra.mxu0 %v4304_v44 }
0x1549   : > { %5262 = vmatmul.mubr.msk.bf16.vlgmr.msra.gmra.mxu0 %vm2225_vm12, %v4294_v46 }
0x1609   : > { %v4340_v23 = vpop.f32.mrf.mxu0 }
0x160a   : > { %v4341_v43 = vadd.f32 %v4340_v23, %v4298_v25 }
0x160b   : > { %v5263_v42 = vpop.f32.mrf.mxu0 }
0x160c   : > { %v4347_v41 = vrot.slane %v4341_v43, 7 }
0x160d   : > { %v4343_v39 = vpop.f32.mrf.mxu0 }
0x160e   : > { %v4349_v13 = vsel %vm1032_vm9, %v4085_v35, %v4347_v41 }
0x160f   : > { %4746 = vst [vmem:[%s6387_s12 + $0x70] sm:$0x3] %v4349_v13  ;;  %v5264_v15 = vpop.f32.mrf.mxu0 }
0x1610 PF: > { %s15_s20 = sadd.s32 1, %s5677_s20   ;;  %s7006_s18 = smov %s5673_s19 }
0x1611   : > { %p12_p5 = scmp.ge.s32.totalorder %s15_s20, 4   ;;  %s7007_s19 = smov %s7009_s21 }
0x1613   :  { %14 = sbr.rel (!%p12_p5) target bundleno = 2 (0x2), region = 84 }

// kernel: ray_transformer_forward.5
= control target key start
LH: loop header
LB: loop body
LE: loop exit
PB: predicated region body
PF: predicated region fallthrough
CT: control target
= control target key end

     0   :  { %vm43_vm0 = vcmask 261120   ;;  %v6779_v37 = vmov 0.0   ;;  %vm5606_vm2 = vmmov 0   ;;  %s5607_s5 = smov 96   ;;  %s5608_s6 = smov 64   ;;  %vm188_vm10 = vcmask 64512   ;;  %s6775_s1 = inlined_call_operand.vmem [shape: bf16[240,96], index: 1, kind: input, shape index: {}]   ;;  %s6776_s0 = inlined_call_operand.vmem [shape: f32[8,8,32], index: 0, kind: input, shape index: {}]   ;;  %s6777_s2 = inlined_call_operand.vmem [shape: f32[6,32], index: 2, kind: input, shape index: {}]   ;;  %s6778_s3 = inlined_call_operand.vmem [shape: f32[64,1], index: 3, kind: output, shape index: {}]  }
   0x1   :  { %v5454_v0 = vld [vmem:[%s6775_s1 + $0x8] sm:$0xff]   ;;  %v5455_v1 = vld [vmem:[%s6775_s1] sm:$0xff]   ;;  %v17_v5 = vld [vmem:[%s6776_s0 + $0x10] sm:$0xff]  ;;  %4920 = vmatprep.subr.bf16.mxu1 %v6779_v37  ;;  %4922 = vmatprep.mubr.msk.bf16.mxu1 %vm5606_vm2, %v6779_v37  ;;  %s5609_s7 = smov 88   ;;  %s5610_s8 = smov 120   ;;  %vm640_vm11 = vcmask 1043456  }
   0x2   :  { %4908 = vmatprep.subr.bf16.mxu0 %v5454_v0  ;;  %v15_v2 = vld [vmem:[%s6776_s0] sm:$0xff]  ;;  %v16_v3 = vld [vmem:[%s6776_s0 + $0x8] sm:$0xff]  ;;  %v18_v6 = vld [vmem:[%s6776_s0 + $0x18] sm:$0xff]  ;;  %s5611_s9 = smov 56   ;;  %s5612_s10 = smov 80   ;;  %vm3659_vm12 = vcmask 130048  }
   0x3   :  { %4909 = vmatpush3.bf16.msra.mxu0 %v5454_v0  ;;  %v5653_v4 = vpack.c.bf16 %v16_v3, %v15_v2  ;;  %v19_v7 = vld [vmem:[%s6776_s0 + $0x20] sm:$0xff]  ;;  %v20_v8 = vld [vmem:[%s6776_s0 + $0x28] sm:$0xff]  ;;  %v5669_v9 = vpack.c.bf16 %v18_v6, %v17_v5  ;;  %v21_v11 = vld [vmem:[%s6776_s0 + $0x30] sm:$0xff]  ;;  %s5613_s11 = smov 112   ;;  %s5614_s12 = smov 48   ;;  %vm3668_vm13 = vcmask 195584  }
   0x4   :  { %4910 = vmatprep.subr.bf16.mxu0 %v5455_v1  ;;  %v5671_v10 = vpack.c.bf16 %v20_v8, %v19_v7  ;;  %v22_v12 = vld [vmem:[%s6776_s0 + $0x38] sm:$0xff]  ;;  %s5615_s13 = smov 72   ;;  %s5616_s14 = smov 104   ;;  %vm4127_vm14 = vcmask 523264  }
   0x5   :  { %6785 = vst [vmem:[#allocation2_spill] sm:$0xff] %v5653_v4  ;;  %4912 = vmatprep.mubr.msk.bf16.mxu0 %vm43_vm0, %v5653_v4  ;;  %6786 = vst [vmem:[#allocation3_spill] sm:$0xff] %v5669_v9  ;;  %v5683_v13 = vpack.c.bf16 %v22_v12, %v21_v11  ;;  %s5617_s15 = smov 40   ;;  %s5618_s16 = smov 8  }
   0x6   :  { %6787 = vst [vmem:[#allocation4_spill] sm:$0xff] %v5671_v10  ;;  %s5619_s17 = smov 16   ;;  %s5620_s22 = smov 24  }
   0x7   :  { %4911 = vmatpush3.bf16.msra.mxu0 %v5455_v1  ;;  %6788 = vst [vmem:[#allocation5_spill] sm:$0xff] %v5683_v13 }
   0x8   :  { %4932 = vmatprep.subr.bf16.mxu0 %v6779_v37 }
   0xa   :  { %4913 = vmatmul.mubr.msk.bf16.vlgmr.msra.gmra.mxu0 %vm43_vm0, %v5669_v9 }
   0xb   :  { %4916 = vmatprep.mubr.msk.bf16.mxu0 %vm43_vm0, %v5671_v10 }
  0x12   :  { %4917 = vmatmul.mubr.msk.bf16.gmra.mxu0 %vm43_vm0, %v5683_v13 }
  0x13   :  { %4934 = vmatprep.mubr.msk.bf16.mxu0 %vm5606_vm2, %v6779_v37 }
  0xca   :  { %v5687_v14 = vpop.f32.mrf.mxu0 }
  0xcb   :  { %v131_v15 = vmin.f32 %v5687_v14, 0.0  ;;  %vm123_vm1 = vcmp.gt.f32.partialorder %v5687_v14, 0.0 }
  0xcc   :  { %v5690_v16 = vpop.f32.mrf.mxu0 }
  0xcd   :  { %v141_v17 = vmul.f32 1.442695, %v131_v15  ;;  %v129_v18 = vmin.f32 %v5690_v16, 0.0  ;;  %vm121_vm3 = vcmp.gt.f32.partialorder %v5690_v16, 0.0 }
  0xce   :  { %v5693_v19 = vpop.f32.mrf.mxu0 }
  0xcf   :  { %5469 = vpow2.f32 %v141_v17  ;;  %v137_v20 = vmul.f32 1.442695, %v129_v18  ;;  %v132_v21 = vmin.f32 %v5693_v19, 0.0  ;;  %vm124_vm4 = vcmp.gt.f32.partialorder %v5693_v19, 0.0 }
  0xd0   :  { %v5696_v22 = vpop.f32.mrf.mxu0 }
  0xd1   :  { %5471 = vpow2.f32 %v137_v20  ;;  %v143_v23 = vmul.f32 1.442695, %v132_v21  ;;  %v130_v24 = vmin.f32 %v5696_v22, 0.0  ;;  %vm122_vm5 = vcmp.gt.f32.partialorder %v5696_v22, 0.0 }
  0xd2   :  { %v5699_v25 = vpop.f32.mrf.mxu0  ;;  %v5763_v21 = vpack.c.bf16 %v5690_v16, %v5690_v16 }
  0xd3   :  { %5473 = vpow2.f32 %v143_v23  ;;  %v139_v26 = vmul.f32 1.442695, %v130_v24  ;;  %v135_v27 = vmin.f32 %v5699_v25, 0.0  ;;  %vm127_vm6 = vcmp.gt.f32.partialorder %v5699_v25, 0.0 }
  0xd4   :  { %v5702_v28 = vpop.f32.mrf.mxu0  ;;  %v5772_v24 = vpack.c.bf16 %v5687_v14, %v5687_v14 }
  0xd5   :  { %5475 = vpow2.f32 %v139_v26  ;;  %v149_v29 = vmul.f32 1.442695, %v135_v27  ;;  %v133_v30 = vmin.f32 %v5702_v28, 0.0  ;;  %vm125_vm7 = vcmp.gt.f32.partialorder %v5702_v28, 0.0 }
  0xd6   :  { %v5705_v31 = vpop.f32.mrf.mxu0  ;;  %v5776_v26 = vpack.c.bf16 %v5696_v22, %v5696_v22  ;;  %v5786_v27 = vpack.c.bf16 %v5702_v28, %v5702_v28 }
  0xd7   :  { %5477 = vpow2.f32 %v149_v29  ;;  %v145_v32 = vmul.f32 1.442695, %v133_v30  ;;  %v136_v33 = vmin.f32 %v5705_v31, 0.0  ;;  %vm128_vm8 = vcmp.gt.f32.partialorder %v5705_v31, 0.0 }
  0xd8   :  { %v5708_v34 = vpop.f32.mrf.mxu0 }
  0xd9   :  { %5479 = vpow2.f32 %v145_v32  ;;  %v151_v35 = vmul.f32 1.442695, %v136_v33  ;;  %v134_v36 = vmin.f32 %v5708_v34, 0.0  ;;  %vm126_vm9 = vcmp.gt.f32.partialorder %v5708_v34, 0.0 }
  0xdb   :  { %5481 = vpow2.f32 %v151_v35  ;;  %v147_v38 = vmul.f32 1.442695, %v134_v36 }
  0xdc   :  { %v5470_v39 = vpop.eup %5469 }
  0xdd   :  { %v4616_v40 = vadd.f32 -1.0, %v5470_v39  ;;  %5483 = vpow2.f32 %v147_v38 }
  0xde   :  { %v5472_v41 = vpop.eup %5471 }
  0xdf   :  { %v163_v42 = vsel %vm123_vm1, %v5687_v14, %v4616_v40  ;;  %v4614_v43 = vadd.f32 -1.0, %v5472_v41  ;;  %v5792_v14 = vpack.c.bf16 %v5699_v25, %v5699_v25 }
  0xe0   :  { %v5474_v44 = vpop.eup %5473  ;;  %v171_v45 = vadd.f32 1.0, %v163_v42 }
  0xe1   :  { %v161_v46 = vsel %vm121_vm3, %v5690_v16, %v4614_v43  ;;  %v4617_v47 = vadd.f32 -1.0, %v5474_v44  ;;  %v5782_v16 = vpack.c.bf16 %v5693_v19, %v5693_v19 }
  0xe2   :  { %v5476_v48 = vpop.eup %5475  ;;  %v5721_v49 = vpack.c.bf16 %v171_v45, %v171_v45  ;;  %v169_v50 = vadd.f32 1.0, %v161_v46 }
  0xe3   :  { %v164_v51 = vsel %vm124_vm4, %v5693_v19, %v4617_v47  ;;  %v4615_v52 = vadd.f32 -1.0, %v5476_v48  ;;  %v5802_v19 = vpack.c.bf16 %v5705_v31, %v5705_v31 }
  0xe4   :  { %v5478_v53 = vpop.eup %5477  ;;  %v5725_v54 = vpack.c.bf16 %v169_v50, %v169_v50  ;;  %v172_v55 = vadd.f32 1.0, %v164_v51  ;;  %285 = vrot.lane.b32.xlu1 %v5721_v49, %s5607_s5 }
  0xe5   :  { %v162_v56 = vsel %vm122_vm5, %v5696_v22, %v4615_v52  ;;  %v4620_v57 = vadd.f32 -1.0, %v5478_v53  ;;  %v5796_v22 = vpack.c.bf16 %v5708_v34, %v5708_v34 }
  0xe6   :  { %v5480_v58 = vpop.eup %5479  ;;  %v5731_v59 = vpack.c.bf16 %v172_v55, %v172_v55  ;;  %v170_v60 = vadd.f32 1.0, %v162_v56  ;;  %186 = vrot.lane.b32.xlu0 %v5725_v54, %s5607_s5 }
  0xe7   :  { %v4618_v61 = vadd.f32 -1.0, %v5480_v58  ;;  %v167_v0 = vsel %vm127_vm6, %v5699_v25, %v4620_v57 }
  0xe8   :  { %v5482_v62 = vpop.eup %5481  ;;  %v5735_v63 = vpack.c.bf16 %v170_v60, %v170_v60  ;;  %334 = vrot.lane.b32.xlu1 %v5731_v59, %s5607_s5  ;;  %v175_v7 = vadd.f32 1.0, %v167_v0 }
  0xe9   :  { %v165_v1 = vsel %vm125_vm7, %v5702_v28, %v4618_v61  ;;  %v4621_v2 = vadd.f32 -1.0, %v5482_v62  ;;  %vm4595_vm7 = vcmask 7168  }
  0xea   :  { %v5484_v3 = vpop.eup %5483  ;;  %v173_v5 = vadd.f32 1.0, %v165_v1  ;;  %236 = vrot.lane.b32.xlu0 %v5735_v63, %s5607_s5  ;;  %v5753_v17 = vpack.c.bf16 %v175_v7, %v175_v7 }
  0xeb   :  { %v4619_v6 = vadd.f32 -1.0, %v5484_v3  ;;  %v168_v11 = vsel %vm128_vm8, %v5705_v31, %v4621_v2 }
  0xec   :  { %v5745_v8 = vpack.c.bf16 %v173_v5, %v173_v5  ;;  %v176_v18 = vadd.f32 1.0, %v168_v11 }
  0xed   :  { %v166_v12 = vsel %vm126_vm9, %v5708_v34, %v4619_v6 }
  0xee   :  { %v174_v15 = vadd.f32 1.0, %v166_v12  ;;  %383 = vrot.lane.b32.xlu0 %v5745_v8, %s5607_s5  ;;  %v5765_v23 = vpack.c.bf16 %v176_v18, %v176_v18 }
  0xf0   :  { %v5755_v20 = vpack.c.bf16 %v174_v15, %v174_v15 }
  0xf2   :  { %481 = vrot.lane.b32.xlu0 %v5753_v17, %s5607_s5  ;;  %432 = vrot.lane.b32.xlu1 %v5755_v20, %s5607_s5 }
  0xf6   :  { %635 = vrot.lane.b32.xlu0 %v5763_v21, %s5608_s6  ;;  %530 = vrot.lane.b32.xlu1 %v5765_v23, %s5607_s5 }
  0xfa   :  { %734 = vrot.lane.b32.xlu0 %v5772_v24, %s5608_s6  ;;  %685 = vrot.lane.b32.xlu1 %v5776_v26, %s5608_s6 }
  0xfe   :  { %832 = vrot.lane.b32.xlu0 %v5786_v27, %s5608_s6  ;;  %783 = vrot.lane.b32.xlu1 %v5782_v16, %s5608_s6 }
 0x102   :  { %930 = vrot.lane.b32.xlu0 %v5792_v14, %s5608_s6  ;;  %881 = vrot.lane.b32.xlu1 %v5796_v22, %s5608_s6 }
 0x106   :  { %1037 = vrot.lane.b32.xlu0 %v5725_v54, %s5609_s7  ;;  %979 = vrot.lane.b32.xlu1 %v5802_v19, %s5608_s6 }
 0x10a   :  { %1035 = vrot.lane.b32.xlu0 %v5725_v54, %s5610_s8  ;;  %1087 = vrot.lane.b32.xlu1 %v5735_v63, %s5609_s7 }
 0x10e   :  { %1137 = vrot.lane.b32.xlu0 %v5721_v49, %s5609_s7  ;;  %1085 = vrot.lane.b32.xlu1 %v5735_v63, %s5610_s8 }
 0x112   :  { %1135 = vrot.lane.b32.xlu0 %v5721_v49, %s5610_s8  ;;  %1187 = vrot.lane.b32.xlu1 %v5731_v59, %s5609_s7 }
 0x116   :  { %1237 = vrot.lane.b32.xlu0 %v5745_v8, %s5609_s7  ;;  %1185 = vrot.lane.b32.xlu1 %v5731_v59, %s5610_s8 }
 0x11a   :  { %1235 = vrot.lane.b32.xlu0 %v5745_v8, %s5610_s8  ;;  %1287 = vrot.lane.b32.xlu1 %v5755_v20, %s5609_s7 }
 0x11e   :  { %1337 = vrot.lane.b32.xlu0 %v5753_v17, %s5609_s7  ;;  %1285 = vrot.lane.b32.xlu1 %v5755_v20, %s5610_s8 }
 0x122   :  { %1335 = vrot.lane.b32.xlu0 %v5753_v17, %s5610_s8  ;;  %1387 = vrot.lane.b32.xlu1 %v5765_v23, %s5609_s7 }
 0x126   :  { %1483 = vrot.lane.b32.xlu0 %v5763_v21, %s5611_s9  ;;  %1385 = vrot.lane.b32.xlu1 %v5765_v23, %s5610_s8 }
 0x12a   :  { %1579 = vrot.lane.b32.xlu0 %v5772_v24, %s5611_s9  ;;  %1531 = vrot.lane.b32.xlu1 %v5776_v26, %s5611_s9 }
 0x12e   :  { %1675 = vrot.lane.b32.xlu0 %v5786_v27, %s5611_s9  ;;  %1627 = vrot.lane.b32.xlu1 %v5782_v16, %s5611_s9 }
 0x132   :  { %1771 = vrot.lane.b32.xlu0 %v5792_v14, %s5611_s9  ;;  %1723 = vrot.lane.b32.xlu1 %v5796_v22, %s5611_s9 }
 0x136   :  { %1877 = vrot.lane.b32.xlu0 %v5725_v54, %s5612_s10  ;;  %1819 = vrot.lane.b32.xlu1 %v5802_v19, %s5611_s9 }
 0x13a   :  { %1875 = vrot.lane.b32.xlu0 %v5725_v54, %s5613_s11  ;;  %1927 = vrot.lane.b32.xlu1 %v5735_v63, %s5612_s10 }
 0x13e   :  { %1977 = vrot.lane.b32.xlu0 %v5721_v49, %s5612_s10  ;;  %1925 = vrot.lane.b32.xlu1 %v5735_v63, %s5613_s11 }
 0x142   :  { %1975 = vrot.lane.b32.xlu0 %v5721_v49, %s5613_s11  ;;  %2027 = vrot.lane.b32.xlu1 %v5731_v59, %s5612_s10 }
 0x146   :  { %2077 = vrot.lane.b32.xlu0 %v5745_v8, %s5612_s10  ;;  %2025 = vrot.lane.b32.xlu1 %v5731_v59, %s5613_s11 }
 0x14a   :  { %2075 = vrot.lane.b32.xlu0 %v5745_v8, %s5613_s11  ;;  %2127 = vrot.lane.b32.xlu1 %v5755_v20, %s5612_s10 }
 0x14e   :  { %2177 = vrot.lane.b32.xlu0 %v5753_v17, %s5612_s10  ;;  %2125 = vrot.lane.b32.xlu1 %v5755_v20, %s5613_s11 }
 0x152   :  { %2175 = vrot.lane.b32.xlu0 %v5753_v17, %s5613_s11  ;;  %2227 = vrot.lane.b32.xlu1 %v5765_v23, %s5612_s10 }
 0x156   :  { %v286_v25 = vpop.permute.xlu1 %285  ;;  %2323 = vrot.lane.b32.xlu0 %v5763_v21, %s5614_s12  ;;  %2225 = vrot.lane.b32.xlu1 %v5765_v23, %s5613_s11 }
 0x157   :  { %v291_v28 = vsel %vm188_vm10, %v286_v25, 0 }
 0x158   :  { %4933 = vmatpush3.bf16.xpose.msra.mxu0 %v291_v28  ;;  %v187_v29 = vpop.permute.xlu0 %186 }
 0x159   :  { %v193_v30 = vsel %vm188_vm10, %v187_v29, 0  ;;  %4944 = vmatprep.subr.bf16.mxu0 %v6779_v37 }
 0x15a   :  { %4921 = vmatpush3.bf16.xpose.msra.mxu1 %v193_v30  ;;  %2419 = vrot.lane.b32.xlu0 %v5772_v24, %s5614_s12  ;;  %v335_v35 = vpop.permute.xlu1 %334 }
 0x15b   :  { %2371 = vrot.lane.b32.xlu1 %v5776_v26, %s5614_s12  ;;  %4926 = vmatprep.subr.bf16.mxu1 %v6779_v37  ;;  %v340_v38 = vsel %vm188_vm10, %v335_v35, 0 }
 0x15c   :  { %v237_v31 = vpop.permute.xlu0 %236 }
 0x15d   :  { %v242_v33 = vsel %vm188_vm10, %v237_v31, 0 }
 0x15e   :  { %2515 = vrot.lane.b32.xlu0 %v5786_v27, %s5614_s12 }
 0x15f   :  { %2467 = vrot.lane.b32.xlu1 %v5782_v16, %s5614_s12  ;;  %4935 = vmatmul.mubr.msk.bf16.vlgmr.msra.gmra.mxu0 %vm188_vm10, %v5721_v49 }
 0x160   :  { %v384_v32 = vpop.permute.xlu0 %383  ;;  %4946 = vmatprep.mubr.msk.bf16.mxu0 %vm5606_vm2, %v6779_v37 }
 0x161   :  { %v389_v34 = vsel %vm188_vm10, %v384_v32, 0  ;;  %4923 = vmatmul.mubr.msk.bf16.vlgmr.msra.gmra.mxu1 %vm188_vm10, %v5725_v54 }
 0x162   :  { %4927 = vmatpush3.bf16.xpose.msra.mxu1 %v242_v33  ;;  %2611 = vrot.lane.b32.xlu0 %v5792_v14, %s5614_s12 }
 0x163   :  { %4945 = vmatpush3.bf16.xpose.msra.mxu0 %v389_v34  ;;  %2563 = vrot.lane.b32.xlu1 %v5796_v22, %s5614_s12 }
 0x164   :  { %4928 = vmatprep.mubr.msk.bf16.mxu1 %vm5606_vm2, %v6779_v37  ;;  %4938 = vmatprep.subr.bf16.mxu1 %v6779_v37  ;;  %v482_v36 = vpop.permute.xlu0 %481  ;;  %v433_v40 = vpop.permute.xlu1 %432 }
 0x165   :  { %4956 = vmatprep.subr.bf16.mxu0 %v6779_v37  ;;  %v487_v39 = vsel %vm188_vm10, %v482_v36, 0  ;;  %v438_v42 = vsel %vm188_vm10, %v433_v40, 0 }
 0x166   :  { %2717 = vrot.lane.b32.xlu0 %v5725_v54, %s5615_s13 }
 0x167   :  { %2659 = vrot.lane.b32.xlu1 %v5802_v19, %s5614_s12 }
 0x168   :  { %v636_v41 = vpop.permute.xlu0 %635  ;;  %v531_v44 = vpop.permute.xlu1 %530 }
 0x169   :  { %4929 = vmatmul.mubr.msk.bf16.vlgmr.msra.gmra.mxu1 %vm188_vm10, %v5735_v63  ;;  %v642_v43 = vsel %vm640_vm11, %v636_v41, 0  ;;  %v536_v45 = vsel %vm188_vm10, %v531_v44, 0 }
 0x16a   :  { %4947 = vmatmul.mubr.msk.bf16.vlgmr.msra.gmra.mxu0 %vm188_vm10, %v5745_v8  ;;  %4939 = vmatpush3.bf16.xpose.msra.mxu1 %v340_v38 }
 0x16b   :  { %2715 = vrot.lane.b32.xlu0 %v5725_v54, %s5616_s14  ;;  %4957 = vmatpush3.bf16.xpose.msra.mxu0 %v487_v39 }
 0x16c   :  { %2767 = vrot.lane.b32.xlu1 %v5735_v63, %s5615_s13  ;;  %4940 = vmatprep.mubr.msk.bf16.mxu1 %vm5606_vm2, %v6779_v37  ;;  %v686_v46 = vpop.permute.xlu1 %685  ;;  %v735_v48 = vpop.permute.xlu0 %734 }
 0x16d   :  { %4958 = vmatprep.mubr.msk.bf16.mxu0 %vm5606_vm2, %v6779_v37  ;;  %4950 = vmatprep.subr.bf16.mxu1 %v6779_v37  ;;  %v691_v47 = vsel %vm640_vm11, %v686_v46, 0  ;;  %v740_v58 = vsel %vm640_vm11, %v735_v48, 0 }
 0x16e   :  { %4968 = vmatprep.subr.bf16.mxu0 %v6779_v37 }
 0x16f   :  { %2817 = vrot.lane.b32.xlu0 %v5721_v49, %s5615_s13 }
 0x170   :  { %2765 = vrot.lane.b32.xlu1 %v5735_v63, %s5616_s14  ;;  %v784_v50 = vpop.permute.xlu1 %783 }
 0x171   :  { %4941 = vmatmul.mubr.msk.bf16.vlgmr.msra.gmra.mxu1 %vm188_vm10, %v5731_v59 }
 0x172   :  { %4959 = vmatmul.mubr.msk.bf16.vlgmr.msra.gmra.mxu0 %vm188_vm10, %v5753_v17  ;;  %4951 = vmatpush3.bf16.xpose.msra.mxu1 %v438_v42 }
 0x173   :  { %2815 = vrot.lane.b32.xlu0 %v5721_v49, %s5616_s14  ;;  %4969 = vmatpush3.bf16.msra.mxu0 %v642_v43  ;;  %v833_v49 = vpop.permute.xlu0 %832 }
 0x174   :  { %2867 = vrot.lane.b32.xlu1 %v5731_v59, %s5615_s13  ;;  %4952 = vmatprep.mubr.msk.bf16.mxu1 %vm5606_vm2, %v6779_v37  ;;  %v838_v7 = vsel %vm640_vm11, %v833_v49, 0 }
 0x175   :  { %4962 = vmatprep.subr.bf16.mxu1 %v6779_v37  ;;  %4970 = vmatprep.mubr.msk.bf16.mxu0 %vm5606_vm2, %v6779_v37 }
 0x176   :  { %4980 = vmatprep.subr.bf16.mxu0 %v6779_v37 }
 0x177   :  { %2917 = vrot.lane.b32.xlu0 %v5745_v8, %s5615_s13  ;;  %v931_v54 = vpop.permute.xlu0 %930 }
 0x178   :  { %2865 = vrot.lane.b32.xlu1 %v5731_v59, %s5616_s14  ;;  %v882_v59 = vpop.permute.xlu1 %881 }
 0x179   :  { %4953 = vmatmul.mubr.msk.bf16.vlgmr.msra.gmra.mxu1 %vm188_vm10, %v5755_v20 }
 0x17a   :  { %4963 = vmatpush3.bf16.xpose.msra.mxu1 %v536_v45  ;;  %4964 = vmatprep.mubr.msk.bf16.mxu1 %vm5606_vm2, %v6779_v37 }
 0x17b   :  { %2915 = vrot.lane.b32.xlu0 %v5745_v8, %s5616_s14  ;;  %4974 = vmatprep.subr.bf16.mxu1 %v6779_v37  ;;  %v1038_v63 = vpop.permute.xlu0 %1037  ;;  %v789_v8 = vsel %vm640_vm11, %v784_v50, 0 }
 0x17c   :  { %2967 = vrot.lane.b32.xlu1 %v5755_v20, %s5615_s13  ;;  %v980_v5 = vpop.permute.xlu1 %979  ;;  %v1043_v39 = vsel %vm188_vm10, %v1038_v63, 0 }
 0x17d   :  { %v985_v40 = vsel %vm640_vm11, %v980_v5, 0 }
 0x17f   :  { %3017 = vrot.lane.b32.xlu0 %v5753_v17, %s5615_s13 }
 0x180   :  { %2965 = vrot.lane.b32.xlu1 %v5755_v20, %s5616_s14 }
 0x181   :  { %4965 = vmatmul.mubr.msk.bf16.vlgmr.msra.gmra.mxu1 %vm188_vm10, %v5765_v23 }
 0x182   :  { %4975 = vmatpush3.bf16.msra.mxu1 %v691_v47  ;;  %4976 = vmatprep.mubr.msk.bf16.mxu1 %vm5606_vm2, %v6779_v37 }
 0x183   :  { %3015 = vrot.lane.b32.xlu0 %v5753_v17, %s5616_s14  ;;  %4986 = vmatprep.subr.bf16.mxu1 %v6779_v37  ;;  %v1036_v17 = vpop.permute.xlu0 %1035 }
 0x184   :  { %3067 = vrot.lane.b32.xlu1 %v5765_v23, %s5615_s13 }
 0x187   :  { %3163 = vrot.lane.b32.xlu0 %v5763_v21, %s5617_s15  ;;  %v1088_v21 = vpop.permute.xlu1 %1087  ;;  %v1138_v25 = vpop.permute.xlu0 %1137 }
 0x188   :  { %3065 = vrot.lane.b32.xlu1 %v5765_v23, %s5616_s14  ;;  %v1093_v49 = vsel %vm188_vm10, %v1088_v21, 0  ;;  %v1143_v50 = vsel %vm188_vm10, %v1138_v25, 0 }
 0x18b   :  { %3259 = vrot.lane.b32.xlu0 %v5772_v24, %s5617_s15  ;;  %v1086_v30 = vpop.permute.xlu1 %1085  ;;  %v1136_v36 = vpop.permute.xlu0 %1135 }
 0x18c   :  { %3211 = vrot.lane.b32.xlu1 %v5776_v26, %s5617_s15 }
 0x18f   :  { %3355 = vrot.lane.b32.xlu0 %v5786_v27, %s5617_s15  ;;  %v1188_v41 = vpop.permute.xlu1 %1187  ;;  %v1238_v44 = vpop.permute.xlu0 %1237 }
 0x190   :  { %3307 = vrot.lane.b32.xlu1 %v5782_v16, %s5617_s15 }
 0x193   :  { %3451 = vrot.lane.b32.xlu0 %v5792_v14, %s5617_s15  ;;  %v936_v14 = vsel %vm640_vm11, %v931_v54, 0  ;;  %v1186_v47 = vpop.permute.xlu1 %1185  ;;  %v1236_v54 = vpop.permute.xlu0 %1235 }
 0x194   :  { %3403 = vrot.lane.b32.xlu1 %v5796_v22, %s5617_s15  ;;  %v887_v22 = vsel %vm640_vm11, %v882_v59, 0 }
 0x197   :  { %v1338_v59 = vpop.permute.xlu0 %1337 }
 0x198   :  { %3499 = vrot.lane.b32.xlu1 %v5802_v19, %s5617_s15  ;;  %v1343_v63 = vsel %vm188_vm10, %v1338_v59, 0 }
 0x21f   :  { %v5953_v51 = vpop.f32.mrf.mxu0 }
 0x220   :  { %v620_v1 = vpack.c.bf16 %v5953_v51, %v5953_v51 }
 0x221   :  { %v5955_v52 = vpop.f32.mrf.mxu1  ;;  %v4936_v53 = vpop.f32.mrf.mxu0 }
 0x222   :  { %v618_v55 = vpack.c.bf16 %v5955_v52, %v5955_v52 }
 0x223   :  { %v4924_v56 = vpop.f32.mrf.mxu1  ;;  %v330_v57 = vpop.f32.mrf.mxu0 }
 0x224   :  { %4971 = vmatmul.mubr.msk.bf16.vlgmr.msra.gmra.mxu0 %vm188_vm10, %v618_v55  ;;  %v1288_v56 = vpop.permute.xlu1 %1287  ;;  %v1193_v57 = vsel %vm188_vm10, %v1188_v41, 0 }
 0x225   :  { %4981 = vmatpush3.bf16.msra.mxu0 %v740_v58  ;;  %v232_v60 = vpop.f32.mrf.mxu1  ;;  %v4937_v61 = vpop.f32.mrf.mxu0  ;;  %4982 = vmatprep.mubr.msk.bf16.mxu0 %vm5606_vm2, %v6779_v37  ;;  %v1243_v58 = vsel %vm188_vm10, %v1238_v44, 0 }
 0x226   :  { %4992 = vmatprep.subr.bf16.mxu0 %v6779_v37  ;;  %v1336_v61 = vpop.permute.xlu0 %1335 }
 0x227   :  { %v4925_v62 = vpop.f32.mrf.mxu1 }
 0x228   :  { %v1286_v60 = vpop.permute.xlu1 %1285  ;;  %v1293_v62 = vsel %vm188_vm10, %v1288_v56, 0 }
 0x229   :  { %v5964_v0 = vpop.f32.mrf.mxu1 }
 0x22a   :  { %v619_v2 = vpack.c.bf16 %v5964_v0, %v5964_v0  ;;  %v5970_v3 = vpop.f32.mrf.mxu0 }
 0x22b   :  { %v4930_v6 = vpop.f32.mrf.mxu1  ;;  %v622_v24 = vpack.c.bf16 %v5970_v3, %v5970_v3 }
 0x22c   :  { %v4948_v11 = vpop.f32.mrf.mxu0  ;;  %4977 = vmatmul.mubr.msk.bf16.vlgmr.msra.gmra.mxu1 %vm188_vm10, %v619_v2  ;;  %4983 = vmatmul.mubr.msk.bf16.vlgmr.msra.gmra.mxu0 %vm188_vm10, %v620_v1  ;;  %v1388_v1 = vpop.permute.xlu1 %1387 }
 0x22d   :  { %4987 = vmatpush3.bf16.msra.mxu1 %v789_v8  ;;  %4993 = vmatpush3.bf16.msra.mxu0 %v838_v7  ;;  %v281_v12 = vpop.f32.mrf.mxu1  ;;  %v1484_v2 = vpop.permute.xlu0 %1483  ;;  %v1393_v6 = vsel %vm188_vm10, %v1388_v1, 0 }
 0x22e   :  { %v428_v15 = vpop.f32.mrf.mxu0  ;;  %4988 = vmatprep.mubr.msk.bf16.mxu1 %vm5606_vm2, %v6779_v37  ;;  %4994 = vmatprep.mubr.msk.bf16.mxu0 %vm5606_vm2, %v6779_v37  ;;  %v1489_v7 = vsel %vm640_vm11, %v1484_v2, 0 }
 0x22f   :  { %v4931_v18 = vpop.f32.mrf.mxu1  ;;  %4998 = vmatprep.subr.bf16.mxu1 %v6779_v37  ;;  %5004 = vmatprep.subr.bf16.mxu0 %v6779_v37 }
 0x230   :  { %v4949_v20 = vpop.f32.mrf.mxu0  ;;  %v1386_v5 = vpop.permute.xlu1 %1385 }
 0x231   :  { %v5982_v23 = vpop.f32.mrf.mxu1 }
 0x232   :  { %v621_v26 = vpack.c.bf16 %v5982_v23, %v5982_v23  ;;  %v5988_v16 = vpop.f32.mrf.mxu0 }
 0x233   :  { %v4942_v27 = vpop.f32.mrf.mxu1  ;;  %v624_v34 = vpack.c.bf16 %v5988_v16, %v5988_v16 }
 0x234   :  { %v4960_v19 = vpop.f32.mrf.mxu0  ;;  %4989 = vmatmul.mubr.msk.bf16.vlgmr.msra.gmra.mxu1 %vm188_vm10, %v621_v26  ;;  %4995 = vmatmul.mubr.msk.bf16.vlgmr.msra.gmra.mxu0 %vm188_vm10, %v622_v24  ;;  %v1532_v8 = vpop.permute.xlu1 %1531 }
 0x235   :  { %4999 = vmatpush3.bf16.msra.mxu1 %v887_v22  ;;  %5005 = vmatpush3.bf16.msra.mxu0 %v936_v14  ;;  %v379_v28 = vpop.f32.mrf.mxu1  ;;  %v1537_v11 = vsel %vm640_vm11, %v1532_v8, 0 }
 0x236   :  { %v526_v29 = vpop.f32.mrf.mxu0  ;;  %5000 = vmatprep.mubr.msk.bf16.mxu1 %vm5606_vm2, %v6779_v37  ;;  %5006 = vmatprep.mubr.msk.bf16.mxu0 %vm5606_vm2, %v6779_v37 }
 0x237   :  { %v4943_v31 = vpop.f32.mrf.mxu1  ;;  %5010 = vmatprep.subr.bf16.mxu1 %v6779_v37  ;;  %5016 = vmatprep.subr.bf16.mxu0 %v6779_v37 }
 0x238   :  { %v4961_v32 = vpop.f32.mrf.mxu0 }
 0x239   :  { %v6000_v33 = vpop.f32.mrf.mxu1 }
 0x23a   :  { %v623_v35 = vpack.c.bf16 %v6000_v33, %v6000_v33 }
 0x23b   :  { %v4954_v38 = vpop.f32.mrf.mxu1 }
 0x23c   :  { %5001 = vmatmul.mubr.msk.bf16.vlgmr.msra.gmra.mxu1 %vm188_vm10, %v623_v35  ;;  %5007 = vmatmul.mubr.msk.bf16.vlgmr.msra.gmra.mxu0 %vm188_vm10, %v624_v34  ;;  %v1580_v34 = vpop.permute.xlu0 %1579 }
 0x23d   :  { %5011 = vmatpush3.bf16.msra.mxu1 %v985_v40  ;;  %5017 = vmatpush3.bf16.xpose.msra.mxu0 %v1043_v39  ;;  %v477_v42 = vpop.f32.mrf.mxu1 }
 0x23e   :  { %5012 = vmatprep.mubr.msk.bf16.mxu1 %vm5606_vm2, %v6779_v37  ;;  %5018 = vmatprep.mubr.msk.bf16.mxu0 %vm5606_vm2, %v6779_v37 }
 0x23f   :  { %v4955_v43 = vpop.f32.mrf.mxu1  ;;  %5022 = vmatprep.subr.bf16.mxu1 %v6779_v37  ;;  %5028 = vmatprep.subr.bf16.mxu0 %v6779_v37 }
 0x240   :  { %v1676_v42 = vpop.permute.xlu0 %1675 }
 0x241   :  { %v6016_v45 = vpop.f32.mrf.mxu1 }
 0x242   :  { %v625_v46 = vpack.c.bf16 %v6016_v45, %v6016_v45 }
 0x243   :  { %v4966_v48 = vpop.f32.mrf.mxu1 }
 0x244   :  { %5013 = vmatmul.mubr.msk.bf16.vlgmr.msra.gmra.mxu1 %vm188_vm10, %v625_v46  ;;  %5019 = vmatmul.mubr.msk.bf16.vlgmr.msra.gmra.mxu0 %vm188_vm10, %v1036_v17  ;;  %v1628_v46 = vpop.permute.xlu1 %1627 }
 0x245   :  { %5023 = vmatpush3.bf16.xpose.msra.mxu1 %v1093_v49  ;;  %5029 = vmatpush3.bf16.xpose.msra.mxu0 %v1143_v50  ;;  %v575_v53 = vpop.f32.mrf.mxu1 }
 0x246   :  { %5024 = vmatprep.mubr.msk.bf16.mxu1 %vm5606_vm2, %v6779_v37  ;;  %5030 = vmatprep.mubr.msk.bf16.mxu0 %vm5606_vm2, %v6779_v37  ;;  %v1772_v53 = vpop.permute.xlu0 %1771 }
 0x247   :  { %v4967_v55 = vpop.f32.mrf.mxu1  ;;  %5034 = vmatprep.subr.bf16.mxu1 %v6779_v37  ;;  %5040 = vmatprep.subr.bf16.mxu0 %v6779_v37 }
 0x248   :  { %v1724_v59 = vpop.permute.xlu1 %1723 }
 0x24a   :  { %v6087_v1 = vpop.permute.xlu0 %1877 }
 0x24c   :  { %5025 = vmatmul.mubr.msk.bf16.vlgmr.msra.gmra.mxu1 %vm188_vm10, %v1086_v30  ;;  %5031 = vmatmul.mubr.msk.bf16.vlgmr.msra.gmra.mxu0 %vm188_vm10, %v1136_v36 }
 0x24d   :  { %5035 = vmatpush3.bf16.xpose.msra.mxu1 %v1193_v57  ;;  %5041 = vmatpush3.bf16.xpose.msra.mxu0 %v1243_v58  ;;  %v1585_v58 = vsel %vm640_vm11, %v1580_v34, 0 }
 0x24e   :  { %5036 = vmatprep.mubr.msk.bf16.mxu1 %vm5606_vm2, %v6779_v37  ;;  %5042 = vmatprep.mubr.msk.bf16.mxu0 %vm5606_vm2, %v6779_v37 }
 0x24f   :  { %5046 = vmatprep.subr.bf16.mxu1 %v6779_v37  ;;  %5052 = vmatprep.subr.bf16.mxu0 %v6779_v37 }
 0x254   :  { %5037 = vmatmul.mubr.msk.bf16.vlgmr.msra.gmra.mxu1 %vm188_vm10, %v1186_v47  ;;  %5043 = vmatmul.mubr.msk.bf16.vlgmr.msra.gmra.mxu0 %vm188_vm10, %v1236_v54 }
 0x255   :  { %5047 = vmatpush3.bf16.xpose.msra.mxu1 %v1293_v62  ;;  %5053 = vmatpush3.bf16.xpose.msra.mxu0 %v1343_v63 }
 0x256   :  { %5048 = vmatprep.mubr.msk.bf16.mxu1 %vm5606_vm2, %v6779_v37  ;;  %5054 = vmatprep.mubr.msk.bf16.mxu0 %vm5606_vm2, %v6779_v37 }
 0x257   :  { %5058 = vmatprep.subr.bf16.mxu1 %v6779_v37  ;;  %5064 = vmatprep.subr.bf16.mxu0 %v6779_v37 }
 0x25c   :  { %5049 = vmatmul.mubr.msk.bf16.vlgmr.msra.gmra.mxu1 %vm188_vm10, %v1286_v60  ;;  %5055 = vmatmul.mubr.msk.bf16.vlgmr.msra.gmra.mxu0 %vm188_vm10, %v1336_v61 }
 0x25d   :  { %5059 = vmatpush3.bf16.xpose.msra.mxu1 %v1393_v6  ;;  %5065 = vmatpush3.bf16.msra.mxu0 %v1489_v7  ;;  %v6089_v6 = vpop.permute.xlu1 %1819 }
 0x25e   :  { %5060 = vmatprep.mubr.msk.bf16.mxu1 %vm5606_vm2, %v6779_v37  ;;  %5070 = vmatprep.subr.bf16.mxu1 %v6779_v37 }
 0x25f   :  { %5066 = vmatprep.mubr.msk.bf16.mxu0 %vm5606_vm2, %v6779_v37  ;;  %5076 = vmatprep.subr.bf16.mxu0 %v6779_v37 }
 0x264   :  { %5061 = vmatmul.mubr.msk.bf16.vlgmr.msra.gmra.mxu1 %vm188_vm10, %v1386_v5 }
 0x265   :  { %5071 = vmatpush3.bf16.msra.mxu1 %v1537_v11  ;;  %5072 = vmatprep.mubr.msk.bf16.mxu1 %vm5606_vm2, %v6779_v37 }
 0x266   :  { %5082 = vmatprep.subr.bf16.mxu1 %v6779_v37 }
 0x2e4   :  { %v6065_v12 = vpop.f32.mrf.mxu0 }
 0x2e6   :  { %v4972_v15 = vpop.f32.mrf.mxu0 }
 0x2e8   :  { %v681_v17 = vpop.f32.mrf.mxu0 }
 0x2ea   :  { %v4973_v18 = vpop.f32.mrf.mxu0 }
 0x2ec   :  { %v6067_v20 = vpop.f32.mrf.mxu1  ;;  %v6069_v21 = vpop.f32.mrf.mxu0 }
 0x2ed   :  { %6789 = vst [vmem:[#allocation6_spill] sm:$0xff] %v6069_v21 }
 0x2ee   :  { %v4978_v24 = vpop.f32.mrf.mxu1  ;;  %v4984_v26 = vpop.f32.mrf.mxu0 }
 0x2ef   :  { %v1681_v24 = vsel %vm640_vm11, %v1676_v42, 0  ;;  %v1633_v26 = vsel %vm640_vm11, %v1628_v46, 0 }
 0x2f0   :  { %v730_v27 = vpop.f32.mrf.mxu1  ;;  %v779_v14 = vpop.f32.mrf.mxu0 }
 0x2f2   :  { %v4979_v22 = vpop.f32.mrf.mxu1  ;;  %v4985_v19 = vpop.f32.mrf.mxu0 }
 0x2f3   :  { %v6097_v22 = vpop.permute.xlu0 %1875 }
 0x2f4   :  { %v6071_v25 = vpop.f32.mrf.mxu1  ;;  %v6073_v28 = vpop.f32.mrf.mxu0 }
 0x2f5   :  { %6790 = vst [vmem:[#allocation7_spill] sm:$0xff] %v6071_v25  ;;  %6791 = vst [vmem:[#allocation8_spill] sm:$0xff] %v6073_v28 }
 0x2f6   :  { %v4990_v29 = vpop.f32.mrf.mxu1  ;;  %v4996_v30 = vpop.f32.mrf.mxu0 }
 0x2f7   :  { %v1928_v30 = vpop.permute.xlu1 %1927  ;;  %v1978_v46 = vpop.permute.xlu0 %1977 }
 0x2f8   :  { %v828_v31 = vpop.f32.mrf.mxu1  ;;  %v877_v32 = vpop.f32.mrf.mxu0 }
 0x2fa   :  { %v4991_v35 = vpop.f32.mrf.mxu1  ;;  %v4997_v36 = vpop.f32.mrf.mxu0 }
 0x2fc   :  { %v6075_v38 = vpop.f32.mrf.mxu1  ;;  %v6077_v39 = vpop.f32.mrf.mxu0 }
 0x2fd   :  { %6792 = vst [vmem:[#allocation9_spill] sm:$0xff] %v6075_v38  ;;  %6793 = vst [vmem:[#allocation10_spill] sm:$0xff] %v6077_v39 }
 0x2fe   :  { %v5002_v40 = vpop.f32.mrf.mxu1  ;;  %v5008_v41 = vpop.f32.mrf.mxu0 }
 0x300   :  { %v926_v43 = vpop.f32.mrf.mxu1  ;;  %v975_v44 = vpop.f32.mrf.mxu0 }
 0x301   :  { %v1777_v43 = vsel %vm640_vm11, %v1772_v53, 0  ;;  %v1729_v44 = vsel %vm640_vm11, %v1724_v59, 0 }
 0x302   :  { %v5003_v47 = vpop.f32.mrf.mxu1  ;;  %v5009_v48 = vpop.f32.mrf.mxu0 }
 0x304   :  { %v6079_v49 = vpop.f32.mrf.mxu1  ;;  %v1079_v50 = vpop.f32.mrf.mxu0 }
 0x305   :  { %6794 = vst [vmem:[#allocation11_spill] sm:$0xff] %v6079_v49  ;;  %v1475_v54 = vpack.c.bf16 %v1079_v50, %v1079_v50  ;;  %v1435_v55 = vsel %vm188_vm10, %v1079_v50, 0.0  ;;  %v1926_v50 = vpop.permute.xlu1 %1925 }
 0x306   :  { %1436 = vadd.xlane.f32.xlu0 %v1435_v55  ;;  %v5014_v56 = vpop.f32.mrf.mxu1  ;;  %v5020_v57 = vpop.f32.mrf.mxu0 }
 0x307   :  { %5067 = vmatmul.mubr.msk.bf16.vlgmr.msra.gmra.mxu0 %vm188_vm10, %v1475_v54  ;;  %v1976_v57 = vpop.permute.xlu0 %1975 }
 0x308   :  { %5077 = vmatpush3.bf16.msra.mxu0 %v1585_v58  ;;  %v1024_v60 = vpop.f32.mrf.mxu1  ;;  %v1082_v61 = vpop.f32.mrf.mxu0  ;;  %5078 = vmatprep.mubr.msk.bf16.mxu0 %vm5606_vm2, %v6779_v37 }
 0x309   :  { %5088 = vmatprep.subr.bf16.mxu0 %v6779_v37 }
 0x30a   :  { %v5015_v62 = vpop.f32.mrf.mxu1  ;;  %v5021_v63 = vpop.f32.mrf.mxu0 }
 0x30c   :  { %v1129_v2 = vpop.f32.mrf.mxu1  ;;  %v1179_v5 = vpop.f32.mrf.mxu0 }
 0x30d   :  { %v1476_v7 = vpack.c.bf16 %v1129_v2, %v1129_v2  ;;  %v1477_v8 = vpack.c.bf16 %v1179_v5, %v1179_v5  ;;  %v1441_v11 = vsel %vm188_vm10, %v1179_v5, 0.0  ;;  %v1438_v15 = vsel %vm188_vm10, %v1129_v2, 0.0 }
 0x30e   :  { %1442 = vadd.xlane.f32.xlu0 %v1441_v11  ;;  %v5032_v17 = vpop.f32.mrf.mxu0  ;;  %1439 = vadd.xlane.f32.xlu1 %v1438_v15  ;;  %v5026_v18 = vpop.f32.mrf.mxu1  ;;  %v1883_v2 = vsel %vm188_vm10, %v6087_v1, 0  ;;  %v1825_v5 = vsel %vm640_vm11, %v6089_v6, 0 }
 0x30f   :  { %5073 = vmatmul.mubr.msk.bf16.vlgmr.msra.gmra.mxu1 %vm188_vm10, %v1476_v7  ;;  %5079 = vmatmul.mubr.msk.bf16.vlgmr.msra.gmra.mxu0 %vm188_vm10, %v1477_v8  ;;  %v2028_v7 = vpop.permute.xlu1 %2027  ;;  %v2078_v1 = vpop.permute.xlu0 %2077 }
 0x310   :  { %5083 = vmatpush3.bf16.msra.mxu1 %v1633_v26  ;;  %5089 = vmatpush3.bf16.msra.mxu0 %v1681_v24  ;;  %v1132_v27 = vpop.f32.mrf.mxu1  ;;  %v1182_v14 = vpop.f32.mrf.mxu0 }
 0x311   :  { %5090 = vmatprep.mubr.msk.bf16.mxu0 %vm5606_vm2, %v6779_v37  ;;  %5100 = vmatprep.subr.bf16.mxu0 %v6779_v37  ;;  %v1933_v14 = vsel %vm188_vm10, %v1928_v30, 0 }
 0x312   :  { %v5027_v19 = vpop.f32.mrf.mxu1  ;;  %v5033_v29 = vpop.f32.mrf.mxu0  ;;  %5084 = vmatprep.mubr.msk.bf16.mxu1 %vm5606_vm2, %v6779_v37  ;;  %5094 = vmatprep.subr.bf16.mxu1 %v6779_v37 }
 0x313   :  { %v2026_v26 = vpop.permute.xlu1 %2025  ;;  %v1983_v19 = vsel %vm188_vm10, %v1978_v46, 0 }
 0x314   :  { %v1229_v31 = vpop.f32.mrf.mxu1  ;;  %v1279_v32 = vpop.f32.mrf.mxu0 }
 0x315   :  { %v1478_v34 = vpack.c.bf16 %v1229_v31, %v1229_v31  ;;  %v1479_v35 = vpack.c.bf16 %v1279_v32, %v1279_v32  ;;  %v1447_v36 = vsel %vm188_vm10, %v1279_v32, 0.0  ;;  %v1444_v40 = vsel %vm188_vm10, %v1229_v31, 0.0  ;;  %v2076_v31 = vpop.permute.xlu0 %2075 }
 0x316   :  { %v5044_v41 = vpop.f32.mrf.mxu0  ;;  %1448 = vadd.xlane.f32.xlu1 %v1447_v36  ;;  %1445 = vadd.xlane.f32.xlu0 %v1444_v40  ;;  %v5038_v42 = vpop.f32.mrf.mxu1 }
 0x317   :  { %5085 = vmatmul.mubr.msk.bf16.vlgmr.msra.gmra.mxu1 %vm188_vm10, %v1478_v34  ;;  %5091 = vmatmul.mubr.msk.bf16.vlgmr.msra.gmra.mxu0 %vm188_vm10, %v1479_v35  ;;  %v2128_v30 = vpop.permute.xlu1 %2127  ;;  %v2033_v34 = vsel %vm188_vm10, %v2028_v7, 0 }
 0x318   :  { %5095 = vmatpush3.bf16.msra.mxu1 %v1729_v44  ;;  %5101 = vmatpush3.bf16.msra.mxu0 %v1777_v43  ;;  %v1232_v47 = vpop.f32.mrf.mxu1  ;;  %v1282_v48 = vpop.f32.mrf.mxu0  ;;  %v2133_v41 = vsel %vm188_vm10, %v2128_v30, 0 }
 0x319   :  { %5102 = vmatprep.mubr.msk.bf16.mxu0 %vm5606_vm2, %v6779_v37  ;;  %5112 = vmatprep.subr.bf16.mxu0 %v6779_v37  ;;  %v2178_v35 = vpop.permute.xlu0 %2177 }
 0x31a   :  { %v5039_v54 = vpop.f32.mrf.mxu1  ;;  %v5045_v55 = vpop.f32.mrf.mxu0  ;;  %5096 = vmatprep.mubr.msk.bf16.mxu1 %vm5606_vm2, %v6779_v37  ;;  %5106 = vmatprep.subr.bf16.mxu1 %v6779_v37  ;;  %v2183_v42 = vsel %vm188_vm10, %v2178_v35, 0 }
 0x31b   :  { %v2126_v36 = vpop.permute.xlu1 %2125 }
 0x31c   :  { %v1329_v53 = vpop.f32.mrf.mxu1  ;;  %v1379_v56 = vpop.f32.mrf.mxu0 }
 0x31d   :  { %v1480_v58 = vpack.c.bf16 %v1329_v53, %v1329_v53  ;;  %v1481_v59 = vpack.c.bf16 %v1379_v56, %v1379_v56  ;;  %v1453_v60 = vsel %vm188_vm10, %v1379_v56, 0.0  ;;  %v1450_v61 = vsel %vm188_vm10, %v1329_v53, 0.0  ;;  %v2176_v40 = vpop.permute.xlu0 %2175 }
 0x31e   :  { %v5056_v62 = vpop.f32.mrf.mxu0  ;;  %1454 = vadd.xlane.f32.xlu1 %v1453_v60  ;;  %1451 = vadd.xlane.f32.xlu0 %v1450_v61  ;;  %v5050_v63 = vpop.f32.mrf.mxu1 }
 0x31f   :  { %5097 = vmatmul.mubr.msk.bf16.vlgmr.msra.gmra.mxu1 %vm188_vm10, %v1480_v58  ;;  %5103 = vmatmul.mubr.msk.bf16.vlgmr.msra.gmra.mxu0 %vm188_vm10, %v1481_v59  ;;  %v2228_v43 = vpop.permute.xlu1 %2227 }
 0x320   :  { %5107 = vmatpush3.bf16.msra.mxu1 %v1825_v5  ;;  %5113 = vmatpush3.bf16.xpose.msra.mxu0 %v1883_v2  ;;  %v1332_v8 = vpop.f32.mrf.mxu1  ;;  %v1382_v11 = vpop.f32.mrf.mxu0  ;;  %v2233_v47 = vsel %vm188_vm10, %v2228_v43, 0 }
 0x321   :  { %5114 = vmatprep.mubr.msk.bf16.mxu0 %vm5606_vm2, %v6779_v37  ;;  %5124 = vmatprep.subr.bf16.mxu0 %v6779_v37  ;;  %v2324_v44 = vpop.permute.xlu0 %2323 }
 0x322   :  { %v5051_v15 = vpop.f32.mrf.mxu1  ;;  %v5057_v17 = vpop.f32.mrf.mxu0  ;;  %5108 = vmatprep.mubr.msk.bf16.mxu1 %vm5606_vm2, %v6779_v37  ;;  %5118 = vmatprep.subr.bf16.mxu1 %v6779_v37  ;;  %v2329_v48 = vsel %vm640_vm11, %v2324_v44, 0 }
 0x323   :  { %v2226_v46 = vpop.permute.xlu1 %2225 }
 0x324   :  { %v1429_v6 = vpop.f32.mrf.mxu1 }
 0x325   :  { %v1482_v18 = vpack.c.bf16 %v1429_v6, %v1429_v6  ;;  %v1456_v24 = vsel %vm188_vm10, %v1429_v6, 0.0  ;;  %v6178_v55 = vpop.permute.xlu0 %2419 }
 0x326   :  { %1457 = vadd.xlane.f32.xlu0 %v1456_v24  ;;  %v5062_v27 = vpop.f32.mrf.mxu1 }
 0x327   :  { %5109 = vmatmul.mubr.msk.bf16.vlgmr.msra.gmra.mxu1 %vm188_vm10, %v1482_v18  ;;  %5115 = vmatmul.mubr.msk.bf16.vlgmr.msra.gmra.mxu0 %vm188_vm10, %v6097_v22  ;;  %v2083_v22 = vsel %vm188_vm10, %v2078_v1, 0 }
 0x328   :  { %5119 = vmatpush3.bf16.xpose.msra.mxu1 %v1933_v14  ;;  %5125 = vmatpush3.bf16.xpose.msra.mxu0 %v1983_v19  ;;  %v1432_v29 = vpop.f32.mrf.mxu1 }
 0x329   :  { %5120 = vmatprep.mubr.msk.bf16.mxu1 %vm5606_vm2, %v6779_v37  ;;  %5126 = vmatprep.mubr.msk.bf16.mxu0 %vm5606_vm2, %v6779_v37  ;;  %v6182_v56 = vpop.permute.xlu0 %2515 }
 0x32a   :  { %v5063_v32 = vpop.f32.mrf.mxu1  ;;  %5130 = vmatprep.subr.bf16.mxu1 %v6779_v37  ;;  %5136 = vmatprep.subr.bf16.mxu0 %v6779_v37 }
 0x32d   :  { %v6186_v58 = vpop.permute.xlu0 %2611 }
 0x32f   :  { %5121 = vmatmul.mubr.msk.bf16.vlgmr.msra.gmra.mxu1 %vm188_vm10, %v1926_v50  ;;  %5127 = vmatmul.mubr.msk.bf16.vlgmr.msra.gmra.mxu0 %vm188_vm10, %v1976_v57  ;;  %v2372_v50 = vpop.permute.xlu1 %2371 }
 0x330   :  { %5131 = vmatpush3.bf16.xpose.msra.mxu1 %v2033_v34  ;;  %5137 = vmatpush3.bf16.xpose.msra.mxu0 %v2083_v22  ;;  %v2377_v54 = vsel %vm640_vm11, %v2372_v50, 0 }
 0x331   :  { %5132 = vmatprep.mubr.msk.bf16.mxu1 %vm5606_vm2, %v6779_v37  ;;  %5138 = vmatprep.mubr.msk.bf16.mxu0 %vm5606_vm2, %v6779_v37  ;;  %v6190_v60 = vpop.permute.xlu0 %2717 }
 0x332   :  { %5142 = vmatprep.subr.bf16.mxu1 %v6779_v37  ;;  %5148 = vmatprep.subr.bf16.mxu0 %v6779_v37 }
 0x333   :  { %v6180_v53 = vpop.permute.xlu1 %2467 }
 0x335   :  { %v6194_v62 = vpop.permute.xlu0 %2715 }
 0x337   :  { %5133 = vmatmul.mubr.msk.bf16.vlgmr.msra.gmra.mxu1 %vm188_vm10, %v2026_v26  ;;  %5139 = vmatmul.mubr.msk.bf16.vlgmr.msra.gmra.mxu0 %vm188_vm10, %v2076_v31  ;;  %v6184_v57 = vpop.permute.xlu1 %2563 }
 0x338   :  { %5143 = vmatpush3.bf16.xpose.msra.mxu1 %v2133_v41  ;;  %5149 = vmatpush3.bf16.xpose.msra.mxu0 %v2183_v42 }
 0x339   :  { %5144 = vmatprep.mubr.msk.bf16.mxu1 %vm5606_vm2, %v6779_v37  ;;  %5150 = vmatprep.mubr.msk.bf16.mxu0 %vm5606_vm2, %v6779_v37  ;;  %v6198_v2 = vpop.permute.xlu0 %2817 }
 0x33a   :  { %5154 = vmatprep.subr.bf16.mxu1 %v6779_v37  ;;  %5160 = vmatprep.subr.bf16.mxu0 %v6779_v37 }
 0x33b   :  { %v6188_v59 = vpop.permute.xlu1 %2659 }
 0x33d   :  { %v6202_v7 = vpop.permute.xlu0 %2815 }
 0x33f   :  { %5145 = vmatmul.mubr.msk.bf16.vlgmr.msra.gmra.mxu1 %vm188_vm10, %v2126_v36  ;;  %5151 = vmatmul.mubr.msk.bf16.vlgmr.msra.gmra.mxu0 %vm188_vm10, %v2176_v40  ;;  %v6192_v61 = vpop.permute.xlu1 %2767 }
 0x340   :  { %5155 = vmatpush3.bf16.xpose.msra.mxu1 %v2233_v47  ;;  %5161 = vmatpush3.bf16.msra.mxu0 %v2329_v48 }
 0x341   :  { %5156 = vmatprep.mubr.msk.bf16.mxu1 %vm5606_vm2, %v6779_v37  ;;  %5166 = vmatprep.subr.bf16.mxu1 %v6779_v37  ;;  %v6206_v11 = vpop.permute.xlu0 %2917 }
 0x342   :  { %5162 = vmatprep.mubr.msk.bf16.mxu0 %vm5606_vm2, %v6779_v37  ;;  %5172 = vmatprep.subr.bf16.mxu0 %v6779_v37 }
 0x343   :  { %v6196_v63 = vpop.permute.xlu1 %2765 }
 0x345   :  { %v6210_v17 = vpop.permute.xlu0 %2915 }
 0x347   :  { %5157 = vmatmul.mubr.msk.bf16.vlgmr.msra.gmra.mxu1 %vm188_vm10, %v2226_v46  ;;  %v6200_v5 = vpop.permute.xlu1 %2867 }
 0x348   :  { %5167 = vmatpush3.bf16.msra.mxu1 %v2377_v54  ;;  %5168 = vmatprep.mubr.msk.bf16.mxu1 %vm5606_vm2, %v6779_v37 }
 0x349   :  { %5178 = vmatprep.subr.bf16.mxu1 %v6779_v37  ;;  %v6214_v6 = vpop.permute.xlu0 %3017 }
 0x34b   :  { %v6204_v8 = vpop.permute.xlu1 %2865 }
 0x34d   :  { %v6218_v24 = vpop.permute.xlu0 %3015 }
 0x34f   :  { %v6208_v15 = vpop.permute.xlu1 %2967 }
 0x351   :  { %v6222_v27 = vpop.permute.xlu0 %3163 }
 0x353   :  { %v6212_v1 = vpop.permute.xlu1 %2965 }
 0x355   :  { %v6226_v19 = vpop.permute.xlu0 %3259 }
 0x357   :  { %v6216_v18 = vpop.permute.xlu1 %3067 }
 0x359   :  { %v6230_v31 = vpop.permute.xlu0 %3355 }
 0x35b   :  { %v6220_v26 = vpop.permute.xlu1 %3065 }
 0x35d   :  { %v6234_v30 = vpop.permute.xlu0 %3451 }
 0x35f   :  { %v6224_v14 = vpop.permute.xlu1 %3211 }
 0x363   :  { %v6228_v29 = vpop.permute.xlu1 %3307 }
 0x367   :  { %v6232_v32 = vpop.permute.xlu1 %3403 }
 0x36b   :  { %v6236_v34 = vpop.permute.xlu1 %3499 }
 0x38f   :  { %v1437_v22 = vpop.xlane.xlu0 %1436 }
 0x390   :  { %v1459_v36 = vadd.f32 1e-06, %v1437_v22 }
 0x392   :  { %5485 = vrcp.f32 %v1459_v36 }
 0x397   :  { %v1440_v35 = vpop.xlane.xlu1 %1439  ;;  %v1443_v41 = vpop.xlane.xlu0 %1442 }
 0x398   :  { %v1460_v40 = vadd.f32 1e-06, %v1440_v35  ;;  %v1461_v43 = vadd.f32 1e-06, %v1443_v41 }
 0x39a   :  { %5487 = vrcp.f32 %v1460_v40 }
 0x39b   :  { %5489 = vrcp.f32 %v1461_v43 }
 0x39f   :  { %v1446_v42 = vpop.xlane.xlu0 %1445  ;;  %v1449_v48 = vpop.xlane.xlu1 %1448 }
 0x3a0   :  { %v1462_v44 = vadd.f32 1e-06, %v1446_v42  ;;  %v1463_v37 = vadd.f32 1e-06, %v1449_v48  ;;  %v5486_v10 = vpop.eup %5485 }
 0x3a2   :  { %5491 = vrcp.f32 %v1462_v44 }
 0x3a3   :  { %5493 = vrcp.f32 %v1463_v37 }
 0x3a7   :  { %v1452_v50 = vpop.xlane.xlu0 %1451  ;;  %v5488_v4 = vpop.eup %5487 }
 0x3a8   :  { %v1464_v9 = vadd.f32 1e-06, %v1452_v50  ;;  %v1455_v42 = vpop.xlane.xlu1 %1454  ;;  %v5490_v39 = vpop.eup %5489 }
 0x3a9   :  { %v1465_v48 = vadd.f32 1e-06, %v1455_v42 }
 0x3aa   :  { %5495 = vrcp.f32 %v1464_v9 }
 0x3ab   :  { %5497 = vrcp.f32 %v1465_v48 }
 0x3af   :  { %v1458_v43 = vpop.xlane.xlu0 %1457 }
 0x3b0   :  { %v1466_v28 = vadd.f32 1e-06, %v1458_v43 }
 0x3b2   :  { %5499 = vrcp.f32 %v1466_v28 }
 0x3c7   :  { %v1525_v46 = vpop.f32.mrf.mxu0 }
 0x3c8   :  { %v6238_v49 = vmul.f32 %v5486_v10, %v1525_v46  ;;  %v5492_v10 = vpop.eup %5491 }
 0x3c9   :  { %v5068_v47 = vpop.f32.mrf.mxu0 }
 0x3cb   :  { %v1528_v54 = vpop.f32.mrf.mxu0 }
 0x3cd   :  { %v5069_v13 = vpop.f32.mrf.mxu0 }
 0x3cf   :  { %v1573_v22 = vpop.f32.mrf.mxu1  ;;  %v1621_v35 = vpop.f32.mrf.mxu0 }
 0x3d0   :  { %v6240_v36 = vmul.f32 %v5488_v4, %v1573_v22  ;;  %v6244_v22 = vmul.f32 %v5490_v39, %v1621_v35 }
 0x3d1   :  { %v5074_v40 = vpop.f32.mrf.mxu1  ;;  %v5080_v41 = vpop.f32.mrf.mxu0 }
 0x3d3   :  { %v1576_v47 = vpop.f32.mrf.mxu1  ;;  %v1624_v13 = vpop.f32.mrf.mxu0 }
 0x3d5   :  { %v5075_v50 = vpop.f32.mrf.mxu1  ;;  %v5081_v54 = vpop.f32.mrf.mxu0 }
 0x3d6   :  { %v5494_v54 = vpop.eup %5493 }
 0x3d7   :  { %v1669_v46 = vpop.f32.mrf.mxu1  ;;  %v1717_v4 = vpop.f32.mrf.mxu0 }
 0x3d8   :  { %v6246_v37 = vmul.f32 %v5492_v10, %v1669_v46  ;;  %v5496_v43 = vpop.eup %5495  ;;  %v6250_v21 = vmul.f32 %v5494_v54, %v1717_v4 }
 0x3d9   :  { %v5086_v9 = vpop.f32.mrf.mxu1  ;;  %v5092_v40 = vpop.f32.mrf.mxu0 }
 0x3db   :  { %v1672_v47 = vpop.f32.mrf.mxu1  ;;  %v1720_v42 = vpop.f32.mrf.mxu0 }
 0x3dc   :  { %v5498_v47 = vpop.eup %5497 }
 0x3dd   :  { %v5087_v13 = vpop.f32.mrf.mxu1  ;;  %v5093_v50 = vpop.f32.mrf.mxu0 }
 0x3de   :  { %v5500_v42 = vpop.eup %5499 }
 0x3df   :  { %v1765_v44 = vpop.f32.mrf.mxu1  ;;  %v1813_v38 = vpop.f32.mrf.mxu0 }
 0x3e0   :  { %v6252_v39 = vmul.f32 %v5496_v43, %v1765_v44  ;;  %v6256_v41 = vmul.f32 %v5498_v47, %v1813_v38 }
 0x3e1   :  { %v5098_v35 = vpop.f32.mrf.mxu1  ;;  %v5104_v48 = vpop.f32.mrf.mxu0 }
 0x3e2   :  { %v5414_v28 = vpack.i.bf16 %v6252_v39, %v6250_v21  ;;  %v2425_v35 = vsel %vm640_vm11, %v6178_v55, 0  ;;  %v5456_v21 = vld [vmem:[%s6775_s1 + $0x18] sm:$0xff]  }
 0x3e3   :  { %v1768_v10 = vpop.f32.mrf.mxu1  ;;  %v1816_v46 = vpop.f32.mrf.mxu0 }
 0x3e4   :  { %v6795_v46 = vmov 0.0  }
 0x3e5   :  { %v5099_v9 = vpop.f32.mrf.mxu1  ;;  %v5105_v40 = vpop.f32.mrf.mxu0 }
 0x3e7   :  { %v1861_v13 = vpop.f32.mrf.mxu1  ;;  %v1919_v50 = vpop.f32.mrf.mxu0 }
 0x3e8   :  { %v6258_v25 = vmul.f32 %v5500_v42, %v1861_v13  ;;  %v2315_v4 = vpack.c.bf16 %v1919_v50, %v1919_v50  ;;  %v2275_v44 = vsel %vm188_vm10, %v1919_v50, 0.0 }
 0x3e9   :  { %v5116_v54 = vpop.f32.mrf.mxu0  ;;  %2276 = vadd.xlane.f32.xlu1 %v2275_v44  ;;  %v5110_v43 = vpop.f32.mrf.mxu1 }
 0x3ea   :  { %v5419_v48 = vpack.i.bf16 %v6258_v25, %v6256_v41  ;;  %5163 = vmatmul.mubr.msk.bf16.vlgmr.msra.gmra.mxu0 %vm188_vm10, %v2315_v4  ;;  %v2521_v43 = vsel %vm640_vm11, %v6182_v56, 0 }
 0x3eb   :  { %5173 = vmatpush3.bf16.msra.mxu0 %v2425_v35  ;;  %v1864_v10 = vpop.f32.mrf.mxu1  ;;  %v1922_v38 = vpop.f32.mrf.mxu0  ;;  %5174 = vmatprep.mubr.msk.bf16.mxu0 %vm5606_vm2, %v6795_v46  ;;  %v2473_v35 = vsel %vm640_vm11, %v6180_v53, 0 }
 0x3ec   :  { %5184 = vmatprep.subr.bf16.mxu0 %v6795_v46 }
 0x3ed   :  { %v5111_v9 = vpop.f32.mrf.mxu1  ;;  %v5117_v40 = vpop.f32.mrf.mxu0 }
 0x3ef   :  { %v1969_v47 = vpop.f32.mrf.mxu1  ;;  %v2019_v42 = vpop.f32.mrf.mxu0 }
 0x3f0   :  { %v2316_v13 = vpack.c.bf16 %v1969_v47, %v1969_v47  ;;  %v2317_v50 = vpack.c.bf16 %v2019_v42, %v2019_v42  ;;  %v2281_v55 = vsel %vm188_vm10, %v2019_v42, 0.0  ;;  %v2278_v44 = vsel %vm188_vm10, %v1969_v47, 0.0 }
 0x3f1   :  { %v5128_v54 = vpop.f32.mrf.mxu0  ;;  %2282 = vadd.xlane.f32.xlu1 %v2281_v55  ;;  %2279 = vadd.xlane.f32.xlu0 %v2278_v44  ;;  %v5122_v4 = vpop.f32.mrf.mxu1 }
 0x3f2   :  { %5169 = vmatmul.mubr.msk.bf16.vlgmr.msra.gmra.mxu1 %vm188_vm10, %v2316_v13  ;;  %5175 = vmatmul.mubr.msk.bf16.vlgmr.msra.gmra.mxu0 %vm188_vm10, %v2317_v50  ;;  %v2617_v54 = vsel %vm640_vm11, %v6186_v58, 0  ;;  %v2569_v4 = vsel %vm640_vm11, %v6184_v57, 0 }
 0x3f3   :  { %5179 = vmatpush3.bf16.msra.mxu1 %v2473_v35  ;;  %5185 = vmatpush3.bf16.msra.mxu0 %v2521_v43  ;;  %v1972_v10 = vpop.f32.mrf.mxu1  ;;  %v2022_v38 = vpop.f32.mrf.mxu0 }
 0x3f4   :  { %5186 = vmatprep.mubr.msk.bf16.mxu0 %vm5606_vm2, %v6795_v46  ;;  %5196 = vmatprep.subr.bf16.mxu0 %v6795_v46 }
 0x3f5   :  { %v5123_v9 = vpop.f32.mrf.mxu1  ;;  %v5129_v40 = vpop.f32.mrf.mxu0  ;;  %5180 = vmatprep.mubr.msk.bf16.mxu1 %vm5606_vm2, %v6795_v46  ;;  %5190 = vmatprep.subr.bf16.mxu1 %v6795_v46 }
 0x3f7   :  { %v2069_v53 = vpop.f32.mrf.mxu1  ;;  %v2119_v56 = vpop.f32.mrf.mxu0 }
 0x3f8   :  { %v2318_v47 = vpack.c.bf16 %v2069_v53, %v2069_v53  ;;  %v2319_v42 = vpack.c.bf16 %v2119_v56, %v2119_v56  ;;  %v2287_v13 = vsel %vm188_vm10, %v2119_v56, 0.0  ;;  %v2284_v50 = vsel %vm188_vm10, %v2069_v53, 0.0 }
 0x3f9   :  { %v5140_v55 = vpop.f32.mrf.mxu0  ;;  %2288 = vadd.xlane.f32.xlu1 %v2287_v13  ;;  %2285 = vadd.xlane.f32.xlu0 %v2284_v50  ;;  %v5134_v44 = vpop.f32.mrf.mxu1  ;;  %v2723_v13 = vsel %vm188_vm10, %v6190_v60, 0  ;;  %v2665_v50 = vsel %vm640_vm11, %v6188_v59, 0 }
 0x3fa   :  { %5181 = vmatmul.mubr.msk.bf16.vlgmr.msra.gmra.mxu1 %vm188_vm10, %v2318_v47  ;;  %5187 = vmatmul.mubr.msk.bf16.vlgmr.msra.gmra.mxu0 %vm188_vm10, %v2319_v42 }
 0x3fb   :  { %5191 = vmatpush3.bf16.msra.mxu1 %v2569_v4  ;;  %5197 = vmatpush3.bf16.msra.mxu0 %v2617_v54  ;;  %v2072_v43 = vpop.f32.mrf.mxu1  ;;  %v2122_v35 = vpop.f32.mrf.mxu0 }
 0x3fc   :  { %5198 = vmatprep.mubr.msk.bf16.mxu0 %vm5606_vm2, %v6795_v46  ;;  %5208 = vmatprep.subr.bf16.mxu0 %v6795_v46 }
 0x3fd   :  { %v5135_v10 = vpop.f32.mrf.mxu1  ;;  %v5141_v38 = vpop.f32.mrf.mxu0  ;;  %5192 = vmatprep.mubr.msk.bf16.mxu1 %vm5606_vm2, %v6795_v46  ;;  %5202 = vmatprep.subr.bf16.mxu1 %v6795_v46 }
 0x3fe   :  { %v2773_v10 = vsel %vm188_vm10, %v6192_v61, 0  ;;  %v2823_v38 = vsel %vm188_vm10, %v6198_v2, 0  ;;  %v2873_v61 = vsel %vm188_vm10, %v6200_v5, 0  ;;  %v2973_v2 = vsel %vm188_vm10, %v6208_v15, 0 }
 0x3ff   :  { %v2169_v57 = vpop.f32.mrf.mxu1  ;;  %v2219_v58 = vpop.f32.mrf.mxu0  ;;  %v3073_v5 = vsel %vm188_vm10, %v6216_v18, 0 }
 0x400   :  { %v2320_v9 = vpack.c.bf16 %v2169_v57, %v2169_v57  ;;  %v2321_v40 = vpack.c.bf16 %v2219_v58, %v2219_v58  ;;  %v2293_v53 = vsel %vm188_vm10, %v2219_v58, 0.0  ;;  %v2290_v56 = vsel %vm188_vm10, %v2169_v57, 0.0 }
 0x401   :  { %v5152_v47 = vpop.f32.mrf.mxu0  ;;  %2294 = vadd.xlane.f32.xlu1 %v2293_v53  ;;  %2291 = vadd.xlane.f32.xlu0 %v2290_v56  ;;  %v5146_v42 = vpop.f32.mrf.mxu1 }
 0x402   :  { %5193 = vmatmul.mubr.msk.bf16.vlgmr.msra.gmra.mxu1 %vm188_vm10, %v2320_v9  ;;  %5199 = vmatmul.mubr.msk.bf16.vlgmr.msra.gmra.mxu0 %vm188_vm10, %v2321_v40 }
 0x403   :  { %5203 = vmatpush3.bf16.msra.mxu1 %v2665_v50  ;;  %5209 = vmatpush3.bf16.xpose.msra.mxu0 %v2723_v13  ;;  %v2172_v55 = vpop.f32.mrf.mxu1  ;;  %v2222_v44 = vpop.f32.mrf.mxu0 }
 0x404   :  { %5210 = vmatprep.mubr.msk.bf16.mxu0 %vm5606_vm2, %v6795_v46  ;;  %5220 = vmatprep.subr.bf16.mxu0 %v6795_v46 }
 0x405   :  { %v5147_v54 = vpop.f32.mrf.mxu1  ;;  %v5153_v4 = vpop.f32.mrf.mxu0  ;;  %5204 = vmatprep.mubr.msk.bf16.mxu1 %vm5606_vm2, %v6795_v46  ;;  %5214 = vmatprep.subr.bf16.mxu1 %v6795_v46 }
 0x407   :  { %v2269_v59 = vpop.f32.mrf.mxu1 }
 0x408   :  { %v2322_v60 = vpack.c.bf16 %v2269_v59, %v2269_v59  ;;  %v2296_v43 = vsel %vm188_vm10, %v2269_v59, 0.0 }
 0x409   :  { %2297 = vadd.xlane.f32.xlu0 %v2296_v43  ;;  %v5158_v35 = vpop.f32.mrf.mxu1 }
 0x40a   :  { %5205 = vmatmul.mubr.msk.bf16.vlgmr.msra.gmra.mxu1 %vm188_vm10, %v2322_v60  ;;  %5211 = vmatmul.mubr.msk.bf16.vlgmr.msra.gmra.mxu0 %vm188_vm10, %v6194_v62  ;;  %v2923_v62 = vsel %vm188_vm10, %v6206_v11, 0 }
 0x40b   :  { %5215 = vmatpush3.bf16.xpose.msra.mxu1 %v2773_v10  ;;  %5221 = vmatpush3.bf16.xpose.msra.mxu0 %v2823_v38  ;;  %v2272_v57 = vpop.f32.mrf.mxu1 }
 0x40c   :  { %5216 = vmatprep.mubr.msk.bf16.mxu1 %vm5606_vm2, %v6795_v46  ;;  %5222 = vmatprep.mubr.msk.bf16.mxu0 %vm5606_vm2, %v6795_v46 }
 0x40d   :  { %v5159_v58 = vpop.f32.mrf.mxu1  ;;  %5226 = vmatprep.subr.bf16.mxu1 %v6795_v46  ;;  %5232 = vmatprep.subr.bf16.mxu0 %v6795_v46 }
 0x412   :  { %5217 = vmatmul.mubr.msk.bf16.vlgmr.msra.gmra.mxu1 %vm188_vm10, %v6196_v63  ;;  %5223 = vmatmul.mubr.msk.bf16.vlgmr.msra.gmra.mxu0 %vm188_vm10, %v6202_v7  ;;  %v3023_v63 = vsel %vm188_vm10, %v6214_v6, 0  ;;  %v3169_v7 = vsel %vm640_vm11, %v6222_v27, 0 }
 0x413   :  { %5227 = vmatpush3.bf16.xpose.msra.mxu1 %v2873_v61  ;;  %5233 = vmatpush3.bf16.xpose.msra.mxu0 %v2923_v62 }
 0x414   :  { %5228 = vmatprep.mubr.msk.bf16.mxu1 %vm5606_vm2, %v6795_v46  ;;  %5234 = vmatprep.mubr.msk.bf16.mxu0 %vm5606_vm2, %v6795_v46 }
 0x415   :  { %5238 = vmatprep.subr.bf16.mxu1 %v6795_v46  ;;  %5244 = vmatprep.subr.bf16.mxu0 %v6795_v46 }
 0x41a   :  { %5229 = vmatmul.mubr.msk.bf16.vlgmr.msra.gmra.mxu1 %vm188_vm10, %v6204_v8  ;;  %5235 = vmatmul.mubr.msk.bf16.vlgmr.msra.gmra.mxu0 %vm188_vm10, %v6210_v17  ;;  %v3217_v8 = vsel %vm640_vm11, %v6224_v14, 0 }
 0x41b   :  { %5239 = vmatpush3.bf16.xpose.msra.mxu1 %v2973_v2  ;;  %5245 = vmatpush3.bf16.xpose.msra.mxu0 %v3023_v63 }
 0x41c   :  { %5240 = vmatprep.mubr.msk.bf16.mxu1 %vm5606_vm2, %v6795_v46  ;;  %5246 = vmatprep.mubr.msk.bf16.mxu0 %vm5606_vm2, %v6795_v46 }
 0x41d   :  { %5250 = vmatprep.subr.bf16.mxu1 %v6795_v46  ;;  %5256 = vmatprep.subr.bf16.mxu0 %v6795_v46 }
 0x422   :  { %5241 = vmatmul.mubr.msk.bf16.vlgmr.msra.gmra.mxu1 %vm188_vm10, %v6212_v1  ;;  %5247 = vmatmul.mubr.msk.bf16.vlgmr.msra.gmra.mxu0 %vm188_vm10, %v6218_v24 }
 0x423   :  { %5251 = vmatpush3.bf16.xpose.msra.mxu1 %v3073_v5  ;;  %5257 = vmatpush3.bf16.msra.mxu0 %v3169_v7 }
 0x424   :  { %5252 = vmatprep.mubr.msk.bf16.mxu1 %vm5606_vm2, %v6795_v46  ;;  %5262 = vmatprep.subr.bf16.mxu1 %v6795_v46 }
 0x425   :  { %5258 = vmatprep.mubr.msk.bf16.mxu0 %vm5606_vm2, %v6795_v46  ;;  %5268 = vmatprep.subr.bf16.mxu0 %v6795_v46 }
 0x42a   :  { %5253 = vmatmul.mubr.msk.bf16.vlgmr.msra.gmra.mxu1 %vm188_vm10, %v6220_v26 }
 0x42b   :  { %5263 = vmatpush3.bf16.msra.mxu1 %v3217_v8  ;;  %5264 = vmatprep.mubr.msk.bf16.mxu1 %vm5606_vm2, %v6795_v46 }
 0x42c   :  { %5274 = vmatprep.subr.bf16.mxu1 %v6795_v46 }
 0x472   :  { %v2277_v11 = vpop.xlane.xlu1 %2276 }
 0x473   :  { %v2299_v17 = vadd.f32 1e-06, %v2277_v11 }
 0x475   :  { %5501 = vrcp.f32 %v2299_v17 }
 0x47a   :  { %v2280_v15 = vpop.xlane.xlu0 %2279  ;;  %v2283_v6 = vpop.xlane.xlu1 %2282 }
 0x47b   :  { %v2300_v1 = vadd.f32 1e-06, %v2280_v15  ;;  %v2301_v24 = vadd.f32 1e-06, %v2283_v6 }
 0x47d   :  { %5503 = vrcp.f32 %v2300_v1 }
 0x47e   :  { %5505 = vrcp.f32 %v2301_v24 }
 0x482   :  { %v2286_v18 = vpop.xlane.xlu0 %2285  ;;  %v2289_v26 = vpop.xlane.xlu1 %2288 }
 0x483   :  { %v2302_v27 = vadd.f32 1e-06, %v2286_v18  ;;  %v2303_v56 = vadd.f32 1e-06, %v2289_v26  ;;  %v5502_v42 = vpop.eup %5501 }
 0x485   :  { %5507 = vrcp.f32 %v2302_v27 }
 0x486   :  { %5509 = vrcp.f32 %v2303_v56 }
 0x48a   :  { %v2292_v40 = vpop.xlane.xlu0 %2291  ;;  %v5504_v50 = vpop.eup %5503 }
 0x48b   :  { %v2304_v13 = vadd.f32 1e-06, %v2292_v40  ;;  %v2295_v43 = vpop.xlane.xlu1 %2294  ;;  %v5506_v2 = vpop.eup %5505 }
 0x48c   :  { %v2305_v58 = vadd.f32 1e-06, %v2295_v43 }
 0x48d   :  { %5511 = vrcp.f32 %v2304_v13 }
 0x48e   :  { %5513 = vrcp.f32 %v2305_v58 }
 0x492   :  { %v2298_v35 = vpop.xlane.xlu0 %2297  ;;  %v5508_v5 = vpop.eup %5507 }
 0x493   :  { %v2306_v63 = vadd.f32 1e-06, %v2298_v35 }
 0x495   :  { %5515 = vrcp.f32 %v2306_v63 }
 0x4aa   :  { %v2365_v14 = vpop.f32.mrf.mxu0 }
 0x4ab   :  { %v6374_v54 = vmul.f32 %v5502_v42, %v2365_v14 }
 0x4ac   :  { %v5164_v9 = vpop.f32.mrf.mxu0 }
 0x4ad   :  { %v5510_v9 = vpop.eup %5509 }
 0x4ae   :  { %v2368_v53 = vpop.f32.mrf.mxu0  ;;  %v5512_v26 = vpop.eup %5511 }
 0x4af   :  { %v5514_v43 = vpop.eup %5513 }
 0x4b0   :  { %v5165_v47 = vpop.f32.mrf.mxu0  ;;  %v5516_v35 = vpop.eup %5515 }
 0x4b2   :  { %v2413_v55 = vpop.f32.mrf.mxu1  ;;  %v2461_v44 = vpop.f32.mrf.mxu0 }
 0x4b3   :  { %v6376_v4 = vmul.f32 %v5504_v50, %v2413_v55  ;;  %v6380_v11 = vmul.f32 %v5506_v2, %v2461_v44 }
 0x4b4   :  { %v5170_v59 = vpop.f32.mrf.mxu1  ;;  %v5176_v60 = vpop.f32.mrf.mxu0 }
 0x4b5   :  { %v5404_v10 = vpack.i.bf16 %v6376_v4, %v6374_v54 }
 0x4b6   :  { %v2416_v38 = vpop.f32.mrf.mxu1  ;;  %v2464_v57 = vpop.f32.mrf.mxu0 }
 0x4b8   :  { %v5171_v61 = vpop.f32.mrf.mxu1  ;;  %v5177_v62 = vpop.f32.mrf.mxu0 }
 0x4ba   :  { %v2509_v7 = vpop.f32.mrf.mxu1  ;;  %v2557_v8 = vpop.f32.mrf.mxu0 }
 0x4bb   :  { %v6382_v15 = vmul.f32 %v5508_v5, %v2509_v7  ;;  %v6386_v56 = vmul.f32 %v5510_v9, %v2557_v8  ;;  %v3265_v7 = vsel %vm640_vm11, %v6226_v19, 0 }
 0x4bc   :  { %v5182_v17 = vpop.f32.mrf.mxu1  ;;  %v5188_v1 = vpop.f32.mrf.mxu0 }
 0x4bd   :  { %v5409_v6 = vpack.i.bf16 %v6382_v15, %v6380_v11 }
 0x4be   :  { %v2512_v18 = vpop.f32.mrf.mxu1  ;;  %v2560_v24 = vpop.f32.mrf.mxu0 }
 0x4c0   :  { %v5183_v27 = vpop.f32.mrf.mxu1  ;;  %v5189_v14 = vpop.f32.mrf.mxu0 }
 0x4c2   :  { %v2605_v40 = vpop.f32.mrf.mxu1  ;;  %v2653_v53 = vpop.f32.mrf.mxu0 }
 0x4c3   :  { %v6388_v47 = vmul.f32 %v5512_v26, %v2605_v40  ;;  %v6392_v58 = vmul.f32 %v5514_v43, %v2653_v53 }
 0x4c4   :  { %v5194_v42 = vpop.f32.mrf.mxu1  ;;  %v5200_v13 = vpop.f32.mrf.mxu0 }
 0x4c5   :  { %v5429_v50 = vpack.i.bf16 %v6388_v47, %v6386_v56  ;;  %v3361_v13 = vsel %vm640_vm11, %v6230_v31, 0 }
 0x4c6   :  { %v2608_v55 = vpop.f32.mrf.mxu1  ;;  %v2656_v44 = vpop.f32.mrf.mxu0 }
 0x4c7   :  { %v3313_v55 = vsel %vm640_vm11, %v6228_v29, 0 }
 0x4c8   :  { %v5195_v59 = vpop.f32.mrf.mxu1  ;;  %v5201_v60 = vpop.f32.mrf.mxu0 }
 0x4ca   :  { %v2701_v38 = vpop.f32.mrf.mxu1  ;;  %v2759_v57 = vpop.f32.mrf.mxu0 }
 0x4cb   :  { %v6394_v61 = vmul.f32 %v5516_v35, %v2701_v38  ;;  %v3155_v62 = vpack.c.bf16 %v2759_v57, %v2759_v57  ;;  %v3115_v2 = vsel %vm188_vm10, %v2759_v57, 0.0 }
 0x4cc   :  { %v5212_v63 = vpop.f32.mrf.mxu0  ;;  %3116 = vadd.xlane.f32.xlu1 %v3115_v2  ;;  %v5206_v5 = vpop.f32.mrf.mxu1 }
 0x4cd   :  { %v5439_v8 = vpack.i.bf16 %v6394_v61, %v6392_v58  ;;  %5259 = vmatmul.mubr.msk.bf16.vlgmr.msra.gmra.mxu0 %vm188_vm10, %v3155_v62  ;;  %v3457_v5 = vsel %vm640_vm11, %v6234_v30, 0 }
 0x4ce   :  { %5269 = vmatpush3.bf16.msra.mxu0 %v3265_v7  ;;  %v2704_v17 = vpop.f32.mrf.mxu1  ;;  %v2762_v1 = vpop.f32.mrf.mxu0  ;;  %5270 = vmatprep.mubr.msk.bf16.mxu0 %vm5606_vm2, %v6795_v46  ;;  %v3409_v7 = vsel %vm640_vm11, %v6232_v32, 0 }
 0x4cf   :  { %5280 = vmatprep.subr.bf16.mxu0 %v6795_v46 }
 0x4d0   :  { %v5207_v18 = vpop.f32.mrf.mxu1  ;;  %v5213_v24 = vpop.f32.mrf.mxu0 }
 0x4d2   :  { %v2809_v27 = vpop.f32.mrf.mxu1  ;;  %v2859_v14 = vpop.f32.mrf.mxu0 }
 0x4d3   :  { %v3156_v9 = vpack.c.bf16 %v2809_v27, %v2809_v27  ;;  %v3157_v26 = vpack.c.bf16 %v2859_v14, %v2859_v14  ;;  %v3121_v19 = vsel %vm188_vm10, %v2859_v14, 0.0  ;;  %v3118_v40 = vsel %vm188_vm10, %v2809_v27, 0.0 }
 0x4d4   :  { %v5224_v53 = vpop.f32.mrf.mxu0  ;;  %3122 = vadd.xlane.f32.xlu1 %v3121_v19  ;;  %3119 = vadd.xlane.f32.xlu0 %v3118_v40  ;;  %v5218_v42 = vpop.f32.mrf.mxu1 }
 0x4d5   :  { %5265 = vmatmul.mubr.msk.bf16.vlgmr.msra.gmra.mxu1 %vm188_vm10, %v3156_v9  ;;  %5271 = vmatmul.mubr.msk.bf16.vlgmr.msra.gmra.mxu0 %vm188_vm10, %v3157_v26  ;;  %v3505_v53 = vsel %vm640_vm11, %v6236_v34, 0  ;;  %v584_v34 = vsel %vm188_vm10, %v5953_v51, 0.0  ;;  %v596_v51 = vsel %vm188_vm10, %v5988_v16, 0.0 }
 0x4d6   :  { %5275 = vmatpush3.bf16.msra.mxu1 %v3313_v55  ;;  %5281 = vmatpush3.bf16.msra.mxu0 %v3361_v13  ;;  %v2812_v44 = vpop.f32.mrf.mxu1  ;;  %v2862_v59 = vpop.f32.mrf.mxu0  ;;  %v578_v55 = vsel %vm188_vm10, %v5955_v52, 0.0  ;;  %v581_v52 = vsel %vm188_vm10, %v5964_v0, 0.0  ;;  %v6796_v0 = vpack.i.bf16 %v6240_v36, %v6238_v49 }
 0x4d7   :  { %5282 = vmatprep.mubr.msk.bf16.mxu0 %vm5606_vm2, %v6795_v46  ;;  %5292 = vmatprep.subr.bf16.mxu0 %v6795_v46 }
 0x4d8   :  { %v5219_v60 = vpop.f32.mrf.mxu1  ;;  %v5225_v43 = vpop.f32.mrf.mxu0  ;;  %5276 = vmatprep.mubr.msk.bf16.mxu1 %vm5606_vm2, %v6795_v46  ;;  %5286 = vmatprep.subr.bf16.mxu1 %v6795_v46 }
 0x4da   :  { %v2909_v29 = vpop.f32.mrf.mxu1  ;;  %v2959_v31 = vpop.f32.mrf.mxu0 }
 0x4db   :  { %v3158_v35 = vpack.c.bf16 %v2909_v29, %v2909_v29  ;;  %v3159_v38 = vpack.c.bf16 %v2959_v31, %v2959_v31  ;;  %v3127_v57 = vsel %vm188_vm10, %v2959_v31, 0.0  ;;  %v3124_v62 = vsel %vm188_vm10, %v2909_v29, 0.0 }
 0x4dc   :  { %v5236_v2 = vpop.f32.mrf.mxu0  ;;  %3128 = vadd.xlane.f32.xlu1 %v3127_v57  ;;  %3125 = vadd.xlane.f32.xlu0 %v3124_v62  ;;  %v5230_v63 = vpop.f32.mrf.mxu1  ;;  %v587_v57 = vsel %vm188_vm10, %v5982_v23, 0.0  ;;  %v593_v62 = vsel %vm188_vm10, %v6000_v33, 0.0  ;;  %v6797_v23 = vpack.i.bf16 %v6246_v37, %v6244_v22 }
 0x4dd   :  { %5277 = vmatmul.mubr.msk.bf16.vlgmr.msra.gmra.mxu1 %vm188_vm10, %v3158_v35  ;;  %5283 = vmatmul.mubr.msk.bf16.vlgmr.msra.gmra.mxu0 %vm188_vm10, %v3159_v38 }
 0x4de   :  { %5287 = vmatpush3.bf16.msra.mxu1 %v3409_v7  ;;  %5293 = vmatpush3.bf16.msra.mxu0 %v3457_v5  ;;  %v2912_v17 = vpop.f32.mrf.mxu1  ;;  %v2962_v1 = vpop.f32.mrf.mxu0 }
 0x4df   :  { %5294 = vmatprep.mubr.msk.bf16.mxu0 %vm5606_vm2, %v6795_v46  ;;  %5288 = vmatprep.mubr.msk.bf16.mxu1 %vm5606_vm2, %v6795_v46  ;;  %v5457_v17 = vld [vmem:[%s6775_s1 + $0x10] sm:$0xff]  }
 0x4e0   :  { %v5231_v18 = vpop.f32.mrf.mxu1  ;;  %v5237_v24 = vpop.f32.mrf.mxu0  ;;  %5298 = vmatprep.subr.bf16.mxu1 %v6795_v46  ;;  %5304 = vmatprep.subr.bf16.mxu0 %v5456_v21 }
 0x4e2   :  { %v3009_v30 = vpop.f32.mrf.mxu1  ;;  %v3059_v32 = vpop.f32.mrf.mxu0 }
 0x4e3   :  { %v3160_v27 = vpack.c.bf16 %v3009_v30, %v3009_v30  ;;  %v3161_v14 = vpack.c.bf16 %v3059_v32, %v3059_v32  ;;  %v3133_v9 = vsel %vm188_vm10, %v3059_v32, 0.0  ;;  %v3130_v26 = vsel %vm188_vm10, %v3009_v30, 0.0 }
 0x4e4   :  { %v5248_v19 = vpop.f32.mrf.mxu0  ;;  %3134 = vadd.xlane.f32.xlu1 %v3133_v9  ;;  %3131 = vadd.xlane.f32.xlu0 %v3130_v26  ;;  %v5242_v40 = vpop.f32.mrf.mxu1 }
 0x4e5   :  { %5289 = vmatmul.mubr.msk.bf16.vlgmr.msra.gmra.mxu1 %vm188_vm10, %v3160_v27  ;;  %5295 = vmatmul.mubr.msk.bf16.vlgmr.msra.gmra.mxu0 %vm188_vm10, %v3161_v14 }
 0x4e6   :  { %5299 = vmatpush3.bf16.msra.mxu1 %v3505_v53  ;;  %v3012_v42 = vpop.f32.mrf.mxu1  ;;  %v3062_v13 = vpop.f32.mrf.mxu0  ;;  %5300 = vmatprep.mubr.msk.bf16.mxu1 %vm5606_vm2, %v6795_v46  ;;  %v590_v46 = vsel %vm188_vm10, %v5970_v3, 0.0  ;;  %v599_v3 = vsel %vm188_vm10, %v6016_v45, 0.0 }
 0x4e7   :  { %5305 = vmatpush3.bf16.msra.mxu0 %v5456_v21 }
 0x4e8   :  { %v5249_v44 = vpop.f32.mrf.mxu0  ;;  %579 = vadd.xlane.f32.xlu1 %v578_v55  ;;  %v5243_v59 = vpop.f32.mrf.mxu1  ;;  %5306 = vmatprep.subr.bf16.mxu0 %v5457_v17 }
 0x4ea   :  { %v3109_v60 = vpop.f32.mrf.mxu1 }
 0x4eb   :  { %v3162_v43 = vpack.c.bf16 %v3109_v60, %v3109_v60  ;;  %v3136_v29 = vsel %vm188_vm10, %v3109_v60, 0.0  ;;  %5307 = vmatpush3.bf16.msra.mxu0 %v5457_v17 }
 0x4ec   :  { %585 = vadd.xlane.f32.xlu1 %v584_v34  ;;  %3137 = vadd.xlane.f32.xlu0 %v3136_v29  ;;  %v5254_v31 = vpop.f32.mrf.mxu1 }
 0x4ed   :  { %5301 = vmatmul.mubr.msk.bf16.vlgmr.msra.gmra.mxu1 %vm188_vm10, %v3162_v43 }
 0x4ee   :  { %v3112_v35 = vpop.f32.mrf.mxu1 }
 0x4f0   :  { %591 = vadd.xlane.f32.xlu1 %v590_v46  ;;  %582 = vadd.xlane.f32.xlu0 %v581_v52  ;;  %v5255_v38 = vpop.f32.mrf.mxu1 }
 0x4f4   :  { %597 = vadd.xlane.f32.xlu1 %v596_v51  ;;  %588 = vadd.xlane.f32.xlu0 %v587_v57 }
 0x4f8   :  { %594 = vadd.xlane.f32.xlu0 %v593_v62 }
 0x4fc   :  { %600 = vadd.xlane.f32.xlu0 %v599_v3 }
 0x505   :  { %5395 = vrot.lane.b32.xlu1 %v6796_v0, %s5618_s16 }
 0x509   :  { %5405 = vrot.lane.b32.xlu1 %v5404_v10, %s5619_s17 }
 0x50d   :  { %5410 = vrot.lane.b32.xlu1 %v5409_v6, %s5619_s17 }
 0x511   :  { %5420 = vrot.lane.b32.xlu1 %v5419_v48, %s5618_s16 }
 0x512   :  { %5400 = vrot.lane.b32.xlu0 %v6797_v23, %s5618_s16 }
 0x516   :  { %5415 = vrot.lane.b32.xlu0 %v5414_v28, %s5618_s16 }
 0x555   :  { %v3117_v16 = vpop.xlane.xlu1 %3116 }
 0x556   :  { %v3139_v45 = vadd.f32 1e-06, %v3117_v16 }
 0x558   :  { %5517 = vrcp.f32 %v3139_v45 }
 0x55d   :  { %v3120_v33 = vpop.xlane.xlu0 %3119  ;;  %v3123_v36 = vpop.xlane.xlu1 %3122 }
 0x55e   :  { %v3140_v49 = vadd.f32 1e-06, %v3120_v33  ;;  %v3141_v4 = vadd.f32 1e-06, %v3123_v36 }
 0x560   :  { %5519 = vrcp.f32 %v3140_v49 }
 0x561   :  { %5521 = vrcp.f32 %v3141_v4 }
 0x565   :  { %v3126_v54 = vpop.xlane.xlu0 %3125  ;;  %v3129_v22 = vpop.xlane.xlu1 %3128 }
 0x566   :  { %v3142_v10 = vadd.f32 1e-06, %v3126_v54  ;;  %v3143_v39 = vadd.f32 1e-06, %v3129_v22  ;;  %v5518_v11 = vpop.eup %5517 }
 0x568   :  { %5523 = vrcp.f32 %v3142_v10 }
 0x569   :  { %5525 = vrcp.f32 %v3143_v39 }
 0x56d   :  { %v3132_v37 = vpop.xlane.xlu0 %3131  ;;  %v5520_v6 = vpop.eup %5519 }
 0x56e   :  { %v3144_v15 = vadd.f32 1e-06, %v3132_v37  ;;  %v3135_v24 = vpop.xlane.xlu1 %3134  ;;  %v5522_v40 = vpop.eup %5521 }
 0x56f   :  { %v3145_v9 = vadd.f32 1e-06, %v3135_v24 }
 0x570   :  { %5527 = vrcp.f32 %v3144_v15 }
 0x571   :  { %5529 = vrcp.f32 %v3145_v9 }
 0x572   :  { %v580_v61 = vpop.xlane.xlu1 %579 }
 0x573   :  { %v602_v39 = vadd.f32 1e-06, %v580_v61 }
 0x575   :  { %v3138_v30 = vpop.xlane.xlu0 %3137  ;;  %v5524_v42 = vpop.eup %5523 }
 0x576   :  { %v3146_v53 = vadd.f32 1e-06, %v3138_v30  ;;  %v5526_v52 = vpop.eup %5525  ;;  %v586_v22 = vpop.xlane.xlu1 %585 }
 0x578   :  { %5531 = vrcp.f32 %v3146_v53 }
 0x57d   :  { %v5528_v38 = vpop.eup %5527 }
 0x57e   :  { %v5530_v45 = vpop.eup %5529 }
 0x585   :  { %v5532_v49 = vpop.eup %5531 }
 0x58d   :  { %v3205_v25 = vpop.f32.mrf.mxu0 }
 0x58e   :  { %v3547_v5 = vmul.f32 %v5518_v11, %v3205_v25 }
 0x58f   :  { %v5260_v41 = vpop.f32.mrf.mxu0 }
 0x591   :  { %v3208_v48 = vpop.f32.mrf.mxu0 }
 0x592   :  { %v592_v48 = vpop.xlane.xlu1 %591 }
 0x593   :  { %v5261_v28 = vpop.f32.mrf.mxu0  ;;  %v606_v24 = vadd.f32 1e-06, %v592_v48 }
 0x595   :  { %v3253_v2 = vpop.f32.mrf.mxu1  ;;  %v3301_v63 = vpop.f32.mrf.mxu0 }
 0x596   :  { %v3548_v7 = vmul.f32 %v5520_v6, %v3253_v2  ;;  %v3549_v44 = vmul.f32 %v5522_v40, %v3301_v63  ;;  %v598_v11 = vpop.xlane.xlu1 %597  ;;  %v604_v2 = vadd.f32 1e-06, %v586_v22 }
 0x597   :  { %v5266_v1 = vpop.f32.mrf.mxu1  ;;  %v5272_v18 = vpop.f32.mrf.mxu0 }
 0x598   :  { %v5424_v32 = vpack.i.bf16 %v3548_v7, %v3547_v5 }
 0x599   :  { %v3256_v27 = vpop.f32.mrf.mxu1  ;;  %v3304_v14 = vpop.f32.mrf.mxu0 }
 0x59a   :  { %5425 = vrot.lane.b32.xlu0 %v5424_v32, %s5620_s22  ;;  %v5396_v63 = vpop.permute.xlu1 %5395 }
 0x59b   :  { %v5267_v26 = vpop.f32.mrf.mxu1  ;;  %v5273_v19 = vpop.f32.mrf.mxu0  ;;  %v5398_v14 = vunpack.i.h.bf16 %v5396_v63  ;;  %v5397_v9 = vunpack.i.l.bf16 %v5396_v63 }
 0x59d   :  { %v3349_v13 = vpop.f32.mrf.mxu1  ;;  %v3397_v55 = vpop.f32.mrf.mxu0 }
 0x59e   :  { %v3550_v59 = vmul.f32 %v5524_v42, %v3349_v13  ;;  %5430 = vrot.lane.b32.xlu0 %v5429_v50, %s5619_s17  ;;  %v3551_v62 = vmul.f32 %v5526_v52, %v3397_v55  ;;  %v5406_v17 = vpop.permute.xlu1 %5405  ;;  %v608_v42 = vadd.f32 1e-06, %v598_v11 }
 0x59f   :  { %v5278_v60 = vpop.f32.mrf.mxu1  ;;  %v5284_v43 = vpop.f32.mrf.mxu0  ;;  %v5407_v26 = vunpack.i.l.bf16 %v5406_v17  ;;  %v5408_v13 = vunpack.i.h.bf16 %v5406_v17 }
 0x5a0   :  { %v5434_v34 = vpack.i.bf16 %v3550_v59, %v3549_v44 }
 0x5a1   :  { %v3352_v29 = vpop.f32.mrf.mxu1  ;;  %v3400_v31 = vpop.f32.mrf.mxu0 }
 0x5a2   :  { %5435 = vrot.lane.b32.xlu1 %v5434_v34, %s5620_s22  ;;  %v5411_v19 = vpop.permute.xlu1 %5410  ;;  %v6798_v29 = vld [vmem:[#allocation7_spill] sm:$0xff] }
 0x5a3   :  { %v5279_v35 = vpop.f32.mrf.mxu1  ;;  %v5285_v46 = vpop.f32.mrf.mxu0 }
 0x5a5   :  { %v3445_v51 = vpop.f32.mrf.mxu1  ;;  %v3493_v57 = vpop.f32.mrf.mxu0 }
 0x5a6   :  { %v3552_v3 = vmul.f32 %v5528_v38, %v3445_v51  ;;  %5440 = vrot.lane.b32.xlu1 %v5439_v8, %s5619_s17  ;;  %v3553_v54 = vmul.f32 %v5530_v45, %v3493_v57  ;;  %v583_v8 = vpop.xlane.xlu0 %582  ;;  %v5421_v38 = vpop.permute.xlu1 %5420 }
 0x5a7   :  { %v5290_v56 = vpop.f32.mrf.mxu1  ;;  %v5296_v47 = vpop.f32.mrf.mxu0  ;;  %v603_v21 = vadd.f32 1e-06, %v583_v8 }
 0x5a8   :  { %v5444_v50 = vpack.i.bf16 %v3552_v3, %v3551_v62  ;;  %v6799_v62 = vld [vmem:[#allocation6_spill] sm:$0xff]  ;;  %v5412_v56 = vunpack.i.l.bf16 %v5411_v19 }
 0x5a9   :  { %v3448_v0 = vpop.f32.mrf.mxu1  ;;  %v3496_v23 = vpop.f32.mrf.mxu0  ;;  %5533 = vrcp.f32 %v603_v21  ;;  %v6801_v21 = vld [vmem:[#allocation8_spill] sm:$0xff] }
 0x5aa   :  { %5445 = vrot.lane.b32.xlu0 %v5444_v50, %s5620_s22  ;;  %v589_v37 = vpop.xlane.xlu0 %588  ;;  %5535 = vrcp.f32 %v602_v39  ;;  %v5413_v0 = vunpack.i.h.bf16 %v5411_v19 }
 0x5ab   :  { %v5291_v16 = vpop.f32.mrf.mxu1  ;;  %v5297_v33 = vpop.f32.mrf.mxu0  ;;  %v605_v15 = vadd.f32 1e-06, %v589_v37 }
 0x5ad   :  { %v3541_v36 = vpop.f32.mrf.mxu1  ;;  %5537 = vrcp.f32 %v605_v15 }
 0x5ae   :  { %v3554_v4 = vmul.f32 %v5532_v49, %v3541_v36  ;;  %v595_v28 = vpop.xlane.xlu0 %594  ;;  %5539 = vrcp.f32 %v604_v2 }
 0x5af   :  { %v5302_v10 = vpop.f32.mrf.mxu1  ;;  %v607_v1 = vadd.f32 1e-06, %v595_v28 }
 0x5b0   :  { %v5449_v25 = vpack.i.bf16 %v3554_v4, %v3553_v54 }
 0x5b1   :  { %v3544_v41 = vpop.f32.mrf.mxu1  ;;  %5541 = vrcp.f32 %v607_v1 }
 0x5b2   :  { %5450 = vrot.lane.b32.xlu1 %v5449_v25, %s5620_s22  ;;  %v601_v6 = vpop.xlane.xlu0 %600  ;;  %5543 = vrcp.f32 %v606_v24 }
 0x5b3   :  { %v5303_v58 = vpop.f32.mrf.mxu1  ;;  %5545 = vrcp.f32 %v608_v42 }
 0x5b4   :  { %v6800_v58 = vld [vmem:[#allocation9_spill] sm:$0xff] }
 0x5b6   :  { %v5401_v5 = vpop.permute.xlu0 %5400  ;;  %v5534_v7 = vpop.eup %5533 }
 0x5b7   :  { %v5536_v18 = vpop.eup %5535  ;;  %v1028_v30 = vmul.f32 %v5534_v7, %v6067_v20  ;;  %v609_v20 = vadd.f32 1e-06, %v601_v6  ;;  %v5402_v35 = vunpack.i.l.bf16 %v5401_v5  ;;  %v5403_v57 = vunpack.i.h.bf16 %v5401_v5 }
 0x5b8   :  { %v1027_v27 = vmul.f32 %v5536_v18, %v6065_v12 }
 0x5b9   :  { %v3652_v40 = vsel %vm188_vm10, %v1028_v30, %v5398_v14  ;;  %5547 = vrcp.f32 %v609_v20  ;;  %v6803_v14 = vld [vmem:[#allocation11_spill] sm:$0xff] }
 0x5ba   :  { %v5416_v32 = vpop.permute.xlu0 %5415  ;;  %v5538_v53 = vpop.eup %5537  ;;  %v3651_v44 = vsel %vm188_vm10, %v1027_v27, %v5397_v9  ;;  %v3661_v34 = vsel %vm3659_vm12, %v3652_v40, %v5408_v13 }
 0x5bb   :  { %v5540_v43 = vpop.eup %5539  ;;  %v3660_v12 = vsel %vm3659_vm12, %v3651_v44, %v5407_v26  ;;  %v1030_v31 = vmul.f32 %v5538_v53, %v6798_v29  ;;  %v5417_v8 = vunpack.i.l.bf16 %v5416_v32  ;;  %v5418_v48 = vunpack.i.h.bf16 %v5416_v32  ;;  %v6802_v32 = vld [vmem:[#allocation10_spill] sm:$0xff] }
 0x5bc   :  { %v1029_v3 = vmul.f32 %v5540_v43, %v6799_v62  ;;  %v5422_v26 = vunpack.i.l.bf16 %v5421_v38  ;;  %v5423_v53 = vunpack.i.h.bf16 %v5421_v38  ;;  %v6804_v29 = vld [vmem:[#allocation2_spill] sm:$0xff] }
 0x5bd   :  { %v3654_v47 = vsel %vm188_vm10, %v1030_v31, %v5403_v57 }
 0x5be   :  { %v3653_v50 = vsel %vm188_vm10, %v1029_v3, %v5402_v35  ;;  %v5542_v45 = vpop.eup %5541  ;;  %v3663_v49 = vsel %vm3659_vm12, %v3654_v47, %v5413_v0 }
 0x5bf   :  { %v3662_v36 = vsel %vm3659_vm12, %v3653_v50, %v5412_v56  ;;  %v5544_v25 = vpop.eup %5543  ;;  %v1032_v61 = vmul.f32 %v5542_v45, %v6800_v58 }
 0x5c0   :  { %v1031_v39 = vmul.f32 %v5544_v25, %v6801_v21  ;;  %v5546_v11 = vpop.eup %5545 }
 0x5c1   :  { %v3656_v15 = vsel %vm188_vm10, %v1032_v61, %v5418_v48  ;;  %v1033_v27 = vmul.f32 %v5546_v11, %v6802_v32 }
 0x5c2   :  { %v3655_v6 = vsel %vm188_vm10, %v1031_v39, %v5417_v8 }
 0x5c6   :  { %v5548_v5 = vpop.eup %5547 }
 0x5c7   :  { %v1034_v9 = vmul.f32 %v5548_v5, %v6803_v14 }
 0x5c9   :  { %v3658_v13 = vsel %vm188_vm10, %v1034_v9, %v5423_v53 }
 0x60c   :  { %v5426_v55 = vpop.permute.xlu0 %5425 }
 0x60d   :  { %v5428_v59 = vunpack.i.h.bf16 %v5426_v55  ;;  %v5427_v60 = vunpack.i.l.bf16 %v5426_v55  ;;  %v3657_v55 = vsel %vm188_vm10, %v1033_v27, %v5422_v26 }
 0x60f   :  { %v3669_v46 = vsel %vm3668_vm13, %v3660_v12, %v5427_v60  ;;  %v3670_v52 = vsel %vm3668_vm13, %v3661_v34, %v5428_v59 }
 0x610   :  { %v3677_v51 = vpack.c.bf16 %v3670_v52, %v3669_v46  ;;  %v5431_v54 = vpop.permute.xlu0 %5430 }
 0x611   :  { %v5433_v22 = vunpack.i.h.bf16 %v5431_v54  ;;  %v5432_v37 = vunpack.i.l.bf16 %v5431_v54 }
 0x612   :  { %5308 = vmatprep.mubr.msk.bf16.mxu0 %vm43_vm0, %v3677_v51 }
 0x613   :  { %v3665_v7 = vsel %vm3659_vm12, %v3656_v15, %v5433_v22  ;;  %v3664_v17 = vsel %vm3659_vm12, %v3655_v6, %v5432_v37 }
 0x614   :  { %v5436_v23 = vpop.permute.xlu1 %5435 }
 0x615   :  { %v5438_v16 = vunpack.i.h.bf16 %v5436_v23  ;;  %v5437_v33 = vunpack.i.l.bf16 %v5436_v23 }
 0x617   :  { %v3671_v4 = vsel %vm3668_vm13, %v3662_v36, %v5437_v33  ;;  %v3672_v10 = vsel %vm3668_vm13, %v3663_v49, %v5438_v16 }
 0x618   :  { %v3678_v41 = vpack.c.bf16 %v3672_v10, %v3671_v4  ;;  %v5441_v1 = vpop.permute.xlu1 %5440 }
 0x619   :  { %v5443_v19 = vunpack.i.h.bf16 %v5441_v1  ;;  %v5442_v40 = vunpack.i.l.bf16 %v5441_v1 }
 0x61a   :  { %5309 = vmatmul.mubr.msk.bf16.vlgmr.msra.gmra.mxu0 %vm43_vm0, %v3678_v41 }
 0x61b   :  { %v3666_v59 = vsel %vm3659_vm12, %v3657_v55, %v5442_v40  ;;  %v3667_v60 = vsel %vm3659_vm12, %v3658_v13, %v5443_v19 }
 0x61c   :  { %v5446_v28 = vpop.permute.xlu0 %5445 }
 0x61d   :  { %v5448_v2 = vunpack.i.h.bf16 %v5446_v28  ;;  %v5447_v63 = vunpack.i.l.bf16 %v5446_v28 }
 0x61f   :  { %v3674_v18 = vsel %vm3668_vm13, %v3665_v7, %v5448_v2  ;;  %v3673_v24 = vsel %vm3668_vm13, %v3664_v17, %v5447_v63 }
 0x620   :  { %v3679_v30 = vpack.c.bf16 %v3674_v18, %v3673_v24 }
 0x622   :  { %5312 = vmatprep.mubr.msk.bf16.mxu0 %vm43_vm0, %v3679_v30 }
 0x624   :  { %v5451_v42 = vpop.permute.xlu1 %5450 }
 0x625   :  { %v5453_v44 = vunpack.i.h.bf16 %v5451_v42  ;;  %v5452_v20 = vunpack.i.l.bf16 %v5451_v42 }
 0x627   :  { %v3675_v43 = vsel %vm3668_vm13, %v3666_v59, %v5452_v20  ;;  %v3676_v12 = vsel %vm3668_vm13, %v3667_v60, %v5453_v44  ;;  %v5458_v44 = vld [vmem:[%s6775_s1 + $0x38] sm:$0xff]   ;;  %v5459_v20 = vld [vmem:[%s6775_s1 + $0x28] sm:$0xff]   ;;  %v5460_v59 = vld [vmem:[%s6775_s1 + $0x30] sm:$0xff]  }
 0x628   :  { %v3680_v34 = vpack.c.bf16 %v3676_v12, %v3675_v43  ;;  %5316 = vmatprep.subr.bf16.mxu1 %v5458_v44  ;;  %5328 = vmatprep.subr.bf16.mxu0 %v5459_v20  ;;  %v5461_v60 = vld [vmem:[%s6775_s1 + $0x20] sm:$0xff]   ;;  %v6805_v43 = vld [vmem:[#allocation3_spill] sm:$0xff]  ;;  %v6806_v12 = vld [vmem:[#allocation4_spill] sm:$0xff] }
 0x629   :  { %5317 = vmatpush3.bf16.msra.mxu1 %v5458_v44  ;;  %5329 = vmatpush3.bf16.msra.mxu0 %v5459_v20 }
 0x62a   :  { %5313 = vmatmul.mubr.msk.bf16.gmra.mxu0 %vm43_vm0, %v3680_v34  ;;  %5318 = vmatprep.subr.bf16.mxu1 %v5460_v59  ;;  %v6807_v34 = vld [vmem:[#allocation5_spill] sm:$0xff] }
 0x62b   :  { %5332 = vmatprep.mubr.msk.bf16.mxu0 %vm43_vm0, %v6804_v29  ;;  %5330 = vmatprep.subr.bf16.mxu0 %v5461_v60  ;;  %v5462_v29 = vld [vmem:[%s6775_s1 + $0x58] sm:$0xff]  }
 0x62d   :  { %5319 = vmatpush3.bf16.msra.mxu1 %v5460_v59  ;;  %5331 = vmatpush3.bf16.msra.mxu0 %v5461_v60 }
 0x62e   :  { %5340 = vmatprep.subr.bf16.mxu1 %v5462_v29 }
 0x632   :  { %5333 = vmatmul.mubr.msk.bf16.vlgmr.msra.gmra.mxu0 %vm43_vm0, %v6805_v43 }
 0x633   :  { %5336 = vmatprep.mubr.msk.bf16.mxu0 %vm43_vm0, %v6806_v12 }
 0x63a   :  { %5337 = vmatmul.mubr.msk.bf16.gmra.mxu0 %vm43_vm0, %v6807_v34 }
 0x6da   :  { %v5310_v31 = vpop.f32.mrf.mxu0 }
 0x6db   :  { %v3782_v51 = vsel %vm43_vm0, %v5310_v31, 0.0 }
 0x6dc   :  { %v3743_v35 = vpop.f32.mrf.mxu0 }
 0x6dd   :  { %v3776_v46 = vsel %vm43_vm0, %v3743_v35, 0.0 }
 0x6de   :  { %3777 = vadd.xlane.f32.xlu0 %v3776_v46  ;;  %v5311_v52 = vpop.f32.mrf.mxu0 }
 0x6df   :  { %v3785_v62 = vsel %vm43_vm0, %v5311_v52, 0.0 }
 0x6e0   :  { %v3746_v38 = vpop.f32.mrf.mxu0 }
 0x6e1   :  { %v3779_v57 = vsel %vm43_vm0, %v3746_v38, 0.0 }
 0x6e2   :  { %3783 = vadd.xlane.f32.xlu0 %v3782_v51  ;;  %3780 = vadd.xlane.f32.xlu1 %v3779_v57 }
 0x6e6   :  { %3786 = vadd.xlane.f32.xlu0 %v3785_v62 }
 0x6ea   :  { %v5314_v3 = vpop.f32.mrf.mxu0 }
 0x6eb   :  { %v3794_v23 = vsel %vm43_vm0, %v5314_v3, 0.0 }
 0x6ec   :  { %v3759_v56 = vpop.f32.mrf.mxu0 }
 0x6ed   :  { %v3788_v47 = vsel %vm43_vm0, %v3759_v56, 0.0 }
 0x6ee   :  { %3789 = vadd.xlane.f32.xlu1 %v3788_v47  ;;  %v5315_v50 = vpop.f32.mrf.mxu0 }
 0x6ef   :  { %v3797_v33 = vsel %vm43_vm0, %v5315_v50, 0.0 }
 0x6f0   :  { %v3762_v0 = vpop.f32.mrf.mxu0 }
 0x6f1   :  { %v3791_v16 = vsel %vm43_vm0, %v3762_v0, 0.0 }
 0x6f2   :  { %3795 = vadd.xlane.f32.xlu1 %v3794_v23  ;;  %3792 = vadd.xlane.f32.xlu0 %v3791_v16 }
 0x6f6   :  { %3798 = vadd.xlane.f32.xlu0 %v3797_v33 }
 0x767   :  { %v3778_v45 = vpop.xlane.xlu0 %3777 }
 0x768   :  { %v3801_v49 = vmul.f32 0.03125, %v3778_v45 }
 0x76a   :  { %v6542_v36 = vsub.f32 %v3743_v35, %v3801_v49 }
 0x76b   :  { %v3784_v54 = vpop.xlane.xlu0 %3783  ;;  %v3781_v4 = vpop.xlane.xlu1 %3780 }
 0x76c   :  { %v3803_v10 = vmul.f32 0.03125, %v3784_v54  ;;  %v3802_v25 = vmul.f32 0.03125, %v3781_v4  ;;  %v3817_v41 = vmul.f32 %v6542_v36, %v6542_v36  ;;  %v4692_v4 = vld [vmem:[%s6777_s2] ss:$0 sm:$0xff] }
 0x76e   :  { %v6546_v58 = vsub.f32 %v5310_v31, %v3803_v10  ;;  %v6548_v61 = vsub.f32 %v3746_v38, %v3802_v25  ;;  %v3825_v8 = vsel %vm43_vm0, %v3817_v41, 0.0 }
 0x76f   :  { %v3787_v22 = vpop.xlane.xlu0 %3786  ;;  %3826 = vadd.xlane.f32.xlu1 %v3825_v8 }
 0x770   :  { %v3804_v37 = vmul.f32 0.03125, %v3787_v22  ;;  %v3819_v48 = vmul.f32 %v6546_v58, %v6546_v58  ;;  %v3818_v21 = vmul.f32 %v6548_v61, %v6548_v61 }
 0x772   :  { %v6555_v39 = vsub.f32 %v5311_v52, %v3804_v37  ;;  %v3831_v28 = vsel %vm43_vm0, %v3819_v48, 0.0  ;;  %v3828_v11 = vsel %vm43_vm0, %v3818_v21, 0.0 }
 0x773   :  { %3832 = vadd.xlane.f32.xlu1 %v3831_v28  ;;  %3829 = vadd.xlane.f32.xlu0 %v3828_v11 }
 0x774   :  { %v3820_v15 = vmul.f32 %v6555_v39, %v6555_v39 }
 0x776   :  { %v3834_v6 = vsel %vm43_vm0, %v3820_v15, 0.0 }
 0x777   :  { %v3790_v2 = vpop.xlane.xlu1 %3789  ;;  %3835 = vadd.xlane.f32.xlu0 %v3834_v6 }
 0x778   :  { %v3805_v63 = vmul.f32 0.03125, %v3790_v2 }
 0x77a   :  { %v6562_v5 = vsub.f32 %v3759_v56, %v3805_v63 }
 0x77b   :  { %v3796_v7 = vpop.xlane.xlu1 %3795  ;;  %v3793_v17 = vpop.xlane.xlu0 %3792 }
 0x77c   :  { %v3807_v1 = vmul.f32 0.03125, %v3796_v7  ;;  %v3806_v18 = vmul.f32 0.03125, %v3793_v17  ;;  %v3821_v24 = vmul.f32 %v6562_v5, %v6562_v5 }
 0x77e   :  { %v6566_v30 = vsub.f32 %v5314_v3, %v3807_v1  ;;  %v6568_v32 = vsub.f32 %v3762_v0, %v3806_v18  ;;  %v3837_v27 = vsel %vm43_vm0, %v3821_v24, 0.0 }
 0x77f   :  { %3838 = vadd.xlane.f32.xlu1 %v3837_v27  ;;  %v3799_v14 = vpop.xlane.xlu0 %3798 }
 0x780   :  { %v3808_v9 = vmul.f32 0.03125, %v3799_v14  ;;  %v3823_v26 = vmul.f32 %v6566_v30, %v6566_v30  ;;  %v3822_v19 = vmul.f32 %v6568_v32, %v6568_v32 }
 0x782   :  { %v6575_v40 = vsub.f32 %v5315_v50, %v3808_v9  ;;  %v3843_v53 = vsel %vm43_vm0, %v3823_v26, 0.0  ;;  %v3840_v42 = vsel %vm43_vm0, %v3822_v19, 0.0 }
 0x783   :  { %3844 = vadd.xlane.f32.xlu1 %v3843_v53  ;;  %3841 = vadd.xlane.f32.xlu0 %v3840_v42 }
 0x784   :  { %v3824_v13 = vmul.f32 %v6575_v40, %v6575_v40 }
 0x786   :  { %v3846_v55 = vsel %vm43_vm0, %v3824_v13, 0.0 }
 0x787   :  { %3847 = vadd.xlane.f32.xlu0 %v3846_v55 }
 0x7f8   :  { %v3827_v31 = vpop.xlane.xlu1 %3826 }
 0x7f9   :  { %v3849_v35 = vmul.f32 0.03125, %v3827_v31 }
 0x7fb   :  { %v3857_v46 = vadd.f32 1e-05, %v3849_v35 }
 0x7fc   :  { %v3833_v52 = vpop.xlane.xlu1 %3832  ;;  %v3830_v38 = vpop.xlane.xlu0 %3829 }
 0x7fd   :  { %5549 = vrsqrt.f32 %v3857_v46  ;;  %v3851_v51 = vmul.f32 0.03125, %v3833_v52  ;;  %v3850_v57 = vmul.f32 0.03125, %v3830_v38 }
 0x7ff   :  { %v3859_v62 = vadd.f32 1e-05, %v3851_v51  ;;  %v3858_v3 = vadd.f32 1e-05, %v3850_v57 }
 0x800   :  { %v3836_v56 = vpop.xlane.xlu0 %3835 }
 0x801   :  { %5551 = vrsqrt.f32 %v3859_v62  ;;  %v3852_v47 = vmul.f32 0.03125, %v3836_v56 }
 0x802   :  { %5553 = vrsqrt.f32 %v3858_v3 }
 0x803   :  { %v3860_v50 = vadd.f32 1e-05, %v3852_v47 }
 0x805   :  { %5555 = vrsqrt.f32 %v3860_v50 }
 0x808   :  { %v3839_v0 = vpop.xlane.xlu1 %3838 }
 0x809   :  { %v3853_v23 = vmul.f32 0.03125, %v3839_v0 }
 0x80a   :  { %v5550_v16 = vpop.eup %5549 }
 0x80b   :  { %v3861_v33 = vadd.f32 1e-05, %v3853_v23  ;;  %v3873_v54 = vmul.f32 %v5550_v16, %v6542_v36  ;;  %v4693_v36 = vld [vmem:[%s6777_s2 + $0x1] ss:$0 sm:$0xff] }
 0x80c   :  { %v3845_v45 = vpop.xlane.xlu1 %3844  ;;  %v3842_v49 = vpop.xlane.xlu0 %3841 }
 0x80d   :  { %5557 = vrsqrt.f32 %v3861_v33  ;;  %v3855_v10 = vmul.f32 0.03125, %v3845_v45  ;;  %v3854_v25 = vmul.f32 0.03125, %v3842_v49  ;;  %v3885_v11 = vmul.f32 %v4692_v4, %v3873_v54 }
 0x80e   :  { %v5552_v41 = vpop.eup %5551 }
 0x80f   :  { %v5554_v8 = vpop.eup %5553  ;;  %v3875_v22 = vmul.f32 %v5552_v41, %v6546_v58  ;;  %v3863_v37 = vadd.f32 1e-05, %v3855_v10  ;;  %v3862_v48 = vadd.f32 1e-05, %v3854_v25  ;;  %v3897_v58 = vadd.f32 %v4693_v36, %v3885_v11 }
 0x810   :  { %v3848_v21 = vpop.xlane.xlu0 %3847  ;;  %v3874_v28 = vmul.f32 %v5554_v8, %v6548_v61 }
 0x811   :  { %5559 = vrsqrt.f32 %v3863_v37  ;;  %v3856_v15 = vmul.f32 0.03125, %v3848_v21  ;;  %v3887_v63 = vmul.f32 %v4692_v4, %v3875_v22 }
 0x812   :  { %v5556_v6 = vpop.eup %5555  ;;  %5561 = vrsqrt.f32 %v3862_v48  ;;  %v3886_v2 = vmul.f32 %v4692_v4, %v3874_v28 }
 0x813   :  { %v3876_v7 = vmul.f32 %v5556_v6, %v6555_v39  ;;  %v3864_v17 = vadd.f32 1e-05, %v3856_v15  ;;  %v3899_v61 = vadd.f32 %v4693_v36, %v3887_v63 }
 0x814   :  { %v3898_v1 = vadd.f32 %v4693_v36, %v3886_v2 }
 0x815   :  { %v3888_v18 = vmul.f32 %v4692_v4, %v3876_v7  ;;  %5563 = vrsqrt.f32 %v3864_v17 }
 0x816   :  { %v3909_v24 = vpack.c.bf16 %v3898_v1, %v3897_v58 }
 0x817   :  { %v3900_v27 = vadd.f32 %v4693_v36, %v3888_v18 }
 0x818   :  { %5320 = vmatprep.mubr.msk.bf16.mxu1 %vm43_vm0, %v3909_v24 }
 0x819   :  { %v3910_v14 = vpack.c.bf16 %v3900_v27, %v3899_v61 }
 0x81a   :  { %v5558_v9 = vpop.eup %5557 }
 0x81b   :  { %5321 = vmatmul.mubr.msk.bf16.vlgmr.msra.gmra.mxu1 %vm43_vm0, %v3910_v14  ;;  %v3877_v26 = vmul.f32 %v5558_v9, %v6562_v5 }
 0x81c   :  { %5341 = vmatpush3.bf16.msra.mxu1 %v5462_v29  ;;  %v5334_v29 = vpop.f32.mrf.mxu0 }
 0x81d   :  { %v3889_v13 = vmul.f32 %v4692_v4, %v3877_v26 }
 0x81e   :  { %v5560_v19 = vpop.eup %5559  ;;  %v4052_v46 = vpop.f32.mrf.mxu0 }
 0x81f   :  { %v5562_v53 = vpop.eup %5561  ;;  %v3879_v39 = vmul.f32 %v5560_v19, %v6566_v30  ;;  %v3901_v60 = vadd.f32 %v4693_v36, %v3889_v13  ;;  %v5463_v30 = vld [vmem:[%s6775_s1 + $0x50] sm:$0xff]  }
 0x820   :  { %v3878_v42 = vmul.f32 %v5562_v53, %v6568_v32  ;;  %5342 = vmatprep.subr.bf16.mxu1 %v5463_v30  ;;  %v5464_v32 = vld [vmem:[%s6775_s1 + $0x48] sm:$0xff]   ;;  %v5335_v38 = vpop.f32.mrf.mxu0 }
 0x821   :  { %v3891_v59 = vmul.f32 %v4692_v4, %v3879_v39  ;;  %5343 = vmatpush3.bf16.msra.mxu1 %v5463_v30 }
 0x822   :  { %v5564_v55 = vpop.eup %5563  ;;  %v3890_v44 = vmul.f32 %v4692_v4, %v3878_v42  ;;  %5344 = vmatprep.subr.bf16.mxu1 %v5464_v32  ;;  %v4055_v62 = vpop.f32.mrf.mxu0 }
 0x823   :  { %v3880_v20 = vmul.f32 %v5564_v55, %v6575_v40  ;;  %v3903_v31 = vadd.f32 %v4693_v36, %v3891_v59  ;;  %v5465_v40 = vld [vmem:[%s6775_s1 + $0x40] sm:$0xff]  }
 0x824   :  { %v3902_v43 = vadd.f32 %v4693_v36, %v3890_v44  ;;  %v5338_v49 = vpop.f32.mrf.mxu0 }
 0x825   :  { %v3892_v12 = vmul.f32 %v4692_v4, %v3880_v20  ;;  %5345 = vmatpush3.bf16.msra.mxu1 %v5464_v32 }
 0x826   :  { %v3911_v34 = vpack.c.bf16 %v3902_v43, %v3901_v60  ;;  %5346 = vmatprep.subr.bf16.mxu1 %v5465_v40  ;;  %v4068_v10 = vpop.f32.mrf.mxu0 }
 0x827   :  { %v3904_v35 = vadd.f32 %v4693_v36, %v3892_v12 }
 0x828   :  { %5324 = vmatprep.mubr.msk.bf16.mxu1 %vm43_vm0, %v3911_v34  ;;  %v5339_v41 = vpop.f32.mrf.mxu0 }
 0x829   :  { %v3912_v5 = vpack.c.bf16 %v3904_v35, %v3903_v31  ;;  %5347 = vmatpush3.bf16.msra.mxu1 %v5465_v40 }
 0x82a   :  { %v4071_v28 = vpop.f32.mrf.mxu0 }
 0x82b   :  { %5325 = vmatmul.mubr.msk.bf16.gmra.mxu1 %vm43_vm0, %v3912_v5 }
 0x8db   :  { %v5322_v52 = vpop.f32.mrf.mxu1 }
 0x8dc   :  { %v4061_v47 = vadd.f32 %v5334_v29, %v5322_v52 }
 0x8dd   :  { %v3975_v51 = vpop.f32.mrf.mxu1 }
 0x8de   :  { %v4053_v3 = vadd.f32 %v4052_v46, %v3975_v51  ;;  %v4085_v45 = vmax.f32 %v4061_v47, 0.0 }
 0x8df   :  { %v5323_v57 = vpop.f32.mrf.mxu1 }
 0x8e0   :  { %v4064_v56 = vadd.f32 %v5335_v38, %v5323_v57  ;;  %v4083_v16 = vmax.f32 %v4053_v3, 0.0 }
 0x8e1   :  { %v3978_v50 = vpop.f32.mrf.mxu1 }
 0x8e2   :  { %v4056_v0 = vadd.f32 %v4055_v62, %v3978_v50  ;;  %v4086_v23 = vmax.f32 %v4064_v56, 0.0 }
 0x8e4   :  { %v4084_v33 = vmax.f32 %v4056_v0, 0.0  ;;  %v4092_v4 = vpack.c.bf16 %v4086_v23, %v4085_v45 }
 0x8e6   :  { %v4091_v54 = vpack.c.bf16 %v4084_v33, %v4083_v16 }
 0x8e8   :  { %5348 = vmatprep.mubr.msk.bf16.mxu1 %vm4127_vm14, %v4091_v54 }
 0x8e9   :  { %5349 = vmatmul.mubr.msk.bf16.vlgmr.msra.gmra.mxu1 %vm4127_vm14, %v4092_v4 }
 0x8eb   :  { %v5326_v25 = vpop.f32.mrf.mxu1 }
 0x8ec   :  { %v4077_v21 = vadd.f32 %v5338_v49, %v5326_v25 }
 0x8ed   :  { %v3991_v8 = vpop.f32.mrf.mxu1 }
 0x8ee   :  { %v4069_v37 = vadd.f32 %v4068_v10, %v3991_v8  ;;  %v4089_v63 = vmax.f32 %v4077_v21, 0.0 }
 0x8ef   :  { %v5327_v22 = vpop.f32.mrf.mxu1 }
 0x8f0   :  { %v4080_v48 = vadd.f32 %v5339_v41, %v5327_v22  ;;  %v4087_v6 = vmax.f32 %v4069_v37, 0.0 }
 0x8f1   :  { %v3994_v11 = vpop.f32.mrf.mxu1 }
 0x8f2   :  { %v4072_v15 = vadd.f32 %v4071_v28, %v3994_v11  ;;  %v4090_v36 = vmax.f32 %v4080_v48, 0.0  ;;  %v5466_v11 = vld [vmem:[%s6775_s1 + $0x68] sm:$0xff]  }
 0x8f3   :  { %5356 = vmatprep.subr.bf16.mxu0 %v5466_v11 }
 0x8f4   :  { %v4088_v2 = vmax.f32 %v4072_v15, 0.0  ;;  %v4094_v17 = vpack.c.bf16 %v4090_v36, %v4089_v63  ;;  %5357 = vmatpush3.bf16.msra.mxu0 %v5466_v11  ;;  %v5467_v15 = vld [vmem:[%s6775_s1 + $0x60] sm:$0xff]  }
 0x8f5   :  { %5358 = vmatprep.subr.bf16.mxu0 %v5467_v15 }
 0x8f6   :  { %v4093_v7 = vpack.c.bf16 %v4088_v2, %v4087_v6 }
 0x8f8   :  { %5352 = vmatprep.mubr.msk.bf16.mxu1 %vm4127_vm14, %v4093_v7  ;;  %5359 = vmatpush3.bf16.msra.mxu0 %v5467_v15 }
 0x8f9   :  { %5353 = vmatmul.mubr.msk.bf16.gmra.mxu1 %vm4127_vm14, %v4094_v17 }
 0x9a9   :  { %v5350_v58 = vpop.f32.mrf.mxu1 }
 0x9aa   :  { %v4213_v27 = vsel %vm43_vm0, %v5350_v58, 0.0 }
 0x9ab   :  { %v4174_v1 = vpop.f32.mrf.mxu1 }
 0x9ac   :  { %v4207_v18 = vsel %vm43_vm0, %v4174_v1, 0.0 }
 0x9ad   :  { %4208 = vadd.xlane.f32.xlu1 %v4207_v18  ;;  %v5351_v24 = vpop.f32.mrf.mxu1 }
 0x9ae   :  { %v4216_v9 = vsel %vm43_vm0, %v5351_v24, 0.0 }
 0x9af   :  { %v4177_v61 = vpop.f32.mrf.mxu1 }
 0x9b0   :  { %v4210_v14 = vsel %vm43_vm0, %v4177_v61, 0.0 }
 0x9b1   :  { %4214 = vadd.xlane.f32.xlu1 %v4213_v27  ;;  %4211 = vadd.xlane.f32.xlu0 %v4210_v14 }
 0x9b5   :  { %4217 = vadd.xlane.f32.xlu0 %v4216_v9 }
 0x9b9   :  { %v5354_v26 = vpop.f32.mrf.mxu1 }
 0x9ba   :  { %v4225_v13 = vsel %vm43_vm0, %v5354_v26, 0.0 }
 0x9bb   :  { %v4190_v19 = vpop.f32.mrf.mxu1 }
 0x9bc   :  { %v4219_v53 = vsel %vm43_vm0, %v4190_v19, 0.0 }
 0x9bd   :  { %4220 = vadd.xlane.f32.xlu1 %v4219_v53  ;;  %v5355_v39 = vpop.f32.mrf.mxu1 }
 0x9be   :  { %v4228_v44 = vsel %vm43_vm0, %v5355_v39, 0.0 }
 0x9bf   :  { %v4193_v42 = vpop.f32.mrf.mxu1 }
 0x9c0   :  { %v4222_v55 = vsel %vm43_vm0, %v4193_v42, 0.0 }
 0x9c1   :  { %4226 = vadd.xlane.f32.xlu1 %v4225_v13  ;;  %4223 = vadd.xlane.f32.xlu0 %v4222_v55 }
 0x9c5   :  { %4229 = vadd.xlane.f32.xlu0 %v4228_v44 }
 0xa36   :  { %v4209_v20 = vpop.xlane.xlu1 %4208 }
 0xa37   :  { %v4231_v59 = vmul.f32 0.03125, %v4209_v20 }
 0xa39   :  { %v6642_v60 = vsub.f32 %v4174_v1, %v4231_v59 }
 0xa3a   :  { %v4215_v43 = vpop.xlane.xlu1 %4214  ;;  %v4212_v12 = vpop.xlane.xlu0 %4211 }
 0xa3b   :  { %v4233_v34 = vmul.f32 0.03125, %v4215_v43  ;;  %v4232_v31 = vmul.f32 0.03125, %v4212_v12  ;;  %v4247_v35 = vmul.f32 %v6642_v60, %v6642_v60  ;;  %v4715_v12 = vld [vmem:[%s6777_s2 + $0x3] ss:$0 sm:$0xff] }
 0xa3d   :  { %v6646_v5 = vsub.f32 %v5350_v58, %v4233_v34  ;;  %v6648_v30 = vsub.f32 %v4177_v61, %v4232_v31  ;;  %v4255_v32 = vsel %vm43_vm0, %v4247_v35, 0.0 }
 0xa3e   :  { %v4218_v40 = vpop.xlane.xlu0 %4217  ;;  %4256 = vadd.xlane.f32.xlu1 %v4255_v32 }
 0xa3f   :  { %v4234_v29 = vmul.f32 0.03125, %v4218_v40  ;;  %v4249_v46 = vmul.f32 %v6646_v5, %v6646_v5  ;;  %v4248_v52 = vmul.f32 %v6648_v30, %v6648_v30 }
 0xa41   :  { %v6655_v38 = vsub.f32 %v5351_v24, %v4234_v29  ;;  %v4261_v51 = vsel %vm43_vm0, %v4249_v46, 0.0  ;;  %v4258_v57 = vsel %vm43_vm0, %v4248_v52, 0.0 }
 0xa42   :  { %4262 = vadd.xlane.f32.xlu1 %v4261_v51  ;;  %4259 = vadd.xlane.f32.xlu0 %v4258_v57 }
 0xa43   :  { %v4250_v62 = vmul.f32 %v6655_v38, %v6655_v38 }
 0xa45   :  { %v4264_v3 = vsel %vm43_vm0, %v4250_v62, 0.0 }
 0xa46   :  { %v4221_v56 = vpop.xlane.xlu1 %4220  ;;  %4265 = vadd.xlane.f32.xlu0 %v4264_v3 }
 0xa47   :  { %v4235_v47 = vmul.f32 0.03125, %v4221_v56 }
 0xa49   :  { %v6662_v50 = vsub.f32 %v4190_v19, %v4235_v47  ;;  %v4714_v19 = vld [vmem:[%s6777_s2 + $0x2] ss:$0 sm:$0xff] }
 0xa4a   :  { %v4227_v0 = vpop.xlane.xlu1 %4226  ;;  %v4224_v23 = vpop.xlane.xlu0 %4223 }
 0xa4b   :  { %v4237_v16 = vmul.f32 0.03125, %v4227_v0  ;;  %v4236_v33 = vmul.f32 0.03125, %v4224_v23  ;;  %v4251_v45 = vmul.f32 %v6662_v50, %v6662_v50 }
 0xa4d   :  { %v6666_v49 = vsub.f32 %v5354_v26, %v4237_v16  ;;  %v6668_v54 = vsub.f32 %v4193_v42, %v4236_v33  ;;  %v4267_v4 = vsel %vm43_vm0, %v4251_v45, 0.0 }
 0xa4e   :  { %4268 = vadd.xlane.f32.xlu1 %v4267_v4  ;;  %v4230_v10 = vpop.xlane.xlu0 %4229  ;;  %v5600_v4 = vld [vmem:[%s6776_s0 + $0x18] sm:$0xff] }
 0xa4f   :  { %v4238_v25 = vmul.f32 0.03125, %v4230_v10  ;;  %v4253_v41 = vmul.f32 %v6666_v49, %v6666_v49  ;;  %v4252_v8 = vmul.f32 %v6668_v54, %v6668_v54 }
 0xa51   :  { %v6675_v22 = vsub.f32 %v5355_v39, %v4238_v25  ;;  %v4273_v37 = vsel %vm43_vm0, %v4253_v41, 0.0  ;;  %v4270_v48 = vsel %vm43_vm0, %v4252_v8, 0.0 }
 0xa52   :  { %4274 = vadd.xlane.f32.xlu1 %v4273_v37  ;;  %4271 = vadd.xlane.f32.xlu0 %v4270_v48 }
 0xa53   :  { %v4254_v21 = vmul.f32 %v6675_v22, %v6675_v22 }
 0xa55   :  { %v4276_v28 = vsel %vm43_vm0, %v4254_v21, 0.0 }
 0xa56   :  { %4277 = vadd.xlane.f32.xlu0 %v4276_v28 }
 0xac7   :  { %v4257_v36 = vpop.xlane.xlu1 %4256 }
 0xac8   :  { %v4279_v6 = vmul.f32 0.03125, %v4257_v36 }
 0xaca   :  { %v4287_v2 = vadd.f32 1e-05, %v4279_v6 }
 0xacb   :  { %v4263_v63 = vpop.xlane.xlu1 %4262  ;;  %v4260_v7 = vpop.xlane.xlu0 %4259 }
 0xacc   :  { %5565 = vrsqrt.f32 %v4287_v2  ;;  %v4281_v17 = vmul.f32 0.03125, %v4263_v63  ;;  %v4280_v58 = vmul.f32 0.03125, %v4260_v7 }
 0xace   :  { %v4289_v1 = vadd.f32 1e-05, %v4281_v17  ;;  %v4288_v18 = vadd.f32 1e-05, %v4280_v58 }
 0xacf   :  { %v4266_v24 = vpop.xlane.xlu0 %4265 }
 0xad0   :  { %5567 = vrsqrt.f32 %v4289_v1  ;;  %v4282_v61 = vmul.f32 0.03125, %v4266_v24 }
 0xad1   :  { %5569 = vrsqrt.f32 %v4288_v18 }
 0xad2   :  { %v4290_v27 = vadd.f32 1e-05, %v4282_v61  ;;  %v5603_v61 = vld [vmem:[%s6776_s0 + $0x30] sm:$0xff] }
 0xad4   :  { %5571 = vrsqrt.f32 %v4290_v27  ;;  %v5604_v27 = vld [vmem:[%s6776_s0 + $0x38] sm:$0xff] }
 0xad7   :  { %v4269_v14 = vpop.xlane.xlu1 %4268 }
 0xad8   :  { %v4283_v9 = vmul.f32 0.03125, %v4269_v14 }
 0xad9   :  { %v5566_v26 = vpop.eup %5565 }
 0xada   :  { %v4291_v53 = vadd.f32 1e-05, %v4283_v9  ;;  %v4303_v39 = vmul.f32 %v5566_v26, %v6642_v60  ;;  %v5468_v26 = vld [vmem:[%s6775_s1 + $0x70] sm:$0xff]  }
 0xadb   :  { %v4275_v42 = vpop.xlane.xlu1 %4274  ;;  %v4272_v13 = vpop.xlane.xlu0 %4271  ;;  %5368 = vmatprep.subr.bf16.mxu1 %v5468_v26 }
 0xadc   :  { %5573 = vrsqrt.f32 %v4291_v53  ;;  %v4285_v55 = vmul.f32 0.03125, %v4275_v42  ;;  %v4284_v44 = vmul.f32 0.03125, %v4272_v13  ;;  %v4315_v59 = vmul.f32 %v4714_v19, %v4303_v39  ;;  %5369 = vmatpush3.bf16.msra.mxu1 %v5468_v26 }
 0xadd   :  { %v5568_v20 = vpop.eup %5567 }
 0xade   :  { %v5570_v43 = vpop.eup %5569  ;;  %v4305_v34 = vmul.f32 %v5568_v20, %v6646_v5  ;;  %v4293_v31 = vadd.f32 1e-05, %v4285_v55  ;;  %v4292_v35 = vadd.f32 1e-05, %v4284_v44  ;;  %v4327_v51 = vadd.f32 %v4715_v12, %v4315_v59  ;;  %v5597_v5 = vld [vmem:[%s6776_s0] sm:$0xff] }
 0xadf   :  { %v4278_v32 = vpop.xlane.xlu0 %4277  ;;  %v4304_v40 = vmul.f32 %v5570_v43, %v6648_v30  ;;  %v5598_v30 = vld [vmem:[%s6776_s0 + $0x8] sm:$0xff] }
 0xae0   :  { %v4317_v60 = vmul.f32 %v4714_v19, %v4305_v34  ;;  %5575 = vrsqrt.f32 %v4293_v31  ;;  %v4286_v29 = vmul.f32 0.03125, %v4278_v32  ;;  %v4335_v0 = vadd.f32 %v5597_v5, %v4327_v51 }
 0xae1   :  { %v5572_v46 = vpop.eup %5571  ;;  %5577 = vrsqrt.f32 %v4292_v35  ;;  %v4316_v52 = vmul.f32 %v4714_v19, %v4304_v40 }
 0xae2   :  { %v4306_v57 = vmul.f32 %v5572_v46, %v6655_v38  ;;  %v4294_v62 = vadd.f32 1e-05, %v4286_v29  ;;  %v4329_v56 = vadd.f32 %v4715_v12, %v4317_v60  ;;  %v5599_v38 = vld [vmem:[%s6776_s0 + $0x10] sm:$0xff] }
 0xae3   :  { %v4328_v3 = vadd.f32 %v4715_v12, %v4316_v52 }
 0xae4   :  { %v4318_v47 = vmul.f32 %v4714_v19, %v4306_v57  ;;  %5579 = vrsqrt.f32 %v4294_v62  ;;  %v4337_v45 = vadd.f32 %v5599_v38, %v4329_v56 }
 0xae5   :  { %v4336_v23 = vadd.f32 %v5598_v30, %v4328_v3 }
 0xae6   :  { %v4330_v16 = vadd.f32 %v4715_v12, %v4318_v47 }
 0xae7   :  { %v4343_v33 = vpack.c.bf16 %v4336_v23, %v4335_v0 }
 0xae8   :  { %v4338_v10 = vadd.f32 %v5600_v4, %v4330_v16 }
 0xae9   :  { %v5574_v25 = vpop.eup %5573  ;;  %5360 = vmatprep.mubr.msk.bf16.mxu0 %vm43_vm0, %v4343_v33 }
 0xaea   :  { %v4344_v41 = vpack.c.bf16 %v4338_v10, %v4337_v45  ;;  %v4307_v8 = vmul.f32 %v5574_v25, %v6662_v50  ;;  %v5601_v50 = vld [vmem:[%s6776_s0 + $0x20] sm:$0xff] }
 0xaec   :  { %5361 = vmatmul.mubr.msk.bf16.vlgmr.msra.gmra.mxu0 %vm43_vm0, %v4344_v41  ;;  %v4319_v48 = vmul.f32 %v4714_v19, %v4307_v8 }
 0xaed   :  { %v5576_v37 = vpop.eup %5575 }
 0xaee   :  { %v5578_v21 = vpop.eup %5577  ;;  %v4309_v28 = vmul.f32 %v5576_v37, %v6666_v49  ;;  %v4331_v2 = vadd.f32 %v4715_v12, %v4319_v48  ;;  %v5602_v49 = vld [vmem:[%s6776_s0 + $0x28] sm:$0xff] }
 0xaef   :  { %v4308_v11 = vmul.f32 %v5578_v21, %v6668_v54 }
 0xaf0   :  { %v4321_v15 = vmul.f32 %v4714_v19, %v4309_v28  ;;  %v4339_v1 = vadd.f32 %v5601_v50, %v4331_v2 }
 0xaf1   :  { %v5580_v36 = vpop.eup %5579  ;;  %v4320_v6 = vmul.f32 %v4714_v19, %v4308_v11 }
 0xaf2   :  { %v4310_v63 = vmul.f32 %v5580_v36, %v6675_v22  ;;  %v4333_v58 = vadd.f32 %v4715_v12, %v4321_v15 }
 0xaf3   :  { %v4332_v7 = vadd.f32 %v4715_v12, %v4320_v6 }
 0xaf4   :  { %v4322_v17 = vmul.f32 %v4714_v19, %v4310_v63  ;;  %v4341_v22 = vadd.f32 %v5603_v61, %v4333_v58  ;;  %v4716_v19 = vld [vmem:[%s6777_s2 + $0x4] ss:$0 sm:$0xff] }
 0xaf5   :  { %v4340_v18 = vadd.f32 %v5602_v49, %v4332_v7 }
 0xaf6   :  { %v4334_v54 = vadd.f32 %v4715_v12, %v4322_v17 }
 0xaf7   :  { %v4345_v24 = vpack.c.bf16 %v4340_v18, %v4339_v1 }
 0xaf8   :  { %v4342_v14 = vadd.f32 %v5604_v27, %v4334_v54 }
 0xaf9   :  { %5364 = vmatprep.mubr.msk.bf16.mxu0 %vm43_vm0, %v4345_v24 }
 0xafa   :  { %v4346_v9 = vpack.c.bf16 %v4342_v14, %v4341_v22  ;;  %v4731_v14 = vld [vmem:[%s6777_s2 + $0x5] ss:$0 sm:$0xff] }
 0xafc   :  { %5365 = vmatmul.mubr.msk.bf16.gmra.mxu0 %vm43_vm0, %v4346_v9 }
 0xbac   :  { %v5362_v53 = vpop.f32.mrf.mxu0 }
 0xbad   :  { %v4423_v39 = vadd.f32 %v5362_v53, %v4716_v19 }
 0xbae   :  { %v4414_v42 = vpop.f32.mrf.mxu0 }
 0xbaf   :  { %v4455_v13 = vmin.f32 %v4423_v39, 0.0  ;;  %v4415_v55 = vadd.f32 %v4716_v19, %v4414_v42  ;;  %vm4447_vm2 = vcmp.gt.f32.partialorder %v4423_v39, 0.0 }
 0xbb0   :  { %v5363_v44 = vpop.f32.mrf.mxu0 }
 0xbb1   :  { %v4465_v20 = vmul.f32 1.442695, %v4455_v13  ;;  %v4453_v59 = vmin.f32 %v4415_v55, 0.0  ;;  %v4426_v43 = vadd.f32 %v5363_v44, %v4716_v19  ;;  %vm4445_vm0 = vcmp.gt.f32.partialorder %v4415_v55, 0.0 }
 0xbb2   :  { %v4417_v12 = vpop.f32.mrf.mxu0 }
 0xbb3   :  { %v4461_v34 = vmul.f32 1.442695, %v4453_v59  ;;  %v4456_v31 = vmin.f32 %v4426_v43, 0.0  ;;  %v4418_v35 = vadd.f32 %v4716_v19, %v4417_v12  ;;  %5581 = vpow2.f32 %v4465_v20 }
 0xbb4   :  { %vm4448_vm15 = vcmp.gt.f32.partialorder %v4426_v43, 0.0 }
 0xbb5   :  { %v4467_v32 = vmul.f32 1.442695, %v4456_v31  ;;  %5583 = vpow2.f32 %v4461_v34  ;;  %v4454_v40 = vmin.f32 %v4418_v35, 0.0  ;;  %vm4446_vm1 = vcmp.gt.f32.partialorder %v4418_v35, 0.0 }
 0xbb7   :  { %5585 = vpow2.f32 %v4467_v32  ;;  %v4463_v60 = vmul.f32 1.442695, %v4454_v40 }
 0xbb9   :  { %5587 = vpow2.f32 %v4463_v60 }
 0xbbc   :  { %v5366_v29 = vpop.f32.mrf.mxu0 }
 0xbbd   :  { %v4439_v46 = vadd.f32 %v5366_v29, %v4716_v19 }
 0xbbe   :  { %v4430_v52 = vpop.f32.mrf.mxu0 }
 0xbbf   :  { %v4459_v51 = vmin.f32 %v4439_v46, 0.0  ;;  %v4431_v57 = vadd.f32 %v4716_v19, %v4430_v52  ;;  %vm4451_vm6 = vcmp.gt.f32.partialorder %v4439_v46, 0.0 }
 0xbc0   :  { %v5367_v62 = vpop.f32.mrf.mxu0  ;;  %v5582_v56 = vpop.eup %5581 }
 0xbc1   :  { %v4457_v3 = vmin.f32 %v4431_v57, 0.0  ;;  %v4442_v47 = vadd.f32 %v5367_v62, %v4716_v19  ;;  %v4473_v30 = vmul.f32 1.442695, %v4459_v51  ;;  %v4725_v8 = vadd.f32 -1.0, %v5582_v56 }
 0xbc2   :  { %v4433_v5 = vpop.f32.mrf.mxu0  ;;  %v5584_v0 = vpop.eup %5583  ;;  %vm4449_vm4 = vcmp.gt.f32.partialorder %v4431_v57, 0.0 }
 0xbc3   :  { %v4469_v23 = vmul.f32 1.442695, %v4457_v3  ;;  %v4460_v33 = vmin.f32 %v4442_v47, 0.0  ;;  %v4434_v38 = vadd.f32 %v4716_v19, %v4433_v5  ;;  %v4723_v4 = vadd.f32 -1.0, %v5584_v0 }
 0xbc4   :  { %v5586_v16 = vpop.eup %5585  ;;  %v4487_v15 = vsel %vm4447_vm2, %v4423_v39, %v4725_v8  ;;  %vm4452_vm3 = vcmp.gt.f32.partialorder %v4442_v47, 0.0 }
 0xbc5   :  { %v4726_v45 = vadd.f32 -1.0, %v5586_v16  ;;  %5589 = vpow2.f32 %v4469_v23  ;;  %v4475_v10 = vmul.f32 1.442695, %v4460_v33  ;;  %v4458_v25 = vmin.f32 %v4434_v38, 0.0 }
 0xbc6   :  { %v5588_v41 = vpop.eup %5587  ;;  %5591 = vpow2.f32 %v4473_v30  ;;  %v4485_v28 = vsel %vm4445_vm0, %v4415_v55, %v4723_v4  ;;  %vm4450_vm5 = vcmp.gt.f32.partialorder %v4434_v38, 0.0 }
 0xbc7   :  { %v4724_v37 = vadd.f32 -1.0, %v5588_v41  ;;  %5593 = vpow2.f32 %v4475_v10  ;;  %v4471_v48 = vmul.f32 1.442695, %v4458_v25  ;;  %v4488_v21 = vsel %vm4448_vm15, %v4426_v43, %v4726_v45 }
 0xbc8   :  { %v4494_v6 = vpack.c.bf16 %v4488_v21, %v4487_v15 }
 0xbc9   :  { %v4486_v11 = vsel %vm4446_vm1, %v4418_v35, %v4724_v37  ;;  %5595 = vpow2.f32 %v4471_v48 }
 0xbca   :  { %v4493_v36 = vpack.c.bf16 %v4486_v11, %v4485_v28 }
 0xbcc   :  { %5370 = vmatprep.mubr.msk.bf16.mxu1 %vm3659_vm12, %v4493_v36 }
 0xbcd   :  { %5371 = vmatmul.mubr.msk.bf16.vlgmr.msra.gmra.mxu1 %vm3659_vm12, %v4494_v6 }
 0xbd2   :  { %v5590_v2 = vpop.eup %5589 }
 0xbd3   :  { %v5592_v63 = vpop.eup %5591  ;;  %v4727_v17 = vadd.f32 -1.0, %v5590_v2 }
 0xbd4   :  { %v5594_v7 = vpop.eup %5593  ;;  %v4729_v1 = vadd.f32 -1.0, %v5592_v63 }
 0xbd5   :  { %v4730_v58 = vadd.f32 -1.0, %v5594_v7  ;;  %v4489_v54 = vsel %vm4449_vm4, %v4431_v57, %v4727_v17 }
 0xbd6   :  { %v5596_v50 = vpop.eup %5595  ;;  %v4491_v61 = vsel %vm4451_vm6, %v4439_v46, %v4729_v1 }
 0xbd7   :  { %v4728_v49 = vadd.f32 -1.0, %v5596_v50  ;;  %v4492_v18 = vsel %vm4452_vm3, %v4442_v47, %v4730_v58 }
 0xbd8   :  { %v4496_v27 = vpack.c.bf16 %v4492_v18, %v4491_v61 }
 0xbd9   :  { %v4490_v24 = vsel %vm4450_vm5, %v4434_v38, %v4728_v49 }
 0xbda   :  { %v4495_v22 = vpack.c.bf16 %v4490_v24, %v4489_v54 }
 0xbdc   :  { %5374 = vmatprep.mubr.msk.bf16.mxu1 %vm3659_vm12, %v4495_v22 }
 0xbdd   :  { %5375 = vmatmul.mubr.msk.bf16.gmra.mxu1 %vm3659_vm12, %v4496_v27 }
 0xc8d   :  { %v5372_v9 = vpop.f32.mrf.mxu1 }
 0xc8e   :  { %v4565_v26 = vadd.f32 %v5372_v9, %v4731_v14 }
 0xc8f   :  { %v4556_v19 = vpop.f32.mrf.mxu1 }
 0xc90   :  { %v4589_v53 = vmax.f32 %v4565_v26, 0.0  ;;  %v4557_v39 = vadd.f32 %v4731_v14, %v4556_v19 }
 0xc91   :  { %v5373_v42 = vpop.f32.mrf.mxu1 }
 0xc92   :  { %4598 = vst.msk [vmem:[%s6778_s3 + $0x10] sm:$0xff] %vm4595_vm7, %v4589_v53  ;;  %v4587_v13 = vmax.f32 %v4557_v39, 0.0  ;;  %v4568_v55 = vadd.f32 %v5373_v42, %v4731_v14 }
 0xc93   :  { %v4559_v44 = vpop.f32.mrf.mxu1 }
 0xc94   :  { %4596 = vst.msk [vmem:[%s6778_s3] sm:$0xff] %vm4595_vm7, %v4587_v13  ;;  %v4590_v20 = vmax.f32 %v4568_v55, 0.0  ;;  %v4560_v59 = vadd.f32 %v4731_v14, %v4559_v44 }
 0xc96   :  { %4599 = vst.msk [vmem:[%s6778_s3 + $0x18] sm:$0xff] %vm4595_vm7, %v4590_v20  ;;  %v4588_v43 = vmax.f32 %v4560_v59, 0.0 }
 0xc98   :  { %4597 = vst.msk [vmem:[%s6778_s3 + $0x8] sm:$0xff] %vm4595_vm7, %v4588_v43 }
 0xc9d   :  { %v5376_v12 = vpop.f32.mrf.mxu1 }
 0xc9e   :  { %v4581_v34 = vadd.f32 %v5376_v12, %v4731_v14 }
 0xc9f   :  { %v4572_v31 = vpop.f32.mrf.mxu1 }
 0xca0   :  { %v4593_v35 = vmax.f32 %v4581_v34, 0.0  ;;  %v4573_v32 = vadd.f32 %v4731_v14, %v4572_v31 }
 0xca1   :  { %v5377_v40 = vpop.f32.mrf.mxu1 }
 0xca2   :  { %4602 = vst.msk [vmem:[%s6778_s3 + $0x30] sm:$0xff] %vm4595_vm7, %v4593_v35  ;;  %v4591_v60 = vmax.f32 %v4573_v32, 0.0  ;;  %v4584_v29 = vadd.f32 %v5377_v40, %v4731_v14 }
 0xca3   :  { %v4575_v46 = vpop.f32.mrf.mxu1 }
 0xca4   :  { %4600 = vst.msk [vmem:[%s6778_s3 + $0x20] sm:$0xff] %vm4595_vm7, %v4591_v60  ;;  %v4594_v52 = vmax.f32 %v4584_v29, 0.0  ;;  %v4576_v51 = vadd.f32 %v4731_v14, %v4575_v46 }
 0xca6   :  { %4603 = vst.msk [vmem:[%s6778_s3 + $0x38] sm:$0xff] %vm4595_vm7, %v4594_v52  ;;  %v4592_v57 = vmax.f32 %v4576_v51, 0.0 }
 0xca8   :  { %4601 = vst.msk [vmem:[%s6778_s3 + $0x28] sm:$0xff] %vm4595_vm7, %v4592_v57 }

</bundles_post_ra>
